<compile_context>
chip_gen: v6e
topology: v6e:2x2x1
jax: 0.10.0
libtpu: 0.0.40
codegen_flags: <defaults>
</compile_context>

<pallas_src>
import functools

import jax
import jax.numpy as jnp
from jax import lax
from jax.experimental import pallas as pl
from jax.experimental.pallas import tpu as pltpu

# bf16 MXU inputs (f32 accumulate + f32 epilogue) per v6e/v7x guidance; set to
# jnp.float32 to recover exact f32 matmul numerics.
MXU_DTYPE = jnp.bfloat16


# ----------------------------------------------------------------------------- #
# Pallas kernel: 3x3 conv (padding pre-applied & row-flattened), bias, opt. ReLU.
# One grid step = one whole image. stride in {1, 2} handled in-kernel.
# ----------------------------------------------------------------------------- #
def _conv3x3_kernel(xq_ref, w_ref, b_ref, o_ref, *, stride, wp, cin, relu):
    # xq_ref: (1, Lg, stride*Cin)  zero-padded image, rows flattened row-major,
    #         with groups of `stride` consecutive flat pixels stacked on the lane
    #         axis so every 3x3 tap (any stride) is a contiguous (M, Cin) slice.
    # w_ref : (3, 3*Cin, Cout)     w_ref[dy][dx*Cin + ci, co] = torch_w[co, ci, dy, dx]
    # b_ref : (1, Cout) f32
    # o_ref : (1, M, Cout)         M = Hout*Wp pseudo-rows; pseudo-columns >= Wout
    #                              are garbage and dropped by the wrapper.
    m = o_ref.shape[1]
    cout = o_ref.shape[2]

    acc = jnp.zeros((m, cout), jnp.float32)
    for dy in range(3):
        taps = []
        for dx in range(3):
            off = dy * wp + dx                      # flat-pixel offset of this tap
            row0 = off // stride
            col0 = (off % stride) * cin
            slab = xq_ref[0, pl.ds(row0, m), :]     # (M, stride*Cin) contiguous load
            tap = slab if stride == 1 else slab[:, col0:col0 + cin]
            taps.append(tap.astype(MXU_DTYPE))
        patch = jnp.concatenate(taps, axis=-1)      # (M, 3*Cin)  -> one matmul per dy
        acc = acc + jnp.dot(patch, w_ref[dy], preferred_element_type=jnp.float32)

    acc = acc + b_ref[...]                          # f32 epilogue (v5e-friendly)
    if relu:
        acc = jnp.maximum(acc, 0.0)
    o_ref[0] = acc.astype(o_ref.dtype)


def conv3x3(x, wk, bk, *, stride=1, relu=True):
    """3x3 conv, padding=1, stride in {1, 2}, optional fused ReLU.

    x : (N, H, W, Cin) float32 NHWC
    wk: (3, 3*Cin, Cout) MXU_DTYPE (pre-relayouted torch weight, see prepare_params)
    bk: (1, Cout) float32
    """
    assert stride in (1, 2)
    n, h, w, cin = x.shape
    cout = wk.shape[-1]
    assert wk.shape == (3, 3 * cin, cout), (wk.shape, cin, cout)

    hout = (h - 1) // stride + 1
    wout = (w - 1) // stride + 1
    wp = w + 2
    m = hout * wp                                   # pseudo output rows per image

    # Glue (one fused XLA pass): zero-pad H/W by 1 and flatten rows so a 3x3 tap
    # becomes a constant offset into the flat row-major index.
    xp = jnp.pad(x, ((0, 0), (1, 1), (1, 1), (0, 0)))            # (N, H+2, Wp, Cin)
    q = xp.reshape(n, (h + 2) * wp, cin)
    need = 2 * wp + 2 + stride * m                               # flat slack for taps
    lq = ((need + stride - 1) // stride) * stride
    q = jnp.pad(q, ((0, 0), (0, lq - q.shape[1]), (0, 0)))
    # Stack `stride` consecutive flat pixels on the lane axis so stride-2 taps
    # become contiguous (unstrided) slices inside the kernel.
    q = q.reshape(n, lq // stride, stride * cin)

    out_flat = pl.pallas_call(
        functools.partial(_conv3x3_kernel, stride=stride, wp=wp, cin=cin, relu=relu),
        out_shape=jax.ShapeDtypeStruct((n, m, cout), x.dtype),
        grid_spec=pltpu.PrefetchScalarGridSpec(
            num_scalar_prefetch=0,
            grid=(n,),
            in_specs=[
                pl.BlockSpec((1, lq // stride, stride * cin), lambda i: (i, 0, 0)),
                pl.BlockSpec((3, 3 * cin, cout), lambda i: (0, 0, 0)),
                pl.BlockSpec((1, cout), lambda i: (0, 0)),
            ],
            out_specs=pl.BlockSpec((1, m, cout), lambda i: (i, 0, 0)),
        ),
        compiler_params=pltpu.CompilerParams(dimension_semantics=("parallel",)),
    )(q, wk, bk)

    # Drop garbage pseudo-columns (>= Wout); XLA fuses this slice with the
    # consumer's pad / upsample / concat pass.
    return out_flat.reshape(n, hout, wp, cout)[:, :, :wout, :]


# ----------------------------------------------------------------------------- #
# Glue: bilinear x2 upsample (F.interpolate scale_factor=2, align_corners=False).
# out[2k]   = 0.25 * x[k-1] + 0.75 * x[k]   (index clamped at the border)
# out[2k+1] = 0.75 * x[k]   + 0.25 * x[k+1] (index clamped at the border)
# ----------------------------------------------------------------------------- #
def _upsample2x_axis(x, axis):
    n = x.shape[axis]
    first = lax.slice_in_dim(x, 0, 1, axis=axis)
    last = lax.slice_in_dim(x, n - 1, n, axis=axis)
    x_prev = jnp.concatenate([first, lax.slice_in_dim(x, 0, n - 1, axis=axis)], axis=axis)
    x_next = jnp.concatenate([lax.slice_in_dim(x, 1, n, axis=axis), last], axis=axis)
    even = 0.25 * x_prev + 0.75 * x
    odd = 0.75 * x + 0.25 * x_next
    out = jnp.stack([even, odd], axis=axis + 1)
    new_shape = list(x.shape)
    new_shape[axis] = 2 * n
    return out.reshape(new_shape)


def upsample2x_bilinear(x):  # NHWC
    return _upsample2x_axis(_upsample2x_axis(x, 1), 2)


# ----------------------------------------------------------------------------- #
# RefinementNet forward (ce_layers=[0,0,0,0], hidden=[32,64,96], output_dim=4).
# ----------------------------------------------------------------------------- #
def refinement_net_forward(params, img0, img1, ft_0, ft_1,
                           ft_0_s2, ft_1_s2, ft_0_s4, ft_1_s4, c0, c1):
    del ft_0, ft_1, ft_0_s2, ft_1_s2, ft_0_s4, ft_1_s4, c0, c1
    # TODO(synk): backward_warp (flow-based grid_sample) is skipped because with
    # ce_layers=[0,0,0,0] the context features c0/c1 have zero channels, so the
    # warped tensors contribute no channels to the concatenations.
    to_nhwc = lambda t: jnp.transpose(t, (0, 2, 3, 1))

    inp = jnp.concatenate([to_nhwc(img0), to_nhwc(img1)], axis=-1)  # (N, H, W, 6)

    # down path (stride-2 folded into the kernel)
    s0 = conv3x3(inp, *params["down0_0"], stride=2, relu=True)
    s0 = conv3x3(s0, *params["down0_1"], stride=1, relu=True)
    s1 = conv3x3(s0, *params["down1_0"], stride=2, relu=True)
    s1 = conv3x3(s1, *params["down1_1"], stride=1, relu=True)
    s2 = conv3x3(s1, *params["down2_0"], stride=2, relu=True)
    s2 = conv3x3(s2, *params["down2_1"], stride=1, relu=True)

    # up path (leading ReLUs of the up-blocks kept for fidelity; they are no-ops
    # numerically since their inputs are already non-negative)
    x = jnp.maximum(upsample2x_bilinear(s2), 0.0)
    x = conv3x3(x, *params["up0"], stride=1, relu=True)

    x = jnp.maximum(upsample2x_bilinear(jnp.concatenate([x, s1], axis=-1)), 0.0)
    x = conv3x3(x, *params["up1"], stride=1, relu=True)

    x = jnp.maximum(upsample2x_bilinear(jnp.concatenate([x, s0], axis=-1)), 0.0)
    x = conv3x3(x, *params["up2"], stride=1, relu=True)

    x = conv3x3(x, *params["conv"], stride=1, relu=False)
    return jnp.transpose(x, (0, 3, 1, 2))  # back to NCHW


# ----------------------------------------------------------------------------- #
# Parameters: PyTorch Conv2d default init (U(-k, k), k = 1/sqrt(fan_in)) in the
# PyTorch (Cout, Cin, 3, 3) layout, relayouted ONCE for the kernel.
# ----------------------------------------------------------------------------- #
def init_params(key):
    hidden = [32, 64, 96]
    input_dim = 3 * 2  # ce_layers[0] == 0
    output_dim = 4

    def conv_init(k, cout, cin):
        k1, k2 = jax.random.split(k)
        bound = 1.0 / jnp.sqrt(jnp.float32(cin * 9))
        w = jax.random.uniform(k1, (cout, cin, 3, 3), jnp.float32, -bound, bound)
        b = jax.random.uniform(k2, (cout,), jnp.float32, -bound, bound)
        return (w, b)

    keys = jax.random.split(key, 10)
    return {
        "down0_0": conv_init(keys[0], hidden[0], input_dim),
        "down0_1": conv_init(keys[1], hidden[0], hidden[0]),
        "down1_0": conv_init(keys[2], hidden[1], hidden[0]),
        "down1_1": conv_init(keys[3], hidden[1], hidden[1]),
        "down2_0": conv_init(keys[4], hidden[2], hidden[1]),
        "down2_1": conv_init(keys[5], hidden[2], hidden[2]),
        "up0": conv_init(keys[6], hidden[1], hidden[2]),
        "up1": conv_init(keys[7], hidden[0], hidden[1] * 2),
        "up2": conv_init(keys[8], input_dim, hidden[0] * 2),
        "conv": conv_init(keys[9], output_dim, input_dim),
    }


def prepare_params(params):
    """One-time relayout: (Cout,Cin,3,3) torch weight -> (3 [dy], 3*Cin [dx,ci], Cout)."""
    prepared = {}
    for name, (w, b) in params.items():
        cout, cin = w.shape[0], w.shape[1]
        wk = jnp.transpose(w, (2, 3, 1, 0)).reshape(3, 3 * cin, cout).astype(MXU_DTYPE)
        bk = b.reshape(1, cout).astype(jnp.float32)
        prepared[name] = (wk, bk)
    return prepared


if __name__ == "__main__":
    key = jax.random.PRNGKey(0)
    kp, ki = jax.random.split(key)
    params = prepare_params(init_params(kp))

    N, H, W = 2, 16, 16
    ks = jax.random.split(ki, 8)
    img0 = jax.random.normal(ks[0], (N, 3, H, W), jnp.float32)
    img1 = jax.random.normal(ks[1], (N, 3, H, W), jnp.float32)
    ft_0 = jax.random.normal(ks[2], (N, 2, H, W), jnp.float32)
    ft_1 = jax.random.normal(ks[3], (N, 2, H, W), jnp.float32)
    ft_0_s2 = jax.random.normal(ks[4], (N, 2, H // 2, W // 2), jnp.float32)
    ft_1_s2 = jax.random.normal(ks[5], (N, 2, H // 2, W // 2), jnp.float32)
    ft_0_s4 = jax.random.normal(ks[6], (N, 2, H // 4, W // 4), jnp.float32)
    ft_1_s4 = jax.random.normal(ks[7], (N, 2, H // 4, W // 4), jnp.float32)
    # ce_layers = [0,0,0,0] -> zero-channel context pyramids
    c0 = [jnp.zeros((N, 0, H // (2 ** i), W // (2 ** i)), jnp.float32) for i in range(3)]
    c1 = [jnp.zeros((N, 0, H // (2 ** i), W // (2 ** i)), jnp.float32) for i in range(3)]

    forward = jax.jit(refinement_net_forward)
    out = forward(params, img0, img1, ft_0, ft_1,
                  ft_0_s2, ft_1_s2, ft_0_s4, ft_1_s4, c0, c1)
    out = jax.block_until_ready(out)
    assert out.shape == (N, 4, H, W), out.shape
    assert out.dtype == jnp.float32
    print("KERNEL_OK")
</pallas_src>

<mosaic_0001>
module attributes {stable_mosaic.version = 11 : i64} {
  func.func @_conv3x3_kernel(%arg0: i32, %arg1: memref<1x163x12xf32, #tpu.memory_space<vmem>>, %arg2: memref<3x18x32xbf16, #tpu.memory_space<vmem>>, %arg3: memref<1x32xf32, #tpu.memory_space<vmem>>, %arg4: memref<1x144x32xf32, #tpu.memory_space<vmem>>) attributes {dimension_semantics = [#tpu.dimension_semantics<parallel>], iteration_bounds = array<i64: 2>, scalar_prefetch = 0 : i64, scratch_operands = 0 : i64, tpu.core_type = #tpu.core_type<tc>, window_params = [{transform_indices = @transform_0, window_bounds = array<i64: 1, 163, 12>}, {pipeline_mode = #tpu.pipeline_mode<synchronous>, transform_indices = @transform_1, window_bounds = array<i64: 3, 18, 32>}, {pipeline_mode = #tpu.pipeline_mode<synchronous>, transform_indices = @transform_2, window_bounds = array<i64: 1, 32>}, {transform_indices = @transform_3, window_bounds = array<i64: 1, 144, 32>}]} {
    %cst = arith.constant 0.000000e+00 : f32
    %0 = vector.broadcast %cst : f32 to vector<144x32xf32>
    %c0 = arith.constant 0 : index
    %c0_0 = arith.constant 0 : index
    %c0_1 = arith.constant 0 : index
    %1 = vector.load %arg1[%c0, %c0_0, %c0_1] : memref<1x163x12xf32, #tpu.memory_space<vmem>>, vector<1x144x12xf32>
    %2 = vector.shape_cast %1 : vector<1x144x12xf32> to vector<144x12xf32>
    %3 = vector.extract_strided_slice %2 {offsets = [0, 0], sizes = [144, 6], strides = [1, 1]} : vector<144x12xf32> to vector<144x6xf32>
    %4 = arith.truncf %3 : vector<144x6xf32> to vector<144x6xbf16>
    %c0_2 = arith.constant 0 : index
    %c0_3 = arith.constant 0 : index
    %c0_4 = arith.constant 0 : index
    %5 = vector.load %arg1[%c0_2, %c0_3, %c0_4] : memref<1x163x12xf32, #tpu.memory_space<vmem>>, vector<1x144x12xf32>
    %6 = vector.shape_cast %5 : vector<1x144x12xf32> to vector<144x12xf32>
    %7 = vector.extract_strided_slice %6 {offsets = [0, 6], sizes = [144, 6], strides = [1, 1]} : vector<144x12xf32> to vector<144x6xf32>
    %8 = arith.truncf %7 : vector<144x6xf32> to vector<144x6xbf16>
    %c0_5 = arith.constant 0 : index
    %c1 = arith.constant 1 : index
    %c0_6 = arith.constant 0 : index
    %9 = vector.load %arg1[%c0_5, %c1, %c0_6] : memref<1x163x12xf32, #tpu.memory_space<vmem>>, vector<1x144x12xf32>
    %10 = vector.shape_cast %9 : vector<1x144x12xf32> to vector<144x12xf32>
    %11 = vector.extract_strided_slice %10 {offsets = [0, 0], sizes = [144, 6], strides = [1, 1]} : vector<144x12xf32> to vector<144x6xf32>
    %12 = arith.truncf %11 : vector<144x6xf32> to vector<144x6xbf16>
    %13 = tpu.concatenate %4, %8, %12 in 1 : vector<144x6xbf16>, vector<144x6xbf16>, vector<144x6xbf16> -> vector<144x18xbf16>
    %c0_7 = arith.constant 0 : index
    %c0_8 = arith.constant 0 : index
    %c0_9 = arith.constant 0 : index
    %14 = vector.load %arg2[%c0_7, %c0_8, %c0_9] : memref<3x18x32xbf16, #tpu.memory_space<vmem>>, vector<1x18x32xbf16>
    %15 = vector.shape_cast %14 : vector<1x18x32xbf16> to vector<18x32xbf16>
    %cst_10 = arith.constant dense<0.000000e+00> : vector<144x32xf32>
    %16 = tpu.matmul %13, %15, %cst_10 {dimension_numbers = #tpu.dot_dimension_numbers<[1], [0], [0], [1], [0, 0, 1, 1], [], []>} : vector<144x18xbf16>, vector<18x32xbf16>, vector<144x32xf32> -> vector<144x32xf32>
    %17 = arith.addf %0, %16 : vector<144x32xf32>
    %c0_11 = arith.constant 0 : index
    %c9 = arith.constant 9 : index
    %c0_12 = arith.constant 0 : index
    %18 = vector.load %arg1[%c0_11, %c9, %c0_12] : memref<1x163x12xf32, #tpu.memory_space<vmem>>, vector<1x144x12xf32>
    %19 = vector.shape_cast %18 : vector<1x144x12xf32> to vector<144x12xf32>
    %20 = vector.extract_strided_slice %19 {offsets = [0, 0], sizes = [144, 6], strides = [1, 1]} : vector<144x12xf32> to vector<144x6xf32>
    %21 = arith.truncf %20 : vector<144x6xf32> to vector<144x6xbf16>
    %c0_13 = arith.constant 0 : index
    %c9_14 = arith.constant 9 : index
    %c0_15 = arith.constant 0 : index
    %22 = vector.load %arg1[%c0_13, %c9_14, %c0_15] : memref<1x163x12xf32, #tpu.memory_space<vmem>>, vector<1x144x12xf32>
    %23 = vector.shape_cast %22 : vector<1x144x12xf32> to vector<144x12xf32>
    %24 = vector.extract_strided_slice %23 {offsets = [0, 6], sizes = [144, 6], strides = [1, 1]} : vector<144x12xf32> to vector<144x6xf32>
    %25 = arith.truncf %24 : vector<144x6xf32> to vector<144x6xbf16>
    %c0_16 = arith.constant 0 : index
    %c10 = arith.constant 10 : index
    %c0_17 = arith.constant 0 : index
    %26 = vector.load %arg1[%c0_16, %c10, %c0_17] : memref<1x163x12xf32, #tpu.memory_space<vmem>>, vector<1x144x12xf32>
    %27 = vector.shape_cast %26 : vector<1x144x12xf32> to vector<144x12xf32>
    %28 = vector.extract_strided_slice %27 {offsets = [0, 0], sizes = [144, 6], strides = [1, 1]} : vector<144x12xf32> to vector<144x6xf32>
    %29 = arith.truncf %28 : vector<144x6xf32> to vector<144x6xbf16>
    %30 = tpu.concatenate %21, %25, %29 in 1 : vector<144x6xbf16>, vector<144x6xbf16>, vector<144x6xbf16> -> vector<144x18xbf16>
    %c1_18 = arith.constant 1 : index
    %c0_19 = arith.constant 0 : index
    %c0_20 = arith.constant 0 : index
    %31 = vector.load %arg2[%c1_18, %c0_19, %c0_20] : memref<3x18x32xbf16, #tpu.memory_space<vmem>>, vector<1x18x32xbf16>
    %32 = vector.shape_cast %31 : vector<1x18x32xbf16> to vector<18x32xbf16>
    %cst_21 = arith.constant dense<0.000000e+00> : vector<144x32xf32>
    %33 = tpu.matmul %30, %32, %cst_21 {dimension_numbers = #tpu.dot_dimension_numbers<[1], [0], [0], [1], [0, 0, 1, 1], [], []>} : vector<144x18xbf16>, vector<18x32xbf16>, vector<144x32xf32> -> vector<144x32xf32>
    %34 = arith.addf %17, %33 : vector<144x32xf32>
    %c0_22 = arith.constant 0 : index
    %c18 = arith.constant 18 : index
    %c0_23 = arith.constant 0 : index
    %35 = vector.load %arg1[%c0_22, %c18, %c0_23] : memref<1x163x12xf32, #tpu.memory_space<vmem>>, vector<1x144x12xf32>
    %36 = vector.shape_cast %35 : vector<1x144x12xf32> to vector<144x12xf32>
    %37 = vector.extract_strided_slice %36 {offsets = [0, 0], sizes = [144, 6], strides = [1, 1]} : vector<144x12xf32> to vector<144x6xf32>
    %38 = arith.truncf %37 : vector<144x6xf32> to vector<144x6xbf16>
    %c0_24 = arith.constant 0 : index
    %c18_25 = arith.constant 18 : index
    %c0_26 = arith.constant 0 : index
    %39 = vector.load %arg1[%c0_24, %c18_25, %c0_26] : memref<1x163x12xf32, #tpu.memory_space<vmem>>, vector<1x144x12xf32>
    %40 = vector.shape_cast %39 : vector<1x144x12xf32> to vector<144x12xf32>
    %41 = vector.extract_strided_slice %40 {offsets = [0, 6], sizes = [144, 6], strides = [1, 1]} : vector<144x12xf32> to vector<144x6xf32>
    %42 = arith.truncf %41 : vector<144x6xf32> to vector<144x6xbf16>
    %c0_27 = arith.constant 0 : index
    %c19 = arith.constant 19 : index
    %c0_28 = arith.constant 0 : index
    %43 = vector.load %arg1[%c0_27, %c19, %c0_28] : memref<1x163x12xf32, #tpu.memory_space<vmem>>, vector<1x144x12xf32>
    %44 = vector.shape_cast %43 : vector<1x144x12xf32> to vector<144x12xf32>
    %45 = vector.extract_strided_slice %44 {offsets = [0, 0], sizes = [144, 6], strides = [1, 1]} : vector<144x12xf32> to vector<144x6xf32>
    %46 = arith.truncf %45 : vector<144x6xf32> to vector<144x6xbf16>
    %47 = tpu.concatenate %38, %42, %46 in 1 : vector<144x6xbf16>, vector<144x6xbf16>, vector<144x6xbf16> -> vector<144x18xbf16>
    %c2 = arith.constant 2 : index
    %c0_29 = arith.constant 0 : index
    %c0_30 = arith.constant 0 : index
    %48 = vector.load %arg2[%c2, %c0_29, %c0_30] : memref<3x18x32xbf16, #tpu.memory_space<vmem>>, vector<1x18x32xbf16>
    %49 = vector.shape_cast %48 : vector<1x18x32xbf16> to vector<18x32xbf16>
    %cst_31 = arith.constant dense<0.000000e+00> : vector<144x32xf32>
    %50 = tpu.matmul %47, %49, %cst_31 {dimension_numbers = #tpu.dot_dimension_numbers<[1], [0], [0], [1], [0, 0, 1, 1], [], []>} : vector<144x18xbf16>, vector<18x32xbf16>, vector<144x32xf32> -> vector<144x32xf32>
    %51 = arith.addf %34, %50 : vector<144x32xf32>
    %c0_32 = arith.constant 0 : index
    %c0_33 = arith.constant 0 : index
    %52 = vector.load %arg3[%c0_32, %c0_33] : memref<1x32xf32, #tpu.memory_space<vmem>>, vector<1x32xf32>
    %53 = vector.broadcast %52 : vector<1x32xf32> to vector<144x32xf32>
    %54 = arith.addf %51, %53 : vector<144x32xf32>
    %cst_34 = arith.constant 0.000000e+00 : f32
    %55 = vector.broadcast %cst_34 : f32 to vector<144x32xf32>
    %56 = arith.maximumf %54, %55 : vector<144x32xf32>
    %c0_35 = arith.constant 0 : index
    %c0_36 = arith.constant 0 : index
    %c0_37 = arith.constant 0 : index
    %57 = vector.load %arg4[%c0_35, %c0_36, %c0_37] : memref<1x144x32xf32, #tpu.memory_space<vmem>>, vector<1x144x32xf32>
    %58 = vector.shape_cast %57 : vector<1x144x32xf32> to vector<144x32xf32>
    %59 = vector.shape_cast %56 : vector<144x32xf32> to vector<1x144x32xf32>
    tpu.vector_store %arg4[%c0_35, %c0_36, %c0_37], %59 {strides = array<i32>} : memref<1x144x32xf32, #tpu.memory_space<vmem>>, vector<1x144x32xf32>,
    return
  }
  func.func @transform_0(%arg0: i32) -> (i32, i32, i32) {
    %c0_i32 = arith.constant 0 : i32
    %c0_i32_0 = arith.constant 0 : i32
    %c0_i32_1 = arith.constant 0 : i32
    return %arg0, %c0_i32, %c0_i32_0 : i32, i32, i32
  }
  func.func @transform_1(%arg0: i32) -> (i32, i32, i32) {
    %c0_i32 = arith.constant 0 : i32
    %c0_i32_0 = arith.constant 0 : i32
    %c0_i32_1 = arith.constant 0 : i32
    %c0_i32_2 = arith.constant 0 : i32
    return %c0_i32, %c0_i32_0, %c0_i32_1 : i32, i32, i32
  }
  func.func @transform_2(%arg0: i32) -> (i32, i32) {
    %c0_i32 = arith.constant 0 : i32
    %c0_i32_0 = arith.constant 0 : i32
    %c0_i32_1 = arith.constant 0 : i32
    return %c0_i32, %c0_i32_0 : i32, i32
  }
  func.func @transform_3(%arg0: i32) -> (i32, i32, i32) {
    %c0_i32 = arith.constant 0 : i32
    %c0_i32_0 = arith.constant 0 : i32
    %c0_i32_1 = arith.constant 0 : i32
    return %arg0, %c0_i32, %c0_i32_0 : i32, i32, i32
  }
}

module attributes {stable_mosaic.version = 11 : i64} {
  func.func @_conv3x3_kernel(%arg0: i32, %arg1: memref<1x102x32xf32, #tpu.memory_space<vmem>>, %arg2: memref<3x96x32xbf16, #tpu.memory_space<vmem>>, %arg3: memref<1x32xf32, #tpu.memory_space<vmem>>, %arg4: memref<1x80x32xf32, #tpu.memory_space<vmem>>) attributes {dimension_semantics = [#tpu.dimension_semantics<parallel>], iteration_bounds = array<i64: 2>, scalar_prefetch = 0 : i64, scratch_operands = 0 : i64, tpu.core_type = #tpu.core_type<tc>, window_params = [{transform_indices = @transform_0, window_bounds = array<i64: 1, 102, 32>}, {pipeline_mode = #tpu.pipeline_mode<synchronous>, transform_indices = @transform_1, window_bounds = array<i64: 3, 96, 32>}, {pipeline_mode = #tpu.pipeline_mode<synchronous>, transform_indices = @transform_2, window_bounds = array<i64: 1, 32>}, {transform_indices = @transform_3, window_bounds = array<i64: 1, 80, 32>}]} {
    %cst = arith.constant 0.000000e+00 : f32
    %0 = vector.broadcast %cst : f32 to vector<80x32xf32>
    %c0 = arith.constant 0 : index
    %c0_0 = arith.constant 0 : index
    %c0_1 = arith.constant 0 : index
    %1 = vector.load %arg1[%c0, %c0_0, %c0_1] : memref<1x102x32xf32, #tpu.memory_space<vmem>>, vector<1x80x32xf32>
    %2 = vector.shape_cast %1 : vector<1x80x32xf32> to vector<80x32xf32>
    %3 = arith.truncf %2 : vector<80x32xf32> to vector<80x32xbf16>
    %c0_2 = arith.constant 0 : index
    %c1 = arith.constant 1 : index
    %c0_3 = arith.constant 0 : index
    %4 = vector.load %arg1[%c0_2, %c1, %c0_3] : memref<1x102x32xf32, #tpu.memory_space<vmem>>, vector<1x80x32xf32>
    %5 = vector.shape_cast %4 : vector<1x80x32xf32> to vector<80x32xf32>
    %6 = arith.truncf %5 : vector<80x32xf32> to vector<80x32xbf16>
    %c0_4 = arith.constant 0 : index
    %c2 = arith.constant 2 : index
    %c0_5 = arith.constant 0 : index
    %7 = vector.load %arg1[%c0_4, %c2, %c0_5] : memref<1x102x32xf32, #tpu.memory_space<vmem>>, vector<1x80x32xf32>
    %8 = vector.shape_cast %7 : vector<1x80x32xf32> to vector<80x32xf32>
    %9 = arith.truncf %8 : vector<80x32xf32> to vector<80x32xbf16>
    %10 = tpu.concatenate %3, %6, %9 in 1 : vector<80x32xbf16>, vector<80x32xbf16>, vector<80x32xbf16> -> vector<80x96xbf16>
    %c0_6 = arith.constant 0 : index
    %c0_7 = arith.constant 0 : index
    %c0_8 = arith.constant 0 : index
    %11 = vector.load %arg2[%c0_6, %c0_7, %c0_8] : memref<3x96x32xbf16, #tpu.memory_space<vmem>>, vector<1x96x32xbf16>
    %12 = vector.shape_cast %11 : vector<1x96x32xbf16> to vector<96x32xbf16>
    %cst_9 = arith.constant dense<0.000000e+00> : vector<80x32xf32>
    %13 = tpu.matmul %10, %12, %cst_9 {dimension_numbers = #tpu.dot_dimension_numbers<[1], [0], [0], [1], [0, 0, 1, 1], [], []>} : vector<80x96xbf16>, vector<96x32xbf16>, vector<80x32xf32> -> vector<80x32xf32>
    %14 = arith.addf %0, %13 : vector<80x32xf32>
    %c0_10 = arith.constant 0 : index
    %c10 = arith.constant 10 : index
    %c0_11 = arith.constant 0 : index
    %15 = vector.load %arg1[%c0_10, %c10, %c0_11] : memref<1x102x32xf32, #tpu.memory_space<vmem>>, vector<1x80x32xf32>
    %16 = vector.shape_cast %15 : vector<1x80x32xf32> to vector<80x32xf32>
    %17 = arith.truncf %16 : vector<80x32xf32> to vector<80x32xbf16>
    %c0_12 = arith.constant 0 : index
    %c11 = arith.constant 11 : index
    %c0_13 = arith.constant 0 : index
    %18 = vector.load %arg1[%c0_12, %c11, %c0_13] : memref<1x102x32xf32, #tpu.memory_space<vmem>>, vector<1x80x32xf32>
    %19 = vector.shape_cast %18 : vector<1x80x32xf32> to vector<80x32xf32>
    %20 = arith.truncf %19 : vector<80x32xf32> to vector<80x32xbf16>
    %c0_14 = arith.constant 0 : index
    %c12 = arith.constant 12 : index
    %c0_15 = arith.constant 0 : index
    %21 = vector.load %arg1[%c0_14, %c12, %c0_15] : memref<1x102x32xf32, #tpu.memory_space<vmem>>, vector<1x80x32xf32>
    %22 = vector.shape_cast %21 : vector<1x80x32xf32> to vector<80x32xf32>
    %23 = arith.truncf %22 : vector<80x32xf32> to vector<80x32xbf16>
    %24 = tpu.concatenate %17, %20, %23 in 1 : vector<80x32xbf16>, vector<80x32xbf16>, vector<80x32xbf16> -> vector<80x96xbf16>
    %c1_16 = arith.constant 1 : index
    %c0_17 = arith.constant 0 : index
    %c0_18 = arith.constant 0 : index
    %25 = vector.load %arg2[%c1_16, %c0_17, %c0_18] : memref<3x96x32xbf16, #tpu.memory_space<vmem>>, vector<1x96x32xbf16>
    %26 = vector.shape_cast %25 : vector<1x96x32xbf16> to vector<96x32xbf16>
    %cst_19 = arith.constant dense<0.000000e+00> : vector<80x32xf32>
    %27 = tpu.matmul %24, %26, %cst_19 {dimension_numbers = #tpu.dot_dimension_numbers<[1], [0], [0], [1], [0, 0, 1, 1], [], []>} : vector<80x96xbf16>, vector<96x32xbf16>, vector<80x32xf32> -> vector<80x32xf32>
    %28 = arith.addf %14, %27 : vector<80x32xf32>
    %c0_20 = arith.constant 0 : index
    %c20 = arith.constant 20 : index
    %c0_21 = arith.constant 0 : index
    %29 = vector.load %arg1[%c0_20, %c20, %c0_21] : memref<1x102x32xf32, #tpu.memory_space<vmem>>, vector<1x80x32xf32>
    %30 = vector.shape_cast %29 : vector<1x80x32xf32> to vector<80x32xf32>
    %31 = arith.truncf %30 : vector<80x32xf32> to vector<80x32xbf16>
    %c0_22 = arith.constant 0 : index
    %c21 = arith.constant 21 : index
    %c0_23 = arith.constant 0 : index
    %32 = vector.load %arg1[%c0_22, %c21, %c0_23] : memref<1x102x32xf32, #tpu.memory_space<vmem>>, vector<1x80x32xf32>
    %33 = vector.shape_cast %32 : vector<1x80x32xf32> to vector<80x32xf32>
    %34 = arith.truncf %33 : vector<80x32xf32> to vector<80x32xbf16>
    %c0_24 = arith.constant 0 : index
    %c22 = arith.constant 22 : index
    %c0_25 = arith.constant 0 : index
    %35 = vector.load %arg1[%c0_24, %c22, %c0_25] : memref<1x102x32xf32, #tpu.memory_space<vmem>>, vector<1x80x32xf32>
    %36 = vector.shape_cast %35 : vector<1x80x32xf32> to vector<80x32xf32>
    %37 = arith.truncf %36 : vector<80x32xf32> to vector<80x32xbf16>
    %38 = tpu.concatenate %31, %34, %37 in 1 : vector<80x32xbf16>, vector<80x32xbf16>, vector<80x32xbf16> -> vector<80x96xbf16>
    %c2_26 = arith.constant 2 : index
    %c0_27 = arith.constant 0 : index
    %c0_28 = arith.constant 0 : index
    %39 = vector.load %arg2[%c2_26, %c0_27, %c0_28] : memref<3x96x32xbf16, #tpu.memory_space<vmem>>, vector<1x96x32xbf16>
    %40 = vector.shape_cast %39 : vector<1x96x32xbf16> to vector<96x32xbf16>
    %cst_29 = arith.constant dense<0.000000e+00> : vector<80x32xf32>
    %41 = tpu.matmul %38, %40, %cst_29 {dimension_numbers = #tpu.dot_dimension_numbers<[1], [0], [0], [1], [0, 0, 1, 1], [], []>} : vector<80x96xbf16>, vector<96x32xbf16>, vector<80x32xf32> -> vector<80x32xf32>
    %42 = arith.addf %28, %41 : vector<80x32xf32>
    %c0_30 = arith.constant 0 : index
    %c0_31 = arith.constant 0 : index
    %43 = vector.load %arg3[%c0_30, %c0_31] : memref<1x32xf32, #tpu.memory_space<vmem>>, vector<1x32xf32>
    %44 = vector.broadcast %43 : vector<1x32xf32> to vector<80x32xf32>
    %45 = arith.addf %42, %44 : vector<80x32xf32>
    %cst_32 = arith.constant 0.000000e+00 : f32
    %46 = vector.broadcast %cst_32 : f32 to vector<80x32xf32>
    %47 = arith.maximumf %45, %46 : vector<80x32xf32>
    %c0_33 = arith.constant 0 : index
    %c0_34 = arith.constant 0 : index
    %c0_35 = arith.constant 0 : index
    %48 = vector.load %arg4[%c0_33, %c0_34, %c0_35] : memref<1x80x32xf32, #tpu.memory_space<vmem>>, vector<1x80x32xf32>
    %49 = vector.shape_cast %48 : vector<1x80x32xf32> to vector<80x32xf32>
    %50 = vector.shape_cast %47 : vector<80x32xf32> to vector<1x80x32xf32>
    tpu.vector_store %arg4[%c0_33, %c0_34, %c0_35], %50 {strides = array<i32>} : memref<1x80x32xf32, #tpu.memory_space<vmem>>, vector<1x80x32xf32>,
    return
  }
  func.func @transform_0(%arg0: i32) -> (i32, i32, i32) {
    %c0_i32 = arith.constant 0 : i32
    %c0_i32_0 = arith.constant 0 : i32
    %c0_i32_1 = arith.constant 0 : i32
    return %arg0, %c0_i32, %c0_i32_0 : i32, i32, i32
  }
  func.func @transform_1(%arg0: i32) -> (i32, i32, i32) {
    %c0_i32 = arith.constant 0 : i32
    %c0_i32_0 = arith.constant 0 : i32
    %c0_i32_1 = arith.constant 0 : i32
    %c0_i32_2 = arith.constant 0 : i32
    return %c0_i32, %c0_i32_0, %c0_i32_1 : i32, i32, i32
  }
  func.func @transform_2(%arg0: i32) -> (i32, i32) {
    %c0_i32 = arith.constant 0 : i32
    %c0_i32_0 = arith.constant 0 : i32
    %c0_i32_1 = arith.constant 0 : i32
    return %c0_i32, %c0_i32_0 : i32, i32
  }
  func.func @transform_3(%arg0: i32) -> (i32, i32, i32) {
    %c0_i32 = arith.constant 0 : i32
    %c0_i32_0 = arith.constant 0 : i32
    %c0_i32_1 = arith.constant 0 : i32
    return %arg0, %c0_i32, %c0_i32_0 : i32, i32, i32
  }
}

module attributes {stable_mosaic.version = 11 : i64} {
  func.func @_conv3x3_kernel(%arg0: i32, %arg1: memref<1x51x64xf32, #tpu.memory_space<vmem>>, %arg2: memref<3x96x64xbf16, #tpu.memory_space<vmem>>, %arg3: memref<1x64xf32, #tpu.memory_space<vmem>>, %arg4: memref<1x40x64xf32, #tpu.memory_space<vmem>>) attributes {dimension_semantics = [#tpu.dimension_semantics<parallel>], iteration_bounds = array<i64: 2>, scalar_prefetch = 0 : i64, scratch_operands = 0 : i64, tpu.core_type = #tpu.core_type<tc>, window_params = [{transform_indices = @transform_0, window_bounds = array<i64: 1, 51, 64>}, {pipeline_mode = #tpu.pipeline_mode<synchronous>, transform_indices = @transform_1, window_bounds = array<i64: 3, 96, 64>}, {pipeline_mode = #tpu.pipeline_mode<synchronous>, transform_indices = @transform_2, window_bounds = array<i64: 1, 64>}, {transform_indices = @transform_3, window_bounds = array<i64: 1, 40, 64>}]} {
    %cst = arith.constant 0.000000e+00 : f32
    %0 = vector.broadcast %cst : f32 to vector<40x64xf32>
    %c0 = arith.constant 0 : index
    %c0_0 = arith.constant 0 : index
    %c0_1 = arith.constant 0 : index
    %1 = vector.load %arg1[%c0, %c0_0, %c0_1] : memref<1x51x64xf32, #tpu.memory_space<vmem>>, vector<1x40x64xf32>
    %2 = vector.shape_cast %1 : vector<1x40x64xf32> to vector<40x64xf32>
    %3 = vector.extract_strided_slice %2 {offsets = [0, 0], sizes = [40, 32], strides = [1, 1]} : vector<40x64xf32> to vector<40x32xf32>
    %4 = arith.truncf %3 : vector<40x32xf32> to vector<40x32xbf16>
    %c0_2 = arith.constant 0 : index
    %c0_3 = arith.constant 0 : index
    %c0_4 = arith.constant 0 : index
    %5 = vector.load %arg1[%c0_2, %c0_3, %c0_4] : memref<1x51x64xf32, #tpu.memory_space<vmem>>, vector<1x40x64xf32>
    %6 = vector.shape_cast %5 : vector<1x40x64xf32> to vector<40x64xf32>
    %7 = vector.extract_strided_slice %6 {offsets = [0, 32], sizes = [40, 32], strides = [1, 1]} : vector<40x64xf32> to vector<40x32xf32>
    %8 = arith.truncf %7 : vector<40x32xf32> to vector<40x32xbf16>
    %c0_5 = arith.constant 0 : index
    %c1 = arith.constant 1 : index
    %c0_6 = arith.constant 0 : index
    %9 = vector.load %arg1[%c0_5, %c1, %c0_6] : memref<1x51x64xf32, #tpu.memory_space<vmem>>, vector<1x40x64xf32>
    %10 = vector.shape_cast %9 : vector<1x40x64xf32> to vector<40x64xf32>
    %11 = vector.extract_strided_slice %10 {offsets = [0, 0], sizes = [40, 32], strides = [1, 1]} : vector<40x64xf32> to vector<40x32xf32>
    %12 = arith.truncf %11 : vector<40x32xf32> to vector<40x32xbf16>
    %13 = tpu.concatenate %4, %8, %12 in 1 : vector<40x32xbf16>, vector<40x32xbf16>, vector<40x32xbf16> -> vector<40x96xbf16>
    %c0_7 = arith.constant 0 : index
    %c0_8 = arith.constant 0 : index
    %c0_9 = arith.constant 0 : index
    %14 = vector.load %arg2[%c0_7, %c0_8, %c0_9] : memref<3x96x64xbf16, #tpu.memory_space<vmem>>, vector<1x96x64xbf16>
    %15 = vector.shape_cast %14 : vector<1x96x64xbf16> to vector<96x64xbf16>
    %cst_10 = arith.constant dense<0.000000e+00> : vector<40x64xf32>
    %16 = tpu.matmul %13, %15, %cst_10 {dimension_numbers = #tpu.dot_dimension_numbers<[1], [0], [0], [1], [0, 0, 1, 1], [], []>} : vector<40x96xbf16>, vector<96x64xbf16>, vector<40x64xf32> -> vector<40x64xf32>
    %17 = arith.addf %0, %16 : vector<40x64xf32>
    %c0_11 = arith.constant 0 : index
    %c5 = arith.constant 5 : index
    %c0_12 = arith.constant 0 : index
    %18 = vector.load %arg1[%c0_11, %c5, %c0_12] : memref<1x51x64xf32, #tpu.memory_space<vmem>>, vector<1x40x64xf32>
    %19 = vector.shape_cast %18 : vector<1x40x64xf32> to vector<40x64xf32>
    %20 = vector.extract_strided_slice %19 {offsets = [0, 0], sizes = [40, 32], strides = [1, 1]} : vector<40x64xf32> to vector<40x32xf32>
    %21 = arith.truncf %20 : vector<40x32xf32> to vector<40x32xbf16>
    %c0_13 = arith.constant 0 : index
    %c5_14 = arith.constant 5 : index
    %c0_15 = arith.constant 0 : index
    %22 = vector.load %arg1[%c0_13, %c5_14, %c0_15] : memref<1x51x64xf32, #tpu.memory_space<vmem>>, vector<1x40x64xf32>
    %23 = vector.shape_cast %22 : vector<1x40x64xf32> to vector<40x64xf32>
    %24 = vector.extract_strided_slice %23 {offsets = [0, 32], sizes = [40, 32], strides = [1, 1]} : vector<40x64xf32> to vector<40x32xf32>
    %25 = arith.truncf %24 : vector<40x32xf32> to vector<40x32xbf16>
    %c0_16 = arith.constant 0 : index
    %c6 = arith.constant 6 : index
    %c0_17 = arith.constant 0 : index
    %26 = vector.load %arg1[%c0_16, %c6, %c0_17] : memref<1x51x64xf32, #tpu.memory_space<vmem>>, vector<1x40x64xf32>
    %27 = vector.shape_cast %26 : vector<1x40x64xf32> to vector<40x64xf32>
    %28 = vector.extract_strided_slice %27 {offsets = [0, 0], sizes = [40, 32], strides = [1, 1]} : vector<40x64xf32> to vector<40x32xf32>
    %29 = arith.truncf %28 : vector<40x32xf32> to vector<40x32xbf16>
    %30 = tpu.concatenate %21, %25, %29 in 1 : vector<40x32xbf16>, vector<40x32xbf16>, vector<40x32xbf16> -> vector<40x96xbf16>
    %c1_18 = arith.constant 1 : index
    %c0_19 = arith.constant 0 : index
    %c0_20 = arith.constant 0 : index
    %31 = vector.load %arg2[%c1_18, %c0_19, %c0_20] : memref<3x96x64xbf16, #tpu.memory_space<vmem>>, vector<1x96x64xbf16>
    %32 = vector.shape_cast %31 : vector<1x96x64xbf16> to vector<96x64xbf16>
    %cst_21 = arith.constant dense<0.000000e+00> : vector<40x64xf32>
    %33 = tpu.matmul %30, %32, %cst_21 {dimension_numbers = #tpu.dot_dimension_numbers<[1], [0], [0], [1], [0, 0, 1, 1], [], []>} : vector<40x96xbf16>, vector<96x64xbf16>, vector<40x64xf32> -> vector<40x64xf32>
    %34 = arith.addf %17, %33 : vector<40x64xf32>
    %c0_22 = arith.constant 0 : index
    %c10 = arith.constant 10 : index
    %c0_23 = arith.constant 0 : index
    %35 = vector.load %arg1[%c0_22, %c10, %c0_23] : memref<1x51x64xf32, #tpu.memory_space<vmem>>, vector<1x40x64xf32>
    %36 = vector.shape_cast %35 : vector<1x40x64xf32> to vector<40x64xf32>
    %37 = vector.extract_strided_slice %36 {offsets = [0, 0], sizes = [40, 32], strides = [1, 1]} : vector<40x64xf32> to vector<40x32xf32>
    %38 = arith.truncf %37 : vector<40x32xf32> to vector<40x32xbf16>
    %c0_24 = arith.constant 0 : index
    %c10_25 = arith.constant 10 : index
    %c0_26 = arith.constant 0 : index
    %39 = vector.load %arg1[%c0_24, %c10_25, %c0_26] : memref<1x51x64xf32, #tpu.memory_space<vmem>>, vector<1x40x64xf32>
    %40 = vector.shape_cast %39 : vector<1x40x64xf32> to vector<40x64xf32>
    %41 = vector.extract_strided_slice %40 {offsets = [0, 32], sizes = [40, 32], strides = [1, 1]} : vector<40x64xf32> to vector<40x32xf32>
    %42 = arith.truncf %41 : vector<40x32xf32> to vector<40x32xbf16>
    %c0_27 = arith.constant 0 : index
    %c11 = arith.constant 11 : index
    %c0_28 = arith.constant 0 : index
    %43 = vector.load %arg1[%c0_27, %c11, %c0_28] : memref<1x51x64xf32, #tpu.memory_space<vmem>>, vector<1x40x64xf32>
    %44 = vector.shape_cast %43 : vector<1x40x64xf32> to vector<40x64xf32>
    %45 = vector.extract_strided_slice %44 {offsets = [0, 0], sizes = [40, 32], strides = [1, 1]} : vector<40x64xf32> to vector<40x32xf32>
    %46 = arith.truncf %45 : vector<40x32xf32> to vector<40x32xbf16>
    %47 = tpu.concatenate %38, %42, %46 in 1 : vector<40x32xbf16>, vector<40x32xbf16>, vector<40x32xbf16> -> vector<40x96xbf16>
    %c2 = arith.constant 2 : index
    %c0_29 = arith.constant 0 : index
    %c0_30 = arith.constant 0 : index
    %48 = vector.load %arg2[%c2, %c0_29, %c0_30] : memref<3x96x64xbf16, #tpu.memory_space<vmem>>, vector<1x96x64xbf16>
    %49 = vector.shape_cast %48 : vector<1x96x64xbf16> to vector<96x64xbf16>
    %cst_31 = arith.constant dense<0.000000e+00> : vector<40x64xf32>
    %50 = tpu.matmul %47, %49, %cst_31 {dimension_numbers = #tpu.dot_dimension_numbers<[1], [0], [0], [1], [0, 0, 1, 1], [], []>} : vector<40x96xbf16>, vector<96x64xbf16>, vector<40x64xf32> -> vector<40x64xf32>
    %51 = arith.addf %34, %50 : vector<40x64xf32>
    %c0_32 = arith.constant 0 : index
    %c0_33 = arith.constant 0 : index
    %52 = vector.load %arg3[%c0_32, %c0_33] : memref<1x64xf32, #tpu.memory_space<vmem>>, vector<1x64xf32>
    %53 = vector.broadcast %52 : vector<1x64xf32> to vector<40x64xf32>
    %54 = arith.addf %51, %53 : vector<40x64xf32>
    %cst_34 = arith.constant 0.000000e+00 : f32
    %55 = vector.broadcast %cst_34 : f32 to vector<40x64xf32>
    %56 = arith.maximumf %54, %55 : vector<40x64xf32>
    %c0_35 = arith.constant 0 : index
    %c0_36 = arith.constant 0 : index
    %c0_37 = arith.constant 0 : index
    %57 = vector.load %arg4[%c0_35, %c0_36, %c0_37] : memref<1x40x64xf32, #tpu.memory_space<vmem>>, vector<1x40x64xf32>
    %58 = vector.shape_cast %57 : vector<1x40x64xf32> to vector<40x64xf32>
    %59 = vector.shape_cast %56 : vector<40x64xf32> to vector<1x40x64xf32>
    tpu.vector_store %arg4[%c0_35, %c0_36, %c0_37], %59 {strides = array<i32>} : memref<1x40x64xf32, #tpu.memory_space<vmem>>, vector<1x40x64xf32>,
    return
  }
  func.func @transform_0(%arg0: i32) -> (i32, i32, i32) {
    %c0_i32 = arith.constant 0 : i32
    %c0_i32_0 = arith.constant 0 : i32
    %c0_i32_1 = arith.constant 0 : i32
    return %arg0, %c0_i32, %c0_i32_0 : i32, i32, i32
  }
  func.func @transform_1(%arg0: i32) -> (i32, i32, i32) {
    %c0_i32 = arith.constant 0 : i32
    %c0_i32_0 = arith.constant 0 : i32
    %c0_i32_1 = arith.constant 0 : i32
    %c0_i32_2 = arith.constant 0 : i32
    return %c0_i32, %c0_i32_0, %c0_i32_1 : i32, i32, i32
  }
  func.func @transform_2(%arg0: i32) -> (i32, i32) {
    %c0_i32 = arith.constant 0 : i32
    %c0_i32_0 = arith.constant 0 : i32
    %c0_i32_1 = arith.constant 0 : i32
    return %c0_i32, %c0_i32_0 : i32, i32
  }
  func.func @transform_3(%arg0: i32) -> (i32, i32, i32) {
    %c0_i32 = arith.constant 0 : i32
    %c0_i32_0 = arith.constant 0 : i32
    %c0_i32_1 = arith.constant 0 : i32
    return %arg0, %c0_i32, %c0_i32_0 : i32, i32, i32
  }
}

module attributes {stable_mosaic.version = 11 : i64} {
  func.func @_conv3x3_kernel(%arg0: i32, %arg1: memref<1x38x64xf32, #tpu.memory_space<vmem>>, %arg2: memref<3x192x64xbf16, #tpu.memory_space<vmem>>, %arg3: memref<1x64xf32, #tpu.memory_space<vmem>>, %arg4: memref<1x24x64xf32, #tpu.memory_space<vmem>>) attributes {dimension_semantics = [#tpu.dimension_semantics<parallel>], iteration_bounds = array<i64: 2>, scalar_prefetch = 0 : i64, scratch_operands = 0 : i64, tpu.core_type = #tpu.core_type<tc>, window_params = [{transform_indices = @transform_0, window_bounds = array<i64: 1, 38, 64>}, {pipeline_mode = #tpu.pipeline_mode<synchronous>, transform_indices = @transform_1, window_bounds = array<i64: 3, 192, 64>}, {pipeline_mode = #tpu.pipeline_mode<synchronous>, transform_indices = @transform_2, window_bounds = array<i64: 1, 64>}, {transform_indices = @transform_3, window_bounds = array<i64: 1, 24, 64>}]} {
    %cst = arith.constant 0.000000e+00 : f32
    %0 = vector.broadcast %cst : f32 to vector<24x64xf32>
    %c0 = arith.constant 0 : index
    %c0_0 = arith.constant 0 : index
    %c0_1 = arith.constant 0 : index
    %1 = vector.load %arg1[%c0, %c0_0, %c0_1] : memref<1x38x64xf32, #tpu.memory_space<vmem>>, vector<1x24x64xf32>
    %2 = vector.shape_cast %1 : vector<1x24x64xf32> to vector<24x64xf32>
    %3 = arith.truncf %2 : vector<24x64xf32> to vector<24x64xbf16>
    %c0_2 = arith.constant 0 : index
    %c1 = arith.constant 1 : index
    %c0_3 = arith.constant 0 : index
    %4 = vector.load %arg1[%c0_2, %c1, %c0_3] : memref<1x38x64xf32, #tpu.memory_space<vmem>>, vector<1x24x64xf32>
    %5 = vector.shape_cast %4 : vector<1x24x64xf32> to vector<24x64xf32>
    %6 = arith.truncf %5 : vector<24x64xf32> to vector<24x64xbf16>
    %c0_4 = arith.constant 0 : index
    %c2 = arith.constant 2 : index
    %c0_5 = arith.constant 0 : index
    %7 = vector.load %arg1[%c0_4, %c2, %c0_5] : memref<1x38x64xf32, #tpu.memory_space<vmem>>, vector<1x24x64xf32>
    %8 = vector.shape_cast %7 : vector<1x24x64xf32> to vector<24x64xf32>
    %9 = arith.truncf %8 : vector<24x64xf32> to vector<24x64xbf16>
    %10 = tpu.concatenate %3, %6, %9 in 1 : vector<24x64xbf16>, vector<24x64xbf16>, vector<24x64xbf16> -> vector<24x192xbf16>
    %c0_6 = arith.constant 0 : index
    %c0_7 = arith.constant 0 : index
    %c0_8 = arith.constant 0 : index
    %11 = vector.load %arg2[%c0_6, %c0_7, %c0_8] : memref<3x192x64xbf16, #tpu.memory_space<vmem>>, vector<1x192x64xbf16>
    %12 = vector.shape_cast %11 : vector<1x192x64xbf16> to vector<192x64xbf16>
    %cst_9 = arith.constant dense<0.000000e+00> : vector<24x64xf32>
    %13 = tpu.matmul %10, %12, %cst_9 {dimension_numbers = #tpu.dot_dimension_numbers<[1], [0], [0], [1], [0, 0, 1, 1], [], []>} : vector<24x192xbf16>, vector<192x64xbf16>, vector<24x64xf32> -> vector<24x64xf32>
    %14 = arith.addf %0, %13 : vector<24x64xf32>
    %c0_10 = arith.constant 0 : index
    %c6 = arith.constant 6 : index
    %c0_11 = arith.constant 0 : index
    %15 = vector.load %arg1[%c0_10, %c6, %c0_11] : memref<1x38x64xf32, #tpu.memory_space<vmem>>, vector<1x24x64xf32>
    %16 = vector.shape_cast %15 : vector<1x24x64xf32> to vector<24x64xf32>
    %17 = arith.truncf %16 : vector<24x64xf32> to vector<24x64xbf16>
    %c0_12 = arith.constant 0 : index
    %c7 = arith.constant 7 : index
    %c0_13 = arith.constant 0 : index
    %18 = vector.load %arg1[%c0_12, %c7, %c0_13] : memref<1x38x64xf32, #tpu.memory_space<vmem>>, vector<1x24x64xf32>
    %19 = vector.shape_cast %18 : vector<1x24x64xf32> to vector<24x64xf32>
    %20 = arith.truncf %19 : vector<24x64xf32> to vector<24x64xbf16>
    %c0_14 = arith.constant 0 : index
    %c8 = arith.constant 8 : index
    %c0_15 = arith.constant 0 : index
    %21 = vector.load %arg1[%c0_14, %c8, %c0_15] : memref<1x38x64xf32, #tpu.memory_space<vmem>>, vector<1x24x64xf32>
    %22 = vector.shape_cast %21 : vector<1x24x64xf32> to vector<24x64xf32>
    %23 = arith.truncf %22 : vector<24x64xf32> to vector<24x64xbf16>
    %24 = tpu.concatenate %17, %20, %23 in 1 : vector<24x64xbf16>, vector<24x64xbf16>, vector<24x64xbf16> -> vector<24x192xbf16>
    %c1_16 = arith.constant 1 : index
    %c0_17 = arith.constant 0 : index
    %c0_18 = arith.constant 0 : index
    %25 = vector.load %arg2[%c1_16, %c0_17, %c0_18] : memref<3x192x64xbf16, #tpu.memory_space<vmem>>, vector<1x192x64xbf16>
    %26 = vector.shape_cast %25 : vector<1x192x64xbf16> to vector<192x64xbf16>
    %cst_19 = arith.constant dense<0.000000e+00> : vector<24x64xf32>
    %27 = tpu.matmul %24, %26, %cst_19 {dimension_numbers = #tpu.dot_dimension_numbers<[1], [0], [0], [1], [0, 0, 1, 1], [], []>} : vector<24x192xbf16>, vector<192x64xbf16>, vector<24x64xf32> -> vector<24x64xf32>
    %28 = arith.addf %14, %27 : vector<24x64xf32>
    %c0_20 = arith.constant 0 : index
    %c12 = arith.constant 12 : index
    %c0_21 = arith.constant 0 : index
    %29 = vector.load %arg1[%c0_20, %c12, %c0_21] : memref<1x38x64xf32, #tpu.memory_space<vmem>>, vector<1x24x64xf32>
    %30 = vector.shape_cast %29 : vector<1x24x64xf32> to vector<24x64xf32>
    %31 = arith.truncf %30 : vector<24x64xf32> to vector<24x64xbf16>
    %c0_22 = arith.constant 0 : index
    %c13 = arith.constant 13 : index
    %c0_23 = arith.constant 0 : index
    %32 = vector.load %arg1[%c0_22, %c13, %c0_23] : memref<1x38x64xf32, #tpu.memory_space<vmem>>, vector<1x24x64xf32>
    %33 = vector.shape_cast %32 : vector<1x24x64xf32> to vector<24x64xf32>
    %34 = arith.truncf %33 : vector<24x64xf32> to vector<24x64xbf16>
    %c0_24 = arith.constant 0 : index
    %c14 = arith.constant 14 : index
    %c0_25 = arith.constant 0 : index
    %35 = vector.load %arg1[%c0_24, %c14, %c0_25] : memref<1x38x64xf32, #tpu.memory_space<vmem>>, vector<1x24x64xf32>
    %36 = vector.shape_cast %35 : vector<1x24x64xf32> to vector<24x64xf32>
    %37 = arith.truncf %36 : vector<24x64xf32> to vector<24x64xbf16>
    %38 = tpu.concatenate %31, %34, %37 in 1 : vector<24x64xbf16>, vector<24x64xbf16>, vector<24x64xbf16> -> vector<24x192xbf16>
    %c2_26 = arith.constant 2 : index
    %c0_27 = arith.constant 0 : index
    %c0_28 = arith.constant 0 : index
    %39 = vector.load %arg2[%c2_26, %c0_27, %c0_28] : memref<3x192x64xbf16, #tpu.memory_space<vmem>>, vector<1x192x64xbf16>
    %40 = vector.shape_cast %39 : vector<1x192x64xbf16> to vector<192x64xbf16>
    %cst_29 = arith.constant dense<0.000000e+00> : vector<24x64xf32>
    %41 = tpu.matmul %38, %40, %cst_29 {dimension_numbers = #tpu.dot_dimension_numbers<[1], [0], [0], [1], [0, 0, 1, 1], [], []>} : vector<24x192xbf16>, vector<192x64xbf16>, vector<24x64xf32> -> vector<24x64xf32>
    %42 = arith.addf %28, %41 : vector<24x64xf32>
    %c0_30 = arith.constant 0 : index
    %c0_31 = arith.constant 0 : index
    %43 = vector.load %arg3[%c0_30, %c0_31] : memref<1x64xf32, #tpu.memory_space<vmem>>, vector<1x64xf32>
    %44 = vector.broadcast %43 : vector<1x64xf32> to vector<24x64xf32>
    %45 = arith.addf %42, %44 : vector<24x64xf32>
    %cst_32 = arith.constant 0.000000e+00 : f32
    %46 = vector.broadcast %cst_32 : f32 to vector<24x64xf32>
    %47 = arith.maximumf %45, %46 : vector<24x64xf32>
    %c0_33 = arith.constant 0 : index
    %c0_34 = arith.constant 0 : index
    %c0_35 = arith.constant 0 : index
    %48 = vector.load %arg4[%c0_33, %c0_34, %c0_35] : memref<1x24x64xf32, #tpu.memory_space<vmem>>, vector<1x24x64xf32>
    %49 = vector.shape_cast %48 : vector<1x24x64xf32> to vector<24x64xf32>
    %50 = vector.shape_cast %47 : vector<24x64xf32> to vector<1x24x64xf32>
    tpu.vector_store %arg4[%c0_33, %c0_34, %c0_35], %50 {strides = array<i32>} : memref<1x24x64xf32, #tpu.memory_space<vmem>>, vector<1x24x64xf32>,
    return
  }
  func.func @transform_0(%arg0: i32) -> (i32, i32, i32) {
    %c0_i32 = arith.constant 0 : i32
    %c0_i32_0 = arith.constant 0 : i32
    %c0_i32_1 = arith.constant 0 : i32
    return %arg0, %c0_i32, %c0_i32_0 : i32, i32, i32
  }
  func.func @transform_1(%arg0: i32) -> (i32, i32, i32) {
    %c0_i32 = arith.constant 0 : i32
    %c0_i32_0 = arith.constant 0 : i32
    %c0_i32_1 = arith.constant 0 : i32
    %c0_i32_2 = arith.constant 0 : i32
    return %c0_i32, %c0_i32_0, %c0_i32_1 : i32, i32, i32
  }
  func.func @transform_2(%arg0: i32) -> (i32, i32) {
    %c0_i32 = arith.constant 0 : i32
    %c0_i32_0 = arith.constant 0 : i32
    %c0_i32_1 = arith.constant 0 : i32
    return %c0_i32, %c0_i32_0 : i32, i32
  }
  func.func @transform_3(%arg0: i32) -> (i32, i32, i32) {
    %c0_i32 = arith.constant 0 : i32
    %c0_i32_0 = arith.constant 0 : i32
    %c0_i32_1 = arith.constant 0 : i32
    return %arg0, %c0_i32, %c0_i32_0 : i32, i32, i32
  }
}

module attributes {stable_mosaic.version = 11 : i64} {
  func.func @_conv3x3_kernel(%arg0: i32, %arg1: memref<1x19x128xf32, #tpu.memory_space<vmem>>, %arg2: memref<3x192x96xbf16, #tpu.memory_space<vmem>>, %arg3: memref<1x96xf32, #tpu.memory_space<vmem>>, %arg4: memref<1x12x96xf32, #tpu.memory_space<vmem>>) attributes {dimension_semantics = [#tpu.dimension_semantics<parallel>], iteration_bounds = array<i64: 2>, scalar_prefetch = 0 : i64, scratch_operands = 0 : i64, tpu.core_type = #tpu.core_type<tc>, window_params = [{transform_indices = @transform_0, window_bounds = array<i64: 1, 19, 128>}, {pipeline_mode = #tpu.pipeline_mode<synchronous>, transform_indices = @transform_1, window_bounds = array<i64: 3, 192, 96>}, {pipeline_mode = #tpu.pipeline_mode<synchronous>, transform_indices = @transform_2, window_bounds = array<i64: 1, 96>}, {transform_indices = @transform_3, window_bounds = array<i64: 1, 12, 96>}]} {
    %cst = arith.constant 0.000000e+00 : f32
    %0 = vector.broadcast %cst : f32 to vector<12x96xf32>
    %c0 = arith.constant 0 : index
    %c0_0 = arith.constant 0 : index
    %c0_1 = arith.constant 0 : index
    %1 = vector.load %arg1[%c0, %c0_0, %c0_1] : memref<1x19x128xf32, #tpu.memory_space<vmem>>, vector<1x12x128xf32>
    %2 = vector.shape_cast %1 : vector<1x12x128xf32> to vector<12x128xf32>
    %3 = vector.extract_strided_slice %2 {offsets = [0, 0], sizes = [12, 64], strides = [1, 1]} : vector<12x128xf32> to vector<12x64xf32>
    %4 = arith.truncf %3 : vector<12x64xf32> to vector<12x64xbf16>
    %c0_2 = arith.constant 0 : index
    %c0_3 = arith.constant 0 : index
    %c0_4 = arith.constant 0 : index
    %5 = vector.load %arg1[%c0_2, %c0_3, %c0_4] : memref<1x19x128xf32, #tpu.memory_space<vmem>>, vector<1x12x128xf32>
    %6 = vector.shape_cast %5 : vector<1x12x128xf32> to vector<12x128xf32>
    %7 = vector.extract_strided_slice %6 {offsets = [0, 64], sizes = [12, 64], strides = [1, 1]} : vector<12x128xf32> to vector<12x64xf32>
    %8 = arith.truncf %7 : vector<12x64xf32> to vector<12x64xbf16>
    %c0_5 = arith.constant 0 : index
    %c1 = arith.constant 1 : index
    %c0_6 = arith.constant 0 : index
    %9 = vector.load %arg1[%c0_5, %c1, %c0_6] : memref<1x19x128xf32, #tpu.memory_space<vmem>>, vector<1x12x128xf32>
    %10 = vector.shape_cast %9 : vector<1x12x128xf32> to vector<12x128xf32>
    %11 = vector.extract_strided_slice %10 {offsets = [0, 0], sizes = [12, 64], strides = [1, 1]} : vector<12x128xf32> to vector<12x64xf32>
    %12 = arith.truncf %11 : vector<12x64xf32> to vector<12x64xbf16>
    %13 = tpu.concatenate %4, %8, %12 in 1 : vector<12x64xbf16>, vector<12x64xbf16>, vector<12x64xbf16> -> vector<12x192xbf16>
    %c0_7 = arith.constant 0 : index
    %c0_8 = arith.constant 0 : index
    %c0_9 = arith.constant 0 : index
    %14 = vector.load %arg2[%c0_7, %c0_8, %c0_9] : memref<3x192x96xbf16, #tpu.memory_space<vmem>>, vector<1x192x96xbf16>
    %15 = vector.shape_cast %14 : vector<1x192x96xbf16> to vector<192x96xbf16>
    %cst_10 = arith.constant dense<0.000000e+00> : vector<12x96xf32>
    %16 = tpu.matmul %13, %15, %cst_10 {dimension_numbers = #tpu.dot_dimension_numbers<[1], [0], [0], [1], [0, 0, 1, 1], [], []>} : vector<12x192xbf16>, vector<192x96xbf16>, vector<12x96xf32> -> vector<12x96xf32>
    %17 = arith.addf %0, %16 : vector<12x96xf32>
    %c0_11 = arith.constant 0 : index
    %c3 = arith.constant 3 : index
    %c0_12 = arith.constant 0 : index
    %18 = vector.load %arg1[%c0_11, %c3, %c0_12] : memref<1x19x128xf32, #tpu.memory_space<vmem>>, vector<1x12x128xf32>
    %19 = vector.shape_cast %18 : vector<1x12x128xf32> to vector<12x128xf32>
    %20 = vector.extract_strided_slice %19 {offsets = [0, 0], sizes = [12, 64], strides = [1, 1]} : vector<12x128xf32> to vector<12x64xf32>
    %21 = arith.truncf %20 : vector<12x64xf32> to vector<12x64xbf16>
    %c0_13 = arith.constant 0 : index
    %c3_14 = arith.constant 3 : index
    %c0_15 = arith.constant 0 : index
    %22 = vector.load %arg1[%c0_13, %c3_14, %c0_15] : memref<1x19x128xf32, #tpu.memory_space<vmem>>, vector<1x12x128xf32>
    %23 = vector.shape_cast %22 : vector<1x12x128xf32> to vector<12x128xf32>
    %24 = vector.extract_strided_slice %23 {offsets = [0, 64], sizes = [12, 64], strides = [1, 1]} : vector<12x128xf32> to vector<12x64xf32>
    %25 = arith.truncf %24 : vector<12x64xf32> to vector<12x64xbf16>
    %c0_16 = arith.constant 0 : index
    %c4 = arith.constant 4 : index
    %c0_17 = arith.constant 0 : index
    %26 = vector.load %arg1[%c0_16, %c4, %c0_17] : memref<1x19x128xf32, #tpu.memory_space<vmem>>, vector<1x12x128xf32>
    %27 = vector.shape_cast %26 : vector<1x12x128xf32> to vector<12x128xf32>
    %28 = vector.extract_strided_slice %27 {offsets = [0, 0], sizes = [12, 64], strides = [1, 1]} : vector<12x128xf32> to vector<12x64xf32>
    %29 = arith.truncf %28 : vector<12x64xf32> to vector<12x64xbf16>
    %30 = tpu.concatenate %21, %25, %29 in 1 : vector<12x64xbf16>, vector<12x64xbf16>, vector<12x64xbf16> -> vector<12x192xbf16>
    %c1_18 = arith.constant 1 : index
    %c0_19 = arith.constant 0 : index
    %c0_20 = arith.constant 0 : index
    %31 = vector.load %arg2[%c1_18, %c0_19, %c0_20] : memref<3x192x96xbf16, #tpu.memory_space<vmem>>, vector<1x192x96xbf16>
    %32 = vector.shape_cast %31 : vector<1x192x96xbf16> to vector<192x96xbf16>
    %cst_21 = arith.constant dense<0.000000e+00> : vector<12x96xf32>
    %33 = tpu.matmul %30, %32, %cst_21 {dimension_numbers = #tpu.dot_dimension_numbers<[1], [0], [0], [1], [0, 0, 1, 1], [], []>} : vector<12x192xbf16>, vector<192x96xbf16>, vector<12x96xf32> -> vector<12x96xf32>
    %34 = arith.addf %17, %33 : vector<12x96xf32>
    %c0_22 = arith.constant 0 : index
    %c6 = arith.constant 6 : index
    %c0_23 = arith.constant 0 : index
    %35 = vector.load %arg1[%c0_22, %c6, %c0_23] : memref<1x19x128xf32, #tpu.memory_space<vmem>>, vector<1x12x128xf32>
    %36 = vector.shape_cast %35 : vector<1x12x128xf32> to vector<12x128xf32>
    %37 = vector.extract_strided_slice %36 {offsets = [0, 0], sizes = [12, 64], strides = [1, 1]} : vector<12x128xf32> to vector<12x64xf32>
    %38 = arith.truncf %37 : vector<12x64xf32> to vector<12x64xbf16>
    %c0_24 = arith.constant 0 : index
    %c6_25 = arith.constant 6 : index
    %c0_26 = arith.constant 0 : index
    %39 = vector.load %arg1[%c0_24, %c6_25, %c0_26] : memref<1x19x128xf32, #tpu.memory_space<vmem>>, vector<1x12x128xf32>
    %40 = vector.shape_cast %39 : vector<1x12x128xf32> to vector<12x128xf32>
    %41 = vector.extract_strided_slice %40 {offsets = [0, 64], sizes = [12, 64], strides = [1, 1]} : vector<12x128xf32> to vector<12x64xf32>
    %42 = arith.truncf %41 : vector<12x64xf32> to vector<12x64xbf16>
    %c0_27 = arith.constant 0 : index
    %c7 = arith.constant 7 : index
    %c0_28 = arith.constant 0 : index
    %43 = vector.load %arg1[%c0_27, %c7, %c0_28] : memref<1x19x128xf32, #tpu.memory_space<vmem>>, vector<1x12x128xf32>
    %44 = vector.shape_cast %43 : vector<1x12x128xf32> to vector<12x128xf32>
    %45 = vector.extract_strided_slice %44 {offsets = [0, 0], sizes = [12, 64], strides = [1, 1]} : vector<12x128xf32> to vector<12x64xf32>
    %46 = arith.truncf %45 : vector<12x64xf32> to vector<12x64xbf16>
    %47 = tpu.concatenate %38, %42, %46 in 1 : vector<12x64xbf16>, vector<12x64xbf16>, vector<12x64xbf16> -> vector<12x192xbf16>
    %c2 = arith.constant 2 : index
    %c0_29 = arith.constant 0 : index
    %c0_30 = arith.constant 0 : index
    %48 = vector.load %arg2[%c2, %c0_29, %c0_30] : memref<3x192x96xbf16, #tpu.memory_space<vmem>>, vector<1x192x96xbf16>
    %49 = vector.shape_cast %48 : vector<1x192x96xbf16> to vector<192x96xbf16>
    %cst_31 = arith.constant dense<0.000000e+00> : vector<12x96xf32>
    %50 = tpu.matmul %47, %49, %cst_31 {dimension_numbers = #tpu.dot_dimension_numbers<[1], [0], [0], [1], [0, 0, 1, 1], [], []>} : vector<12x192xbf16>, vector<192x96xbf16>, vector<12x96xf32> -> vector<12x96xf32>
    %51 = arith.addf %34, %50 : vector<12x96xf32>
    %c0_32 = arith.constant 0 : index
    %c0_33 = arith.constant 0 : index
    %52 = vector.load %arg3[%c0_32, %c0_33] : memref<1x96xf32, #tpu.memory_space<vmem>>, vector<1x96xf32>
    %53 = vector.broadcast %52 : vector<1x96xf32> to vector<12x96xf32>
    %54 = arith.addf %51, %53 : vector<12x96xf32>
    %cst_34 = arith.constant 0.000000e+00 : f32
    %55 = vector.broadcast %cst_34 : f32 to vector<12x96xf32>
    %56 = arith.maximumf %54, %55 : vector<12x96xf32>
    %c0_35 = arith.constant 0 : index
    %c0_36 = arith.constant 0 : index
    %c0_37 = arith.constant 0 : index
    %57 = vector.load %arg4[%c0_35, %c0_36, %c0_37] : memref<1x12x96xf32, #tpu.memory_space<vmem>>, vector<1x12x96xf32>
    %58 = vector.shape_cast %57 : vector<1x12x96xf32> to vector<12x96xf32>
    %59 = vector.shape_cast %56 : vector<12x96xf32> to vector<1x12x96xf32>
    tpu.vector_store %arg4[%c0_35, %c0_36, %c0_37], %59 {strides = array<i32>} : memref<1x12x96xf32, #tpu.memory_space<vmem>>, vector<1x12x96xf32>,
    return
  }
  func.func @transform_0(%arg0: i32) -> (i32, i32, i32) {
    %c0_i32 = arith.constant 0 : i32
    %c0_i32_0 = arith.constant 0 : i32
    %c0_i32_1 = arith.constant 0 : i32
    return %arg0, %c0_i32, %c0_i32_0 : i32, i32, i32
  }
  func.func @transform_1(%arg0: i32) -> (i32, i32, i32) {
    %c0_i32 = arith.constant 0 : i32
    %c0_i32_0 = arith.constant 0 : i32
    %c0_i32_1 = arith.constant 0 : i32
    %c0_i32_2 = arith.constant 0 : i32
    return %c0_i32, %c0_i32_0, %c0_i32_1 : i32, i32, i32
  }
  func.func @transform_2(%arg0: i32) -> (i32, i32) {
    %c0_i32 = arith.constant 0 : i32
    %c0_i32_0 = arith.constant 0 : i32
    %c0_i32_1 = arith.constant 0 : i32
    return %c0_i32, %c0_i32_0 : i32, i32
  }
  func.func @transform_3(%arg0: i32) -> (i32, i32, i32) {
    %c0_i32 = arith.constant 0 : i32
    %c0_i32_0 = arith.constant 0 : i32
    %c0_i32_1 = arith.constant 0 : i32
    return %arg0, %c0_i32, %c0_i32_0 : i32, i32, i32
  }
}

module attributes {stable_mosaic.version = 11 : i64} {
  func.func @_conv3x3_kernel(%arg0: i32, %arg1: memref<1x18x96xf32, #tpu.memory_space<vmem>>, %arg2: memref<3x288x96xbf16, #tpu.memory_space<vmem>>, %arg3: memref<1x96xf32, #tpu.memory_space<vmem>>, %arg4: memref<1x8x96xf32, #tpu.memory_space<vmem>>) attributes {dimension_semantics = [#tpu.dimension_semantics<parallel>], iteration_bounds = array<i64: 2>, scalar_prefetch = 0 : i64, scratch_operands = 0 : i64, tpu.core_type = #tpu.core_type<tc>, window_params = [{transform_indices = @transform_0, window_bounds = array<i64: 1, 18, 96>}, {pipeline_mode = #tpu.pipeline_mode<synchronous>, transform_indices = @transform_1, window_bounds = array<i64: 3, 288, 96>}, {pipeline_mode = #tpu.pipeline_mode<synchronous>, transform_indices = @transform_2, window_bounds = array<i64: 1, 96>}, {transform_indices = @transform_3, window_bounds = array<i64: 1, 8, 96>}]} {
    %cst = arith.constant 0.000000e+00 : f32
    %0 = vector.broadcast %cst : f32 to vector<8x96xf32>
    %c0 = arith.constant 0 : index
    %c0_0 = arith.constant 0 : index
    %c0_1 = arith.constant 0 : index
    %1 = vector.load %arg1[%c0, %c0_0, %c0_1] : memref<1x18x96xf32, #tpu.memory_space<vmem>>, vector<1x8x96xf32>
    %2 = vector.shape_cast %1 : vector<1x8x96xf32> to vector<8x96xf32>
    %3 = arith.truncf %2 : vector<8x96xf32> to vector<8x96xbf16>
    %c0_2 = arith.constant 0 : index
    %c1 = arith.constant 1 : index
    %c0_3 = arith.constant 0 : index
    %4 = vector.load %arg1[%c0_2, %c1, %c0_3] : memref<1x18x96xf32, #tpu.memory_space<vmem>>, vector<1x8x96xf32>
    %5 = vector.shape_cast %4 : vector<1x8x96xf32> to vector<8x96xf32>
    %6 = arith.truncf %5 : vector<8x96xf32> to vector<8x96xbf16>
    %c0_4 = arith.constant 0 : index
    %c2 = arith.constant 2 : index
    %c0_5 = arith.constant 0 : index
    %7 = vector.load %arg1[%c0_4, %c2, %c0_5] : memref<1x18x96xf32, #tpu.memory_space<vmem>>, vector<1x8x96xf32>
    %8 = vector.shape_cast %7 : vector<1x8x96xf32> to vector<8x96xf32>
    %9 = arith.truncf %8 : vector<8x96xf32> to vector<8x96xbf16>
    %10 = tpu.concatenate %3, %6, %9 in 1 : vector<8x96xbf16>, vector<8x96xbf16>, vector<8x96xbf16> -> vector<8x288xbf16>
    %c0_6 = arith.constant 0 : index
    %c0_7 = arith.constant 0 : index
    %c0_8 = arith.constant 0 : index
    %11 = vector.load %arg2[%c0_6, %c0_7, %c0_8] : memref<3x288x96xbf16, #tpu.memory_space<vmem>>, vector<1x288x96xbf16>
    %12 = vector.shape_cast %11 : vector<1x288x96xbf16> to vector<288x96xbf16>
    %cst_9 = arith.constant dense<0.000000e+00> : vector<8x96xf32>
    %13 = tpu.matmul %10, %12, %cst_9 {dimension_numbers = #tpu.dot_dimension_numbers<[1], [0], [0], [1], [0, 0, 1, 1], [], []>} : vector<8x288xbf16>, vector<288x96xbf16>, vector<8x96xf32> -> vector<8x96xf32>
    %14 = arith.addf %0, %13 : vector<8x96xf32>
    %c0_10 = arith.constant 0 : index
    %c4 = arith.constant 4 : index
    %c0_11 = arith.constant 0 : index
    %15 = vector.load %arg1[%c0_10, %c4, %c0_11] : memref<1x18x96xf32, #tpu.memory_space<vmem>>, vector<1x8x96xf32>
    %16 = vector.shape_cast %15 : vector<1x8x96xf32> to vector<8x96xf32>
    %17 = arith.truncf %16 : vector<8x96xf32> to vector<8x96xbf16>
    %c0_12 = arith.constant 0 : index
    %c5 = arith.constant 5 : index
    %c0_13 = arith.constant 0 : index
    %18 = vector.load %arg1[%c0_12, %c5, %c0_13] : memref<1x18x96xf32, #tpu.memory_space<vmem>>, vector<1x8x96xf32>
    %19 = vector.shape_cast %18 : vector<1x8x96xf32> to vector<8x96xf32>
    %20 = arith.truncf %19 : vector<8x96xf32> to vector<8x96xbf16>
    %c0_14 = arith.constant 0 : index
    %c6 = arith.constant 6 : index
    %c0_15 = arith.constant 0 : index
    %21 = vector.load %arg1[%c0_14, %c6, %c0_15] : memref<1x18x96xf32, #tpu.memory_space<vmem>>, vector<1x8x96xf32>
    %22 = vector.shape_cast %21 : vector<1x8x96xf32> to vector<8x96xf32>
    %23 = arith.truncf %22 : vector<8x96xf32> to vector<8x96xbf16>
    %24 = tpu.concatenate %17, %20, %23 in 1 : vector<8x96xbf16>, vector<8x96xbf16>, vector<8x96xbf16> -> vector<8x288xbf16>
    %c1_16 = arith.constant 1 : index
    %c0_17 = arith.constant 0 : index
    %c0_18 = arith.constant 0 : index
    %25 = vector.load %arg2[%c1_16, %c0_17, %c0_18] : memref<3x288x96xbf16, #tpu.memory_space<vmem>>, vector<1x288x96xbf16>
    %26 = vector.shape_cast %25 : vector<1x288x96xbf16> to vector<288x96xbf16>
    %cst_19 = arith.constant dense<0.000000e+00> : vector<8x96xf32>
    %27 = tpu.matmul %24, %26, %cst_19 {dimension_numbers = #tpu.dot_dimension_numbers<[1], [0], [0], [1], [0, 0, 1, 1], [], []>} : vector<8x288xbf16>, vector<288x96xbf16>, vector<8x96xf32> -> vector<8x96xf32>
    %28 = arith.addf %14, %27 : vector<8x96xf32>
    %c0_20 = arith.constant 0 : index
    %c8 = arith.constant 8 : index
    %c0_21 = arith.constant 0 : index
    %29 = vector.load %arg1[%c0_20, %c8, %c0_21] : memref<1x18x96xf32, #tpu.memory_space<vmem>>, vector<1x8x96xf32>
    %30 = vector.shape_cast %29 : vector<1x8x96xf32> to vector<8x96xf32>
    %31 = arith.truncf %30 : vector<8x96xf32> to vector<8x96xbf16>
    %c0_22 = arith.constant 0 : index
    %c9 = arith.constant 9 : index
    %c0_23 = arith.constant 0 : index
    %32 = vector.load %arg1[%c0_22, %c9, %c0_23] : memref<1x18x96xf32, #tpu.memory_space<vmem>>, vector<1x8x96xf32>
    %33 = vector.shape_cast %32 : vector<1x8x96xf32> to vector<8x96xf32>
    %34 = arith.truncf %33 : vector<8x96xf32> to vector<8x96xbf16>
    %c0_24 = arith.constant 0 : index
    %c10 = arith.constant 10 : index
    %c0_25 = arith.constant 0 : index
    %35 = vector.load %arg1[%c0_24, %c10, %c0_25] : memref<1x18x96xf32, #tpu.memory_space<vmem>>, vector<1x8x96xf32>
    %36 = vector.shape_cast %35 : vector<1x8x96xf32> to vector<8x96xf32>
    %37 = arith.truncf %36 : vector<8x96xf32> to vector<8x96xbf16>
    %38 = tpu.concatenate %31, %34, %37 in 1 : vector<8x96xbf16>, vector<8x96xbf16>, vector<8x96xbf16> -> vector<8x288xbf16>
    %c2_26 = arith.constant 2 : index
    %c0_27 = arith.constant 0 : index
    %c0_28 = arith.constant 0 : index
    %39 = vector.load %arg2[%c2_26, %c0_27, %c0_28] : memref<3x288x96xbf16, #tpu.memory_space<vmem>>, vector<1x288x96xbf16>
    %40 = vector.shape_cast %39 : vector<1x288x96xbf16> to vector<288x96xbf16>
    %cst_29 = arith.constant dense<0.000000e+00> : vector<8x96xf32>
    %41 = tpu.matmul %38, %40, %cst_29 {dimension_numbers = #tpu.dot_dimension_numbers<[1], [0], [0], [1], [0, 0, 1, 1], [], []>} : vector<8x288xbf16>, vector<288x96xbf16>, vector<8x96xf32> -> vector<8x96xf32>
    %42 = arith.addf %28, %41 : vector<8x96xf32>
    %c0_30 = arith.constant 0 : index
    %c0_31 = arith.constant 0 : index
    %43 = vector.load %arg3[%c0_30, %c0_31] : memref<1x96xf32, #tpu.memory_space<vmem>>, vector<1x96xf32>
    %44 = vector.broadcast %43 : vector<1x96xf32> to vector<8x96xf32>
    %45 = arith.addf %42, %44 : vector<8x96xf32>
    %cst_32 = arith.constant 0.000000e+00 : f32
    %46 = vector.broadcast %cst_32 : f32 to vector<8x96xf32>
    %47 = arith.maximumf %45, %46 : vector<8x96xf32>
    %c0_33 = arith.constant 0 : index
    %c0_34 = arith.constant 0 : index
    %c0_35 = arith.constant 0 : index
    %48 = vector.load %arg4[%c0_33, %c0_34, %c0_35] : memref<1x8x96xf32, #tpu.memory_space<vmem>>, vector<1x8x96xf32>
    %49 = vector.shape_cast %48 : vector<1x8x96xf32> to vector<8x96xf32>
    %50 = vector.shape_cast %47 : vector<8x96xf32> to vector<1x8x96xf32>
    tpu.vector_store %arg4[%c0_33, %c0_34, %c0_35], %50 {strides = array<i32>} : memref<1x8x96xf32, #tpu.memory_space<vmem>>, vector<1x8x96xf32>,
    return
  }
  func.func @transform_0(%arg0: i32) -> (i32, i32, i32) {
    %c0_i32 = arith.constant 0 : i32
    %c0_i32_0 = arith.constant 0 : i32
    %c0_i32_1 = arith.constant 0 : i32
    return %arg0, %c0_i32, %c0_i32_0 : i32, i32, i32
  }
  func.func @transform_1(%arg0: i32) -> (i32, i32, i32) {
    %c0_i32 = arith.constant 0 : i32
    %c0_i32_0 = arith.constant 0 : i32
    %c0_i32_1 = arith.constant 0 : i32
    %c0_i32_2 = arith.constant 0 : i32
    return %c0_i32, %c0_i32_0, %c0_i32_1 : i32, i32, i32
  }
  func.func @transform_2(%arg0: i32) -> (i32, i32) {
    %c0_i32 = arith.constant 0 : i32
    %c0_i32_0 = arith.constant 0 : i32
    %c0_i32_1 = arith.constant 0 : i32
    return %c0_i32, %c0_i32_0 : i32, i32
  }
  func.func @transform_3(%arg0: i32) -> (i32, i32, i32) {
    %c0_i32 = arith.constant 0 : i32
    %c0_i32_0 = arith.constant 0 : i32
    %c0_i32_1 = arith.constant 0 : i32
    return %arg0, %c0_i32, %c0_i32_0 : i32, i32, i32
  }
}

module attributes {stable_mosaic.version = 11 : i64} {
  func.func @_conv3x3_kernel(%arg0: i32, %arg1: memref<1x38x96xf32, #tpu.memory_space<vmem>>, %arg2: memref<3x288x64xbf16, #tpu.memory_space<vmem>>, %arg3: memref<1x64xf32, #tpu.memory_space<vmem>>, %arg4: memref<1x24x64xf32, #tpu.memory_space<vmem>>) attributes {dimension_semantics = [#tpu.dimension_semantics<parallel>], iteration_bounds = array<i64: 2>, scalar_prefetch = 0 : i64, scratch_operands = 0 : i64, tpu.core_type = #tpu.core_type<tc>, window_params = [{transform_indices = @transform_0, window_bounds = array<i64: 1, 38, 96>}, {pipeline_mode = #tpu.pipeline_mode<synchronous>, transform_indices = @transform_1, window_bounds = array<i64: 3, 288, 64>}, {pipeline_mode = #tpu.pipeline_mode<synchronous>, transform_indices = @transform_2, window_bounds = array<i64: 1, 64>}, {transform_indices = @transform_3, window_bounds = array<i64: 1, 24, 64>}]} {
    %cst = arith.constant 0.000000e+00 : f32
    %0 = vector.broadcast %cst : f32 to vector<24x64xf32>
    %c0 = arith.constant 0 : index
    %c0_0 = arith.constant 0 : index
    %c0_1 = arith.constant 0 : index
    %1 = vector.load %arg1[%c0, %c0_0, %c0_1] : memref<1x38x96xf32, #tpu.memory_space<vmem>>, vector<1x24x96xf32>
    %2 = vector.shape_cast %1 : vector<1x24x96xf32> to vector<24x96xf32>
    %3 = arith.truncf %2 : vector<24x96xf32> to vector<24x96xbf16>
    %c0_2 = arith.constant 0 : index
    %c1 = arith.constant 1 : index
    %c0_3 = arith.constant 0 : index
    %4 = vector.load %arg1[%c0_2, %c1, %c0_3] : memref<1x38x96xf32, #tpu.memory_space<vmem>>, vector<1x24x96xf32>
    %5 = vector.shape_cast %4 : vector<1x24x96xf32> to vector<24x96xf32>
    %6 = arith.truncf %5 : vector<24x96xf32> to vector<24x96xbf16>
    %c0_4 = arith.constant 0 : index
    %c2 = arith.constant 2 : index
    %c0_5 = arith.constant 0 : index
    %7 = vector.load %arg1[%c0_4, %c2, %c0_5] : memref<1x38x96xf32, #tpu.memory_space<vmem>>, vector<1x24x96xf32>
    %8 = vector.shape_cast %7 : vector<1x24x96xf32> to vector<24x96xf32>
    %9 = arith.truncf %8 : vector<24x96xf32> to vector<24x96xbf16>
    %10 = tpu.concatenate %3, %6, %9 in 1 : vector<24x96xbf16>, vector<24x96xbf16>, vector<24x96xbf16> -> vector<24x288xbf16>
    %c0_6 = arith.constant 0 : index
    %c0_7 = arith.constant 0 : index
    %c0_8 = arith.constant 0 : index
    %11 = vector.load %arg2[%c0_6, %c0_7, %c0_8] : memref<3x288x64xbf16, #tpu.memory_space<vmem>>, vector<1x288x64xbf16>
    %12 = vector.shape_cast %11 : vector<1x288x64xbf16> to vector<288x64xbf16>
    %cst_9 = arith.constant dense<0.000000e+00> : vector<24x64xf32>
    %13 = tpu.matmul %10, %12, %cst_9 {dimension_numbers = #tpu.dot_dimension_numbers<[1], [0], [0], [1], [0, 0, 1, 1], [], []>} : vector<24x288xbf16>, vector<288x64xbf16>, vector<24x64xf32> -> vector<24x64xf32>
    %14 = arith.addf %0, %13 : vector<24x64xf32>
    %c0_10 = arith.constant 0 : index
    %c6 = arith.constant 6 : index
    %c0_11 = arith.constant 0 : index
    %15 = vector.load %arg1[%c0_10, %c6, %c0_11] : memref<1x38x96xf32, #tpu.memory_space<vmem>>, vector<1x24x96xf32>
    %16 = vector.shape_cast %15 : vector<1x24x96xf32> to vector<24x96xf32>
    %17 = arith.truncf %16 : vector<24x96xf32> to vector<24x96xbf16>
    %c0_12 = arith.constant 0 : index
    %c7 = arith.constant 7 : index
    %c0_13 = arith.constant 0 : index
    %18 = vector.load %arg1[%c0_12, %c7, %c0_13] : memref<1x38x96xf32, #tpu.memory_space<vmem>>, vector<1x24x96xf32>
    %19 = vector.shape_cast %18 : vector<1x24x96xf32> to vector<24x96xf32>
    %20 = arith.truncf %19 : vector<24x96xf32> to vector<24x96xbf16>
    %c0_14 = arith.constant 0 : index
    %c8 = arith.constant 8 : index
    %c0_15 = arith.constant 0 : index
    %21 = vector.load %arg1[%c0_14, %c8, %c0_15] : memref<1x38x96xf32, #tpu.memory_space<vmem>>, vector<1x24x96xf32>
    %22 = vector.shape_cast %21 : vector<1x24x96xf32> to vector<24x96xf32>
    %23 = arith.truncf %22 : vector<24x96xf32> to vector<24x96xbf16>
    %24 = tpu.concatenate %17, %20, %23 in 1 : vector<24x96xbf16>, vector<24x96xbf16>, vector<24x96xbf16> -> vector<24x288xbf16>
    %c1_16 = arith.constant 1 : index
    %c0_17 = arith.constant 0 : index
    %c0_18 = arith.constant 0 : index
    %25 = vector.load %arg2[%c1_16, %c0_17, %c0_18] : memref<3x288x64xbf16, #tpu.memory_space<vmem>>, vector<1x288x64xbf16>
    %26 = vector.shape_cast %25 : vector<1x288x64xbf16> to vector<288x64xbf16>
    %cst_19 = arith.constant dense<0.000000e+00> : vector<24x64xf32>
    %27 = tpu.matmul %24, %26, %cst_19 {dimension_numbers = #tpu.dot_dimension_numbers<[1], [0], [0], [1], [0, 0, 1, 1], [], []>} : vector<24x288xbf16>, vector<288x64xbf16>, vector<24x64xf32> -> vector<24x64xf32>
    %28 = arith.addf %14, %27 : vector<24x64xf32>
    %c0_20 = arith.constant 0 : index
    %c12 = arith.constant 12 : index
    %c0_21 = arith.constant 0 : index
    %29 = vector.load %arg1[%c0_20, %c12, %c0_21] : memref<1x38x96xf32, #tpu.memory_space<vmem>>, vector<1x24x96xf32>
    %30 = vector.shape_cast %29 : vector<1x24x96xf32> to vector<24x96xf32>
    %31 = arith.truncf %30 : vector<24x96xf32> to vector<24x96xbf16>
    %c0_22 = arith.constant 0 : index
    %c13 = arith.constant 13 : index
    %c0_23 = arith.constant 0 : index
    %32 = vector.load %arg1[%c0_22, %c13, %c0_23] : memref<1x38x96xf32, #tpu.memory_space<vmem>>, vector<1x24x96xf32>
    %33 = vector.shape_cast %32 : vector<1x24x96xf32> to vector<24x96xf32>
    %34 = arith.truncf %33 : vector<24x96xf32> to vector<24x96xbf16>
    %c0_24 = arith.constant 0 : index
    %c14 = arith.constant 14 : index
    %c0_25 = arith.constant 0 : index
    %35 = vector.load %arg1[%c0_24, %c14, %c0_25] : memref<1x38x96xf32, #tpu.memory_space<vmem>>, vector<1x24x96xf32>
    %36 = vector.shape_cast %35 : vector<1x24x96xf32> to vector<24x96xf32>
    %37 = arith.truncf %36 : vector<24x96xf32> to vector<24x96xbf16>
    %38 = tpu.concatenate %31, %34, %37 in 1 : vector<24x96xbf16>, vector<24x96xbf16>, vector<24x96xbf16> -> vector<24x288xbf16>
    %c2_26 = arith.constant 2 : index
    %c0_27 = arith.constant 0 : index
    %c0_28 = arith.constant 0 : index
    %39 = vector.load %arg2[%c2_26, %c0_27, %c0_28] : memref<3x288x64xbf16, #tpu.memory_space<vmem>>, vector<1x288x64xbf16>
    %40 = vector.shape_cast %39 : vector<1x288x64xbf16> to vector<288x64xbf16>
    %cst_29 = arith.constant dense<0.000000e+00> : vector<24x64xf32>
    %41 = tpu.matmul %38, %40, %cst_29 {dimension_numbers = #tpu.dot_dimension_numbers<[1], [0], [0], [1], [0, 0, 1, 1], [], []>} : vector<24x288xbf16>, vector<288x64xbf16>, vector<24x64xf32> -> vector<24x64xf32>
    %42 = arith.addf %28, %41 : vector<24x64xf32>
    %c0_30 = arith.constant 0 : index
    %c0_31 = arith.constant 0 : index
    %43 = vector.load %arg3[%c0_30, %c0_31] : memref<1x64xf32, #tpu.memory_space<vmem>>, vector<1x64xf32>
    %44 = vector.broadcast %43 : vector<1x64xf32> to vector<24x64xf32>
    %45 = arith.addf %42, %44 : vector<24x64xf32>
    %cst_32 = arith.constant 0.000000e+00 : f32
    %46 = vector.broadcast %cst_32 : f32 to vector<24x64xf32>
    %47 = arith.maximumf %45, %46 : vector<24x64xf32>
    %c0_33 = arith.constant 0 : index
    %c0_34 = arith.constant 0 : index
    %c0_35 = arith.constant 0 : index
    %48 = vector.load %arg4[%c0_33, %c0_34, %c0_35] : memref<1x24x64xf32, #tpu.memory_space<vmem>>, vector<1x24x64xf32>
    %49 = vector.shape_cast %48 : vector<1x24x64xf32> to vector<24x64xf32>
    %50 = vector.shape_cast %47 : vector<24x64xf32> to vector<1x24x64xf32>
    tpu.vector_store %arg4[%c0_33, %c0_34, %c0_35], %50 {strides = array<i32>} : memref<1x24x64xf32, #tpu.memory_space<vmem>>, vector<1x24x64xf32>,
    return
  }
  func.func @transform_0(%arg0: i32) -> (i32, i32, i32) {
    %c0_i32 = arith.constant 0 : i32
    %c0_i32_0 = arith.constant 0 : i32
    %c0_i32_1 = arith.constant 0 : i32
    return %arg0, %c0_i32, %c0_i32_0 : i32, i32, i32
  }
  func.func @transform_1(%arg0: i32) -> (i32, i32, i32) {
    %c0_i32 = arith.constant 0 : i32
    %c0_i32_0 = arith.constant 0 : i32
    %c0_i32_1 = arith.constant 0 : i32
    %c0_i32_2 = arith.constant 0 : i32
    return %c0_i32, %c0_i32_0, %c0_i32_1 : i32, i32, i32
  }
  func.func @transform_2(%arg0: i32) -> (i32, i32) {
    %c0_i32 = arith.constant 0 : i32
    %c0_i32_0 = arith.constant 0 : i32
    %c0_i32_1 = arith.constant 0 : i32
    return %c0_i32, %c0_i32_0 : i32, i32
  }
  func.func @transform_3(%arg0: i32) -> (i32, i32, i32) {
    %c0_i32 = arith.constant 0 : i32
    %c0_i32_0 = arith.constant 0 : i32
    %c0_i32_1 = arith.constant 0 : i32
    return %arg0, %c0_i32, %c0_i32_0 : i32, i32, i32
  }
}

module attributes {stable_mosaic.version = 11 : i64} {
  func.func @_conv3x3_kernel(%arg0: i32, %arg1: memref<1x102x128xf32, #tpu.memory_space<vmem>>, %arg2: memref<3x384x32xbf16, #tpu.memory_space<vmem>>, %arg3: memref<1x32xf32, #tpu.memory_space<vmem>>, %arg4: memref<1x80x32xf32, #tpu.memory_space<vmem>>) attributes {dimension_semantics = [#tpu.dimension_semantics<parallel>], iteration_bounds = array<i64: 2>, scalar_prefetch = 0 : i64, scratch_operands = 0 : i64, tpu.core_type = #tpu.core_type<tc>, window_params = [{transform_indices = @transform_0, window_bounds = array<i64: 1, 102, 128>}, {pipeline_mode = #tpu.pipeline_mode<synchronous>, transform_indices = @transform_1, window_bounds = array<i64: 3, 384, 32>}, {pipeline_mode = #tpu.pipeline_mode<synchronous>, transform_indices = @transform_2, window_bounds = array<i64: 1, 32>}, {transform_indices = @transform_3, window_bounds = array<i64: 1, 80, 32>}]} {
    %cst = arith.constant 0.000000e+00 : f32
    %0 = vector.broadcast %cst : f32 to vector<80x32xf32>
    %c0 = arith.constant 0 : index
    %c0_0 = arith.constant 0 : index
    %c0_1 = arith.constant 0 : index
    %1 = vector.load %arg1[%c0, %c0_0, %c0_1] : memref<1x102x128xf32, #tpu.memory_space<vmem>>, vector<1x80x128xf32>
    %2 = vector.shape_cast %1 : vector<1x80x128xf32> to vector<80x128xf32>
    %3 = arith.truncf %2 : vector<80x128xf32> to vector<80x128xbf16>
    %c0_2 = arith.constant 0 : index
    %c1 = arith.constant 1 : index
    %c0_3 = arith.constant 0 : index
    %4 = vector.load %arg1[%c0_2, %c1, %c0_3] : memref<1x102x128xf32, #tpu.memory_space<vmem>>, vector<1x80x128xf32>
    %5 = vector.shape_cast %4 : vector<1x80x128xf32> to vector<80x128xf32>
    %6 = arith.truncf %5 : vector<80x128xf32> to vector<80x128xbf16>
    %c0_4 = arith.constant 0 : index
    %c2 = arith.constant 2 : index
    %c0_5 = arith.constant 0 : index
    %7 = vector.load %arg1[%c0_4, %c2, %c0_5] : memref<1x102x128xf32, #tpu.memory_space<vmem>>, vector<1x80x128xf32>
    %8 = vector.shape_cast %7 : vector<1x80x128xf32> to vector<80x128xf32>
    %9 = arith.truncf %8 : vector<80x128xf32> to vector<80x128xbf16>
    %10 = tpu.concatenate %3, %6, %9 in 1 : vector<80x128xbf16>, vector<80x128xbf16>, vector<80x128xbf16> -> vector<80x384xbf16>
    %c0_6 = arith.constant 0 : index
    %c0_7 = arith.constant 0 : index
    %c0_8 = arith.constant 0 : index
    %11 = vector.load %arg2[%c0_6, %c0_7, %c0_8] : memref<3x384x32xbf16, #tpu.memory_space<vmem>>, vector<1x384x32xbf16>
    %12 = vector.shape_cast %11 : vector<1x384x32xbf16> to vector<384x32xbf16>
    %cst_9 = arith.constant dense<0.000000e+00> : vector<80x32xf32>
    %13 = tpu.matmul %10, %12, %cst_9 {dimension_numbers = #tpu.dot_dimension_numbers<[1], [0], [0], [1], [0, 0, 1, 1], [], []>} : vector<80x384xbf16>, vector<384x32xbf16>, vector<80x32xf32> -> vector<80x32xf32>
    %14 = arith.addf %0, %13 : vector<80x32xf32>
    %c0_10 = arith.constant 0 : index
    %c10 = arith.constant 10 : index
    %c0_11 = arith.constant 0 : index
    %15 = vector.load %arg1[%c0_10, %c10, %c0_11] : memref<1x102x128xf32, #tpu.memory_space<vmem>>, vector<1x80x128xf32>
    %16 = vector.shape_cast %15 : vector<1x80x128xf32> to vector<80x128xf32>
    %17 = arith.truncf %16 : vector<80x128xf32> to vector<80x128xbf16>
    %c0_12 = arith.constant 0 : index
    %c11 = arith.constant 11 : index
    %c0_13 = arith.constant 0 : index
    %18 = vector.load %arg1[%c0_12, %c11, %c0_13] : memref<1x102x128xf32, #tpu.memory_space<vmem>>, vector<1x80x128xf32>
    %19 = vector.shape_cast %18 : vector<1x80x128xf32> to vector<80x128xf32>
    %20 = arith.truncf %19 : vector<80x128xf32> to vector<80x128xbf16>
    %c0_14 = arith.constant 0 : index
    %c12 = arith.constant 12 : index
    %c0_15 = arith.constant 0 : index
    %21 = vector.load %arg1[%c0_14, %c12, %c0_15] : memref<1x102x128xf32, #tpu.memory_space<vmem>>, vector<1x80x128xf32>
    %22 = vector.shape_cast %21 : vector<1x80x128xf32> to vector<80x128xf32>
    %23 = arith.truncf %22 : vector<80x128xf32> to vector<80x128xbf16>
    %24 = tpu.concatenate %17, %20, %23 in 1 : vector<80x128xbf16>, vector<80x128xbf16>, vector<80x128xbf16> -> vector<80x384xbf16>
    %c1_16 = arith.constant 1 : index
    %c0_17 = arith.constant 0 : index
    %c0_18 = arith.constant 0 : index
    %25 = vector.load %arg2[%c1_16, %c0_17, %c0_18] : memref<3x384x32xbf16, #tpu.memory_space<vmem>>, vector<1x384x32xbf16>
    %26 = vector.shape_cast %25 : vector<1x384x32xbf16> to vector<384x32xbf16>
    %cst_19 = arith.constant dense<0.000000e+00> : vector<80x32xf32>
    %27 = tpu.matmul %24, %26, %cst_19 {dimension_numbers = #tpu.dot_dimension_numbers<[1], [0], [0], [1], [0, 0, 1, 1], [], []>} : vector<80x384xbf16>, vector<384x32xbf16>, vector<80x32xf32> -> vector<80x32xf32>
    %28 = arith.addf %14, %27 : vector<80x32xf32>
    %c0_20 = arith.constant 0 : index
    %c20 = arith.constant 20 : index
    %c0_21 = arith.constant 0 : index
    %29 = vector.load %arg1[%c0_20, %c20, %c0_21] : memref<1x102x128xf32, #tpu.memory_space<vmem>>, vector<1x80x128xf32>
    %30 = vector.shape_cast %29 : vector<1x80x128xf32> to vector<80x128xf32>
    %31 = arith.truncf %30 : vector<80x128xf32> to vector<80x128xbf16>
    %c0_22 = arith.constant 0 : index
    %c21 = arith.constant 21 : index
    %c0_23 = arith.constant 0 : index
    %32 = vector.load %arg1[%c0_22, %c21, %c0_23] : memref<1x102x128xf32, #tpu.memory_space<vmem>>, vector<1x80x128xf32>
    %33 = vector.shape_cast %32 : vector<1x80x128xf32> to vector<80x128xf32>
    %34 = arith.truncf %33 : vector<80x128xf32> to vector<80x128xbf16>
    %c0_24 = arith.constant 0 : index
    %c22 = arith.constant 22 : index
    %c0_25 = arith.constant 0 : index
    %35 = vector.load %arg1[%c0_24, %c22, %c0_25] : memref<1x102x128xf32, #tpu.memory_space<vmem>>, vector<1x80x128xf32>
    %36 = vector.shape_cast %35 : vector<1x80x128xf32> to vector<80x128xf32>
    %37 = arith.truncf %36 : vector<80x128xf32> to vector<80x128xbf16>
    %38 = tpu.concatenate %31, %34, %37 in 1 : vector<80x128xbf16>, vector<80x128xbf16>, vector<80x128xbf16> -> vector<80x384xbf16>
    %c2_26 = arith.constant 2 : index
    %c0_27 = arith.constant 0 : index
    %c0_28 = arith.constant 0 : index
    %39 = vector.load %arg2[%c2_26, %c0_27, %c0_28] : memref<3x384x32xbf16, #tpu.memory_space<vmem>>, vector<1x384x32xbf16>
    %40 = vector.shape_cast %39 : vector<1x384x32xbf16> to vector<384x32xbf16>
    %cst_29 = arith.constant dense<0.000000e+00> : vector<80x32xf32>
    %41 = tpu.matmul %38, %40, %cst_29 {dimension_numbers = #tpu.dot_dimension_numbers<[1], [0], [0], [1], [0, 0, 1, 1], [], []>} : vector<80x384xbf16>, vector<384x32xbf16>, vector<80x32xf32> -> vector<80x32xf32>
    %42 = arith.addf %28, %41 : vector<80x32xf32>
    %c0_30 = arith.constant 0 : index
    %c0_31 = arith.constant 0 : index
    %43 = vector.load %arg3[%c0_30, %c0_31] : memref<1x32xf32, #tpu.memory_space<vmem>>, vector<1x32xf32>
    %44 = vector.broadcast %43 : vector<1x32xf32> to vector<80x32xf32>
    %45 = arith.addf %42, %44 : vector<80x32xf32>
    %cst_32 = arith.constant 0.000000e+00 : f32
    %46 = vector.broadcast %cst_32 : f32 to vector<80x32xf32>
    %47 = arith.maximumf %45, %46 : vector<80x32xf32>
    %c0_33 = arith.constant 0 : index
    %c0_34 = arith.constant 0 : index
    %c0_35 = arith.constant 0 : index
    %48 = vector.load %arg4[%c0_33, %c0_34, %c0_35] : memref<1x80x32xf32, #tpu.memory_space<vmem>>, vector<1x80x32xf32>
    %49 = vector.shape_cast %48 : vector<1x80x32xf32> to vector<80x32xf32>
    %50 = vector.shape_cast %47 : vector<80x32xf32> to vector<1x80x32xf32>
    tpu.vector_store %arg4[%c0_33, %c0_34, %c0_35], %50 {strides = array<i32>} : memref<1x80x32xf32, #tpu.memory_space<vmem>>, vector<1x80x32xf32>,
    return
  }
  func.func @transform_0(%arg0: i32) -> (i32, i32, i32) {
    %c0_i32 = arith.constant 0 : i32
    %c0_i32_0 = arith.constant 0 : i32
    %c0_i32_1 = arith.constant 0 : i32
    return %arg0, %c0_i32, %c0_i32_0 : i32, i32, i32
  }
  func.func @transform_1(%arg0: i32) -> (i32, i32, i32) {
    %c0_i32 = arith.constant 0 : i32
    %c0_i32_0 = arith.constant 0 : i32
    %c0_i32_1 = arith.constant 0 : i32
    %c0_i32_2 = arith.constant 0 : i32
    return %c0_i32, %c0_i32_0, %c0_i32_1 : i32, i32, i32
  }
  func.func @transform_2(%arg0: i32) -> (i32, i32) {
    %c0_i32 = arith.constant 0 : i32
    %c0_i32_0 = arith.constant 0 : i32
    %c0_i32_1 = arith.constant 0 : i32
    return %c0_i32, %c0_i32_0 : i32, i32
  }
  func.func @transform_3(%arg0: i32) -> (i32, i32, i32) {
    %c0_i32 = arith.constant 0 : i32
    %c0_i32_0 = arith.constant 0 : i32
    %c0_i32_1 = arith.constant 0 : i32
    return %arg0, %c0_i32, %c0_i32_0 : i32, i32, i32
  }
}

module attributes {stable_mosaic.version = 11 : i64} {
  func.func @_conv3x3_kernel(%arg0: i32, %arg1: memref<1x326x64xf32, #tpu.memory_space<vmem>>, %arg2: memref<3x192x6xbf16, #tpu.memory_space<vmem>>, %arg3: memref<1x6xf32, #tpu.memory_space<vmem>>, %arg4: memref<1x288x6xf32, #tpu.memory_space<vmem>>) attributes {dimension_semantics = [#tpu.dimension_semantics<parallel>], iteration_bounds = array<i64: 2>, scalar_prefetch = 0 : i64, scratch_operands = 0 : i64, tpu.core_type = #tpu.core_type<tc>, window_params = [{transform_indices = @transform_0, window_bounds = array<i64: 1, 326, 64>}, {pipeline_mode = #tpu.pipeline_mode<synchronous>, transform_indices = @transform_1, window_bounds = array<i64: 3, 192, 6>}, {pipeline_mode = #tpu.pipeline_mode<synchronous>, transform_indices = @transform_2, window_bounds = array<i64: 1, 6>}, {transform_indices = @transform_3, window_bounds = array<i64: 1, 288, 6>}]} {
    %cst = arith.constant 0.000000e+00 : f32
    %0 = vector.broadcast %cst : f32 to vector<288x6xf32>
    %c0 = arith.constant 0 : index
    %c0_0 = arith.constant 0 : index
    %c0_1 = arith.constant 0 : index
    %1 = vector.load %arg1[%c0, %c0_0, %c0_1] : memref<1x326x64xf32, #tpu.memory_space<vmem>>, vector<1x288x64xf32>
    %2 = vector.shape_cast %1 : vector<1x288x64xf32> to vector<288x64xf32>
    %3 = arith.truncf %2 : vector<288x64xf32> to vector<288x64xbf16>
    %c0_2 = arith.constant 0 : index
    %c1 = arith.constant 1 : index
    %c0_3 = arith.constant 0 : index
    %4 = vector.load %arg1[%c0_2, %c1, %c0_3] : memref<1x326x64xf32, #tpu.memory_space<vmem>>, vector<1x288x64xf32>
    %5 = vector.shape_cast %4 : vector<1x288x64xf32> to vector<288x64xf32>
    %6 = arith.truncf %5 : vector<288x64xf32> to vector<288x64xbf16>
    %c0_4 = arith.constant 0 : index
    %c2 = arith.constant 2 : index
    %c0_5 = arith.constant 0 : index
    %7 = vector.load %arg1[%c0_4, %c2, %c0_5] : memref<1x326x64xf32, #tpu.memory_space<vmem>>, vector<1x288x64xf32>
    %8 = vector.shape_cast %7 : vector<1x288x64xf32> to vector<288x64xf32>
    %9 = arith.truncf %8 : vector<288x64xf32> to vector<288x64xbf16>
    %10 = tpu.concatenate %3, %6, %9 in 1 : vector<288x64xbf16>, vector<288x64xbf16>, vector<288x64xbf16> -> vector<288x192xbf16>
    %c0_6 = arith.constant 0 : index
    %c0_7 = arith.constant 0 : index
    %c0_8 = arith.constant 0 : index
    %11 = vector.load %arg2[%c0_6, %c0_7, %c0_8] : memref<3x192x6xbf16, #tpu.memory_space<vmem>>, vector<1x192x6xbf16>
    %12 = vector.shape_cast %11 : vector<1x192x6xbf16> to vector<192x6xbf16>
    %cst_9 = arith.constant dense<0.000000e+00> : vector<288x6xf32>
    %13 = tpu.matmul %10, %12, %cst_9 {dimension_numbers = #tpu.dot_dimension_numbers<[1], [0], [0], [1], [0, 0, 1, 1], [], []>} : vector<288x192xbf16>, vector<192x6xbf16>, vector<288x6xf32> -> vector<288x6xf32>
    %14 = arith.addf %0, %13 : vector<288x6xf32>
    %c0_10 = arith.constant 0 : index
    %c18 = arith.constant 18 : index
    %c0_11 = arith.constant 0 : index
    %15 = vector.load %arg1[%c0_10, %c18, %c0_11] : memref<1x326x64xf32, #tpu.memory_space<vmem>>, vector<1x288x64xf32>
    %16 = vector.shape_cast %15 : vector<1x288x64xf32> to vector<288x64xf32>
    %17 = arith.truncf %16 : vector<288x64xf32> to vector<288x64xbf16>
    %c0_12 = arith.constant 0 : index
    %c19 = arith.constant 19 : index
    %c0_13 = arith.constant 0 : index
    %18 = vector.load %arg1[%c0_12, %c19, %c0_13] : memref<1x326x64xf32, #tpu.memory_space<vmem>>, vector<1x288x64xf32>
    %19 = vector.shape_cast %18 : vector<1x288x64xf32> to vector<288x64xf32>
    %20 = arith.truncf %19 : vector<288x64xf32> to vector<288x64xbf16>
    %c0_14 = arith.constant 0 : index
    %c20 = arith.constant 20 : index
    %c0_15 = arith.constant 0 : index
    %21 = vector.load %arg1[%c0_14, %c20, %c0_15] : memref<1x326x64xf32, #tpu.memory_space<vmem>>, vector<1x288x64xf32>
    %22 = vector.shape_cast %21 : vector<1x288x64xf32> to vector<288x64xf32>
    %23 = arith.truncf %22 : vector<288x64xf32> to vector<288x64xbf16>
    %24 = tpu.concatenate %17, %20, %23 in 1 : vector<288x64xbf16>, vector<288x64xbf16>, vector<288x64xbf16> -> vector<288x192xbf16>
    %c1_16 = arith.constant 1 : index
    %c0_17 = arith.constant 0 : index
    %c0_18 = arith.constant 0 : index
    %25 = vector.load %arg2[%c1_16, %c0_17, %c0_18] : memref<3x192x6xbf16, #tpu.memory_space<vmem>>, vector<1x192x6xbf16>
    %26 = vector.shape_cast %25 : vector<1x192x6xbf16> to vector<192x6xbf16>
    %cst_19 = arith.constant dense<0.000000e+00> : vector<288x6xf32>
    %27 = tpu.matmul %24, %26, %cst_19 {dimension_numbers = #tpu.dot_dimension_numbers<[1], [0], [0], [1], [0, 0, 1, 1], [], []>} : vector<288x192xbf16>, vector<192x6xbf16>, vector<288x6xf32> -> vector<288x6xf32>
    %28 = arith.addf %14, %27 : vector<288x6xf32>
    %c0_20 = arith.constant 0 : index
    %c36 = arith.constant 36 : index
    %c0_21 = arith.constant 0 : index
    %29 = vector.load %arg1[%c0_20, %c36, %c0_21] : memref<1x326x64xf32, #tpu.memory_space<vmem>>, vector<1x288x64xf32>
    %30 = vector.shape_cast %29 : vector<1x288x64xf32> to vector<288x64xf32>
    %31 = arith.truncf %30 : vector<288x64xf32> to vector<288x64xbf16>
    %c0_22 = arith.constant 0 : index
    %c37 = arith.constant 37 : index
    %c0_23 = arith.constant 0 : index
    %32 = vector.load %arg1[%c0_22, %c37, %c0_23] : memref<1x326x64xf32, #tpu.memory_space<vmem>>, vector<1x288x64xf32>
    %33 = vector.shape_cast %32 : vector<1x288x64xf32> to vector<288x64xf32>
    %34 = arith.truncf %33 : vector<288x64xf32> to vector<288x64xbf16>
    %c0_24 = arith.constant 0 : index
    %c38 = arith.constant 38 : index
    %c0_25 = arith.constant 0 : index
    %35 = vector.load %arg1[%c0_24, %c38, %c0_25] : memref<1x326x64xf32, #tpu.memory_space<vmem>>, vector<1x288x64xf32>
    %36 = vector.shape_cast %35 : vector<1x288x64xf32> to vector<288x64xf32>
    %37 = arith.truncf %36 : vector<288x64xf32> to vector<288x64xbf16>
    %38 = tpu.concatenate %31, %34, %37 in 1 : vector<288x64xbf16>, vector<288x64xbf16>, vector<288x64xbf16> -> vector<288x192xbf16>
    %c2_26 = arith.constant 2 : index
    %c0_27 = arith.constant 0 : index
    %c0_28 = arith.constant 0 : index
    %39 = vector.load %arg2[%c2_26, %c0_27, %c0_28] : memref<3x192x6xbf16, #tpu.memory_space<vmem>>, vector<1x192x6xbf16>
    %40 = vector.shape_cast %39 : vector<1x192x6xbf16> to vector<192x6xbf16>
    %cst_29 = arith.constant dense<0.000000e+00> : vector<288x6xf32>
    %41 = tpu.matmul %38, %40, %cst_29 {dimension_numbers = #tpu.dot_dimension_numbers<[1], [0], [0], [1], [0, 0, 1, 1], [], []>} : vector<288x192xbf16>, vector<192x6xbf16>, vector<288x6xf32> -> vector<288x6xf32>
    %42 = arith.addf %28, %41 : vector<288x6xf32>
    %c0_30 = arith.constant 0 : index
    %c0_31 = arith.constant 0 : index
    %43 = vector.load %arg3[%c0_30, %c0_31] : memref<1x6xf32, #tpu.memory_space<vmem>>, vector<1x6xf32>
    %44 = vector.broadcast %43 : vector<1x6xf32> to vector<288x6xf32>
    %45 = arith.addf %42, %44 : vector<288x6xf32>
    %cst_32 = arith.constant 0.000000e+00 : f32
    %46 = vector.broadcast %cst_32 : f32 to vector<288x6xf32>
    %47 = arith.maximumf %45, %46 : vector<288x6xf32>
    %c0_33 = arith.constant 0 : index
    %c0_34 = arith.constant 0 : index
    %c0_35 = arith.constant 0 : index
    %48 = vector.load %arg4[%c0_33, %c0_34, %c0_35] : memref<1x288x6xf32, #tpu.memory_space<vmem>>, vector<1x288x6xf32>
    %49 = vector.shape_cast %48 : vector<1x288x6xf32> to vector<288x6xf32>
    %50 = vector.shape_cast %47 : vector<288x6xf32> to vector<1x288x6xf32>
    tpu.vector_store %arg4[%c0_33, %c0_34, %c0_35], %50 {strides = array<i32>} : memref<1x288x6xf32, #tpu.memory_space<vmem>>, vector<1x288x6xf32>,
    return
  }
  func.func @transform_0(%arg0: i32) -> (i32, i32, i32) {
    %c0_i32 = arith.constant 0 : i32
    %c0_i32_0 = arith.constant 0 : i32
    %c0_i32_1 = arith.constant 0 : i32
    return %arg0, %c0_i32, %c0_i32_0 : i32, i32, i32
  }
  func.func @transform_1(%arg0: i32) -> (i32, i32, i32) {
    %c0_i32 = arith.constant 0 : i32
    %c0_i32_0 = arith.constant 0 : i32
    %c0_i32_1 = arith.constant 0 : i32
    %c0_i32_2 = arith.constant 0 : i32
    return %c0_i32, %c0_i32_0, %c0_i32_1 : i32, i32, i32
  }
  func.func @transform_2(%arg0: i32) -> (i32, i32) {
    %c0_i32 = arith.constant 0 : i32
    %c0_i32_0 = arith.constant 0 : i32
    %c0_i32_1 = arith.constant 0 : i32
    return %c0_i32, %c0_i32_0 : i32, i32
  }
  func.func @transform_3(%arg0: i32) -> (i32, i32, i32) {
    %c0_i32 = arith.constant 0 : i32
    %c0_i32_0 = arith.constant 0 : i32
    %c0_i32_1 = arith.constant 0 : i32
    return %arg0, %c0_i32, %c0_i32_0 : i32, i32, i32
  }
}

module attributes {stable_mosaic.version = 11 : i64} {
  func.func @_conv3x3_kernel(%arg0: i32, %arg1: memref<1x326x6xf32, #tpu.memory_space<vmem>>, %arg2: memref<3x18x4xbf16, #tpu.memory_space<vmem>>, %arg3: memref<1x4xf32, #tpu.memory_space<vmem>>, %arg4: memref<1x288x4xf32, #tpu.memory_space<vmem>>) attributes {dimension_semantics = [#tpu.dimension_semantics<parallel>], iteration_bounds = array<i64: 2>, scalar_prefetch = 0 : i64, scratch_operands = 0 : i64, tpu.core_type = #tpu.core_type<tc>, window_params = [{transform_indices = @transform_0, window_bounds = array<i64: 1, 326, 6>}, {pipeline_mode = #tpu.pipeline_mode<synchronous>, transform_indices = @transform_1, window_bounds = array<i64: 3, 18, 4>}, {pipeline_mode = #tpu.pipeline_mode<synchronous>, transform_indices = @transform_2, window_bounds = array<i64: 1, 4>}, {transform_indices = @transform_3, window_bounds = array<i64: 1, 288, 4>}]} {
    %cst = arith.constant 0.000000e+00 : f32
    %0 = vector.broadcast %cst : f32 to vector<288x4xf32>
    %c0 = arith.constant 0 : index
    %c0_0 = arith.constant 0 : index
    %c0_1 = arith.constant 0 : index
    %1 = vector.load %arg1[%c0, %c0_0, %c0_1] : memref<1x326x6xf32, #tpu.memory_space<vmem>>, vector<1x288x6xf32>
    %2 = vector.shape_cast %1 : vector<1x288x6xf32> to vector<288x6xf32>
    %3 = arith.truncf %2 : vector<288x6xf32> to vector<288x6xbf16>
    %c0_2 = arith.constant 0 : index
    %c1 = arith.constant 1 : index
    %c0_3 = arith.constant 0 : index
    %4 = vector.load %arg1[%c0_2, %c1, %c0_3] : memref<1x326x6xf32, #tpu.memory_space<vmem>>, vector<1x288x6xf32>
    %5 = vector.shape_cast %4 : vector<1x288x6xf32> to vector<288x6xf32>
    %6 = arith.truncf %5 : vector<288x6xf32> to vector<288x6xbf16>
    %c0_4 = arith.constant 0 : index
    %c2 = arith.constant 2 : index
    %c0_5 = arith.constant 0 : index
    %7 = vector.load %arg1[%c0_4, %c2, %c0_5] : memref<1x326x6xf32, #tpu.memory_space<vmem>>, vector<1x288x6xf32>
    %8 = vector.shape_cast %7 : vector<1x288x6xf32> to vector<288x6xf32>
    %9 = arith.truncf %8 : vector<288x6xf32> to vector<288x6xbf16>
    %10 = tpu.concatenate %3, %6, %9 in 1 : vector<288x6xbf16>, vector<288x6xbf16>, vector<288x6xbf16> -> vector<288x18xbf16>
    %c0_6 = arith.constant 0 : index
    %c0_7 = arith.constant 0 : index
    %c0_8 = arith.constant 0 : index
    %11 = vector.load %arg2[%c0_6, %c0_7, %c0_8] : memref<3x18x4xbf16, #tpu.memory_space<vmem>>, vector<1x18x4xbf16>
    %12 = vector.shape_cast %11 : vector<1x18x4xbf16> to vector<18x4xbf16>
    %cst_9 = arith.constant dense<0.000000e+00> : vector<288x4xf32>
    %13 = tpu.matmul %10, %12, %cst_9 {dimension_numbers = #tpu.dot_dimension_numbers<[1], [0], [0], [1], [0, 0, 1, 1], [], []>} : vector<288x18xbf16>, vector<18x4xbf16>, vector<288x4xf32> -> vector<288x4xf32>
    %14 = arith.addf %0, %13 : vector<288x4xf32>
    %c0_10 = arith.constant 0 : index
    %c18 = arith.constant 18 : index
    %c0_11 = arith.constant 0 : index
    %15 = vector.load %arg1[%c0_10, %c18, %c0_11] : memref<1x326x6xf32, #tpu.memory_space<vmem>>, vector<1x288x6xf32>
    %16 = vector.shape_cast %15 : vector<1x288x6xf32> to vector<288x6xf32>
    %17 = arith.truncf %16 : vector<288x6xf32> to vector<288x6xbf16>
    %c0_12 = arith.constant 0 : index
    %c19 = arith.constant 19 : index
    %c0_13 = arith.constant 0 : index
    %18 = vector.load %arg1[%c0_12, %c19, %c0_13] : memref<1x326x6xf32, #tpu.memory_space<vmem>>, vector<1x288x6xf32>
    %19 = vector.shape_cast %18 : vector<1x288x6xf32> to vector<288x6xf32>
    %20 = arith.truncf %19 : vector<288x6xf32> to vector<288x6xbf16>
    %c0_14 = arith.constant 0 : index
    %c20 = arith.constant 20 : index
    %c0_15 = arith.constant 0 : index
    %21 = vector.load %arg1[%c0_14, %c20, %c0_15] : memref<1x326x6xf32, #tpu.memory_space<vmem>>, vector<1x288x6xf32>
    %22 = vector.shape_cast %21 : vector<1x288x6xf32> to vector<288x6xf32>
    %23 = arith.truncf %22 : vector<288x6xf32> to vector<288x6xbf16>
    %24 = tpu.concatenate %17, %20, %23 in 1 : vector<288x6xbf16>, vector<288x6xbf16>, vector<288x6xbf16> -> vector<288x18xbf16>
    %c1_16 = arith.constant 1 : index
    %c0_17 = arith.constant 0 : index
    %c0_18 = arith.constant 0 : index
    %25 = vector.load %arg2[%c1_16, %c0_17, %c0_18] : memref<3x18x4xbf16, #tpu.memory_space<vmem>>, vector<1x18x4xbf16>
    %26 = vector.shape_cast %25 : vector<1x18x4xbf16> to vector<18x4xbf16>
    %cst_19 = arith.constant dense<0.000000e+00> : vector<288x4xf32>
    %27 = tpu.matmul %24, %26, %cst_19 {dimension_numbers = #tpu.dot_dimension_numbers<[1], [0], [0], [1], [0, 0, 1, 1], [], []>} : vector<288x18xbf16>, vector<18x4xbf16>, vector<288x4xf32> -> vector<288x4xf32>
    %28 = arith.addf %14, %27 : vector<288x4xf32>
    %c0_20 = arith.constant 0 : index
    %c36 = arith.constant 36 : index
    %c0_21 = arith.constant 0 : index
    %29 = vector.load %arg1[%c0_20, %c36, %c0_21] : memref<1x326x6xf32, #tpu.memory_space<vmem>>, vector<1x288x6xf32>
    %30 = vector.shape_cast %29 : vector<1x288x6xf32> to vector<288x6xf32>
    %31 = arith.truncf %30 : vector<288x6xf32> to vector<288x6xbf16>
    %c0_22 = arith.constant 0 : index
    %c37 = arith.constant 37 : index
    %c0_23 = arith.constant 0 : index
    %32 = vector.load %arg1[%c0_22, %c37, %c0_23] : memref<1x326x6xf32, #tpu.memory_space<vmem>>, vector<1x288x6xf32>
    %33 = vector.shape_cast %32 : vector<1x288x6xf32> to vector<288x6xf32>
    %34 = arith.truncf %33 : vector<288x6xf32> to vector<288x6xbf16>
    %c0_24 = arith.constant 0 : index
    %c38 = arith.constant 38 : index
    %c0_25 = arith.constant 0 : index
    %35 = vector.load %arg1[%c0_24, %c38, %c0_25] : memref<1x326x6xf32, #tpu.memory_space<vmem>>, vector<1x288x6xf32>
    %36 = vector.shape_cast %35 : vector<1x288x6xf32> to vector<288x6xf32>
    %37 = arith.truncf %36 : vector<288x6xf32> to vector<288x6xbf16>
    %38 = tpu.concatenate %31, %34, %37 in 1 : vector<288x6xbf16>, vector<288x6xbf16>, vector<288x6xbf16> -> vector<288x18xbf16>
    %c2_26 = arith.constant 2 : index
    %c0_27 = arith.constant 0 : index
    %c0_28 = arith.constant 0 : index
    %39 = vector.load %arg2[%c2_26, %c0_27, %c0_28] : memref<3x18x4xbf16, #tpu.memory_space<vmem>>, vector<1x18x4xbf16>
    %40 = vector.shape_cast %39 : vector<1x18x4xbf16> to vector<18x4xbf16>
    %cst_29 = arith.constant dense<0.000000e+00> : vector<288x4xf32>
    %41 = tpu.matmul %38, %40, %cst_29 {dimension_numbers = #tpu.dot_dimension_numbers<[1], [0], [0], [1], [0, 0, 1, 1], [], []>} : vector<288x18xbf16>, vector<18x4xbf16>, vector<288x4xf32> -> vector<288x4xf32>
    %42 = arith.addf %28, %41 : vector<288x4xf32>
    %c0_30 = arith.constant 0 : index
    %c0_31 = arith.constant 0 : index
    %43 = vector.load %arg3[%c0_30, %c0_31] : memref<1x4xf32, #tpu.memory_space<vmem>>, vector<1x4xf32>
    %44 = vector.broadcast %43 : vector<1x4xf32> to vector<288x4xf32>
    %45 = arith.addf %42, %44 : vector<288x4xf32>
    %c0_32 = arith.constant 0 : index
    %c0_33 = arith.constant 0 : index
    %c0_34 = arith.constant 0 : index
    %46 = vector.load %arg4[%c0_32, %c0_33, %c0_34] : memref<1x288x4xf32, #tpu.memory_space<vmem>>, vector<1x288x4xf32>
    %47 = vector.shape_cast %46 : vector<1x288x4xf32> to vector<288x4xf32>
    %48 = vector.shape_cast %45 : vector<288x4xf32> to vector<1x288x4xf32>
    tpu.vector_store %arg4[%c0_32, %c0_33, %c0_34], %48 {strides = array<i32>} : memref<1x288x4xf32, #tpu.memory_space<vmem>>, vector<1x288x4xf32>,
    return
  }
  func.func @transform_0(%arg0: i32) -> (i32, i32, i32) {
    %c0_i32 = arith.constant 0 : i32
    %c0_i32_0 = arith.constant 0 : i32
    %c0_i32_1 = arith.constant 0 : i32
    return %arg0, %c0_i32, %c0_i32_0 : i32, i32, i32
  }
  func.func @transform_1(%arg0: i32) -> (i32, i32, i32) {
    %c0_i32 = arith.constant 0 : i32
    %c0_i32_0 = arith.constant 0 : i32
    %c0_i32_1 = arith.constant 0 : i32
    %c0_i32_2 = arith.constant 0 : i32
    return %c0_i32, %c0_i32_0, %c0_i32_1 : i32, i32, i32
  }
  func.func @transform_2(%arg0: i32) -> (i32, i32) {
    %c0_i32 = arith.constant 0 : i32
    %c0_i32_0 = arith.constant 0 : i32
    %c0_i32_1 = arith.constant 0 : i32
    return %c0_i32, %c0_i32_0 : i32, i32
  }
  func.func @transform_3(%arg0: i32) -> (i32, i32, i32) {
    %c0_i32 = arith.constant 0 : i32
    %c0_i32_0 = arith.constant 0 : i32
    %c0_i32_1 = arith.constant 0 : i32
    return %arg0, %c0_i32, %c0_i32_0 : i32, i32, i32
  }
}

</mosaic_0001>

<bundles_post_ra>
// kernel: refinement_net_forward.10
= control target key start
LH: loop header
LB: loop body
LE: loop exit
PB: predicated region body
PF: predicated region fallthrough
CT: control target
= control target key end

     0   :  { %s1289_s12 = smov 0   ;;  %s1821_s0 = inlined_call_operand.vmem [shape: f32[2,163,12], index: 0, kind: input, shape index: {}]   ;;  %s1822_s1 = inlined_call_operand.vmem [shape: bf16[3,18,32], index: 1, kind: input, shape index: {}]   ;;  %s1823_s2 = inlined_call_operand.vmem [shape: f32[1,32], index: 2, kind: input, shape index: {}]   ;;  %s1824_s3 = inlined_call_operand.vmem [shape: f32[2,144,32], index: 3, kind: output, shape index: {}]  }
   0x1 LB: > { %s1033_s13 = sadd.s32 4294967295, %s1264_s12   ;;  %p1037_p0 = scmp.ge.s32.totalorder %s1264_s12, 1  ;;  %s1264_s12 = sphi %s1289_s12, %s13_s12  }
   0x2   : > { %p137_p1 = scmp.lt.s32.totalorder %s1264_s12, 3 }
   0x4   : > { %p138_p2 = pnand %p1037_p0, %p137_p1 }
   0x5   : > { %p161_p3 = scmp.lt.s32.totalorder (!%p138_p2), %s1033_s13, 1  ;;  %s1268_s22 = smov (!%p138_p2), 12  }
   0x6   : > { %141 = sbr.rel (%p138_p2) target bundleno = 444 (0x1bc), region = 32 }
   0xb   : > { %vm407_vm0 = vcmask 1040384   ;;  %v1266_v0 = vmov 0.0   ;;  %v1252_v1 = vld [vmem:[%s1822_s1 + $0x14] ss:$0 sps:$4 sm:$0x11]   ;;  %s1826_s13 = smov (!%p161_p3, %s1033_s13), 1 }
   0xc   : > { %1115 = vmatprep.subr.bf16.mxu0 %v1266_v0  ;;  %1235 = vmatprep.subr.bf16.mxu1 %v1266_v0  ;;  %v409_v2 = vsel %vm407_vm0, %v1252_v1, 0  ;;  %vm1267_vm1 = vmmov 0   ;;  %s1239_s16 = smul.u32 168, %s1826_s13  ;;  %v1253_v3 = vld [vmem:[%s1822_s1 + $0xc] sm:$0xff]   ;;  %vm262_vm2 = vcmask 97280   ;;  %vm388_vm3 = vcmask 146432  }
   0xd   : > { %1119 = vmatprep.mubr.msk.bf16.mxu0 %vm1267_vm1, %v1266_v0  ;;  %1139 = vmatprep.mubr.msk.bf16.mxu1 %vm1267_vm1, %v1266_v0  ;;  %s1240_s4 = smul.u32 144, %s1826_s13  ;;  %vm959_vm4 = vcmask 261120  }
   0xe   : > { %1116 = vmatpush3.bf16.msra.mxu0 %v409_v2  ;;  %1237 = vmatpush3.bf16.msra.mxu1 %v409_v2  ;;  %s1318_s21 = scalar_lea.vmem %s1821_s0, %s1239_s16 }
   0xf   : > { %1117 = vmatprep.subr.bf16.mxu0 %v1266_v0  ;;  %1236 = vmatprep.subr.bf16.mxu1 %v1266_v0  ;;  %v294_v4 = vld [vmem:[%s1318_s21 + $0xa] sm:$0xff]  ;;  %v1322_v5 = vld [vmem:[%s1318_s21 + $0x12] sm:$0xff]  ;;  %v1325_v6 = vld [vmem:[%s1318_s21 + $0x5a] sm:$0xff]  ;;  %s1750_s9 = scalar_lea.vmem %s1824_s3, %s1240_s4 }
  0x10   : > { %v312_v7 = vpack.c.bf16 %v1322_v5, %v294_v4  ;;  %v1329_v8 = vld [vmem:[%s1318_s21 + $0x62] sm:$0xff]  ;;  %v1332_v9 = vld [vmem:[%s1318_s21 + $0x1a] sm:$0xff]  ;;  %v1340_v12 = vld [vmem:[%s1318_s21 + $0x6a] sm:$0xff] }
  0x11   : > { %v1335_v10 = vld [vmem:[%s1318_s21 + $0x22] sm:$0xff]  ;;  %v1343_v13 = vld [vmem:[%s1318_s21 + $0x72] sm:$0xff]  ;;  %v317_v14 = vpack.c.bf16 %v1329_v8, %v1325_v6  ;;  %v1354_v16 = vld [vmem:[%s1318_s21 + $0x2a] sm:$0xff] }
  0x12   : > { %1118 = vmatpush3.bf16.msra.mxu0 %v1253_v3  ;;  %1238 = vmatpush3.bf16.msra.mxu1 %v1253_v3  ;;  %v313_v11 = vpack.c.bf16 %v1335_v10, %v1332_v9  ;;  %v318_v15 = vpack.c.bf16 %v1343_v13, %v1340_v12  ;;  %v1357_v17 = vld [vmem:[%s1318_s21 + $0x32] sm:$0xff]  ;;  %v1360_v18 = vld [vmem:[%s1318_s21 + $0x7a] sm:$0xff]  ;;  %v1363_v19 = vld [vmem:[%s1318_s21 + $0x82] sm:$0xff] }
  0x13   : > { %1195 = vmatprep.subr.bf16.mxu0 %v1266_v0  ;;  %1155 = vmatprep.subr.bf16.mxu1 %v1266_v0  ;;  %v314_v20 = vpack.c.bf16 %v1357_v17, %v1354_v16  ;;  %v1369_v21 = vld [vmem:[%s1318_s21 + $0x3a] sm:$0xff]  ;;  %v1372_v22 = vld [vmem:[%s1318_s21 + $0x9] sm:$0xff]  ;;  %v1375_v23 = vld [vmem:[%s1318_s21 + $0x11] sm:$0xff]  ;;  %v319_v24 = vpack.c.bf16 %v1363_v19, %v1360_v18 }
  0x14   : > { %330 = vrot.lane.b32.xlu0 %v312_v7, %s1268_s22  ;;  %332 = vrot.lane.b32.xlu1 %v313_v11, %s1268_s22  ;;  %v1381_v25 = vld [vmem:[%s1318_s21 + $0x42] sm:$0xff]  ;;  %v1384_v26 = vld [vmem:[%s1318_s21 + $0x19] sm:$0xff]  ;;  %v285_v27 = vpack.c.bf16 %v1375_v23, %v1372_v22  ;;  %v669_v7 = vpack.c.bf16 %v1332_v9, %v1322_v5 }
  0x15   : > { %v1389_v28 = vld [vmem:[%s1318_s21 + $0x21] sm:$0xff]  ;;  %v1392_v29 = vld [vmem:[%s1318_s21 + $0x8a] sm:$0xff]  ;;  %v1395_v30 = vld [vmem:[%s1318_s21 + $0x92] sm:$0xff]  ;;  %v315_v34 = vpack.c.bf16 %v1381_v25, %v1369_v21  ;;  %v218_v60 = vpack.c.bf16 %v1384_v26, %v1375_v23 }
  0x16   : > { %v286_v31 = vpack.c.bf16 %v1389_v28, %v1384_v26  ;;  %v1400_v32 = vld [vmem:[%s1318_s21 + $0x29] sm:$0xff]  ;;  %v1403_v33 = vld [vmem:[%s1318_s21 + $0x31] sm:$0xff]  ;;  %v1412_v36 = vld [vmem:[%s1318_s21 + $0x39] sm:$0xff]  ;;  %v320_v39 = vpack.c.bf16 %v1395_v30, %v1392_v29 }
  0x17   : > { %v1409_v35 = vld [vmem:[%s1318_s21 + $0x4a] sm:$0xff]  ;;  %v287_v37 = vpack.c.bf16 %v1403_v33, %v1400_v32  ;;  %v1417_v38 = vld [vmem:[%s1318_s21 + $0x41] sm:$0xff]  ;;  %v1423_v40 = vld [vmem:[%s1318_s21 + $0x52] sm:$0xff]  ;;  %v219_v1 = vpack.c.bf16 %v1400_v32, %v1389_v28  ;;  %v220_v11 = vpack.c.bf16 %v1412_v36, %v1403_v33 }
  0x18   : > { %340 = vrot.lane.b32.xlu0 %v317_v14, %s1268_s22  ;;  %342 = vrot.lane.b32.xlu1 %v318_v15, %s1268_s22  ;;  %v1426_v41 = vld [vmem:[%s1318_s21 + $0x49] sm:$0xff]  ;;  %v288_v42 = vpack.c.bf16 %v1417_v38, %v1412_v36  ;;  %v1431_v43 = vld [vmem:[%s1318_s21 + $0x51] sm:$0xff]  ;;  %v316_v48 = vpack.c.bf16 %v1423_v40, %v1409_v35 }
  0x19   : > { %v199_v44 = vld [vmem:[%s1318_s21 + $0x1] sm:$0xff]  ;;  %v289_v45 = vpack.c.bf16 %v1431_v43, %v1426_v41  ;;  %v1437_v46 = vld [vmem:[%s1318_s21 + $0x59] sm:$0xff]  ;;  %v1447_v50 = vld [vmem:[%s1318_s21 + $0x69] sm:$0xff] }
  0x1a   : > { %v1440_v47 = vld [vmem:[%s1318_s21 + $0x61] sm:$0xff]  ;;  %v678_v49 = vld [vmem:[%s1318_s21 + $0x13] sm:$0xff]  ;;  %v217_v53 = vpack.c.bf16 %v1372_v22, %v199_v44  ;;  %v681_v62 = vld [vmem:[%s1318_s21 + $0x2b] sm:$0xff] }
  0x1b   : > { %v290_v51 = vpack.c.bf16 %v1440_v47, %v1437_v46  ;;  %v1452_v52 = vld [vmem:[%s1318_s21 + $0x71] sm:$0xff]  ;;  %v679_v54 = vld [vmem:[%s1318_s21 + $0x1b] sm:$0xff]  ;;  %v680_v61 = vld [vmem:[%s1318_s21 + $0x23] sm:$0xff] }
  0x1c   : > { %334 = vrot.lane.b32.xlu0 %v314_v20, %s1268_s22  ;;  %344 = vrot.lane.b32.xlu1 %v319_v24, %s1268_s22  ;;  %v1458_v55 = vld [vmem:[%s1318_s21 + $0x79] sm:$0xff]  ;;  %v291_v56 = vpack.c.bf16 %v1452_v52, %v1447_v50  ;;  %v1463_v57 = vld [vmem:[%s1318_s21 + $0x81] sm:$0xff]  ;;  %v696_v59 = vpack.c.bf16 %v679_v54, %v678_v49  ;;  %v697_v63 = vpack.c.bf16 %v681_v62, %v680_v61 }
  0x1d   : > { %v292_v58 = vpack.c.bf16 %v1463_v57, %v1458_v55  ;;  %v682_v2 = vld [vmem:[%s1318_s21 + $0x33] sm:$0xff]  ;;  %v683_v3 = vld [vmem:[%s1318_s21 + $0x3b] sm:$0xff]  ;;  %v684_v14 = vld [vmem:[%s1318_s21 + $0x43] sm:$0xff]  ;;  %v221_v24 = vpack.c.bf16 %v1426_v41, %v1417_v38  ;;  %v222_v49 = vpack.c.bf16 %v1437_v46, %v1431_v43 }
  0x1e   : > { %v698_v4 = vpack.c.bf16 %v683_v3, %v682_v2  ;;  %v685_v15 = vld [vmem:[%s1318_s21 + $0x4b] sm:$0xff]  ;;  %v690_v61 = vld [vmem:[%s1318_s21 + $0x73] sm:$0xff]  ;;  %v691_v62 = vld [vmem:[%s1318_s21 + $0x7b] sm:$0xff]  ;;  %v224_v2 = vpack.c.bf16 %v1458_v55, %v1452_v52 }
  0x1f   : > { %v699_v20 = vpack.c.bf16 %v685_v15, %v684_v14  ;;  %v689_v54 = vld [vmem:[%s1318_s21 + $0x6b] sm:$0xff]  ;;  %v692_v3 = vld [vmem:[%s1318_s21 + $0x83] sm:$0xff]  ;;  %v175_v43 = vld [vmem:[%s1318_s21 + $0x18] sm:$0xff] }
  0x20   : > { %336 = vrot.lane.b32.xlu0 %v315_v34, %s1268_s22  ;;  %346 = vrot.lane.b32.xlu1 %v320_v39, %s1268_s22  ;;  %v686_v34 = vld [vmem:[%s1318_s21 + $0x53] sm:$0xff]  ;;  %v687_v39 = vld [vmem:[%s1318_s21 + $0x5b] sm:$0xff] }
  0x21   : > { %v700_v44 = vpack.c.bf16 %v687_v39, %v686_v34  ;;  %v672_v39 = vpack.c.bf16 %v1409_v35, %v1381_v25  ;;  %v284_v32 = vld [vmem:[%s1318_s21 + $0x91] sm:$0xff]  ;;  %v674_v25 = vpack.c.bf16 %v1340_v12, %v1329_v8  ;;  %v176_v5 = vld [vmem:[%s1318_s21 + $0x20] sm:$0xff]  ;;  %v177_v9 = vld [vmem:[%s1318_s21 + $0x28] sm:$0xff] }
  0x22   : > { %v174_v41 = vld [vmem:[%s1318_s21 + $0x10] sm:$0xff] }
  0x24   : > { %338 = vrot.lane.b32.xlu0 %v316_v48, %s1268_s22  ;;  %235 = vrot.lane.b32.xlu1 %v217_v53, %s1268_s22  ;;  %v670_v48 = vpack.c.bf16 %v1354_v16, %v1335_v10  ;;  %v688_v53 = vld [vmem:[%s1318_s21 + $0x63] sm:$0xff] }
  0x28   : > { %714 = vrot.lane.b32.xlu0 %v696_v59, %s1268_s22  ;;  %237 = vrot.lane.b32.xlu1 %v218_v60, %s1268_s22  ;;  %v701_v59 = vpack.c.bf16 %v689_v54, %v688_v53  ;;  %v223_v60 = vpack.c.bf16 %v1447_v50, %v1440_v47 }
  0x2c   : > { %716 = vrot.lane.b32.xlu0 %v697_v63, %s1268_s22  ;;  %239 = vrot.lane.b32.xlu1 %v219_v1, %s1268_s22  ;;  %v702_v63 = vpack.c.bf16 %v691_v62, %v690_v61  ;;  %v671_v1 = vpack.c.bf16 %v1369_v21, %v1357_v17 }
  0x30   : > { %718 = vrot.lane.b32.xlu0 %v698_v4, %s1268_s22  ;;  %241 = vrot.lane.b32.xlu1 %v220_v11, %s1268_s22  ;;  %v693_v4 = vld [vmem:[%s1318_s21 + $0x8b] sm:$0xff] }
  0x31   : > { %v216_v11 = vld [vmem:[%s1318_s21 + $0x89] sm:$0xff]  ;;  %v703_v14 = vpack.c.bf16 %v693_v4, %v692_v3 }
  0x32   : > { %v225_v15 = vpack.c.bf16 %v216_v11, %v1463_v57  ;;  %v172_v57 = vld [vmem:[%s1318_s21] sm:$0xff] }
  0x34   : > { %720 = vrot.lane.b32.xlu0 %v699_v20, %s1268_s22  ;;  %243 = vrot.lane.b32.xlu1 %v221_v24, %s1268_s22  ;;  %v694_v20 = vld [vmem:[%s1318_s21 + $0x93] sm:$0xff]  ;;  %v695_v24 = vld [vmem:[%s1318_s21 + $0x9b] sm:$0xff] }
  0x35   : > { %v704_v34 = vpack.c.bf16 %v695_v24, %v694_v20 }
  0x38   : > { %722 = vrot.lane.b32.xlu0 %v700_v44, %s1268_s22  ;;  %245 = vrot.lane.b32.xlu1 %v222_v49, %s1268_s22  ;;  %v673_v44 = vpack.c.bf16 %v1325_v6, %v1423_v40  ;;  %v1254_v49 = vld [vmem:[%s1822_s1 + $0x20] ss:$0 sps:$4 sm:$0x11]   ;;  %v192_v40 = vpack.c.bf16 %v177_v9, %v176_v5 }
  0x39   : > { %v791_v54 = vsel %vm407_vm0, %v1254_v49, 0 }
  0x3c   : > { %724 = vrot.lane.b32.xlu0 %v701_v59, %s1268_s22  ;;  %247 = vrot.lane.b32.xlu1 %v223_v60, %s1268_s22  ;;  %v1255_v59 = vld [vmem:[%s1822_s1 + $0x8] ss:$0 sps:$4 sm:$0x11]  }
  0x40   : > { %726 = vrot.lane.b32.xlu0 %v702_v63, %s1268_s22  ;;  %249 = vrot.lane.b32.xlu1 %v224_v2, %s1268_s22  ;;  %v544_v63 = vsel %vm407_vm0, %v1255_v59, 0  ;;  %v1256_v2 = vld [vmem:[%s1822_s1 + $0x18] sm:$0xff]  }
  0x44   : > { %728 = vrot.lane.b32.xlu0 %v703_v14, %s1268_s22  ;;  %251 = vrot.lane.b32.xlu1 %v225_v15, %s1268_s22 }
  0x48   : > { %730 = vrot.lane.b32.xlu0 %v704_v34, %s1268_s22  ;;  %v191_v34 = vpack.c.bf16 %v175_v43, %v174_v41 }
  0x86   : > { %v331_v53 = vpop.permute.xlu0 %330  ;;  %v333_v61 = vpop.permute.xlu1 %332 }
  0x87   : > { %v358_v60 = vsel %vm262_vm2, %v285_v27, %v331_v53  ;;  %v360_v23 = vsel %vm262_vm2, %v286_v31, %v333_v61  ;;  %v1257_v27 = vld [vmem:[%s1822_s1] sm:$0xff]   ;;  %v178_v53 = vld [vmem:[%s1318_s21 + $0x30] sm:$0xff]  ;;  %v181_v61 = vld [vmem:[%s1318_s21 + $0x48] sm:$0xff] }
  0x88   : > { %1120 = vmatmul.mubr.msk.bf16.vlgmr.msra.gmra.mxu0 %vm388_vm3, %v358_v60  ;;  %v180_v60 = vld [vmem:[%s1318_s21 + $0x40] sm:$0xff] }
  0x89   : > { %1196 = vmatpush3.bf16.msra.mxu0 %v791_v54  ;;  %1123 = vmatprep.mubr.msk.bf16.mxu0 %vm1267_vm1, %v1266_v0  ;;  %v179_v54 = vld [vmem:[%s1318_s21 + $0x38] sm:$0xff]  ;;  %v194_v17 = vpack.c.bf16 %v181_v61, %v180_v60 }
  0x8a   : > { %v341_v62 = vpop.permute.xlu0 %340  ;;  %1197 = vmatprep.subr.bf16.mxu0 %v1266_v0  ;;  %v343_v3 = vpop.permute.xlu1 %342  ;;  %v193_v16 = vpack.c.bf16 %v179_v54, %v178_v53 }
  0x8b   : > { %v368_v22 = vsel %vm262_vm2, %v290_v51, %v341_v62  ;;  %v370_v26 = vsel %vm262_vm2, %v291_v56, %v343_v3  ;;  %v182_v62 = vld [vmem:[%s1318_s21 + $0x50] sm:$0xff]  ;;  %v185_v3 = vld [vmem:[%s1318_s21 + $0x68] sm:$0xff] }
  0x8c   : > { %1140 = vmatmul.mubr.msk.bf16.vlgmr.msra.gmra.mxu1 %vm388_vm3, %v368_v22 }
  0x8d   : > { %1156 = vmatpush3.bf16.msra.mxu1 %v544_v63  ;;  %1143 = vmatprep.mubr.msk.bf16.mxu1 %vm1267_vm1, %v1266_v0  ;;  %v183_v63 = vld [vmem:[%s1318_s21 + $0x58] sm:$0xff] }
  0x8e   : > { %v335_v4 = vpop.permute.xlu0 %334  ;;  %1198 = vmatpush3.bf16.msra.mxu0 %v1256_v2  ;;  %1157 = vmatprep.subr.bf16.mxu1 %v1266_v0  ;;  %v345_v46 = vpop.permute.xlu1 %344  ;;  %v195_v2 = vpack.c.bf16 %v183_v63, %v182_v62 }
  0x8f   : > { %v362_v31 = vsel %vm262_vm2, %v287_v37, %v335_v4  ;;  %v372_v50 = vsel %vm262_vm2, %v292_v58, %v345_v46  ;;  %v293_v37 = vpack.c.bf16 %v284_v32, %v216_v11  ;;  %v173_v58 = vld [vmem:[%s1318_s21 + $0x8] sm:$0xff] }
  0x90   : > { %1124 = vmatmul.mubr.msk.bf16.gmra.mxu0 %vm388_vm3, %v360_v23  ;;  %v190_v38 = vpack.c.bf16 %v173_v58, %v172_v57 }
  0x91   : > { %1127 = vmatprep.mubr.msk.bf16.mxu0 %vm1267_vm1, %v1266_v0  ;;  %1158 = vmatpush3.bf16.msra.mxu1 %v1257_v27  ;;  %v184_v27 = vld [vmem:[%s1318_s21 + $0x60] sm:$0xff] }
  0x92   : > { %v337_v28 = vpop.permute.xlu0 %336  ;;  %v347_v52 = vpop.permute.xlu1 %346  ;;  %v196_v4 = vpack.c.bf16 %v185_v3, %v184_v27 }
  0x93   : > { %v364_v51 = vsel %vm262_vm2, %v288_v42, %v337_v28  ;;  %v374_v56 = vsel %vm262_vm2, %v293_v37, %v347_v52  ;;  %v188_v52 = vld [vmem:[%s1318_s21 + $0x80] sm:$0xff] }
  0x94   : > { %1144 = vmatmul.mubr.msk.bf16.gmra.mxu1 %vm388_vm3, %v370_v26 }
  0x95   : > { %1147 = vmatprep.mubr.msk.bf16.mxu1 %vm1267_vm1, %v1266_v0 }
  0x96   : > { %v339_v47 = vpop.permute.xlu0 %338  ;;  %v236_v42 = vpop.permute.xlu1 %235 }
  0x97   : > { %v366_v36 = vsel %vm262_vm2, %v289_v45, %v339_v47  ;;  %v264_v20 = vsel %vm262_vm2, %v190_v38, %v236_v42  ;;  %v186_v47 = vld [vmem:[%s1318_s21 + $0x70] sm:$0xff] }
  0x98   : > { %1128 = vmatmul.mubr.msk.bf16.gmra.mxu0 %vm388_vm3, %v362_v31  ;;  %v675_v31 = vpack.c.bf16 %v1360_v18, %v1343_v13  ;;  %v676_v18 = vpack.c.bf16 %v1392_v29, %v1363_v19 }
  0x99   : > { %1131 = vmatprep.mubr.msk.bf16.mxu0 %vm1267_vm1, %v1266_v0 }
  0x9a   : > { %v715_v33 = vpop.permute.xlu0 %714 }
  0x9b   : > { %v742_v35 = vsel %vm262_vm2, %v669_v7, %v715_v33 }
  0x9c   : > { %1148 = vmatmul.mubr.msk.bf16.gmra.mxu1 %vm388_vm3, %v372_v50  ;;  %v187_v50 = vld [vmem:[%s1318_s21 + $0x78] sm:$0xff] }
  0x9d   : > { %1151 = vmatprep.mubr.msk.bf16.mxu1 %vm1267_vm1, %v1266_v0  ;;  %v197_v33 = vpack.c.bf16 %v187_v50, %v186_v47 }
  0x9e   : > { %v717_v55 = vpop.permute.xlu0 %716 }
  0x9f   : > { %v744_v12 = vsel %vm262_vm2, %v670_v48, %v717_v55  ;;  %v189_v55 = vld [vmem:[%s1318_s21 + $0x88] sm:$0xff] }
  0xa0   : > { %1132 = vmatmul.mubr.msk.bf16.gmra.mxu0 %vm388_vm3, %v364_v51  ;;  %v198_v57 = vpack.c.bf16 %v189_v55, %v188_v52 }
  0xa1   : > { %1135 = vmatprep.mubr.msk.bf16.mxu0 %vm1267_vm1, %v1266_v0 }
  0xa2   : > { %v719_v11 = vpop.permute.xlu0 %718 }
  0xa3   : > { %v746_v10 = vsel %vm262_vm2, %v671_v1, %v719_v11  ;;  %v668_v11 = vld [vmem:[%s1318_s21 + $0x9a] sm:$0xff] }
  0xa4   : > { %1152 = vmatmul.mubr.msk.bf16.gmra.mxu1 %vm388_vm3, %v374_v56  ;;  %v677_v29 = vpack.c.bf16 %v668_v11, %v1395_v30 }
  0xa5   : > { %1159 = vmatprep.mubr.msk.bf16.mxu1 %vm1267_vm1, %v1266_v0 }
  0xa6   : > { %v721_v14 = vpop.permute.xlu0 %720 }
  0xa7   : > { %v748_v15 = vsel %vm262_vm2, %v672_v39, %v721_v14  ;;  %v238_v39 = vpop.permute.xlu1 %237 }
  0xa8   : > { %1136 = vmatmul.mubr.msk.bf16.gmra.mxu0 %vm388_vm3, %v366_v36  ;;  %v266_v8 = vsel %vm262_vm2, %v191_v34, %v238_v39 }
  0xa9   : > { %1199 = vmatprep.mubr.msk.bf16.mxu0 %vm1267_vm1, %v1266_v0 }
  0xaa   : > { %v723_v45 = vpop.permute.xlu0 %722 }
  0xab   : > { %v750_v24 = vsel %vm262_vm2, %v673_v44, %v723_v45  ;;  %v240_v7 = vpop.permute.xlu1 %239 }
  0xac   : > { %1160 = vmatmul.mubr.msk.bf16.vlgmr.msra.gmra.mxu1 %vm388_vm3, %v264_v20  ;;  %v268_v44 = vsel %vm262_vm2, %v192_v40, %v240_v7 }
  0xad   : > { %1163 = vmatprep.mubr.msk.bf16.mxu1 %vm1267_vm1, %v1266_v0 }
  0xae   : > { %v725_v49 = vpop.permute.xlu0 %724 }
  0xaf   : > { %v752_v6 = vsel %vm262_vm2, %v674_v25, %v725_v49  ;;  %v242_v48 = vpop.permute.xlu1 %241 }
  0xb0   : > { %1200 = vmatmul.mubr.msk.bf16.vlgmr.msra.gmra.mxu0 %vm388_vm3, %v742_v35  ;;  %v270_v59 = vsel %vm262_vm2, %v193_v16, %v242_v48 }
  0xb1   : > { %1203 = vmatprep.mubr.msk.bf16.mxu0 %vm1267_vm1, %v1266_v0 }
  0xb2   : > { %v727_v46 = vpop.permute.xlu0 %726 }
  0xb3   : > { %v244_v21 = vpop.permute.xlu1 %243  ;;  %v754_v32 = vsel %vm262_vm2, %v675_v31, %v727_v46 }
  0xb4   : > { %1164 = vmatmul.mubr.msk.bf16.gmra.mxu1 %vm388_vm3, %v266_v8  ;;  %v272_v1 = vsel %vm262_vm2, %v194_v17, %v244_v21 }
  0xb5   : > { %1167 = vmatprep.mubr.msk.bf16.mxu1 %vm1267_vm1, %v1266_v0 }
  0xb6   : > { %v729_v51 = vpop.permute.xlu0 %728 }
  0xb7   : > { %v246_v22 = vpop.permute.xlu1 %245  ;;  %v756_v56 = vsel %vm262_vm2, %v676_v18, %v729_v51 }
  0xb8   : > { %1204 = vmatmul.mubr.msk.bf16.gmra.mxu0 %vm388_vm3, %v744_v12  ;;  %v274_v23 = vsel %vm262_vm2, %v195_v2, %v246_v22 }
  0xb9   : > { %1207 = vmatprep.mubr.msk.bf16.mxu0 %vm1267_vm1, %v1266_v0 }
  0xba   : > { %v731_v36 = vpop.permute.xlu0 %730 }
  0xbb   : > { %v248_v26 = vpop.permute.xlu1 %247  ;;  %v758_v38 = vsel %vm262_vm2, %v677_v29, %v731_v36 }
  0xbc   : > { %1168 = vmatmul.mubr.msk.bf16.gmra.mxu1 %vm388_vm3, %v268_v44  ;;  %v276_v28 = vsel %vm262_vm2, %v196_v4, %v248_v26  ;;  %v1744_v4 = vld [vmem:[%s1823_s2] ss:$0 sm:$0xff] }
  0xbd   : > { %1171 = vmatprep.mubr.msk.bf16.mxu1 %vm1267_vm1, %v1266_v0 }
  0xbf   : > { %v250_v37 = vpop.permute.xlu1 %249 }
  0xc0   : > { %1208 = vmatmul.mubr.msk.bf16.gmra.mxu0 %vm388_vm3, %v746_v10  ;;  %v278_v13 = vsel %vm262_vm2, %v197_v33, %v250_v37 }
  0xc1   : > { %1211 = vmatprep.mubr.msk.bf16.mxu0 %vm1267_vm1, %v1266_v0 }
  0xc3   : > { %v252_v58 = vpop.permute.xlu1 %251 }
  0xc4   : > { %1172 = vmatmul.mubr.msk.bf16.gmra.mxu1 %vm388_vm3, %v270_v59  ;;  %v280_v19 = vsel %vm262_vm2, %v198_v57, %v252_v58 }
  0xc5   : > { %1175 = vmatprep.mubr.msk.bf16.mxu1 %vm1267_vm1, %v1266_v0 }
  0xc8   : > { %1212 = vmatmul.mubr.msk.bf16.gmra.mxu0 %vm388_vm3, %v748_v15 }
  0xc9   : > { %1215 = vmatprep.mubr.msk.bf16.mxu0 %vm1267_vm1, %v1266_v0 }
  0xcc   : > { %1176 = vmatmul.mubr.msk.bf16.gmra.mxu1 %vm388_vm3, %v272_v1 }
  0xcd   : > { %1179 = vmatprep.mubr.msk.bf16.mxu1 %vm1267_vm1, %v1266_v0 }
  0xd0   : > { %1216 = vmatmul.mubr.msk.bf16.gmra.mxu0 %vm388_vm3, %v750_v24 }
  0xd1   : > { %1219 = vmatprep.mubr.msk.bf16.mxu0 %vm1267_vm1, %v1266_v0 }
  0xd4   : > { %1180 = vmatmul.mubr.msk.bf16.gmra.mxu1 %vm388_vm3, %v274_v23 }
  0xd5   : > { %1183 = vmatprep.mubr.msk.bf16.mxu1 %vm1267_vm1, %v1266_v0 }
  0xd8   : > { %1220 = vmatmul.mubr.msk.bf16.gmra.mxu0 %vm388_vm3, %v752_v6 }
  0xd9   : > { %1223 = vmatprep.mubr.msk.bf16.mxu0 %vm1267_vm1, %v1266_v0 }
  0xdc   : > { %1184 = vmatmul.mubr.msk.bf16.gmra.mxu1 %vm388_vm3, %v276_v28 }
  0xdd   : > { %1187 = vmatprep.mubr.msk.bf16.mxu1 %vm1267_vm1, %v1266_v0 }
  0xe0   : > { %1224 = vmatmul.mubr.msk.bf16.gmra.mxu0 %vm388_vm3, %v754_v32 }
  0xe1   : > { %1227 = vmatprep.mubr.msk.bf16.mxu0 %vm1267_vm1, %v1266_v0 }
  0xe4   : > { %1188 = vmatmul.mubr.msk.bf16.gmra.mxu1 %vm388_vm3, %v278_v13 }
  0xe5   : > { %1191 = vmatprep.mubr.msk.bf16.mxu1 %vm1267_vm1, %v1266_v0 }
  0xe8   : > { %1228 = vmatmul.mubr.msk.bf16.gmra.mxu0 %vm388_vm3, %v756_v56 }
  0xe9   : > { %1231 = vmatprep.mubr.msk.bf16.mxu0 %vm1267_vm1, %v1266_v0 }
  0xec   : > { %1192 = vmatmul.mubr.msk.bf16.gmra.mxu1 %vm388_vm3, %v280_v19 }
  0xf0   : > { %1232 = vmatmul.mubr.msk.bf16.gmra.mxu0 %vm388_vm3, %v758_v38 }
 0x148   : > { %v445_v42 = vpop.f32.mrf.mxu0 }
 0x14a   : > { %v1121_v14 = vpop.f32.mrf.mxu0 }
 0x14c   : > { %v448_v15 = vpop.f32.mrf.mxu0  ;;  %v1714_v20 = vpop.f32.mrf.mxu1 }
 0x14e   : > { %v1122_v41 = vpop.f32.mrf.mxu0  ;;  %v1141_v43 = vpop.f32.mrf.mxu1 }
 0x150   : > { %v453_v45 = vpop.f32.mrf.mxu0  ;;  %v1716_v24 = vpop.f32.mrf.mxu1 }
 0x152   : > { %v1125_v30 = vpop.f32.mrf.mxu0  ;;  %v1142_v25 = vpop.f32.mrf.mxu1 }
 0x154   : > { %v456_v0 = vpop.f32.mrf.mxu0  ;;  %v1718_v35 = vpop.f32.mrf.mxu1 }
 0x156   : > { %v1126_v34 = vpop.f32.mrf.mxu0  ;;  %v1145_v39 = vpop.f32.mrf.mxu1 }
 0x158   : > { %v461_v49 = vpop.f32.mrf.mxu0  ;;  %v1720_v6 = vpop.f32.mrf.mxu1 }
 0x15a   : > { %v1129_v8 = vpop.f32.mrf.mxu0  ;;  %v1146_v5 = vpop.f32.mrf.mxu1 }
 0x15c   : > { %v1722_v9 = vpop.f32.mrf.mxu0  ;;  %v1724_v12 = vpop.f32.mrf.mxu1 }
 0x15e   : > { %v1130_v40 = vpop.f32.mrf.mxu0  ;;  %v1149_v7 = vpop.f32.mrf.mxu1 }
 0x160   : > { %v1726_v44 = vpop.f32.mrf.mxu0  ;;  %v1728_v53 = vpop.f32.mrf.mxu1 }
 0x162   : > { %v1133_v54 = vpop.f32.mrf.mxu0  ;;  %v1150_v10 = vpop.f32.mrf.mxu1 }
 0x164   : > { %v1730_v16 = vpop.f32.mrf.mxu0  ;;  %v1732_v48 = vpop.f32.mrf.mxu1 }
 0x166   : > { %v1134_v59 = vpop.f32.mrf.mxu0  ;;  %v1153_v60 = vpop.f32.mrf.mxu1 }
 0x168   : > { %v1734_v61 = vpop.f32.mrf.mxu0  ;;  %v1736_v17 = vpop.f32.mrf.mxu1 }
 0x16a   : > { %v1137_v21 = vpop.f32.mrf.mxu0  ;;  %v1154_v1 = vpop.f32.mrf.mxu1 }
 0x16c   : > { %v1738_v62 = vpop.f32.mrf.mxu0  ;;  %v580_v63 = vpop.f32.mrf.mxu1 }
 0x16d   : > { %v581_v23 = vadd.f32 %v580_v63, %v445_v42 }
 0x16e   : > { %v1138_v2 = vpop.f32.mrf.mxu0  ;;  %v1161_v22 = vpop.f32.mrf.mxu1 }
 0x170   : > { %v583_v27 = vpop.f32.mrf.mxu1  ;;  %v827_v3 = vpop.f32.mrf.mxu0 }
 0x171   : > { %v898_v26 = vadd.f32 %v827_v3, %v581_v23  ;;  %v584_v46 = vadd.f32 %v583_v27, %v448_v15 }
 0x172   : > { %v1162_v28 = vpop.f32.mrf.mxu1  ;;  %v1201_v31 = vpop.f32.mrf.mxu0 }
 0x173   : > { %v923_v47 = vadd.f32 %v1744_v4, %v898_v26 }
 0x174   : > { %v588_v50 = vpop.f32.mrf.mxu1  ;;  %v830_v32 = vpop.f32.mrf.mxu0 }
 0x175   : > { %v941_v33 = vmax.f32 %v923_v47, 0.0  ;;  %v899_v37 = vadd.f32 %v830_v32, %v584_v46  ;;  %v589_v51 = vadd.f32 %v588_v50, %v453_v45 }
 0x176   : > { %v1165_v13 = vpop.f32.mrf.mxu1  ;;  %v1202_v18 = vpop.f32.mrf.mxu0 }
 0x177   : > { %960 = vst.msk [vmem:[%s1750_s9] sm:$0xff] %vm959_vm4, %v941_v33  ;;  %v924_v52 = vadd.f32 %v1744_v4, %v899_v37 }
 0x178   : > { %v591_v55 = vpop.f32.mrf.mxu1  ;;  %v835_v56 = vpop.f32.mrf.mxu0 }
 0x179   : > { %v942_v57 = vmax.f32 %v924_v52, 0.0  ;;  %v900_v58 = vadd.f32 %v835_v56, %v589_v51  ;;  %v592_v29 = vadd.f32 %v591_v55, %v456_v0 }
 0x17a   : > { %v1166_v11 = vpop.f32.mrf.mxu1  ;;  %v1205_v19 = vpop.f32.mrf.mxu0 }
 0x17b   : > { %961 = vst.msk [vmem:[%s1750_s9 + $0x8] sm:$0xff] %vm959_vm4, %v942_v57  ;;  %v925_v36 = vadd.f32 %v1744_v4, %v900_v58 }
 0x17c   : > { %v596_v38 = vpop.f32.mrf.mxu1  ;;  %v838_v42 = vpop.f32.mrf.mxu0 }
 0x17d   : > { %v943_v14 = vmax.f32 %v925_v36, 0.0  ;;  %v901_v15 = vadd.f32 %v838_v42, %v592_v29  ;;  %v597_v45 = vadd.f32 %v596_v38, %v461_v49 }
 0x17e   : > { %v1169_v41 = vpop.f32.mrf.mxu1  ;;  %v1206_v43 = vpop.f32.mrf.mxu0 }
 0x17f   : > { %962 = vst.msk [vmem:[%s1750_s9 + $0x10] sm:$0xff] %vm959_vm4, %v943_v14  ;;  %v926_v30 = vadd.f32 %v1744_v4, %v901_v15 }
 0x180   : > { %v599_v25 = vpop.f32.mrf.mxu1  ;;  %v843_v34 = vpop.f32.mrf.mxu0 }
 0x181   : > { %v944_v39 = vmax.f32 %v926_v30, 0.0  ;;  %v902_v8 = vadd.f32 %v843_v34, %v597_v45  ;;  %v600_v40 = vadd.f32 %v599_v25, %v1722_v9 }
 0x182   : > { %v1170_v0 = vpop.f32.mrf.mxu1  ;;  %v1209_v5 = vpop.f32.mrf.mxu0 }
 0x183   : > { %963 = vst.msk [vmem:[%s1750_s9 + $0x18] sm:$0xff] %vm959_vm4, %v944_v39  ;;  %v927_v7 = vadd.f32 %v1744_v4, %v902_v8 }
 0x184   : > { %v604_v54 = vpop.f32.mrf.mxu1  ;;  %v846_v10 = vpop.f32.mrf.mxu0 }
 0x185   : > { %v945_v59 = vmax.f32 %v927_v7, 0.0  ;;  %v903_v49 = vadd.f32 %v846_v10, %v600_v40  ;;  %v605_v1 = vadd.f32 %v604_v54, %v1726_v44 }
 0x186   : > { %v1173_v60 = vpop.f32.mrf.mxu1  ;;  %v1210_v21 = vpop.f32.mrf.mxu0 }
 0x187   : > { %964 = vst.msk [vmem:[%s1750_s9 + $0x20] sm:$0xff] %vm959_vm4, %v945_v59  ;;  %v928_v63 = vadd.f32 %v1744_v4, %v903_v49 }
 0x188   : > { %v607_v2 = vpop.f32.mrf.mxu1  ;;  %v851_v22 = vpop.f32.mrf.mxu0 }
 0x189   : > { %v946_v23 = vmax.f32 %v928_v63, 0.0  ;;  %v904_v9 = vadd.f32 %v851_v22, %v605_v1  ;;  %v608_v26 = vadd.f32 %v607_v2, %v1730_v16 }
 0x18a   : > { %v1174_v27 = vpop.f32.mrf.mxu1  ;;  %v1213_v3 = vpop.f32.mrf.mxu0 }
 0x18b   : > { %965 = vst.msk [vmem:[%s1750_s9 + $0x28] sm:$0xff] %vm959_vm4, %v946_v23  ;;  %v929_v28 = vadd.f32 %v1744_v4, %v904_v9 }
 0x18c   : > { %v612_v31 = vpop.f32.mrf.mxu1  ;;  %v854_v46 = vpop.f32.mrf.mxu0 }
 0x18d   : > { %v947_v47 = vmax.f32 %v929_v28, 0.0  ;;  %v905_v44 = vadd.f32 %v854_v46, %v608_v26  ;;  %v613_v33 = vadd.f32 %v612_v31, %v1734_v61 }
 0x18e   : > { %v1177_v50 = vpop.f32.mrf.mxu1  ;;  %v1214_v32 = vpop.f32.mrf.mxu0 }
 0x18f   : > { %966 = vst.msk [vmem:[%s1750_s9 + $0x30] sm:$0xff] %vm959_vm4, %v947_v47  ;;  %v930_v37 = vadd.f32 %v1744_v4, %v905_v44 }
 0x190   : > { %v615_v13 = vpop.f32.mrf.mxu1  ;;  %v859_v18 = vpop.f32.mrf.mxu0 }
 0x191   : > { %v948_v51 = vmax.f32 %v930_v37, 0.0  ;;  %v906_v16 = vadd.f32 %v859_v18, %v613_v33  ;;  %v616_v56 = vadd.f32 %v615_v13, %v1738_v62 }
 0x192   : > { %v1178_v52 = vpop.f32.mrf.mxu1  ;;  %v1217_v55 = vpop.f32.mrf.mxu0 }
 0x193   : > { %967 = vst.msk [vmem:[%s1750_s9 + $0x38] sm:$0xff] %vm959_vm4, %v948_v51  ;;  %v931_v57 = vadd.f32 %v1744_v4, %v906_v16 }
 0x194   : > { %v620_v58 = vpop.f32.mrf.mxu1  ;;  %v862_v11 = vpop.f32.mrf.mxu0 }
 0x195   : > { %v949_v19 = vmax.f32 %v931_v57, 0.0  ;;  %v907_v61 = vadd.f32 %v862_v11, %v616_v56  ;;  %v621_v38 = vadd.f32 %v620_v58, %v1714_v20 }
 0x196   : > { %v1181_v29 = vpop.f32.mrf.mxu1  ;;  %v1218_v36 = vpop.f32.mrf.mxu0 }
 0x197   : > { %968 = vst.msk [vmem:[%s1750_s9 + $0x40] sm:$0xff] %vm959_vm4, %v949_v19  ;;  %v932_v42 = vadd.f32 %v1744_v4, %v907_v61 }
 0x198   : > { %v623_v14 = vpop.f32.mrf.mxu1  ;;  %v867_v15 = vpop.f32.mrf.mxu0 }
 0x199   : > { %v950_v41 = vmax.f32 %v932_v42, 0.0  ;;  %v908_v62 = vadd.f32 %v867_v15, %v621_v38  ;;  %v624_v30 = vadd.f32 %v623_v14, %v1716_v24 }
 0x19a   : > { %v1182_v43 = vpop.f32.mrf.mxu1  ;;  %v1221_v45 = vpop.f32.mrf.mxu0 }
 0x19b   : > { %969 = vst.msk [vmem:[%s1750_s9 + $0x48] sm:$0xff] %vm959_vm4, %v950_v41  ;;  %v933_v25 = vadd.f32 %v1744_v4, %v908_v62 }
 0x19c   : > { %v628_v34 = vpop.f32.mrf.mxu1  ;;  %v870_v39 = vpop.f32.mrf.mxu0 }
 0x19d   : > { %v951_v8 = vmax.f32 %v933_v25, 0.0  ;;  %v909_v20 = vadd.f32 %v870_v39, %v624_v30  ;;  %v629_v40 = vadd.f32 %v628_v34, %v1718_v35 }
 0x19e   : > { %v1185_v0 = vpop.f32.mrf.mxu1  ;;  %v1222_v5 = vpop.f32.mrf.mxu0 }
 0x19f   : > { %970 = vst.msk [vmem:[%s1750_s9 + $0x50] sm:$0xff] %vm959_vm4, %v951_v8  ;;  %v934_v7 = vadd.f32 %v1744_v4, %v909_v20 }
 0x1a0   : > { %v631_v54 = vpop.f32.mrf.mxu1  ;;  %v875_v10 = vpop.f32.mrf.mxu0 }
 0x1a1   : > { %v952_v59 = vmax.f32 %v934_v7, 0.0  ;;  %v910_v24 = vadd.f32 %v875_v10, %v629_v40  ;;  %v632_v21 = vadd.f32 %v631_v54, %v1720_v6 }
 0x1a2   : > { %v1186_v49 = vpop.f32.mrf.mxu1  ;;  %v1225_v60 = vpop.f32.mrf.mxu0 }
 0x1a3   : > { %971 = vst.msk [vmem:[%s1750_s9 + $0x58] sm:$0xff] %vm959_vm4, %v952_v59  ;;  %v935_v1 = vadd.f32 %v1744_v4, %v910_v24 }
 0x1a4   : > { %v636_v63 = vpop.f32.mrf.mxu1  ;;  %v878_v2 = vpop.f32.mrf.mxu0 }
 0x1a5   : > { %v953_v22 = vmax.f32 %v935_v1, 0.0  ;;  %v911_v35 = vadd.f32 %v878_v2, %v632_v21  ;;  %v637_v27 = vadd.f32 %v636_v63, %v1724_v12 }
 0x1a6   : > { %v1189_v23 = vpop.f32.mrf.mxu1  ;;  %v1226_v9 = vpop.f32.mrf.mxu0 }
 0x1a7   : > { %972 = vst.msk [vmem:[%s1750_s9 + $0x60] sm:$0xff] %vm959_vm4, %v953_v22  ;;  %v936_v3 = vadd.f32 %v1744_v4, %v911_v35 }
 0x1a8   : > { %v639_v26 = vpop.f32.mrf.mxu1  ;;  %v883_v28 = vpop.f32.mrf.mxu0 }
 0x1a9   : > { %v954_v31 = vmax.f32 %v936_v3, 0.0  ;;  %v912_v6 = vadd.f32 %v883_v28, %v637_v27  ;;  %v640_v44 = vadd.f32 %v639_v26, %v1728_v53 }
 0x1aa   : > { %v1190_v46 = vpop.f32.mrf.mxu1  ;;  %v1229_v47 = vpop.f32.mrf.mxu0 }
 0x1ab   : > { %973 = vst.msk [vmem:[%s1750_s9 + $0x68] sm:$0xff] %vm959_vm4, %v954_v31  ;;  %v937_v50 = vadd.f32 %v1744_v4, %v912_v6 }
 0x1ac   : > { %v644_v32 = vpop.f32.mrf.mxu1  ;;  %v886_v33 = vpop.f32.mrf.mxu0 }
 0x1ad   : > { %v955_v37 = vmax.f32 %v937_v50, 0.0  ;;  %v913_v12 = vadd.f32 %v886_v33, %v640_v44  ;;  %v645_v51 = vadd.f32 %v644_v32, %v1732_v48 }
 0x1ae   : > { %v1193_v13 = vpop.f32.mrf.mxu1  ;;  %v1230_v18 = vpop.f32.mrf.mxu0 }
 0x1af   : > { %974 = vst.msk [vmem:[%s1750_s9 + $0x70] sm:$0xff] %vm959_vm4, %v955_v37  ;;  %v938_v16 = vadd.f32 %v1744_v4, %v913_v12 }
 0x1b0   : > { %v647_v52 = vpop.f32.mrf.mxu1  ;;  %v891_v55 = vpop.f32.mrf.mxu0 }
 0x1b1   : > { %v956_v53 = vmax.f32 %v938_v16, 0.0  ;;  %v914_v56 = vadd.f32 %v891_v55, %v645_v51  ;;  %v648_v11 = vadd.f32 %v647_v52, %v1736_v17 }
 0x1b2   : > { %v1194_v57 = vpop.f32.mrf.mxu1  ;;  %v1233_v58 = vpop.f32.mrf.mxu0 }
 0x1b3   : > { %975 = vst.msk [vmem:[%s1750_s9 + $0x78] sm:$0xff] %vm959_vm4, %v956_v53  ;;  %v939_v19 = vadd.f32 %v1744_v4, %v914_v56 }
 0x1b4   : > { %v894_v61 = vpop.f32.mrf.mxu0 }
 0x1b5   : > { %v957_v29 = vmax.f32 %v939_v19, 0.0  ;;  %v915_v36 = vadd.f32 %v894_v61, %v648_v11 }
 0x1b6   : > { %v1234_v38 = vpop.f32.mrf.mxu0 }
 0x1b7   : > { %976 = vst.msk [vmem:[%s1750_s9 + $0x80] sm:$0xff] %vm959_vm4, %v957_v29  ;;  %v940_v48 = vadd.f32 %v1744_v4, %v915_v36 }
 0x1b9   : > { %v958_v42 = vmax.f32 %v940_v48, 0.0 }
 0x1bb   : > { %977 = vst.msk [vmem:[%s1750_s9 + $0x88] sm:$0xff] %vm959_vm4, %v958_v42 }
 0x1bc PF: > { %s13_s12 = sadd.s32 1, %s1264_s12  }
 0x1bd   : > { %p10_p4 = scmp.ge.s32.totalorder %s13_s12, 4  }
 0x1bf   :  { %12 = sbr.rel (!%p10_p4) target bundleno = 1 (0x1), region = 64 }

// kernel: refinement_net_forward.11
= control target key start
LH: loop header
LB: loop body
LE: loop exit
PB: predicated region body
PF: predicated region fallthrough
CT: control target
= control target key end

     0   :  { %s1235_s12 = smov 0   ;;  %s1659_s0 = inlined_call_operand.vmem [shape: f32[2,102,32], index: 0, kind: input, shape index: {}]   ;;  %s1660_s1 = inlined_call_operand.vmem [shape: bf16[3,96,32], index: 1, kind: input, shape index: {}]   ;;  %s1661_s2 = inlined_call_operand.vmem [shape: f32[1,32], index: 2, kind: input, shape index: {}]   ;;  %s1662_s3 = inlined_call_operand.vmem [shape: f32[2,80,32], index: 3, kind: output, shape index: {}]  }
   0x1 LB: > { %s963_s13 = sadd.s32 4294967295, %s1209_s12   ;;  %p967_p0 = scmp.ge.s32.totalorder %s1209_s12, 1  ;;  %s1209_s12 = sphi %s1235_s12, %s13_s12  }
   0x2   : > { %p137_p1 = scmp.lt.s32.totalorder %s1209_s12, 3 }
   0x4   : > { %p138_p2 = pnand %p967_p0, %p137_p1 }
   0x5   : > { %p161_p3 = scmp.lt.s32.totalorder (!%p138_p2), %s963_s13, 1  ;;  %s1213_s24 = smov (!%p138_p2), 32  }
   0x6   : > { %141 = sbr.rel (%p138_p2) target bundleno = 400 (0x190), region = 32  ;;  %s1214_s27 = smov (!%p138_p2), 64  }
   0xb   : > { %v1185_v0 = vld [vmem:[%s1660_s1 + $0x58] sm:$0xff]   ;;  %v1211_v1 = vmov 0.0   ;;  %s1664_s13 = smov (!%p161_p3, %s963_s13), 1  ;;  %v1186_v2 = vld [vmem:[%s1660_s1 + $0x50] sm:$0xff]   ;;  %v1187_v3 = vld [vmem:[%s1660_s1 + $0x48] sm:$0xff]   ;;  %vm1212_vm0 = vmmov 0  }
   0xc   : > { %1159 = vmatprep.subr.bf16.mxu1 %v1211_v1  ;;  %1063 = vmatprep.subr.bf16.mxu0 %v1211_v1  ;;  %s1171_s18 = smul.u32 104, %s1664_s13  ;;  %v1188_v15 = vld [vmem:[%s1660_s1 + $0x40] sm:$0xff]   ;;  %v1189_v22 = vld [vmem:[%s1660_s1 + $0x38] sm:$0xff]   ;;  %v1190_v33 = vld [vmem:[%s1660_s1 + $0x30] sm:$0xff]   ;;  %vm247_vm1 = vcmask 261120   ;;  %vm263_vm2 = vcmask 523264  }
   0xd   : > { %1165 = vmatpush3.bf16.msra.mxu1 %v1185_v0  ;;  %1064 = vmatpush3.bf16.msra.mxu0 %v1185_v0  ;;  %vm426_vm3 = vcmask 785408  }
   0xe   : > { %1160 = vmatprep.subr.bf16.mxu1 %v1211_v1  ;;  %1065 = vmatprep.subr.bf16.mxu0 %v1211_v1  ;;  %s1259_s21 = scalar_lea.vmem %s1659_s0, %s1171_s18 }
   0xf   : > { %v298_v4 = vld [vmem:[%s1259_s21 + $0x3b] sm:$0xff]  ;;  %v299_v5 = vld [vmem:[%s1259_s21 + $0x43] sm:$0xff]  ;;  %v292_v9 = vld [vmem:[%s1259_s21 + $0xb] sm:$0xff]  ;;  %1087 = vmatprep.mubr.msk.bf16.mxu1 %vm1212_vm0, %v1211_v1  ;;  %1075 = vmatprep.mubr.msk.bf16.mxu0 %vm1212_vm0, %v1211_v1 }
  0x10   : > { %v1267_v6 = vld [vmem:[%s1259_s21 + $0x3c] sm:$0xff]  ;;  %v305_v7 = vpack.c.bf16 %v299_v5, %v298_v4  ;;  %v1272_v8 = vld [vmem:[%s1259_s21 + $0x44] sm:$0xff]  ;;  %v293_v10 = vld [vmem:[%s1259_s21 + $0x13] sm:$0xff] }
  0x11   : > { %1166 = vmatpush3.bf16.msra.mxu1 %v1186_v2  ;;  %1066 = vmatpush3.bf16.msra.mxu0 %v1186_v2  ;;  %v320_v11 = vpack.c.bf16 %v1272_v8, %v1267_v6  ;;  %v307_v12 = vld [vmem:[%s1259_s21 + $0xc] sm:$0xff]  ;;  %v1284_v13 = vld [vmem:[%s1259_s21 + $0x14] sm:$0xff]  ;;  %v302_v14 = vpack.c.bf16 %v293_v10, %v292_v9  ;;  %v295_v18 = vld [vmem:[%s1259_s21 + $0x23] sm:$0xff] }
  0x12   : > { %1161 = vmatprep.subr.bf16.mxu1 %v1211_v1  ;;  %1067 = vmatprep.subr.bf16.mxu0 %v1211_v1  ;;  %v317_v16 = vpack.c.bf16 %v1284_v13, %v307_v12  ;;  %v294_v17 = vld [vmem:[%s1259_s21 + $0x1b] sm:$0xff]  ;;  %v1299_v20 = vld [vmem:[%s1259_s21 + $0x24] sm:$0xff]  ;;  %v301_v25 = vld [vmem:[%s1259_s21 + $0x53] sm:$0xff] }
  0x13   : > { %333 = vrot.lane.b32.xlu0 %v305_v7, %s1213_s24  ;;  %348 = vrot.lane.b32.xlu1 %v320_v11, %s1214_s27  ;;  %v1296_v19 = vld [vmem:[%s1259_s21 + $0x1c] sm:$0xff]  ;;  %v303_v21 = vpack.c.bf16 %v295_v18, %v294_v17  ;;  %v300_v24 = vld [vmem:[%s1259_s21 + $0x4b] sm:$0xff] }
  0x14   : > { %v318_v23 = vpack.c.bf16 %v1299_v20, %v1296_v19  ;;  %v1313_v26 = vld [vmem:[%s1259_s21 + $0x4c] sm:$0xff]  ;;  %v1316_v27 = vld [vmem:[%s1259_s21 + $0x54] sm:$0xff]  ;;  %v306_v30 = vpack.c.bf16 %v301_v25, %v300_v24  ;;  %v1340_v37 = vld [vmem:[%s1259_s21 + $0x22] sm:$0xff]  ;;  %v639_v49 = vpack.c.bf16 %v1296_v19, %v1284_v13 }
  0x15   : > { %1167 = vmatpush3.bf16.msra.mxu1 %v1187_v3  ;;  %1068 = vmatpush3.bf16.msra.mxu0 %v1187_v3  ;;  %v1319_v28 = vld [vmem:[%s1259_s21 + $0xa] sm:$0xff]  ;;  %v1322_v29 = vld [vmem:[%s1259_s21 + $0x12] sm:$0xff]  ;;  %v321_v34 = vpack.c.bf16 %v1316_v27, %v1313_v26  ;;  %v1337_v36 = vld [vmem:[%s1259_s21 + $0x1a] sm:$0xff] }
  0x16   : > { %1162 = vmatprep.subr.bf16.mxu1 %v1211_v1  ;;  %1069 = vmatprep.subr.bf16.mxu0 %v1211_v1  ;;  %v296_v31 = vld [vmem:[%s1259_s21 + $0x2b] sm:$0xff]  ;;  %v287_v32 = vpack.c.bf16 %v1322_v29, %v1319_v28  ;;  %v297_v35 = vld [vmem:[%s1259_s21 + $0x33] sm:$0xff]  ;;  %v288_v40 = vpack.c.bf16 %v1340_v37, %v1337_v36  ;;  %v187_v45 = vld [vmem:[%s1259_s21 + $0x1] sm:$0xff]  ;;  %v213_v4 = vpack.c.bf16 %v1337_v36, %v1322_v29 }
  0x17   : > { %327 = vrot.lane.b32.xlu0 %v302_v14, %s1213_s24  ;;  %342 = vrot.lane.b32.xlu1 %v317_v16, %s1214_s27  ;;  %v1344_v38 = vld [vmem:[%s1259_s21 + $0x2c] sm:$0xff]  ;;  %v1347_v39 = vld [vmem:[%s1259_s21 + $0x34] sm:$0xff]  ;;  %v304_v41 = vpack.c.bf16 %v297_v35, %v296_v31  ;;  %v642_v31 = vpack.c.bf16 %v1313_v26, %v1272_v8 }
  0x18   : > { %v1354_v42 = vld [vmem:[%s1259_s21 + $0x2a] sm:$0xff]  ;;  %v1357_v43 = vld [vmem:[%s1259_s21 + $0x32] sm:$0xff]  ;;  %v319_v44 = vpack.c.bf16 %v1347_v39, %v1344_v38  ;;  %v202_v48 = vld [vmem:[%s1259_s21 + $0x2] sm:$0xff]  ;;  %v640_v63 = vpack.c.bf16 %v1344_v38, %v1299_v20  ;;  %v641_v14 = vpack.c.bf16 %v1267_v6, %v1347_v39 }
  0x19   : > { %1168 = vmatpush3.bf16.msra.mxu1 %v1188_v15  ;;  %1070 = vmatpush3.bf16.msra.mxu0 %v1188_v15  ;;  %v188_v46 = vld [vmem:[%s1259_s21 + $0x9] sm:$0xff]  ;;  %v289_v47 = vpack.c.bf16 %v1357_v43, %v1354_v42  ;;  %v1374_v51 = vld [vmem:[%s1259_s21 + $0x52] sm:$0xff]  ;;  %v212_v55 = vpack.c.bf16 %v1319_v28, %v202_v48  ;;  %v645_v56 = vld [vmem:[%s1259_s21 + $0x1d] sm:$0xff]  ;;  %v214_v16 = vpack.c.bf16 %v1354_v42, %v1340_v37 }
  0x1a   : > { %1163 = vmatprep.subr.bf16.mxu1 %v1211_v1  ;;  %1071 = vmatprep.subr.bf16.mxu0 %v1211_v1  ;;  %v1371_v50 = vld [vmem:[%s1259_s21 + $0x4a] sm:$0xff]  ;;  %v197_v52 = vpack.c.bf16 %v188_v46, %v187_v45  ;;  %v644_v53 = vld [vmem:[%s1259_s21 + $0x15] sm:$0xff]  ;;  %v660_v58 = vld [vmem:[%s1259_s21 + $0x1e] sm:$0xff] }
  0x1b   : > { %329 = vrot.lane.b32.xlu0 %v303_v21, %s1213_s24  ;;  %344 = vrot.lane.b32.xlu1 %v318_v23, %s1214_s27  ;;  %v291_v54 = vpack.c.bf16 %v1374_v51, %v1371_v50  ;;  %v659_v57 = vld [vmem:[%s1259_s21 + $0x16] sm:$0xff]  ;;  %v654_v59 = vpack.c.bf16 %v645_v56, %v644_v53  ;;  %v646_v0 = vld [vmem:[%s1259_s21 + $0x25] sm:$0xff] }
  0x1c   : > { %v189_v60 = vld [vmem:[%s1259_s21 + $0x11] sm:$0xff]  ;;  %v669_v61 = vpack.c.bf16 %v660_v58, %v659_v57  ;;  %v190_v62 = vld [vmem:[%s1259_s21 + $0x19] sm:$0xff]  ;;  %v661_v5 = vld [vmem:[%s1259_s21 + $0x26] sm:$0xff] }
  0x1d   : > { %1169 = vmatpush3.bf16.msra.mxu1 %v1189_v22  ;;  %1072 = vmatpush3.bf16.msra.mxu0 %v1189_v22  ;;  %v198_v2 = vpack.c.bf16 %v190_v62, %v189_v60  ;;  %v647_v3 = vld [vmem:[%s1259_s21 + $0x2d] sm:$0xff]  ;;  %v191_v11 = vld [vmem:[%s1259_s21 + $0x21] sm:$0xff]  ;;  %v648_v17 = vld [vmem:[%s1259_s21 + $0x35] sm:$0xff] }
  0x1e   : > { %1164 = vmatprep.subr.bf16.mxu1 %v1211_v1  ;;  %1073 = vmatprep.subr.bf16.mxu0 %v1211_v1  ;;  %v662_v7 = vld [vmem:[%s1259_s21 + $0x2e] sm:$0xff]  ;;  %v655_v9 = vpack.c.bf16 %v647_v3, %v646_v0  ;;  %v649_v18 = vld [vmem:[%s1259_s21 + $0x3d] sm:$0xff]  ;;  %v665_v45 = vld [vmem:[%s1259_s21 + $0x46] sm:$0xff] }
  0x1f   : > { %335 = vrot.lane.b32.xlu0 %v306_v30, %s1213_s24  ;;  %350 = vrot.lane.b32.xlu1 %v321_v34, %s1214_s27  ;;  %v670_v10 = vpack.c.bf16 %v662_v7, %v661_v5  ;;  %v192_v12 = vld [vmem:[%s1259_s21 + $0x29] sm:$0xff]  ;;  %v663_v21 = vld [vmem:[%s1259_s21 + $0x36] sm:$0xff]  ;;  %v656_v23 = vpack.c.bf16 %v649_v18, %v648_v17 }
  0x20   : > { %v199_v15 = vpack.c.bf16 %v192_v12, %v191_v11  ;;  %v664_v22 = vld [vmem:[%s1259_s21 + $0x3e] sm:$0xff]  ;;  %v193_v25 = vld [vmem:[%s1259_s21 + $0x31] sm:$0xff]  ;;  %v1193_v17 = vld [vmem:[%s1660_s1 + $0x88] sm:$0xff]  }
  0x21   : > { %1170 = vmatpush3.bf16.msra.mxu1 %v1190_v33  ;;  %1074 = vmatpush3.bf16.msra.mxu0 %v1190_v33  ;;  %v671_v24 = vpack.c.bf16 %v664_v22, %v663_v21  ;;  %v194_v30 = vld [vmem:[%s1259_s21 + $0x39] sm:$0xff]  ;;  %v666_v46 = vld [vmem:[%s1259_s21 + $0x4e] sm:$0xff]  ;;  %v195_v53 = vld [vmem:[%s1259_s21 + $0x41] sm:$0xff] }
  0x22   : > { %1095 = vmatprep.subr.bf16.mxu1 %v1211_v1  ;;  %1127 = vmatprep.subr.bf16.mxu0 %v1211_v1  ;;  %v209_v33 = vld [vmem:[%s1259_s21 + $0x3a] sm:$0xff]  ;;  %v200_v34 = vpack.c.bf16 %v194_v30, %v193_v25  ;;  %v210_v57 = vld [vmem:[%s1259_s21 + $0x42] sm:$0xff]  ;;  %v1196_v36 = vld [vmem:[%s1660_s1 + $0x10] sm:$0xff]  }
  0x23   : > { %331 = vrot.lane.b32.xlu0 %v304_v41, %s1213_s24  ;;  %346 = vrot.lane.b32.xlu1 %v319_v44, %s1214_s27  ;;  %v215_v35 = vpack.c.bf16 %v209_v33, %v1357_v43  ;;  %v650_v41 = vld [vmem:[%s1259_s21 + $0x45] sm:$0xff]  ;;  %v651_v44 = vld [vmem:[%s1259_s21 + $0x4d] sm:$0xff]  ;;  %v216_v60 = vpack.c.bf16 %v1371_v50, %v210_v57  ;;  %v290_v5 = vpack.c.bf16 %v210_v57, %v209_v33 }
  0x24   : > { %v657_v48 = vpack.c.bf16 %v651_v44, %v650_v41  ;;  %v1433_v56 = vld [vmem:[%s1259_s21 + $0x5c] sm:$0xff]  ;;  %v173_v41 = vld [vmem:[%s1259_s21 + $0x8] sm:$0xff]  ;;  %v1199_v51 = vld [vmem:[%s1660_s1 + $0x70] sm:$0xff]  }
  0x25   : > { %v643_v58 = vpack.c.bf16 %v1433_v56, %v1316_v27  ;;  %v653_v62 = vld [vmem:[%s1259_s21 + $0x5d] sm:$0xff]  ;;  %v1198_v50 = vld [vmem:[%s1660_s1 + $0x8] sm:$0xff]  }
  0x26   : > { %v667_v0 = vld [vmem:[%s1259_s21 + $0x56] sm:$0xff]  ;;  %v1195_v28 = vld [vmem:[%s1660_s1 + $0x80] sm:$0xff]   ;;  %v1201_v43 = vld [vmem:[%s1660_s1 + $0x68] sm:$0xff]  }
  0x27   : > { %222 = vrot.lane.b32.xlu0 %v197_v52, %s1213_s24  ;;  %237 = vrot.lane.b32.xlu1 %v212_v55, %s1214_s27  ;;  %v672_v52 = vpack.c.bf16 %v666_v46, %v665_v45  ;;  %v196_v55 = vld [vmem:[%s1259_s21 + $0x49] sm:$0xff]  ;;  %v1197_v37 = vld [vmem:[%s1660_s1 + $0x78] sm:$0xff]  }
  0x28   : > { %v1200_v42 = vld [vmem:[%s1660_s1] sm:$0xff]   ;;  %v175_v57 = vld [vmem:[%s1259_s21 + $0x18] sm:$0xff]  ;;  %v177_v19 = vld [vmem:[%s1259_s21 + $0x28] sm:$0xff] }
  0x29   : > { %v176_v13 = vld [vmem:[%s1259_s21 + $0x20] sm:$0xff] }
  0x2b   : > { %679 = vrot.lane.b32.xlu0 %v654_v59, %s1213_s24  ;;  %694 = vrot.lane.b32.xlu1 %v669_v61, %s1214_s27  ;;  %v201_v59 = vpack.c.bf16 %v196_v55, %v195_v53  ;;  %v652_v61 = vld [vmem:[%s1259_s21 + $0x55] sm:$0xff] }
  0x2c   : > { %v658_v3 = vpack.c.bf16 %v653_v62, %v652_v61  ;;  %v174_v55 = vld [vmem:[%s1259_s21 + $0x10] sm:$0xff] }
  0x2f   : > { %224 = vrot.lane.b32.xlu0 %v198_v2, %s1213_s24  ;;  %239 = vrot.lane.b32.xlu1 %v213_v4, %s1214_s27  ;;  %v668_v2 = vld [vmem:[%s1259_s21 + $0x5e] sm:$0xff] }
  0x30   : > { %v673_v4 = vpack.c.bf16 %v668_v2, %v667_v0  ;;  %v183_v2 = vpack.c.bf16 %v175_v57, %v174_v55 }
  0x33   : > { %681 = vrot.lane.b32.xlu0 %v655_v9, %s1213_s24  ;;  %696 = vrot.lane.b32.xlu1 %v670_v10, %s1214_s27  ;;  %v1191_v9 = vld [vmem:[%s1660_s1 + $0x28] sm:$0xff]  }
  0x37   : > { %226 = vrot.lane.b32.xlu0 %v199_v15, %s1213_s24  ;;  %241 = vrot.lane.b32.xlu1 %v214_v16, %s1214_s27  ;;  %v1192_v16 = vld [vmem:[%s1660_s1 + $0x20] sm:$0xff]  }
  0x3b   : > { %683 = vrot.lane.b32.xlu0 %v656_v23, %s1213_s24  ;;  %698 = vrot.lane.b32.xlu1 %v671_v24, %s1214_s27  ;;  %v1194_v24 = vld [vmem:[%s1660_s1 + $0x18] sm:$0xff]  }
  0x3f   : > { %228 = vrot.lane.b32.xlu0 %v200_v34, %s1213_s24  ;;  %243 = vrot.lane.b32.xlu1 %v215_v35, %s1214_s27  ;;  %v172_v35 = vld [vmem:[%s1259_s21] sm:$0xff] }
  0x40   : > { %v182_v46 = vpack.c.bf16 %v173_v41, %v172_v35 }
  0x43   : > { %685 = vrot.lane.b32.xlu0 %v657_v48, %s1213_s24  ;;  %700 = vrot.lane.b32.xlu1 %v672_v52, %s1214_s27 }
  0x47   : > { %230 = vrot.lane.b32.xlu0 %v201_v59, %s1213_s24  ;;  %245 = vrot.lane.b32.xlu1 %v216_v60, %s1214_s27  ;;  %v1202_v60 = vld [vmem:[%s1660_s1 + $0x60] sm:$0xff]  }
  0x4b   : > { %687 = vrot.lane.b32.xlu0 %v658_v3, %s1213_s24  ;;  %702 = vrot.lane.b32.xlu1 %v673_v4, %s1214_s27 }
  0x85   : > { %v334_v7 = vpop.permute.xlu0 %333  ;;  %v349_v11 = vpop.permute.xlu1 %348 }
  0x86   : > { %v363_v10 = vsel %vm247_vm1, %v290_v5, %v334_v7 }
  0x87   : > { %v374_v12 = vsel %vm263_vm2, %v363_v10, %v349_v11 }
  0x88   : > { %1088 = vmatmul.mubr.msk.bf16.vlgmr.msra.gmra.mxu1 %vm426_vm3, %v374_v12  ;;  %v184_v12 = vpack.c.bf16 %v177_v19, %v176_v13 }
  0x89   : > { %1096 = vmatpush3.bf16.msra.mxu1 %v1191_v9  ;;  %v328_v15 = vpop.permute.xlu0 %327  ;;  %1091 = vmatprep.mubr.msk.bf16.mxu1 %vm1212_vm0, %v1211_v1  ;;  %v343_v21 = vpop.permute.xlu1 %342 }
  0x8a   : > { %v354_v18 = vsel %vm247_vm1, %v287_v32, %v328_v15  ;;  %1097 = vmatprep.subr.bf16.mxu1 %v1211_v1 }
  0x8b   : > { %v368_v22 = vsel %vm263_vm2, %v354_v18, %v343_v21  ;;  %v178_v21 = vld [vmem:[%s1259_s21 + $0x30] sm:$0xff] }
  0x8c   : > { %1076 = vmatmul.mubr.msk.bf16.vlgmr.msra.gmra.mxu0 %vm426_vm3, %v368_v22  ;;  %v179_v22 = vld [vmem:[%s1259_s21 + $0x38] sm:$0xff] }
  0x8d   : > { %1098 = vmatpush3.bf16.msra.mxu1 %v1192_v16  ;;  %1128 = vmatpush3.bf16.msra.mxu0 %v1193_v17  ;;  %v330_v23 = vpop.permute.xlu0 %329  ;;  %v345_v32 = vpop.permute.xlu1 %344 }
  0x8e   : > { %v357_v29 = vsel %vm247_vm1, %v288_v40, %v330_v23  ;;  %1099 = vmatprep.subr.bf16.mxu1 %v1211_v1  ;;  %1129 = vmatprep.subr.bf16.mxu0 %v1211_v1 }
  0x8f   : > { %1079 = vmatprep.mubr.msk.bf16.mxu0 %vm1212_vm0, %v1211_v1  ;;  %v370_v25 = vsel %vm263_vm2, %v357_v29, %v345_v32 }
  0x91   : > { %1100 = vmatpush3.bf16.msra.mxu1 %v1194_v24  ;;  %1130 = vmatpush3.bf16.msra.mxu0 %v1195_v28  ;;  %v336_v30 = vpop.permute.xlu0 %335  ;;  %v351_v33 = vpop.permute.xlu1 %350  ;;  %v185_v24 = vpack.c.bf16 %v179_v22, %v178_v21 }
  0x92   : > { %v366_v40 = vsel %vm247_vm1, %v291_v54, %v336_v30  ;;  %1101 = vmatprep.subr.bf16.mxu1 %v1211_v1  ;;  %1131 = vmatprep.subr.bf16.mxu0 %v1211_v1  ;;  %v180_v30 = vld [vmem:[%s1259_s21 + $0x40] sm:$0xff] }
  0x93   : > { %v376_v34 = vsel %vm263_vm2, %v366_v40, %v351_v33 }
  0x94   : > { %1080 = vmatmul.mubr.msk.bf16.gmra.mxu0 %vm426_vm3, %v370_v25  ;;  %1092 = vmatmul.mubr.msk.bf16.gmra.mxu1 %vm426_vm3, %v376_v34 }
  0x95   : > { %1102 = vmatpush3.bf16.msra.mxu1 %v1196_v36  ;;  %1132 = vmatpush3.bf16.msra.mxu0 %v1197_v37  ;;  %v332_v44 = vpop.permute.xlu0 %331  ;;  %v347_v45 = vpop.permute.xlu1 %346  ;;  %v181_v36 = vld [vmem:[%s1259_s21 + $0x48] sm:$0xff]  ;;  %s1172_s21 = smul.u32 80, %s1664_s13 }
  0x96   : > { %1103 = vmatprep.subr.bf16.mxu1 %v1211_v1  ;;  %1133 = vmatprep.subr.bf16.mxu0 %v1211_v1  ;;  %v360_v54 = vsel %vm247_vm1, %v289_v47, %v332_v44  ;;  %v186_v40 = vpack.c.bf16 %v181_v36, %v180_v30 }
  0x97   : > { %1083 = vmatprep.mubr.msk.bf16.mxu0 %vm1212_vm0, %v1211_v1  ;;  %1107 = vmatprep.mubr.msk.bf16.mxu1 %vm1212_vm0, %v1211_v1  ;;  %v372_v48 = vsel %vm263_vm2, %v360_v54, %v347_v45  ;;  %s1621_s9 = scalar_lea.vmem %s1662_s3, %s1172_s21 }
  0x99   : > { %1104 = vmatpush3.bf16.msra.mxu1 %v1198_v50  ;;  %1134 = vmatpush3.bf16.msra.mxu0 %v1199_v51  ;;  %v223_v47 = vpop.permute.xlu0 %222  ;;  %v238_v53 = vpop.permute.xlu1 %237 }
  0x9a   : > { %1105 = vmatprep.subr.bf16.mxu1 %v1211_v1  ;;  %1135 = vmatprep.subr.bf16.mxu0 %v1211_v1  ;;  %v250_v52 = vsel %vm247_vm1, %v182_v46, %v223_v47 }
  0x9b   : > { %v265_v59 = vsel %vm263_vm2, %v250_v52, %v238_v53 }
  0x9c   : > { %1084 = vmatmul.mubr.msk.bf16.gmra.mxu0 %vm426_vm3, %v372_v48 }
  0x9d   : > { %1106 = vmatpush3.bf16.msra.mxu1 %v1200_v42  ;;  %1136 = vmatpush3.bf16.msra.mxu0 %v1201_v43  ;;  %v680_v61 = vpop.permute.xlu0 %679  ;;  %v695_v0 = vpop.permute.xlu1 %694 }
  0x9e   : > { %1137 = vmatprep.subr.bf16.mxu0 %v1211_v1  ;;  %v706_v62 = vsel %vm247_vm1, %v639_v49, %v680_v61  ;;  %1139 = vmatprep.mubr.msk.bf16.mxu0 %vm1212_vm0, %v1211_v1 }
  0x9f   : > { %v720_v3 = vsel %vm263_vm2, %v706_v62, %v695_v0 }
  0xa0   : > { %1108 = vmatmul.mubr.msk.bf16.vlgmr.msra.gmra.mxu1 %vm426_vm3, %v265_v59 }
  0xa1   : > { %1138 = vmatpush3.bf16.msra.mxu0 %v1202_v60  ;;  %v225_v4 = vpop.permute.xlu0 %224  ;;  %1111 = vmatprep.mubr.msk.bf16.mxu1 %vm1212_vm0, %v1211_v1  ;;  %v240_v7 = vpop.permute.xlu1 %239 }
  0xa2   : > { %v253_v5 = vsel %vm247_vm1, %v183_v2, %v225_v4 }
  0xa3   : > { %v267_v49 = vsel %vm263_vm2, %v253_v5, %v240_v7  ;;  %v1615_v7 = vld [vmem:[%s1661_s2] ss:$0 sm:$0xff] }
  0xa4   : > { %1140 = vmatmul.mubr.msk.bf16.vlgmr.msra.gmra.mxu0 %vm426_vm3, %v720_v3 }
  0xa5   : > { %v682_v9 = vpop.permute.xlu0 %681  ;;  %1143 = vmatprep.mubr.msk.bf16.mxu0 %vm1212_vm0, %v1211_v1  ;;  %v697_v11 = vpop.permute.xlu1 %696 }
  0xa6   : > { %v709_v10 = vsel %vm247_vm1, %v640_v63, %v682_v9 }
  0xa7   : > { %v722_v15 = vsel %vm263_vm2, %v709_v10, %v697_v11 }
  0xa8   : > { %1112 = vmatmul.mubr.msk.bf16.gmra.mxu1 %vm426_vm3, %v267_v49 }
  0xa9   : > { %v227_v16 = vpop.permute.xlu0 %226  ;;  %1115 = vmatprep.mubr.msk.bf16.mxu1 %vm1212_vm0, %v1211_v1  ;;  %v242_v18 = vpop.permute.xlu1 %241 }
  0xaa   : > { %v256_v17 = vsel %vm247_vm1, %v184_v12, %v227_v16 }
  0xab   : > { %v269_v20 = vsel %vm263_vm2, %v256_v17, %v242_v18 }
  0xac   : > { %1144 = vmatmul.mubr.msk.bf16.gmra.mxu0 %vm426_vm3, %v722_v15 }
  0xad   : > { %v684_v38 = vpop.permute.xlu0 %683  ;;  %1147 = vmatprep.mubr.msk.bf16.mxu0 %vm1212_vm0, %v1211_v1  ;;  %v699_v23 = vpop.permute.xlu1 %698 }
  0xae   : > { %v712_v63 = vsel %vm247_vm1, %v641_v14, %v684_v38 }
  0xaf   : > { %v724_v28 = vsel %vm263_vm2, %v712_v63, %v699_v23 }
  0xb0   : > { %1116 = vmatmul.mubr.msk.bf16.gmra.mxu1 %vm426_vm3, %v269_v20 }
  0xb1   : > { %v229_v29 = vpop.permute.xlu0 %228  ;;  %1119 = vmatprep.mubr.msk.bf16.mxu1 %vm1212_vm0, %v1211_v1  ;;  %v244_v25 = vpop.permute.xlu1 %243 }
  0xb2   : > { %v259_v32 = vsel %vm247_vm1, %v185_v24, %v229_v29 }
  0xb3   : > { %v271_v6 = vsel %vm263_vm2, %v259_v32, %v244_v25 }
  0xb4   : > { %1148 = vmatmul.mubr.msk.bf16.gmra.mxu0 %vm426_vm3, %v724_v28 }
  0xb5   : > { %v686_v39 = vpop.permute.xlu0 %685  ;;  %1151 = vmatprep.mubr.msk.bf16.mxu0 %vm1212_vm0, %v1211_v1  ;;  %v701_v37 = vpop.permute.xlu1 %700 }
  0xb6   : > { %v715_v14 = vsel %vm247_vm1, %v642_v31, %v686_v39 }
  0xb7   : > { %v726_v33 = vsel %vm263_vm2, %v715_v14, %v701_v37 }
  0xb8   : > { %1120 = vmatmul.mubr.msk.bf16.gmra.mxu1 %vm426_vm3, %v271_v6 }
  0xb9   : > { %v231_v34 = vpop.permute.xlu0 %230  ;;  %1123 = vmatprep.mubr.msk.bf16.mxu1 %vm1212_vm0, %v1211_v1  ;;  %v246_v41 = vpop.permute.xlu1 %245 }
  0xba   : > { %v262_v35 = vsel %vm247_vm1, %v186_v40, %v231_v34 }
  0xbb   : > { %v273_v44 = vsel %vm263_vm2, %v262_v35, %v246_v41 }
  0xbc   : > { %1152 = vmatmul.mubr.msk.bf16.gmra.mxu0 %vm426_vm3, %v726_v33 }
  0xbd   : > { %v688_v8 = vpop.permute.xlu0 %687  ;;  %1155 = vmatprep.mubr.msk.bf16.mxu0 %vm1212_vm0, %v1211_v1  ;;  %v703_v31 = vpop.permute.xlu1 %702 }
  0xbe   : > { %v718_v26 = vsel %vm247_vm1, %v643_v58, %v688_v8 }
  0xbf   : > { %v728_v50 = vsel %vm263_vm2, %v718_v26, %v703_v31 }
  0xc0   : > { %1124 = vmatmul.mubr.msk.bf16.gmra.mxu1 %vm426_vm3, %v273_v44 }
  0xc4   : > { %1156 = vmatmul.mubr.msk.bf16.gmra.mxu0 %vm426_vm3, %v728_v50 }
 0x148   : > { %v1603_v51 = vpop.f32.mrf.mxu1 }
 0x14a   : > { %v1089_v54 = vpop.f32.mrf.mxu1 }
 0x14c   : > { %v471_v45 = vpop.f32.mrf.mxu0  ;;  %v1605_v46 = vpop.f32.mrf.mxu1 }
 0x14e   : > { %v1077_v48 = vpop.f32.mrf.mxu0  ;;  %v1090_v1 = vpop.f32.mrf.mxu1 }
 0x150   : > { %v474_v42 = vpop.f32.mrf.mxu0 }
 0x152   : > { %v1078_v43 = vpop.f32.mrf.mxu0 }
 0x154   : > { %v479_v27 = vpop.f32.mrf.mxu0  ;;  %v1607_v56 = vpop.f32.mrf.mxu1 }
 0x156   : > { %v1081_v58 = vpop.f32.mrf.mxu0  ;;  %v1093_v47 = vpop.f32.mrf.mxu1 }
 0x158   : > { %v482_v52 = vpop.f32.mrf.mxu0  ;;  %v1609_v53 = vpop.f32.mrf.mxu1 }
 0x15a   : > { %v1082_v55 = vpop.f32.mrf.mxu0  ;;  %v1094_v57 = vpop.f32.mrf.mxu1 }
 0x15c   : > { %v487_v59 = vpop.f32.mrf.mxu0 }
 0x15e   : > { %v1085_v60 = vpop.f32.mrf.mxu0 }
 0x160   : > { %v590_v61 = vpop.f32.mrf.mxu1  ;;  %v490_v62 = vpop.f32.mrf.mxu0 }
 0x161   : > { %v591_v3 = vadd.f32 %v590_v61, %v471_v45 }
 0x162   : > { %v1109_v0 = vpop.f32.mrf.mxu1  ;;  %v1086_v2 = vpop.f32.mrf.mxu0 }
 0x164   : > { %v593_v4 = vpop.f32.mrf.mxu1  ;;  %v822_v5 = vpop.f32.mrf.mxu0 }
 0x165   : > { %v861_v13 = vadd.f32 %v822_v5, %v591_v3  ;;  %v594_v9 = vadd.f32 %v593_v4, %v474_v42 }
 0x166   : > { %v1110_v19 = vpop.f32.mrf.mxu1  ;;  %v1141_v49 = vpop.f32.mrf.mxu0 }
 0x167   : > { %v878_v10 = vadd.f32 %v1615_v7, %v861_v13 }
 0x168   : > { %v598_v11 = vpop.f32.mrf.mxu1  ;;  %v825_v12 = vpop.f32.mrf.mxu0 }
 0x169   : > { %v888_v15 = vmax.f32 %v878_v10, 0.0  ;;  %v862_v16 = vadd.f32 %v825_v12, %v594_v9  ;;  %v599_v21 = vadd.f32 %v598_v11, %v479_v27 }
 0x16a   : > { %v1113_v17 = vpop.f32.mrf.mxu1  ;;  %v1142_v18 = vpop.f32.mrf.mxu0 }
 0x16b   : > { %898 = vst.msk [vmem:[%s1621_s9] sm:$0xff] %vm247_vm1, %v888_v15  ;;  %v879_v22 = vadd.f32 %v1615_v7, %v862_v16 }
 0x16c   : > { %v601_v20 = vpop.f32.mrf.mxu1  ;;  %v830_v38 = vpop.f32.mrf.mxu0 }
 0x16d   : > { %v889_v63 = vmax.f32 %v879_v22, 0.0  ;;  %v863_v23 = vadd.f32 %v830_v38, %v599_v21  ;;  %v602_v29 = vadd.f32 %v601_v20, %v482_v52 }
 0x16e   : > { %v1114_v24 = vpop.f32.mrf.mxu1  ;;  %v1145_v28 = vpop.f32.mrf.mxu0 }
 0x16f   : > { %899 = vst.msk [vmem:[%s1621_s9 + $0x8] sm:$0xff] %vm247_vm1, %v889_v63  ;;  %v880_v32 = vadd.f32 %v1615_v7, %v863_v23 }
 0x170   : > { %v606_v25 = vpop.f32.mrf.mxu1  ;;  %v833_v30 = vpop.f32.mrf.mxu0 }
 0x171   : > { %v890_v36 = vmax.f32 %v880_v32, 0.0  ;;  %v864_v6 = vadd.f32 %v833_v30, %v602_v29  ;;  %v607_v37 = vadd.f32 %v606_v25, %v487_v59 }
 0x172   : > { %v1117_v39 = vpop.f32.mrf.mxu1  ;;  %v1146_v14 = vpop.f32.mrf.mxu0 }
 0x173   : > { %900 = vst.msk [vmem:[%s1621_s9 + $0x10] sm:$0xff] %vm247_vm1, %v890_v36  ;;  %v881_v40 = vadd.f32 %v1615_v7, %v864_v6 }
 0x174   : > { %v609_v33 = vpop.f32.mrf.mxu1  ;;  %v838_v34 = vpop.f32.mrf.mxu0 }
 0x175   : > { %v891_v35 = vmax.f32 %v881_v40, 0.0  ;;  %v865_v41 = vadd.f32 %v838_v34, %v607_v37  ;;  %v610_v26 = vadd.f32 %v609_v33, %v490_v62 }
 0x176   : > { %v1118_v44 = vpop.f32.mrf.mxu1  ;;  %v1149_v8 = vpop.f32.mrf.mxu0 }
 0x177   : > { %901 = vst.msk [vmem:[%s1621_s9 + $0x18] sm:$0xff] %vm247_vm1, %v891_v35  ;;  %v882_v31 = vadd.f32 %v1615_v7, %v865_v41 }
 0x178   : > { %v614_v50 = vpop.f32.mrf.mxu1  ;;  %v841_v54 = vpop.f32.mrf.mxu0 }
 0x179   : > { %v892_v45 = vmax.f32 %v882_v31, 0.0  ;;  %v866_v48 = vadd.f32 %v841_v54, %v610_v26  ;;  %v615_v43 = vadd.f32 %v614_v50, %v1603_v51 }
 0x17a   : > { %v1121_v1 = vpop.f32.mrf.mxu1  ;;  %v1150_v42 = vpop.f32.mrf.mxu0 }
 0x17b   : > { %902 = vst.msk [vmem:[%s1621_s9 + $0x20] sm:$0xff] %vm247_vm1, %v892_v45  ;;  %v883_v27 = vadd.f32 %v1615_v7, %v866_v48 }
 0x17c   : > { %v617_v58 = vpop.f32.mrf.mxu1  ;;  %v846_v47 = vpop.f32.mrf.mxu0 }
 0x17d   : > { %v893_v52 = vmax.f32 %v883_v27, 0.0  ;;  %v867_v55 = vadd.f32 %v846_v47, %v615_v43  ;;  %v618_v60 = vadd.f32 %v617_v58, %v1605_v46 }
 0x17e   : > { %v1122_v57 = vpop.f32.mrf.mxu1  ;;  %v1153_v59 = vpop.f32.mrf.mxu0 }
 0x17f   : > { %903 = vst.msk [vmem:[%s1621_s9 + $0x28] sm:$0xff] %vm247_vm1, %v893_v52  ;;  %v884_v61 = vadd.f32 %v1615_v7, %v867_v55 }
 0x180   : > { %v622_v62 = vpop.f32.mrf.mxu1  ;;  %v849_v0 = vpop.f32.mrf.mxu0 }
 0x181   : > { %v894_v2 = vmax.f32 %v884_v61, 0.0  ;;  %v868_v51 = vadd.f32 %v849_v0, %v618_v60  ;;  %v623_v5 = vadd.f32 %v622_v62, %v1607_v56 }
 0x182   : > { %v1125_v3 = vpop.f32.mrf.mxu1  ;;  %v1154_v4 = vpop.f32.mrf.mxu0 }
 0x183   : > { %904 = vst.msk [vmem:[%s1621_s9 + $0x30] sm:$0xff] %vm247_vm1, %v894_v2  ;;  %v885_v13 = vadd.f32 %v1615_v7, %v868_v51 }
 0x184   : > { %v625_v19 = vpop.f32.mrf.mxu1  ;;  %v854_v49 = vpop.f32.mrf.mxu0 }
 0x185   : > { %v895_v46 = vmax.f32 %v885_v13, 0.0  ;;  %v869_v9 = vadd.f32 %v854_v49, %v623_v5  ;;  %v626_v12 = vadd.f32 %v625_v19, %v1609_v53 }
 0x186   : > { %v1126_v10 = vpop.f32.mrf.mxu1  ;;  %v1157_v11 = vpop.f32.mrf.mxu0 }
 0x187   : > { %905 = vst.msk [vmem:[%s1621_s9 + $0x38] sm:$0xff] %vm247_vm1, %v895_v46  ;;  %v886_v15 = vadd.f32 %v1615_v7, %v869_v9 }
 0x188   : > { %v857_v16 = vpop.f32.mrf.mxu0 }
 0x189   : > { %v896_v17 = vmax.f32 %v886_v15, 0.0  ;;  %v870_v18 = vadd.f32 %v857_v16, %v626_v12 }
 0x18a   : > { %v1158_v21 = vpop.f32.mrf.mxu0 }
 0x18b   : > { %906 = vst.msk [vmem:[%s1621_s9 + $0x40] sm:$0xff] %vm247_vm1, %v896_v17  ;;  %v887_v56 = vadd.f32 %v1615_v7, %v870_v18 }
 0x18d   : > { %v897_v22 = vmax.f32 %v887_v56, 0.0 }
 0x18f   : > { %907 = vst.msk [vmem:[%s1621_s9 + $0x48] sm:$0xff] %vm247_vm1, %v897_v22 }
 0x190 PF: > { %s13_s12 = sadd.s32 1, %s1209_s12  }
 0x191   : > { %p10_p4 = scmp.ge.s32.totalorder %s13_s12, 4  }
 0x193   :  { %12 = sbr.rel (!%p10_p4) target bundleno = 1 (0x1), region = 64 }

// kernel: refinement_net_forward.12
= control target key start
LH: loop header
LB: loop body
LE: loop exit
PB: predicated region body
PF: predicated region fallthrough
CT: control target
= control target key end

     0   :  { %s924_s12 = smov 0   ;;  %s1108_s0 = inlined_call_operand.vmem [shape: f32[2,51,64], index: 0, kind: input, shape index: {}]   ;;  %s1109_s1 = inlined_call_operand.vmem [shape: bf16[3,96,64], index: 1, kind: input, shape index: {}]   ;;  %s1110_s2 = inlined_call_operand.vmem [shape: f32[1,64], index: 2, kind: input, shape index: {}]   ;;  %s1111_s3 = inlined_call_operand.vmem [shape: f32[2,40,64], index: 3, kind: output, shape index: {}]  }
   0x1 LB: > { %s690_s13 = sadd.s32 4294967295, %s899_s12   ;;  %p694_p0 = scmp.ge.s32.totalorder %s899_s12, 1  ;;  %s899_s12 = sphi %s924_s12, %s13_s12  }
   0x2   : > { %p137_p1 = scmp.lt.s32.totalorder %s899_s12, 3 }
   0x4   : > { %p138_p2 = pnand %p694_p0, %p137_p1 }
   0x5   : > { %p161_p3 = scmp.lt.s32.totalorder (!%p138_p2), %s690_s13, 1  ;;  %s903_s30 = smov (!%p138_p2), 64  }
   0x6   : > { %141 = sbr.rel (%p138_p2) target bundleno = 367 (0x16f), region = 32 }
   0xb   : > { %v875_v0 = vld [vmem:[%s1109_s1 + $0x28] sm:$0xff]   ;;  %v901_v1 = vmov 0.0   ;;  %s1113_s13 = smov (!%p161_p3, %s690_s13), 1  ;;  %v876_v2 = vld [vmem:[%s1109_s1 + $0x58] sm:$0xff]   ;;  %v877_v3 = vld [vmem:[%s1109_s1 + $0x20] sm:$0xff]   ;;  %vm902_vm0 = vmmov 0  }
   0xc   : > { %802 = vmatprep.subr.bf16.mxu1 %v901_v1  ;;  %778 = vmatprep.subr.bf16.mxu0 %v901_v1  ;;  %s862_s20 = smul.u32 56, %s1113_s13  ;;  %v878_v4 = vld [vmem:[%s1109_s1 + $0x50] sm:$0xff]   ;;  %v879_v5 = vld [vmem:[%s1109_s1 + $0x18] sm:$0xff]   ;;  %v880_v6 = vld [vmem:[%s1109_s1 + $0x48] sm:$0xff]   ;;  %vm200_vm1 = vcmask 523264   ;;  %vm302_vm2 = vcmask 785408  }
   0xd   : > { %803 = vmatpush3.bf16.msra.mxu1 %v875_v0  ;;  %779 = vmatpush3.bf16.msra.mxu0 %v876_v2  ;;  %v881_v21 = vld [vmem:[%s1109_s1 + $0x10] sm:$0xff]   ;;  %v882_v23 = vld [vmem:[%s1109_s1 + $0x40] sm:$0xff]   ;;  %v883_v25 = vld [vmem:[%s1109_s1 + $0x8] sm:$0xff]  }
   0xe   : > { %804 = vmatprep.subr.bf16.mxu1 %v901_v1  ;;  %780 = vmatprep.subr.bf16.mxu0 %v901_v1  ;;  %s957_s27 = scalar_lea.vmem %s1108_s0, %s862_s20  ;;  %v884_v30 = vld [vmem:[%s1109_s1 + $0x38] sm:$0xff]   ;;  %v885_v32 = vld [vmem:[%s1109_s1] sm:$0xff]   ;;  %v886_v35 = vld [vmem:[%s1109_s1 + $0x30] sm:$0xff]  }
   0xf   : > { %814 = vmatprep.mubr.msk.bf16.mxu1 %vm902_vm0, %v901_v1  ;;  %v180_v7 = vld [vmem:[%s957_s27 + $0x1] sm:$0xff]  ;;  %v181_v8 = vld [vmem:[%s957_s27 + $0x9] sm:$0xff]  ;;  %790 = vmatprep.mubr.msk.bf16.mxu0 %vm902_vm0, %v901_v1  ;;  %v182_v12 = vld [vmem:[%s957_s27 + $0x11] sm:$0xff] }
  0x10   : > { %v227_v9 = vld [vmem:[%s957_s27 + $0x6] sm:$0xff]  ;;  %v185_v10 = vpack.c.bf16 %v181_v8, %v180_v7  ;;  %v228_v11 = vld [vmem:[%s957_s27 + $0xe] sm:$0xff]  ;;  %v183_v13 = vld [vmem:[%s957_s27 + $0x19] sm:$0xff] }
  0x11   : > { %805 = vmatpush3.bf16.msra.mxu1 %v877_v3  ;;  %781 = vmatpush3.bf16.msra.mxu0 %v878_v4  ;;  %v186_v14 = vpack.c.bf16 %v183_v13, %v182_v12  ;;  %v229_v15 = vld [vmem:[%s957_s27 + $0x16] sm:$0xff]  ;;  %v230_v16 = vld [vmem:[%s957_s27 + $0x1e] sm:$0xff]  ;;  %v232_v17 = vpack.c.bf16 %v228_v11, %v227_v9  ;;  %v231_v20 = vld [vmem:[%s957_s27 + $0x26] sm:$0xff] }
  0x12   : > { %806 = vmatprep.subr.bf16.mxu1 %v901_v1  ;;  %782 = vmatprep.subr.bf16.mxu0 %v901_v1  ;;  %v233_v18 = vpack.c.bf16 %v230_v16, %v229_v15  ;;  %v184_v19 = vld [vmem:[%s957_s27 + $0x21] sm:$0xff]  ;;  %v234_v26 = vpack.c.bf16 %v231_v20, %v231_v20  ;;  %v471_v28 = vld [vmem:[%s957_s27 + $0xb] sm:$0xff]  ;;  %v472_v29 = vld [vmem:[%s957_s27 + $0x13] sm:$0xff] }
  0x13   : > { %191 = vrot.lane.b32.xlu0 %v185_v10, %s903_s30  ;;  %193 = vrot.lane.b32.xlu1 %v186_v14, %s903_s30  ;;  %v473_v22 = vld [vmem:[%s957_s27 + $0x1b] sm:$0xff]  ;;  %v187_v24 = vpack.c.bf16 %v184_v19, %v184_v19  ;;  %v474_v27 = vld [vmem:[%s957_s27 + $0x23] sm:$0xff]  ;;  %v476_v33 = vpack.c.bf16 %v472_v29, %v471_v28 }
  0x14   : > { %v477_v31 = vpack.c.bf16 %v474_v27, %v473_v22  ;;  %v475_v34 = vld [vmem:[%s957_s27 + $0x2b] sm:$0xff]  ;;  %v172_v37 = vld [vmem:[%s957_s27] sm:$0xff]  ;;  %v175_v45 = vld [vmem:[%s957_s27 + $0x18] sm:$0xff] }
  0x15   : > { %807 = vmatpush3.bf16.msra.mxu1 %v879_v5  ;;  %783 = vmatpush3.bf16.msra.mxu0 %v880_v6  ;;  %v478_v36 = vpack.c.bf16 %v475_v34, %v475_v34  ;;  %v173_v38 = vld [vmem:[%s957_s27 + $0x8] sm:$0xff]  ;;  %v174_v44 = vld [vmem:[%s957_s27 + $0x10] sm:$0xff]  ;;  %v888_v49 = vld [vmem:[%s1109_s1 + $0x80] sm:$0xff]  }
  0x16   : > { %808 = vmatprep.subr.bf16.mxu1 %v901_v1  ;;  %784 = vmatprep.subr.bf16.mxu0 %v901_v1  ;;  %v177_v39 = vpack.c.bf16 %v173_v38, %v172_v37  ;;  %v219_v40 = vld [vmem:[%s957_s27 + $0x5] sm:$0xff]  ;;  %v220_v41 = vld [vmem:[%s957_s27 + $0xd] sm:$0xff]  ;;  %v178_v50 = vpack.c.bf16 %v175_v45, %v174_v44  ;;  %v221_v52 = vld [vmem:[%s957_s27 + $0x15] sm:$0xff] }
  0x17   : > { %238 = vrot.lane.b32.xlu0 %v232_v17, %s903_s30  ;;  %240 = vrot.lane.b32.xlu1 %v233_v18, %s903_s30  ;;  %v887_v42 = vld [vmem:[%s1109_s1 + $0x88] sm:$0xff]   ;;  %v224_v47 = vpack.c.bf16 %v220_v41, %v219_v40  ;;  %v222_v53 = vld [vmem:[%s957_s27 + $0x1d] sm:$0xff] }
  0x18   : > { %v889_v56 = vld [vmem:[%s1109_s1 + $0x78] sm:$0xff]   ;;  %v225_v57 = vpack.c.bf16 %v222_v53, %v221_v52  ;;  %v176_v59 = vld [vmem:[%s957_s27 + $0x20] sm:$0xff]  ;;  %v890_v61 = vld [vmem:[%s1109_s1 + $0x70] sm:$0xff]  }
  0x19   : > { %809 = vmatpush3.bf16.msra.mxu1 %v881_v21  ;;  %785 = vmatpush3.bf16.msra.mxu0 %v882_v23  ;;  %v179_v62 = vpack.c.bf16 %v176_v59, %v176_v59  ;;  %v223_v0 = vld [vmem:[%s957_s27 + $0x25] sm:$0xff]  ;;  %v465_v6 = vld [vmem:[%s957_s27 + $0x1a] sm:$0xff]  ;;  %v464_v13 = vld [vmem:[%s957_s27 + $0x12] sm:$0xff] }
  0x1a   : > { %810 = vmatprep.subr.bf16.mxu1 %v901_v1  ;;  %786 = vmatprep.subr.bf16.mxu0 %v901_v1  ;;  %v891_v3 = vld [vmem:[%s1109_s1 + $0x68] sm:$0xff]   ;;  %v226_v4 = vpack.c.bf16 %v223_v0, %v223_v0  ;;  %v892_v9 = vld [vmem:[%s1109_s1 + $0x60] sm:$0xff]  }
  0x1b   : > { %195 = vrot.lane.b32.xlu0 %v187_v24, %s903_s30  ;;  %242 = vrot.lane.b32.xlu1 %v234_v26, %s903_s30  ;;  %v466_v7 = vld [vmem:[%s957_s27 + $0x22] sm:$0xff]  ;;  %v463_v12 = vld [vmem:[%s957_s27 + $0xa] sm:$0xff] }
  0x1c   : > { %v469_v10 = vpack.c.bf16 %v466_v7, %v465_v6  ;;  %v468_v15 = vpack.c.bf16 %v464_v13, %v463_v12  ;;  %v467_v17 = vld [vmem:[%s957_s27 + $0x2a] sm:$0xff]  ;;  %s863_s27 = smul.u32 40, %s1113_s13 }
  0x1d   : > { %811 = vmatpush3.bf16.msra.mxu1 %v883_v25  ;;  %787 = vmatpush3.bf16.msra.mxu0 %v884_v30  ;;  %v470_v19 = vpack.c.bf16 %v467_v17, %v467_v17 }
  0x1e   : > { %812 = vmatprep.subr.bf16.mxu1 %v901_v1  ;;  %788 = vmatprep.subr.bf16.mxu0 %v901_v1  ;;  %s170_s8 = scalar_lea.vmem %s1111_s3, %s863_s27 }
  0x1f   : > { %484 = vrot.lane.b32.xlu0 %v477_v31, %s903_s30  ;;  %482 = vrot.lane.b32.xlu1 %v476_v33, %s903_s30 }
  0x21   : > { %813 = vmatpush3.bf16.msra.mxu1 %v885_v32  ;;  %789 = vmatpush3.bf16.msra.mxu0 %v886_v35 }
  0x22   : > { %850 = vmatprep.subr.bf16.mxu1 %v901_v1  ;;  %826 = vmatprep.subr.bf16.mxu0 %v901_v1 }
  0x23   : > { %486 = vrot.lane.b32.xlu0 %v478_v36, %s903_s30 }
  0x85   : > { %v192_v43 = vpop.permute.xlu0 %191  ;;  %v194_v48 = vpop.permute.xlu1 %193 }
  0x86   : > { %v202_v46 = vsel %vm200_vm1, %v177_v39, %v192_v43  ;;  %v204_v55 = vsel %vm200_vm1, %v178_v50, %v194_v48 }
  0x87   : > { %815 = vmatmul.mubr.msk.bf16.vlgmr.msra.gmra.mxu1 %vm302_vm2, %v202_v46  ;;  %v748_v46 = vld [vmem:[%s1110_s2] ss:$0 sm:$0xff] }
  0x88   : > { %856 = vmatpush3.bf16.msra.mxu1 %v887_v42  ;;  %818 = vmatprep.mubr.msk.bf16.mxu1 %vm902_vm0, %v901_v1 }
  0x89   : > { %v239_v51 = vpop.permute.xlu0 %238  ;;  %851 = vmatprep.subr.bf16.mxu1 %v901_v1  ;;  %v241_v58 = vpop.permute.xlu1 %240 }
  0x8a   : > { %v248_v54 = vsel %vm200_vm1, %v224_v47, %v239_v51  ;;  %v250_v60 = vsel %vm200_vm1, %v225_v57, %v241_v58 }
  0x8b   : > { %791 = vmatmul.mubr.msk.bf16.vlgmr.msra.gmra.mxu0 %vm302_vm2, %v248_v54 }
  0x8c   : > { %827 = vmatpush3.bf16.msra.mxu0 %v887_v42  ;;  %857 = vmatpush3.bf16.msra.mxu1 %v888_v49 }
  0x8d   : > { %828 = vmatprep.subr.bf16.mxu0 %v901_v1  ;;  %852 = vmatprep.subr.bf16.mxu1 %v901_v1  ;;  %v196_v63 = vpop.permute.xlu0 %195  ;;  %v243_v5 = vpop.permute.xlu1 %242 }
  0x8e   : > { %794 = vmatprep.mubr.msk.bf16.mxu0 %vm902_vm0, %v901_v1  ;;  %v206_v2 = vsel %vm200_vm1, %v179_v62, %v196_v63  ;;  %v252_v8 = vsel %vm200_vm1, %v226_v4, %v243_v5 }
  0x8f   : > { %819 = vmatmul.mubr.msk.bf16.gmra.mxu1 %vm302_vm2, %v204_v55 }
  0x90   : > { %829 = vmatpush3.bf16.msra.mxu0 %v888_v49  ;;  %858 = vmatpush3.bf16.msra.mxu1 %v889_v56 }
  0x91   : > { %830 = vmatprep.subr.bf16.mxu0 %v901_v1  ;;  %853 = vmatprep.subr.bf16.mxu1 %v901_v1  ;;  %v485_v11 = vpop.permute.xlu0 %484  ;;  %v483_v16 = vpop.permute.xlu1 %482 }
  0x92   : > { %822 = vmatprep.mubr.msk.bf16.mxu1 %vm902_vm0, %v901_v1  ;;  %v494_v14 = vsel %vm200_vm1, %v469_v10, %v485_v11  ;;  %v492_v18 = vsel %vm200_vm1, %v468_v15, %v483_v16 }
  0x93   : > { %795 = vmatmul.mubr.msk.bf16.gmra.mxu0 %vm302_vm2, %v250_v60 }
  0x94   : > { %831 = vmatpush3.bf16.msra.mxu0 %v889_v56  ;;  %859 = vmatpush3.bf16.msra.mxu1 %v890_v61 }
  0x95   : > { %832 = vmatprep.subr.bf16.mxu0 %v901_v1  ;;  %854 = vmatprep.subr.bf16.mxu1 %v901_v1  ;;  %v487_v20 = vpop.permute.xlu0 %486 }
  0x96   : > { %798 = vmatprep.mubr.msk.bf16.mxu0 %vm902_vm0, %v901_v1  ;;  %v496_v21 = vsel %vm200_vm1, %v470_v19, %v487_v20 }
  0x97   : > { %823 = vmatmul.mubr.msk.bf16.gmra.mxu1 %vm302_vm2, %v206_v2 }
  0x98   : > { %833 = vmatpush3.bf16.msra.mxu0 %v890_v61  ;;  %860 = vmatpush3.bf16.msra.mxu1 %v891_v3 }
  0x99   : > { %834 = vmatprep.subr.bf16.mxu0 %v901_v1  ;;  %855 = vmatprep.subr.bf16.mxu1 %v901_v1 }
  0x9a   : > { %842 = vmatprep.mubr.msk.bf16.mxu1 %vm902_vm0, %v901_v1 }
  0x9b   : > { %799 = vmatmul.mubr.msk.bf16.gmra.mxu0 %vm302_vm2, %v252_v8 }
  0x9c   : > { %835 = vmatpush3.bf16.msra.mxu0 %v891_v3  ;;  %861 = vmatpush3.bf16.msra.mxu1 %v892_v9 }
  0x9d   : > { %836 = vmatprep.subr.bf16.mxu0 %v901_v1  ;;  %838 = vmatprep.mubr.msk.bf16.mxu0 %vm902_vm0, %v901_v1 }
  0x9f   : > { %843 = vmatmul.mubr.msk.bf16.vlgmr.msra.gmra.mxu1 %vm302_vm2, %v494_v14 }
  0xa0   : > { %837 = vmatpush3.bf16.msra.mxu0 %v892_v9  ;;  %846 = vmatprep.mubr.msk.bf16.mxu1 %vm902_vm0, %v901_v1 }
  0xa3   : > { %839 = vmatmul.mubr.msk.bf16.vlgmr.msra.gmra.mxu0 %vm302_vm2, %v492_v18 }
  0xa7   : > { %847 = vmatmul.mubr.msk.bf16.gmra.mxu1 %vm302_vm2, %v496_v21 }
 0x147   : > { %v441_v22 = vpop.f32.mrf.mxu1 }
 0x149   : > { %v816_v23 = vpop.f32.mrf.mxu1 }
 0x14b   : > { %v343_v24 = vpop.f32.mrf.mxu0  ;;  %v444_v25 = vpop.f32.mrf.mxu1 }
 0x14c   : > { %v442_v50 = vadd.f32 %v441_v22, %v343_v24 }
 0x14d   : > { %v792_v26 = vpop.f32.mrf.mxu0  ;;  %v817_v27 = vpop.f32.mrf.mxu1 }
 0x14f   : > { %v346_v28 = vpop.f32.mrf.mxu0  ;;  %v449_v29 = vpop.f32.mrf.mxu1 }
 0x150   : > { %v445_v60 = vadd.f32 %v444_v25, %v346_v28 }
 0x151   : > { %v793_v30 = vpop.f32.mrf.mxu0  ;;  %v820_v31 = vpop.f32.mrf.mxu1 }
 0x153   : > { %v351_v32 = vpop.f32.mrf.mxu0  ;;  %v452_v1 = vpop.f32.mrf.mxu1 }
 0x154   : > { %v450_v43 = vadd.f32 %v449_v29, %v351_v32 }
 0x155   : > { %v796_v33 = vpop.f32.mrf.mxu0  ;;  %v821_v34 = vpop.f32.mrf.mxu1 }
 0x157   : > { %v354_v35 = vpop.f32.mrf.mxu0  ;;  %v457_v36 = vpop.f32.mrf.mxu1 }
 0x158   : > { %v453_v51 = vadd.f32 %v452_v1, %v354_v35 }
 0x159   : > { %v797_v37 = vpop.f32.mrf.mxu0  ;;  %v824_v38 = vpop.f32.mrf.mxu1 }
 0x15b   : > { %v359_v39 = vpop.f32.mrf.mxu0  ;;  %v460_v40 = vpop.f32.mrf.mxu1 }
 0x15c   : > { %v458_v61 = vadd.f32 %v457_v36, %v359_v39 }
 0x15d   : > { %v800_v41 = vpop.f32.mrf.mxu0  ;;  %v825_v42 = vpop.f32.mrf.mxu1 }
 0x15f   : > { %v362_v44 = vpop.f32.mrf.mxu0  ;;  %v594_v45 = vpop.f32.mrf.mxu1 }
 0x160   : > { %v610_v47 = vadd.f32 %v594_v45, %v450_v43 }
 0x161   : > { %v801_v48 = vpop.f32.mrf.mxu0  ;;  %v844_v49 = vpop.f32.mrf.mxu1 }
 0x162   : > { %v622_v52 = vadd.f32 %v748_v46, %v610_v47 }
 0x163   : > { %v586_v53 = vpop.f32.mrf.mxu0  ;;  %v597_v54 = vpop.f32.mrf.mxu1 }
 0x164   : > { %v627_v55 = vmax.f32 %v622_v52, 0.0  ;;  %v608_v56 = vadd.f32 %v586_v53, %v442_v50  ;;  %v611_v57 = vadd.f32 %v597_v54, %v453_v51 }
 0x165   : > { %v840_v58 = vpop.f32.mrf.mxu0  ;;  %v845_v59 = vpop.f32.mrf.mxu1 }
 0x166   : > { %632 = vst.msk [vmem:[%s170_s8 + $0x10] sm:$0xff] %vm200_vm1, %v627_v55  ;;  %v620_v62 = vadd.f32 %v748_v46, %v608_v56  ;;  %v623_v63 = vadd.f32 %v748_v46, %v611_v57 }
 0x167   : > { %v589_v0 = vpop.f32.mrf.mxu0  ;;  %v602_v2 = vpop.f32.mrf.mxu1 }
 0x168   : > { %v625_v3 = vmax.f32 %v620_v62, 0.0  ;;  %v628_v4 = vmax.f32 %v623_v63, 0.0  ;;  %v609_v5 = vadd.f32 %v589_v0, %v445_v60  ;;  %v612_v6 = vadd.f32 %v602_v2, %v458_v61 }
 0x169   : > { %v841_v7 = vpop.f32.mrf.mxu0  ;;  %v848_v8 = vpop.f32.mrf.mxu1 }
 0x16a   : > { %630 = vst.msk [vmem:[%s170_s8] sm:$0xff] %vm200_vm1, %v625_v3  ;;  %633 = vst.msk [vmem:[%s170_s8 + $0x18] sm:$0xff] %vm200_vm1, %v628_v4  ;;  %v621_v9 = vadd.f32 %v748_v46, %v609_v5  ;;  %v624_v10 = vadd.f32 %v748_v46, %v612_v6 }
 0x16b   : > { %v605_v11 = vpop.f32.mrf.mxu1 }
 0x16c   : > { %v626_v12 = vmax.f32 %v621_v9, 0.0  ;;  %v629_v13 = vmax.f32 %v624_v10, 0.0 }
 0x16d   : > { %v849_v14 = vpop.f32.mrf.mxu1 }
 0x16e   : > { %631 = vst.msk [vmem:[%s170_s8 + $0x8] sm:$0xff] %vm200_vm1, %v626_v12  ;;  %634 = vst.msk [vmem:[%s170_s8 + $0x20] sm:$0xff] %vm200_vm1, %v629_v13 }
 0x16f PF: > { %s13_s12 = sadd.s32 1, %s899_s12  }
 0x170   : > { %p10_p4 = scmp.ge.s32.totalorder %s13_s12, 4  }
 0x172   :  { %12 = sbr.rel (!%p10_p4) target bundleno = 1 (0x1), region = 64 }

// kernel: refinement_net_forward.13
= control target key start
LH: loop header
LB: loop body
LE: loop exit
PB: predicated region body
PF: predicated region fallthrough
CT: control target
= control target key end

     0   :  { %s986_s12 = smov 0   ;;  %s1214_s0 = inlined_call_operand.vmem [shape: f32[2,38,64], index: 0, kind: input, shape index: {}]   ;;  %s1215_s1 = inlined_call_operand.vmem [shape: bf16[3,192,64], index: 1, kind: input, shape index: {}]   ;;  %s1216_s2 = inlined_call_operand.vmem [shape: f32[1,64], index: 2, kind: input, shape index: {}]   ;;  %s1217_s3 = inlined_call_operand.vmem [shape: f32[2,24,64], index: 3, kind: output, shape index: {}]  }
   0x1 LB: > { %s784_s13 = sadd.s32 4294967295, %s962_s12   ;;  %p788_p0 = scmp.ge.s32.totalorder %s962_s12, 1  ;;  %s962_s12 = sphi %s986_s12, %s13_s12  }
   0x2   : > { %p137_p1 = scmp.lt.s32.totalorder %s962_s12, 3 }
   0x4   : > { %p138_p2 = pnand %p788_p0, %p137_p1 }
   0x5   : > { %p161_p3 = scmp.lt.s32.totalorder (!%p138_p2), %s784_s13, 1  ;;  %s965_s30 = smov (!%p138_p2), 64  }
   0x6   : > { %141 = sbr.rel (%p138_p2) target bundleno = 386 (0x182), region = 32 }
   0xb   : > { %v920_v0 = vld [vmem:[%s1215_s1 + $0x98] sm:$0xff]   ;;  %v964_v1 = vmov 0   ;;  %s1219_s13 = smov (!%p161_p3, %s784_s13), 1  ;;  %v921_v2 = vld [vmem:[%s1215_s1 + $0x90] sm:$0xff]   ;;  %v923_v5 = vld [vmem:[%s1215_s1 + $0x88] sm:$0xff]   ;;  %vm193_vm0 = vcmask 523264  }
   0xc   : > { %356 = vmatprep.subr.bf16.mxu0 %v964_v1  ;;  %482 = vmatprep.subr.bf16.mxu1 %v964_v1  ;;  %v922_v3 = vld [vmem:[%s1215_s1 + $0x38] sm:$0xff]   ;;  %s908_s20 = smul.u32 40, %s1219_s13  ;;  %v924_v4 = vld [vmem:[%s1215_s1 + $0x30] sm:$0xff]   ;;  %v925_v15 = vld [vmem:[%s1215_s1 + $0x80] sm:$0xff]  }
   0xd   : > { %357 = vmatpush1.bf16.msra.mxu0 %v920_v0  ;;  %483 = vmatpush1.bf16.msra.mxu1 %v922_v3  ;;  %v926_v17 = vld [vmem:[%s1215_s1 + $0x28] sm:$0xff]   ;;  %v928_v21 = vld [vmem:[%s1215_s1 + $0x20] sm:$0xff]   ;;  %v927_v23 = vld [vmem:[%s1215_s1 + $0x78] sm:$0xff]  }
   0xe   : > { %358 = vmatprep.subr.bf16.mxu0 %v964_v1  ;;  %s1015_s25 = scalar_lea.vmem %s1214_s0, %s908_s20  ;;  %484 = vmatprep.subr.bf16.mxu1 %v964_v1  ;;  %v930_v25 = vld [vmem:[%s1215_s1 + $0x18] sm:$0xff]   ;;  %v929_v26 = vld [vmem:[%s1215_s1 + $0x70] sm:$0xff]   ;;  %v931_v28 = vld [vmem:[%s1215_s1 + $0x68] sm:$0xff]  }
   0xf   : > { %v231_v6 = vld [vmem:[%s1015_s25 + $0x7] sm:$0xff]  ;;  %v232_v7 = vld [vmem:[%s1015_s25 + $0xf] sm:$0xff]  ;;  %v233_v11 = vld [vmem:[%s1015_s25 + $0x17] sm:$0xff] }
  0x10   : > { %v177_v8 = vld [vmem:[%s1015_s25 + $0x1] sm:$0xff]  ;;  %v234_v9 = vpack.c.bf16 %v232_v7, %v231_v6  ;;  %v178_v10 = vld [vmem:[%s1015_s25 + $0x9] sm:$0xff]  ;;  %v179_v12 = vld [vmem:[%s1015_s25 + $0x11] sm:$0xff]  ;;  %v235_v13 = vpack.c.bf16 %v233_v11, %v233_v11 }
  0x11   : > { %359 = vmatpush1.bf16.msra.mxu0 %v921_v2  ;;  %v535_v14 = vld [vmem:[%s1015_s25 + $0xd] sm:$0xff]  ;;  %485 = vmatpush1.bf16.msra.mxu1 %v924_v4  ;;  %v180_v16 = vpack.c.bf16 %v178_v10, %v177_v8  ;;  %v181_v18 = vpack.c.bf16 %v179_v12, %v179_v12  ;;  %v536_v19 = vld [vmem:[%s1015_s25 + $0x15] sm:$0xff]  ;;  %v537_v20 = vld [vmem:[%s1015_s25 + $0x1d] sm:$0xff] }
  0x12   : > { %360 = vmatprep.subr.bf16.mxu0 %v964_v1  ;;  %241 = vrot.lane.b32.xlu0 %v234_v9, %s965_s30  ;;  %v538_v22 = vpack.c.bf16 %v536_v19, %v535_v14  ;;  %v539_v24 = vpack.c.bf16 %v537_v20, %v537_v20  ;;  %v932_v27 = vld [vmem:[%s1215_s1 + $0x10] sm:$0xff]   ;;  %v934_v29 = vld [vmem:[%s1215_s1 + $0x8] sm:$0xff]   ;;  %v933_v30 = vld [vmem:[%s1215_s1 + $0x60] sm:$0xff]  }
  0x13   : > { %243 = vrot.lane.b32.xlu1 %v235_v13, %s965_s30  ;;  %486 = vmatprep.subr.bf16.mxu1 %v964_v1  ;;  %v1071_v31 = vld [vmem:[%s1015_s25] sm:$0xff]  ;;  %v173_v32 = vld [vmem:[%s1015_s25 + $0x8] sm:$0xff]  ;;  %v1076_v33 = vld [vmem:[%s1015_s25 + $0x10] sm:$0xff] }
  0x14   : > { %v175_v34 = vpack.c.bf16 %v173_v32, %v1071_v31  ;;  %v935_v35 = vld [vmem:[%s1215_s1 + $0xb8] sm:$0xff]   ;;  %v237_v36 = vpack.c.bf16 %v1076_v33, %v173_v32  ;;  %v936_v37 = vld [vmem:[%s1215_s1] sm:$0xff]   ;;  %v183_v39 = vld [vmem:[%s1015_s25 + $0xa] sm:$0xff]  ;;  %v176_v0 = vpack.c.bf16 %v1076_v33, %v1076_v33 }
  0x15   : > { %361 = vmatpush1.bf16.msra.mxu0 %v923_v5  ;;  %487 = vmatpush1.bf16.msra.mxu1 %v926_v17  ;;  %v182_v38 = vld [vmem:[%s1015_s25 + $0x2] sm:$0xff]  ;;  %v938_v41 = vld [vmem:[%s1215_s1 + $0x58] sm:$0xff]   ;;  %v937_v42 = vld [vmem:[%s1215_s1 + $0xb0] sm:$0xff]  }
  0x16   : > { %362 = vmatprep.subr.bf16.mxu0 %v964_v1  ;;  %189 = vrot.lane.b32.xlu0 %v180_v16, %s965_s30  ;;  %v185_v40 = vpack.c.bf16 %v183_v39, %v182_v38  ;;  %v940_v43 = vld [vmem:[%s1215_s1 + $0x50] sm:$0xff]   ;;  %v939_v44 = vld [vmem:[%s1215_s1 + $0xa8] sm:$0xff]   ;;  %v941_v46 = vld [vmem:[%s1215_s1 + $0xa0] sm:$0xff]  }
  0x17   : > { %191 = vrot.lane.b32.xlu1 %v181_v18, %s965_s30  ;;  %488 = vmatprep.subr.bf16.mxu1 %v964_v1  ;;  %v942_v45 = vld [vmem:[%s1215_s1 + $0x48] sm:$0xff]   ;;  %v943_v47 = vld [vmem:[%s1215_s1 + $0x40] sm:$0xff]   ;;  %v236_v50 = vld [vmem:[%s1015_s25 + $0x18] sm:$0xff] }
  0x18   : > { %827 = vmatprep.mubr.msk.bf16.mxu0 %vm193_vm0, %v237_v36  ;;  %841 = vmatprep.mubr.msk.bf16.mxu1 %vm193_vm0, %v185_v40  ;;  %v226_v48 = vld [vmem:[%s1015_s25 + $0x6] sm:$0xff]  ;;  %v227_v49 = vld [vmem:[%s1015_s25 + $0xe] sm:$0xff]  ;;  %v944_v52 = vld [vmem:[%s1215_s1 + $0xf8] sm:$0xff]   ;;  %v238_v53 = vpack.c.bf16 %v236_v50, %v236_v50 }
  0x19   : > { %363 = vmatpush1.bf16.msra.mxu0 %v925_v15  ;;  %489 = vmatpush1.bf16.msra.mxu1 %v928_v21  ;;  %v229_v51 = vpack.c.bf16 %v227_v49, %v226_v48  ;;  %v228_v55 = vld [vmem:[%s1015_s25 + $0x16] sm:$0xff]  ;;  %v946_v2 = vld [vmem:[%s1215_s1 + $0xe8] sm:$0xff]   ;;  %v542_v6 = vld [vmem:[%s1015_s25 + $0x1e] sm:$0xff] }
  0x1a   : > { %364 = vmatprep.subr.bf16.mxu0 %v964_v1  ;;  %547 = vrot.lane.b32.xlu0 %v538_v22, %s965_s30  ;;  %v184_v58 = vld [vmem:[%s1015_s25 + $0x12] sm:$0xff]  ;;  %v230_v60 = vpack.c.bf16 %v228_v55, %v228_v55  ;;  %v543_v5 = vpack.c.bf16 %v228_v55, %v227_v49  ;;  %v947_v7 = vld [vmem:[%s1215_s1 + $0xe0] sm:$0xff]   ;;  %v544_v9 = vpack.c.bf16 %v542_v6, %v542_v6  ;;  %v950_v12 = vld [vmem:[%s1215_s1 + $0xc8] sm:$0xff]  }
  0x1b   : > { %549 = vrot.lane.b32.xlu1 %v539_v24, %s965_s30  ;;  %490 = vmatprep.subr.bf16.mxu1 %v964_v1  ;;  %v945_v59 = vld [vmem:[%s1215_s1 + $0xf0] sm:$0xff]   ;;  %v186_v63 = vpack.c.bf16 %v184_v58, %v184_v58  ;;  %v948_v10 = vld [vmem:[%s1215_s1 + $0xd8] sm:$0xff]   ;;  %v951_v13 = vld [vmem:[%s1215_s1 + $0xc0] sm:$0xff]  }
  0x1c   : > { %v949_v11 = vld [vmem:[%s1215_s1 + $0xd0] sm:$0xff]   ;;  %v952_v14 = vld [vmem:[%s1215_s1 + $0x118] sm:$0xff]   ;;  %v954_v16 = vld [vmem:[%s1215_s1 + $0x108] sm:$0xff]  }
  0x1d   : > { %365 = vmatpush1.bf16.msra.mxu0 %v927_v23  ;;  %491 = vmatpush1.bf16.msra.mxu1 %v930_v25  ;;  %v953_v15 = vld [vmem:[%s1215_s1 + $0x110] sm:$0xff]   ;;  %v955_v19 = vld [vmem:[%s1215_s1 + $0x100] sm:$0xff]  }
  0x1e   : > { %366 = vmatprep.subr.bf16.mxu0 %v964_v1  ;;  %492 = vmatprep.subr.bf16.mxu1 %v964_v1  ;;  %v530_v17 = vld [vmem:[%s1015_s25 + $0xc] sm:$0xff]  ;;  %v531_v18 = vld [vmem:[%s1015_s25 + $0x14] sm:$0xff]  ;;  %v532_v22 = vld [vmem:[%s1015_s25 + $0x1c] sm:$0xff]  ;;  %s909_s25 = smul.u32 24, %s1219_s13 }
  0x1f   : > { %v533_v20 = vpack.c.bf16 %v531_v18, %v530_v17  ;;  %v534_v24 = vpack.c.bf16 %v532_v22, %v532_v22 }
  0x20   : > { %s170_s22 = scalar_lea.vmem %s1217_s3, %s909_s25 }
  0x21   : > { %367 = vmatpush1.bf16.msra.mxu0 %v929_v26  ;;  %493 = vmatpush1.bf16.msra.mxu1 %v932_v27 }
  0x22   : > { %368 = vmatprep.subr.bf16.mxu0 %v964_v1  ;;  %494 = vmatprep.subr.bf16.mxu1 %v964_v1 }
  0x25   : > { %369 = vmatpush1.bf16.msra.mxu0 %v931_v28  ;;  %495 = vmatpush1.bf16.msra.mxu1 %v934_v29 }
  0x26   : > { %370 = vmatprep.subr.bf16.mxu0 %v964_v1  ;;  %496 = vmatprep.subr.bf16.mxu1 %v964_v1 }
  0x29   : > { %371 = vmatpush1.bf16.msra.mxu0 %v933_v30  ;;  %497 = vmatpush1.bf16.msra.mxu1 %v936_v37 }
  0x2a   : > { %380 = vmatprep.subr.bf16.mxu0 %v964_v1  ;;  %506 = vmatprep.subr.bf16.mxu1 %v964_v1 }
  0x2d   : > { %381 = vmatpush2.bf16.msra.mxu0 %v935_v35  ;;  %507 = vmatpush2.bf16.msra.mxu1 %v938_v41 }
  0x2e   : > { %382 = vmatprep.subr.bf16.mxu0 %v964_v1  ;;  %508 = vmatprep.subr.bf16.mxu1 %v964_v1 }
  0x31   : > { %383 = vmatpush2.bf16.msra.mxu0 %v937_v42  ;;  %509 = vmatpush2.bf16.msra.mxu1 %v940_v43 }
  0x32   : > { %384 = vmatprep.subr.bf16.mxu0 %v964_v1  ;;  %510 = vmatprep.subr.bf16.mxu1 %v964_v1 }
  0x35   : > { %385 = vmatpush2.bf16.msra.mxu0 %v939_v44  ;;  %511 = vmatpush2.bf16.msra.mxu1 %v942_v45  ;;  %v881_v44 = vld [vmem:[%s1216_s2] ss:$0 sm:$0xff] }
  0x36   : > { %386 = vmatprep.subr.bf16.mxu0 %v964_v1  ;;  %512 = vmatprep.subr.bf16.mxu1 %v964_v1 }
  0x39   : > { %387 = vmatpush2.bf16.msra.mxu0 %v941_v46  ;;  %513 = vmatpush2.bf16.msra.mxu1 %v943_v47 }
  0x3a   : > { %662 = vmatprep.subr.bf16.mxu0 %v964_v1  ;;  %884 = vmatprep.subr.bf16.mxu1 %v964_v1 }
  0x84   : > { %v242_v54 = vpop.permute.xlu0 %241 }
  0x85   : > { %v247_v56 = vsel %vm193_vm0, %v229_v51, %v242_v54  ;;  %v244_v57 = vpop.permute.xlu1 %243 }
  0x86   : > { %389 = vmatmul.mubr.bf16.vlgmr.msra.gmra.mxu0 %v247_v56  ;;  %v251_v3 = vsel %vm193_vm0, %v230_v60, %v244_v57 }
  0x87   : > { %663 = vmatpush1.bf16.msra.mxu0 %v944_v52  ;;  %828 = vmatprep.mubr.msk.bf16.mxu0 %vm193_vm0, %v238_v53 }
  0x88   : > { %v190_v61 = vpop.permute.xlu0 %189  ;;  %664 = vmatprep.subr.bf16.mxu0 %v964_v1 }
  0x89   : > { %v196_v62 = vsel %vm193_vm0, %v175_v34, %v190_v61  ;;  %v192_v4 = vpop.permute.xlu1 %191 }
  0x8a   : > { %515 = vmatmul.mubr.bf16.vlgmr.msra.gmra.mxu1 %v196_v62  ;;  %v200_v8 = vsel %vm193_vm0, %v176_v0, %v192_v4 }
  0x8b   : > { %896 = vmatpush1.bf16.msra.mxu1 %v944_v52  ;;  %665 = vmatpush1.bf16.msra.mxu0 %v945_v59 }
  0x8c   : > { %885 = vmatprep.subr.bf16.mxu1 %v964_v1  ;;  %666 = vmatprep.subr.bf16.mxu0 %v964_v1  ;;  %v548_v21 = vpop.permute.xlu0 %547 }
  0x8d   : > { %842 = vmatprep.mubr.msk.bf16.mxu1 %vm193_vm0, %v186_v63  ;;  %v553_v23 = vsel %vm193_vm0, %v533_v20, %v548_v21  ;;  %v550_v25 = vpop.permute.xlu1 %549 }
  0x8e   : > { %397 = vmatmul.mubr.bf16.gmra.mxu0 %v251_v3  ;;  %v557_v26 = vsel %vm193_vm0, %v534_v24, %v550_v25 }
  0x8f   : > { %897 = vmatpush1.bf16.msra.mxu1 %v945_v59  ;;  %667 = vmatpush1.bf16.msra.mxu0 %v946_v2 }
  0x90   : > { %886 = vmatprep.subr.bf16.mxu1 %v964_v1  ;;  %668 = vmatprep.subr.bf16.mxu0 %v964_v1 }
  0x91   : > { %879 = vmatprep.mubr.msk.bf16.mxu0 %vm193_vm0, %v543_v5 }
  0x92   : > { %523 = vmatmul.mubr.bf16.gmra.mxu1 %v200_v8 }
  0x93   : > { %898 = vmatpush1.bf16.msra.mxu1 %v946_v2  ;;  %669 = vmatpush1.bf16.msra.mxu0 %v947_v7 }
  0x94   : > { %887 = vmatprep.subr.bf16.mxu1 %v964_v1  ;;  %670 = vmatprep.subr.bf16.mxu0 %v964_v1 }
  0x95   : > { %880 = vmatprep.mubr.msk.bf16.mxu1 %vm193_vm0, %v544_v9 }
  0x97   : > { %899 = vmatpush1.bf16.msra.mxu1 %v947_v7  ;;  %671 = vmatpush1.bf16.msra.mxu0 %v948_v10 }
  0x98   : > { %888 = vmatprep.subr.bf16.mxu1 %v964_v1  ;;  %672 = vmatprep.subr.bf16.mxu0 %v964_v1 }
  0x9b   : > { %900 = vmatpush1.bf16.msra.mxu1 %v948_v10  ;;  %673 = vmatpush1.bf16.msra.mxu0 %v949_v11 }
  0x9c   : > { %889 = vmatprep.subr.bf16.mxu1 %v964_v1  ;;  %674 = vmatprep.subr.bf16.mxu0 %v964_v1 }
  0x9f   : > { %901 = vmatpush1.bf16.msra.mxu1 %v949_v11  ;;  %675 = vmatpush1.bf16.msra.mxu0 %v950_v12 }
  0xa0   : > { %890 = vmatprep.subr.bf16.mxu1 %v964_v1  ;;  %676 = vmatprep.subr.bf16.mxu0 %v964_v1 }
  0xa3   : > { %902 = vmatpush1.bf16.msra.mxu1 %v950_v12  ;;  %677 = vmatpush1.bf16.msra.mxu0 %v951_v13 }
  0xa4   : > { %891 = vmatprep.subr.bf16.mxu1 %v964_v1  ;;  %686 = vmatprep.subr.bf16.mxu0 %v964_v1 }
  0xa7   : > { %903 = vmatpush1.bf16.msra.mxu1 %v951_v13  ;;  %687 = vmatpush2.bf16.msra.mxu0 %v952_v14 }
  0xa8   : > { %892 = vmatprep.subr.bf16.mxu1 %v964_v1  ;;  %688 = vmatprep.subr.bf16.mxu0 %v964_v1 }
  0xab   : > { %904 = vmatpush2.bf16.msra.mxu1 %v952_v14  ;;  %689 = vmatpush2.bf16.msra.mxu0 %v953_v15 }
  0xac   : > { %893 = vmatprep.subr.bf16.mxu1 %v964_v1  ;;  %690 = vmatprep.subr.bf16.mxu0 %v964_v1 }
  0xaf   : > { %905 = vmatpush2.bf16.msra.mxu1 %v953_v15  ;;  %691 = vmatpush2.bf16.msra.mxu0 %v954_v16 }
  0xb0   : > { %894 = vmatprep.subr.bf16.mxu1 %v964_v1  ;;  %692 = vmatprep.subr.bf16.mxu0 %v964_v1 }
  0xb3   : > { %906 = vmatpush2.bf16.msra.mxu1 %v954_v16  ;;  %693 = vmatpush2.bf16.msra.mxu0 %v955_v19 }
  0xb4   : > { %895 = vmatprep.subr.bf16.mxu1 %v964_v1 }
  0xb6   : > { %695 = vmatmul.mubr.bf16.vlgmr.msra.gmra.mxu0 %v553_v23 }
  0xb7   : > { %907 = vmatpush2.bf16.msra.mxu1 %v955_v19 }
  0xba   : > { %703 = vmatmul.mubr.bf16.vlgmr.msra.gmra.mxu1 %v557_v26 }
 0x146   : > { %v390_v27 = vpop.f32.mrf.mxu0 }
 0x148   : > { %v392_v28 = vpop.f32.mrf.mxu0 }
 0x14a   : > { %v393_v29 = vpop.f32.mrf.mxu0  ;;  %v516_v30 = vpop.f32.mrf.mxu1 }
 0x14b   : > { %v517_v42 = vadd.f32 %v516_v30, %v390_v27 }
 0x14c   : > { %v395_v31 = vpop.f32.mrf.mxu0  ;;  %v518_v32 = vpop.f32.mrf.mxu1 }
 0x14e   : > { %v519_v33 = vpop.f32.mrf.mxu1  ;;  %v398_v34 = vpop.f32.mrf.mxu0 }
 0x14f   : > { %v520_v47 = vadd.f32 %v519_v33, %v393_v29 }
 0x150   : > { %v521_v35 = vpop.f32.mrf.mxu1  ;;  %v400_v36 = vpop.f32.mrf.mxu0 }
 0x152   : > { %v401_v37 = vpop.f32.mrf.mxu0  ;;  %v524_v38 = vpop.f32.mrf.mxu1 }
 0x153   : > { %v525_v48 = vadd.f32 %v524_v38, %v398_v34 }
 0x154   : > { %v402_v1 = vpop.f32.mrf.mxu0  ;;  %v526_v39 = vpop.f32.mrf.mxu1 }
 0x156   : > { %v527_v40 = vpop.f32.mrf.mxu1 }
 0x158   : > { %v528_v41 = vpop.f32.mrf.mxu1 }
 0x176   : > { %v696_v43 = vpop.f32.mrf.mxu0 }
 0x177   : > { %v710_v45 = vadd.f32 %v696_v43, %v517_v42 }
 0x178   : > { %v698_v46 = vpop.f32.mrf.mxu0 }
 0x179   : > { %v720_v49 = vadd.f32 %v881_v44, %v710_v45 }
 0x17a   : > { %v699_v50 = vpop.f32.mrf.mxu0  ;;  %v704_v51 = vpop.f32.mrf.mxu1 }
 0x17b   : > { %v723_v52 = vmax.f32 %v720_v49, 0.0  ;;  %v711_v53 = vadd.f32 %v699_v50, %v520_v47  ;;  %v712_v54 = vadd.f32 %v704_v51, %v525_v48 }
 0x17c   : > { %v701_v55 = vpop.f32.mrf.mxu0  ;;  %v706_v56 = vpop.f32.mrf.mxu1 }
 0x17d   : > { %726 = vst.msk [vmem:[%s170_s22] sm:$0xff] %vm193_vm0, %v723_v52  ;;  %v721_v57 = vadd.f32 %v881_v44, %v711_v53  ;;  %v722_v58 = vadd.f32 %v881_v44, %v712_v54 }
 0x17e   : > { %v707_v59 = vpop.f32.mrf.mxu1 }
 0x17f   : > { %v724_v60 = vmax.f32 %v721_v57, 0.0  ;;  %v725_v61 = vmax.f32 %v722_v58, 0.0 }
 0x180   : > { %v708_v62 = vpop.f32.mrf.mxu1 }
 0x181   : > { %727 = vst.msk [vmem:[%s170_s22 + $0x8] sm:$0xff] %vm193_vm0, %v724_v60  ;;  %728 = vst.msk [vmem:[%s170_s22 + $0x10] sm:$0xff] %vm193_vm0, %v725_v61 }
 0x182 PF: > { %s13_s12 = sadd.s32 1, %s962_s12  }
 0x183   : > { %p10_p4 = scmp.ge.s32.totalorder %s13_s12, 4  }
 0x185   :  { %12 = sbr.rel (!%p10_p4) target bundleno = 1 (0x1), region = 64 }

// kernel: refinement_net_forward.14
= control target key start
LH: loop header
LB: loop body
LE: loop exit
PB: predicated region body
PF: predicated region fallthrough
CT: control target
= control target key end

     0   :  { %s865_s12 = smov 0   ;;  %s1050_s0 = inlined_call_operand.vmem [shape: f32[2,19,128], index: 0, kind: input, shape index: {}]   ;;  %s1051_s1 = inlined_call_operand.vmem [shape: bf16[3,192,96], index: 1, kind: input, shape index: {}]   ;;  %s1052_s2 = inlined_call_operand.vmem [shape: f32[1,96], index: 2, kind: input, shape index: {}]   ;;  %s1053_s3 = inlined_call_operand.vmem [shape: f32[2,12,96], index: 3, kind: output, shape index: {}]  }
   0x1 LB: > { %s691_s13 = sadd.s32 4294967295, %s842_s12   ;;  %p695_p0 = scmp.ge.s32.totalorder %s842_s12, 1  ;;  %s842_s12 = sphi %s865_s12, %s13_s12  }
   0x2   : > { %p137_p1 = scmp.lt.s32.totalorder %s842_s12, 3 }
   0x4   : > { %p138_p2 = pnand %p695_p0, %p137_p1 }
   0x5   : > { %p161_p3 = scmp.lt.s32.totalorder (!%p138_p2), %s691_s13, 1 }
   0x6   : > { %141 = sbr.rel (%p138_p2) target bundleno = 312 (0x138), region = 32 }
   0xb   : > { %v800_v0 = vld [vmem:[%s1051_s1 + $0x98] sm:$0xff]   ;;  %v844_v1 = vmov 0   ;;  %v802_v3 = vld [vmem:[%s1051_s1 + $0x90] sm:$0xff]   ;;  %v804_v5 = vld [vmem:[%s1051_s1 + $0x88] sm:$0xff]   ;;  %s1055_s13 = smov (!%p161_p3, %s691_s13), 1  ;;  %vm178_vm0 = vcmask 523264  }
   0xc   : > { %313 = vmatprep.subr.bf16.mxu0 %v844_v1  ;;  %429 = vmatprep.subr.bf16.mxu1 %v844_v1  ;;  %v801_v2 = vld [vmem:[%s1051_s1 + $0x38] sm:$0xff]   ;;  %v803_v4 = vld [vmem:[%s1051_s1 + $0x30] sm:$0xff]   ;;  %v805_v6 = vld [vmem:[%s1051_s1 + $0x28] sm:$0xff]   ;;  %s790_s7 = smul.u32 24, %s1055_s13  ;;  %vm632_vm1 = vcmask 785408   ;;  %vm634_vm2 = vcmask 781312  }
   0xd   : > { %314 = vmatpush1.bf16.msra.mxu0 %v800_v0  ;;  %430 = vmatpush1.bf16.msra.mxu1 %v801_v2  ;;  %v806_v7 = vld [vmem:[%s1051_s1 + $0x80] sm:$0xff]   ;;  %v808_v9 = vld [vmem:[%s1051_s1 + $0x78] sm:$0xff]   ;;  %v810_v11 = vld [vmem:[%s1051_s1 + $0x70] sm:$0xff]  }
   0xe   : > { %315 = vmatprep.subr.bf16.mxu0 %v844_v1  ;;  %431 = vmatprep.subr.bf16.mxu1 %v844_v1  ;;  %v807_v8 = vld [vmem:[%s1051_s1 + $0x20] sm:$0xff]   ;;  %v809_v10 = vld [vmem:[%s1051_s1 + $0x18] sm:$0xff]   ;;  %v811_v12 = vld [vmem:[%s1051_s1 + $0x10] sm:$0xff]   ;;  %s927_s16 = scalar_lea.vmem %s1050_s0, %s790_s7 }
   0xf   : > { %v812_v13 = vld [vmem:[%s1051_s1 + $0x68] sm:$0xff]   ;;  %v814_v20 = vld [vmem:[%s1051_s1 + $0x60] sm:$0xff]   ;;  %v816_v23 = vld [vmem:[%s1051_s1 + $0xb8] sm:$0xff]  }
  0x10   : > { %v813_v14 = vld [vmem:[%s1051_s1 + $0x8] sm:$0xff]   ;;  %v815_v22 = vld [vmem:[%s1051_s1] sm:$0xff]   ;;  %v817_v24 = vld [vmem:[%s1051_s1 + $0x58] sm:$0xff]  }
  0x11   : > { %316 = vmatpush1.bf16.msra.mxu0 %v802_v3  ;;  %432 = vmatpush1.bf16.msra.mxu1 %v803_v4  ;;  %v208_v15 = vld [vmem:[%s927_s16 + $0x4] sm:$0xff]  ;;  %v209_v16 = vld [vmem:[%s927_s16 + $0xc] sm:$0xf]  ;;  %v818_v25 = vld [vmem:[%s1051_s1 + $0xb0] sm:$0xff]  }
  0x12   : > { %317 = vmatprep.subr.bf16.mxu0 %v844_v1  ;;  %433 = vmatprep.subr.bf16.mxu1 %v844_v1  ;;  %v175_v17 = vld [vmem:[%s927_s16 + $0x1] sm:$0xff]  ;;  %v210_v18 = vpack.c.bf16 %v209_v16, %v208_v15  ;;  %v176_v19 = vld [vmem:[%s927_s16 + $0x9] sm:$0xf]  ;;  %v819_v26 = vld [vmem:[%s1051_s1 + $0x50] sm:$0xff]  }
  0x13   : > { %v177_v21 = vpack.c.bf16 %v176_v19, %v175_v17  ;;  %v820_v27 = vld [vmem:[%s1051_s1 + $0xa8] sm:$0xff]   ;;  %v822_v29 = vld [vmem:[%s1051_s1 + $0xa0] sm:$0xff]   ;;  %v824_v39 = vld [vmem:[%s1051_s1 + $0xf8] sm:$0xff]  }
  0x14   : > { %735 = vmatprep.mubr.msk.bf16.mxu0 %vm178_vm0, %v210_v18  ;;  %v821_v28 = vld [vmem:[%s1051_s1 + $0x48] sm:$0xff]   ;;  %v823_v32 = vld [vmem:[%s1051_s1 + $0x40] sm:$0xff]   ;;  %v825_v41 = vld [vmem:[%s1051_s1 + $0xf0] sm:$0xff]  }
  0x15   : > { %318 = vmatpush1.bf16.msra.mxu0 %v804_v5  ;;  %434 = vmatpush1.bf16.msra.mxu1 %v805_v6  ;;  %v205_v30 = vld [vmem:[%s927_s16 + $0x3] sm:$0xff]  ;;  %v206_v31 = vld [vmem:[%s927_s16 + $0xb] sm:$0xf]  ;;  %v474_v36 = vld [vmem:[%s927_s16 + $0xf] sm:$0xf] }
  0x16   : > { %319 = vmatprep.subr.bf16.mxu0 %v844_v1  ;;  %435 = vmatprep.subr.bf16.mxu1 %v844_v1  ;;  %v172_v33 = vld [vmem:[%s927_s16] sm:$0xff]  ;;  %v173_v34 = vld [vmem:[%s927_s16 + $0x8] sm:$0xf]  ;;  %v207_v37 = vpack.c.bf16 %v206_v31, %v205_v30  ;;  %v828_v44 = vld [vmem:[%s1051_s1 + $0xd8] sm:$0xff]  }
  0x17   : > { %748 = vmatprep.mubr.msk.bf16.mxu1 %vm178_vm0, %v177_v21  ;;  %v473_v35 = vld [vmem:[%s927_s16 + $0x7] sm:$0xff]  ;;  %v174_v38 = vpack.c.bf16 %v173_v34, %v172_v33  ;;  %v829_v45 = vld [vmem:[%s1051_s1 + $0xd0] sm:$0xff]   ;;  %v832_v48 = vld [vmem:[%s1051_s1 + $0x118] sm:$0xff]  }
  0x18   : > { %v475_v40 = vpack.c.bf16 %v474_v36, %v473_v35  ;;  %v826_v42 = vld [vmem:[%s1051_s1 + $0xe8] sm:$0xff]   ;;  %v827_v43 = vld [vmem:[%s1051_s1 + $0xe0] sm:$0xff]   ;;  %v833_v49 = vld [vmem:[%s1051_s1 + $0x110] sm:$0xff]  }
  0x19   : > { %320 = vmatpush1.bf16.msra.mxu0 %v806_v7  ;;  %436 = vmatpush1.bf16.msra.mxu1 %v807_v8  ;;  %v830_v46 = vld [vmem:[%s1051_s1 + $0xc8] sm:$0xff]   ;;  %v831_v47 = vld [vmem:[%s1051_s1 + $0xc0] sm:$0xff]  }
  0x1a   : > { %321 = vmatprep.subr.bf16.mxu0 %v844_v1  ;;  %437 = vmatprep.subr.bf16.mxu1 %v844_v1  ;;  %v834_v50 = vld [vmem:[%s1051_s1 + $0x108] sm:$0xff]   ;;  %v835_v51 = vld [vmem:[%s1051_s1 + $0x100] sm:$0xff]  }
  0x1b   : > { %v470_v52 = vld [vmem:[%s927_s16 + $0x6] sm:$0xff]  ;;  %v471_v53 = vld [vmem:[%s927_s16 + $0xe] sm:$0xf]  ;;  %v786_v2 = vld [vmem:[%s1052_s2] ss:$0 sm:$0xff]  ;;  %s789_s16 = sshll.u32 %s1055_s13, 4 }
  0x1c   : > { %v472_v54 = vpack.c.bf16 %v471_v53, %v470_v52  ;;  %s170_s21 = scalar_lea.vmem %s1053_s3, %s789_s16 }
  0x1d   : > { %322 = vmatpush1.bf16.msra.mxu0 %v808_v9  ;;  %438 = vmatpush1.bf16.msra.mxu1 %v809_v10 }
  0x1e   : > { %323 = vmatprep.subr.bf16.mxu0 %v844_v1  ;;  %439 = vmatprep.subr.bf16.mxu1 %v844_v1 }
  0x21   : > { %324 = vmatpush1.bf16.msra.mxu0 %v810_v11  ;;  %440 = vmatpush1.bf16.msra.mxu1 %v811_v12 }
  0x22   : > { %325 = vmatprep.subr.bf16.mxu0 %v844_v1  ;;  %441 = vmatprep.subr.bf16.mxu1 %v844_v1 }
  0x25   : > { %326 = vmatpush1.bf16.msra.mxu0 %v812_v13  ;;  %442 = vmatpush1.bf16.msra.mxu1 %v813_v14 }
  0x26   : > { %327 = vmatprep.subr.bf16.mxu0 %v844_v1  ;;  %443 = vmatprep.subr.bf16.mxu1 %v844_v1 }
  0x29   : > { %328 = vmatpush1.bf16.msra.mxu0 %v814_v20  ;;  %444 = vmatpush1.bf16.msra.mxu1 %v815_v22 }
  0x2a   : > { %337 = vmatprep.subr.bf16.mxu0 %v844_v1  ;;  %453 = vmatprep.subr.bf16.mxu1 %v844_v1 }
  0x2d   : > { %338 = vmatpush2.bf16.msra.mxu0 %v816_v23  ;;  %454 = vmatpush2.bf16.msra.mxu1 %v817_v24 }
  0x2e   : > { %339 = vmatprep.subr.bf16.mxu0 %v844_v1  ;;  %455 = vmatprep.subr.bf16.mxu1 %v844_v1 }
  0x31   : > { %340 = vmatpush2.bf16.msra.mxu0 %v818_v25  ;;  %456 = vmatpush2.bf16.msra.mxu1 %v819_v26 }
  0x32   : > { %341 = vmatprep.subr.bf16.mxu0 %v844_v1  ;;  %457 = vmatprep.subr.bf16.mxu1 %v844_v1 }
  0x35   : > { %342 = vmatpush2.bf16.msra.mxu0 %v820_v27  ;;  %458 = vmatpush2.bf16.msra.mxu1 %v821_v28 }
  0x36   : > { %343 = vmatprep.subr.bf16.mxu0 %v844_v1  ;;  %459 = vmatprep.subr.bf16.mxu1 %v844_v1 }
  0x39   : > { %344 = vmatpush2.bf16.msra.mxu0 %v822_v29  ;;  %460 = vmatpush2.bf16.msra.mxu1 %v823_v32 }
  0x3a   : > { %578 = vmatprep.subr.bf16.mxu0 %v844_v1 }
  0x3c   : > { %346 = vmatmul.mubr.bf16.vlgmr.msra.gmra.mxu0 %v207_v37  ;;  %462 = vmatmul.mubr.bf16.vlgmr.msra.gmra.mxu1 %v174_v38 }
  0x3d   : > { %579 = vmatpush1.bf16.msra.mxu0 %v824_v39  ;;  %785 = vmatprep.mubr.msk.bf16.mxu0 %vm178_vm0, %v475_v40 }
  0x3e   : > { %580 = vmatprep.subr.bf16.mxu0 %v844_v1 }
  0x41   : > { %581 = vmatpush1.bf16.msra.mxu0 %v825_v41 }
  0x42   : > { %582 = vmatprep.subr.bf16.mxu0 %v844_v1 }
  0x45   : > { %583 = vmatpush1.bf16.msra.mxu0 %v826_v42 }
  0x46   : > { %584 = vmatprep.subr.bf16.mxu0 %v844_v1 }
  0x49   : > { %585 = vmatpush1.bf16.msra.mxu0 %v827_v43 }
  0x4a   : > { %586 = vmatprep.subr.bf16.mxu0 %v844_v1 }
  0x4d   : > { %587 = vmatpush1.bf16.msra.mxu0 %v828_v44 }
  0x4e   : > { %588 = vmatprep.subr.bf16.mxu0 %v844_v1 }
  0x51   : > { %589 = vmatpush1.bf16.msra.mxu0 %v829_v45 }
  0x52   : > { %590 = vmatprep.subr.bf16.mxu0 %v844_v1 }
  0x55   : > { %591 = vmatpush1.bf16.msra.mxu0 %v830_v46 }
  0x56   : > { %592 = vmatprep.subr.bf16.mxu0 %v844_v1 }
  0x59   : > { %593 = vmatpush1.bf16.msra.mxu0 %v831_v47 }
  0x5a   : > { %602 = vmatprep.subr.bf16.mxu0 %v844_v1 }
  0x5d   : > { %603 = vmatpush2.bf16.msra.mxu0 %v832_v48 }
  0x5e   : > { %604 = vmatprep.subr.bf16.mxu0 %v844_v1 }
  0x61   : > { %605 = vmatpush2.bf16.msra.mxu0 %v833_v49 }
  0x62   : > { %606 = vmatprep.subr.bf16.mxu0 %v844_v1 }
  0x65   : > { %607 = vmatpush2.bf16.msra.mxu0 %v834_v50 }
  0x66   : > { %608 = vmatprep.subr.bf16.mxu0 %v844_v1 }
  0x69   : > { %609 = vmatpush2.bf16.msra.mxu0 %v835_v51 }
  0x6c   : > { %611 = vmatmul.mubr.bf16.vlgmr.msra.gmra.mxu0 %v472_v54 }
  0xfc   : > { %v347_v55 = vpop.f32.mrf.mxu0  ;;  %v463_v56 = vpop.f32.mrf.mxu1 }
  0xfd   : > { %v464_v63 = vadd.f32 %v463_v56, %v347_v55 }
  0xfe   : > { %v349_v57 = vpop.f32.mrf.mxu0  ;;  %v465_v58 = vpop.f32.mrf.mxu1 }
 0x100   : > { %v350_v59 = vpop.f32.mrf.mxu0  ;;  %v466_v60 = vpop.f32.mrf.mxu1 }
 0x101   : > { %v467_v4 = vadd.f32 %v466_v60, %v350_v59 }
 0x102   : > { %v352_v61 = vpop.f32.mrf.mxu0  ;;  %v468_v62 = vpop.f32.mrf.mxu1 }
 0x12c   : > { %v612_v0 = vpop.f32.mrf.mxu0 }
 0x12d   : > { %v619_v3 = vadd.f32 %v612_v0, %v464_v63 }
 0x12e   : > { %v614_v1 = vpop.f32.mrf.mxu0 }
 0x12f   : > { %v628_v5 = vadd.f32 %v786_v2, %v619_v3 }
 0x130   : > { %v615_v6 = vpop.f32.mrf.mxu0 }
 0x131   : > { %v630_v7 = vmax.f32 %v628_v5, 0.0  ;;  %v620_v8 = vadd.f32 %v615_v6, %v467_v4 }
 0x132   : > { %v617_v9 = vpop.f32.mrf.mxu0 }
 0x133   : > { %633 = vst.msk [vmem:[%s170_s21] sm:$0xff] %vm632_vm1, %v630_v7  ;;  %v629_v10 = vadd.f32 %v786_v2, %v620_v8 }
 0x135   : > { %v631_v11 = vmax.f32 %v629_v10, 0.0 }
 0x137   : > { %635 = vst.msk [vmem:[%s170_s21 + $0x8] sm:$0xf] %vm634_vm2, %v631_v11 }
 0x138 PF: > { %s13_s12 = sadd.s32 1, %s842_s12  }
 0x139   : > { %p10_p4 = scmp.ge.s32.totalorder %s13_s12, 4  }
 0x13b   :  { %12 = sbr.rel (!%p10_p4) target bundleno = 1 (0x1), region = 64 }

// kernel: refinement_net_forward.15
= control target key start
LH: loop header
LB: loop body
LE: loop exit
PB: predicated region body
PF: predicated region fallthrough
CT: control target
= control target key end

     0   :  { %s1311_s12 = smov 0   ;;  %s1542_s0 = inlined_call_operand.vmem [shape: f32[2,18,96], index: 0, kind: input, shape index: {}]   ;;  %s1543_s1 = inlined_call_operand.vmem [shape: bf16[3,288,96], index: 1, kind: input, shape index: {}]   ;;  %s1544_s2 = inlined_call_operand.vmem [shape: f32[1,96], index: 2, kind: input, shape index: {}]   ;;  %s1545_s3 = inlined_call_operand.vmem [shape: f32[2,8,96], index: 3, kind: output, shape index: {}]  }
   0x1 LB: > { %s974_s13 = sadd.s32 4294967295, %s1285_s12   ;;  %p978_p0 = scmp.ge.s32.totalorder %s1285_s12, 1  ;;  %s1285_s12 = sphi %s1311_s12, %s13_s12  }
   0x2   : > { %p137_p1 = scmp.lt.s32.totalorder %s1285_s12, 3 }
   0x4   : > { %p138_p2 = pnand %p978_p0, %p137_p1 }
   0x5   : > { %p160_p3 = scmp.lt.s32.totalorder (!%p138_p2), %s974_s13, 1  ;;  %s1289_s5 = smov (!%p138_p2), 64  }
   0x6   : > { %141 = sbr.rel (%p138_p2) target bundleno = 383 (0x17f), region = 32  ;;  %s1290_s6 = smov (!%p138_p2), 96  }
   0xb   : > { %v1225_v0 = vld [vmem:[%s1543_s1 + $0x108] sm:$0xff]   ;;  %s1547_s13 = smov (!%p160_p3, %s974_s13), 1  ;;  %v1227_v2 = vld [vmem:[%s1543_s1 + $0x100] sm:$0xff]   ;;  %v1287_v4 = vmov 0.0   ;;  %v1229_v5 = vld [vmem:[%s1543_s1 + $0xf8] sm:$0xff]   ;;  %vm1288_vm0 = vmmov 0  }
   0xc   : > { %v1226_v1 = vld [vmem:[%s1543_s1 + $0xc8] sm:$0xff]   ;;  %1113 = vmatprep.subr.bf16.mxu0 %v1225_v0  ;;  %s1212_s20 = smul.u32 24, %s1547_s13  ;;  %v1228_v3 = vld [vmem:[%s1543_s1 + $0xc0] sm:$0xff]   ;;  %1188 = vmatprep.subr.bf16.mxu1 %v1287_v4  ;;  %v1230_v12 = vld [vmem:[%s1543_s1 + $0xb8] sm:$0xff]   ;;  %vm391_vm1 = vcmask 261120   ;;  %vm187_vm2 = vcmask 523264  }
   0xd   : > { %1114 = vmatpush3.bf16.msra.mxu0 %v1226_v1  ;;  %1192 = vmatprep.mubr.msk.bf16.mxu1 %vm1288_vm0, %v1287_v4  ;;  %v1231_v14 = vld [vmem:[%s1543_s1 + $0xf0] sm:$0xff]   ;;  %v1233_v19 = vld [vmem:[%s1543_s1 + $0xe8] sm:$0xff]   ;;  %v1235_v20 = vld [vmem:[%s1543_s1 + $0x118] sm:$0xff]   ;;  %vm182_vm3 = vcmask 785408  }
   0xe   : > { %1115 = vmatprep.subr.bf16.mxu0 %v1227_v2  ;;  %s1341_s27 = scalar_lea.vmem %s1542_s0, %s1212_s20  ;;  %v1232_v18 = vld [vmem:[%s1543_s1 + $0xb0] sm:$0xff]   ;;  %v1234_v23 = vld [vmem:[%s1543_s1 + $0xa8] sm:$0xff]   ;;  %1189 = vmatpush3.bf16.msra.mxu1 %v1235_v20  ;;  %v1236_v25 = vld [vmem:[%s1543_s1 + $0xe0] sm:$0xff]  }
   0xf   : > { %v231_v6 = vld [vmem:[%s1341_s27 + $0x6] sm:$0xff]  ;;  %1190 = vmatprep.subr.bf16.mxu1 %v1287_v4  ;;  %v1238_v24 = vld [vmem:[%s1543_s1 + $0x110] sm:$0xff]   ;;  %v1241_v27 = vld [vmem:[%s1543_s1 + $0x78] sm:$0xff]  }
  0x10   : > { %v229_v7 = vld [vmem:[%s1341_s27 + $0x5] sm:$0xff]  ;;  %v232_v9 = vpack.c.bf16 %v231_v6, %v231_v6  ;;  %v1239_v28 = vld [vmem:[%s1543_s1 + $0xd8] sm:$0xff]   ;;  %v1243_v30 = vld [vmem:[%s1543_s1 + $0xd0] sm:$0xff]  }
  0x11   : > { %v172_v8 = vld [vmem:[%s1341_s27 + $0x1] sm:$0xff]  ;;  %1116 = vmatpush3.bf16.msra.mxu0 %v1228_v3  ;;  %v666_v13 = vld [vmem:[%s1341_s27 + $0x9] sm:$0xff]  ;;  %v230_v15 = vpack.c.bf16 %v229_v7, %v229_v7  ;;  %v1240_v29 = vld [vmem:[%s1543_s1 + $0x98] sm:$0xff]  }
  0x12   : > { %v173_v10 = vpack.c.bf16 %v172_v8, %v172_v8  ;;  %v174_v11 = vld [vmem:[%s1341_s27 + $0x2] sm:$0xff]  ;;  %1117 = vmatprep.subr.bf16.mxu0 %v1229_v5  ;;  %237 = vrot.lane.b32.xlu0 %v232_v9, %s1289_s5  ;;  %v668_v17 = vld [vmem:[%s1341_s27 + $0xa] sm:$0xff]  ;;  %v667_v21 = vpack.c.bf16 %v666_v13, %v666_v13  ;;  %v1247_v32 = vld [vmem:[%s1543_s1 + $0x198] sm:$0xff]  }
  0x13   : > { %v175_v16 = vpack.c.bf16 %v174_v11, %v174_v11  ;;  %v669_v22 = vpack.c.bf16 %v668_v17, %v668_v17  ;;  %v1237_v26 = vld [vmem:[%s1543_s1 + $0xa0] sm:$0xff]   ;;  %1191 = vmatpush3.bf16.msra.mxu1 %v1238_v24  ;;  %v1244_v31 = vld [vmem:[%s1543_s1 + $0x90] sm:$0xff]   ;;  %v1242_v33 = vld [vmem:[%s1543_s1 + $0x38] sm:$0xff]  }
  0x14   : > { %177 = vrot.lane.b32.xlu1 %v173_v10, %s1290_s6  ;;  %1138 = vmatprep.subr.bf16.mxu1 %v1241_v27  ;;  %v227_v34 = vld [vmem:[%s1341_s27 + $0x4] sm:$0xff]  ;;  %v1245_v35 = vld [vmem:[%s1543_s1 + $0x70] sm:$0xff]   ;;  %v1248_v42 = vld [vmem:[%s1543_s1 + $0x158] sm:$0xff]  }
  0x15   : > { %1118 = vmatpush3.bf16.msra.mxu0 %v1230_v12  ;;  %v228_v38 = vpack.c.bf16 %v227_v34, %v227_v34  ;;  %v1246_v39 = vld [vmem:[%s1543_s1 + $0x30] sm:$0xff]   ;;  %v1249_v40 = vld [vmem:[%s1543_s1 + $0x68] sm:$0xff]   ;;  %v1253_v49 = vld [vmem:[%s1543_s1 + $0x60] sm:$0xff]  }
  0x16   : > { %1119 = vmatprep.subr.bf16.mxu0 %v1231_v14  ;;  %234 = vrot.lane.b32.xlu0 %v230_v15, %s1290_s6  ;;  %v1251_v46 = vld [vmem:[%s1543_s1 + $0x190] sm:$0xff]   ;;  %v1250_v48 = vld [vmem:[%s1543_s1 + $0x28] sm:$0xff]   ;;  %v1254_v55 = vld [vmem:[%s1543_s1 + $0x20] sm:$0xff]  }
  0x17   : > { %v1252_v50 = vld [vmem:[%s1543_s1 + $0x150] sm:$0xff]   ;;  %v1255_v53 = vld [vmem:[%s1543_s1 + $0x188] sm:$0xff]   ;;  %v1257_v56 = vld [vmem:[%s1543_s1 + $0x58] sm:$0xff]  }
  0x18   : > { %180 = vrot.lane.b32.xlu1 %v175_v16, %s1289_s5  ;;  %v1256_v57 = vld [vmem:[%s1543_s1 + $0x148] sm:$0xff]   ;;  %v1259_v58 = vld [vmem:[%s1543_s1 + $0x180] sm:$0xff]   ;;  %v1258_v59 = vld [vmem:[%s1543_s1 + $0x18] sm:$0xff]  }
  0x19   : > { %1120 = vmatpush3.bf16.msra.mxu0 %v1232_v18  ;;  %v1261_v60 = vld [vmem:[%s1543_s1 + $0x50] sm:$0xff]   ;;  %v1260_v61 = vld [vmem:[%s1543_s1 + $0x140] sm:$0xff]   ;;  %v1263_v62 = vld [vmem:[%s1543_s1 + $0x178] sm:$0xff]  }
  0x1a   : > { %1121 = vmatprep.subr.bf16.mxu0 %v1233_v19  ;;  %671 = vrot.lane.b32.xlu0 %v667_v21, %s1290_s6  ;;  %v1262_v63 = vld [vmem:[%s1543_s1 + $0x10] sm:$0xff]   ;;  %v1265_v0 = vld [vmem:[%s1543_s1 + $0x48] sm:$0xff]   ;;  %v1264_v1 = vld [vmem:[%s1543_s1 + $0x138] sm:$0xff]   ;;  %s980_s6 = sshll.u32 %s1547_s13, 3 }
  0x1b   : > { %v1267_v2 = vld [vmem:[%s1543_s1 + $0x170] sm:$0xff]   ;;  %v1266_v3 = vld [vmem:[%s1543_s1 + $0x8] sm:$0xff]   ;;  %v1269_v5 = vld [vmem:[%s1543_s1 + $0x40] sm:$0xff]   ;;  %s168_s9 = scalar_lea.vmem %s1545_s3, %s980_s6 }
  0x1c   : > { %674 = vrot.lane.b32.xlu1 %v669_v22, %s1289_s5  ;;  %v1268_v6 = vld [vmem:[%s1543_s1 + $0x130] sm:$0xff]   ;;  %v170_v7 = vld [vmem:[%s1341_s27] sm:$0xff]  ;;  %v1271_v8 = vld [vmem:[%s1543_s1 + $0x168] sm:$0xff]  }
  0x1d   : > { %1122 = vmatpush3.bf16.msra.mxu0 %v1234_v23  ;;  %v1270_v9 = vld [vmem:[%s1543_s1] sm:$0xff]   ;;  %v171_v10 = vpack.c.bf16 %v170_v7, %v170_v7  ;;  %v1272_v11 = vld [vmem:[%s1543_s1 + $0x128] sm:$0xff]  }
  0x1e   : > { %1123 = vmatprep.subr.bf16.mxu0 %v1236_v25  ;;  %v1274_v12 = vld [vmem:[%s1543_s1 + $0x160] sm:$0xff]   ;;  %v664_v13 = vld [vmem:[%s1341_s27 + $0x8] sm:$0xff] }
  0x1f   : > { %v1273_v14 = vld [vmem:[%s1543_s1 + $0x88] sm:$0xff]   ;;  %v665_v16 = vpack.c.bf16 %v664_v13, %v664_v13  ;;  %v1275_v17 = vld [vmem:[%s1543_s1 + $0x120] sm:$0xff]  }
  0x20   : > { %v1276_v18 = vld [vmem:[%s1543_s1 + $0x80] sm:$0xff]   ;;  %v1277_v20 = vld [vmem:[%s1543_s1 + $0x1a8] sm:$0xff]  }
  0x21   : > { %1124 = vmatpush3.bf16.msra.mxu0 %v1237_v26  ;;  %v1278_v21 = vld [vmem:[%s1543_s1 + $0x1a0] sm:$0xff]  }
  0x22   : > { %1125 = vmatprep.subr.bf16.mxu0 %v1239_v28 }
  0x25   : > { %1126 = vmatpush3.bf16.msra.mxu0 %v1240_v29 }
  0x26   : > { %1127 = vmatprep.subr.bf16.mxu0 %v1243_v30 }
  0x29   : > { %1128 = vmatpush3.bf16.msra.mxu0 %v1244_v31 }
  0x2a   : > { %1163 = vmatprep.subr.bf16.mxu0 %v1247_v32 }
  0x84   : > { %v238_v36 = vpop.permute.xlu0 %237 }
  0x85   : > { %1193 = vmatmul.mubr.msk.bf16.vlgmr.msra.gmra.mxu1 %vm391_vm1, %v238_v36 }
  0x86   : > { %v1404_v37 = vpop.permute.xlu1 %177  ;;  %1139 = vmatpush3.bf16.msra.mxu1 %v1242_v33 }
  0x87   : > { %1140 = vmatprep.subr.bf16.mxu1 %v1245_v35  ;;  %v185_v15 = vsel %vm182_vm3, %v171_v10, %v1404_v37 }
  0x88   : > { %v235_v41 = vpop.permute.xlu0 %234 }
  0x89   : > { %v244_v44 = vsel %vm187_vm2, %v235_v41, %v238_v36  ;;  %v241_v45 = vsel %vm182_vm3, %v228_v38, %v235_v41 }
  0x8a   : > { %v1416_v43 = vpop.permute.xlu1 %180  ;;  %1141 = vmatpush3.bf16.msra.mxu1 %v1246_v39  ;;  %426 = vmatprep.mubr.bf16.mxu0 %v244_v44 }
  0x8b   : > { %v189_v47 = vsel %vm187_vm2, %v1404_v37, %v1416_v43  ;;  %427 = vmatmul.mubr.bf16.vlgmr.msra.gmra.mxu0 %v241_v45  ;;  %1142 = vmatprep.subr.bf16.mxu1 %v1249_v40 }
  0x8c   : > { %1164 = vmatpush3.bf16.msra.mxu0 %v1248_v42  ;;  %616 = vmatprep.mubr.bf16.mxu1 %v189_v47  ;;  %v672_v51 = vpop.permute.xlu0 %671 }
  0x8d   : > { %1165 = vmatprep.subr.bf16.mxu0 %v1251_v46  ;;  %v678_v19 = vsel %vm182_vm3, %v665_v16, %v672_v51 }
  0x8e   : > { %v1435_v52 = vpop.permute.xlu1 %674  ;;  %1143 = vmatpush3.bf16.msra.mxu1 %v1250_v48 }
  0x8f   : > { %v681_v54 = vsel %vm187_vm2, %v672_v51, %v1435_v52  ;;  %1144 = vmatprep.subr.bf16.mxu1 %v1253_v49  ;;  %v1110_v49 = vld [vmem:[%s1544_s2] ss:$0 sm:$0xff] }
  0x90   : > { %862 = vmatprep.mubr.bf16.mxu0 %v681_v54  ;;  %1166 = vmatpush3.bf16.msra.mxu0 %v1252_v50 }
  0x91   : > { %1167 = vmatprep.subr.bf16.mxu0 %v1255_v53 }
  0x92   : > { %1145 = vmatpush3.bf16.msra.mxu1 %v1254_v55 }
  0x93   : > { %1146 = vmatprep.subr.bf16.mxu1 %v1257_v56 }
  0x94   : > { %1168 = vmatpush3.bf16.msra.mxu0 %v1256_v57 }
  0x95   : > { %1169 = vmatprep.subr.bf16.mxu0 %v1259_v58 }
  0x96   : > { %1147 = vmatpush3.bf16.msra.mxu1 %v1258_v59 }
  0x97   : > { %1148 = vmatprep.subr.bf16.mxu1 %v1261_v60 }
  0x98   : > { %1170 = vmatpush3.bf16.msra.mxu0 %v1260_v61 }
  0x99   : > { %1171 = vmatprep.subr.bf16.mxu0 %v1263_v62 }
  0x9a   : > { %1149 = vmatpush3.bf16.msra.mxu1 %v1262_v63 }
  0x9b   : > { %1150 = vmatprep.subr.bf16.mxu1 %v1265_v0 }
  0x9c   : > { %1172 = vmatpush3.bf16.msra.mxu0 %v1264_v1 }
  0x9d   : > { %1173 = vmatprep.subr.bf16.mxu0 %v1267_v2 }
  0x9e   : > { %1151 = vmatpush3.bf16.msra.mxu1 %v1266_v3 }
  0x9f   : > { %1152 = vmatprep.subr.bf16.mxu1 %v1269_v5 }
  0xa0   : > { %1174 = vmatpush3.bf16.msra.mxu0 %v1268_v6 }
  0xa1   : > { %1175 = vmatprep.subr.bf16.mxu0 %v1271_v8 }
  0xa2   : > { %1153 = vmatpush3.bf16.msra.mxu1 %v1270_v9 }
  0xa3   : > { %1196 = vmatprep.subr.bf16.mxu1 %v1287_v4 }
  0xa4   : > { %1176 = vmatpush3.bf16.msra.mxu0 %v1272_v11 }
  0xa5   : > { %617 = vmatmul.mubr.bf16.vlgmr.msra.gmra.mxu1 %v185_v15  ;;  %1177 = vmatprep.subr.bf16.mxu0 %v1274_v12 }
  0xa6   : > { %1197 = vmatpush3.bf16.msra.mxu1 %v1273_v14  ;;  %1200 = vmatprep.mubr.msk.bf16.mxu1 %vm1288_vm0, %v1287_v4 }
  0xa7   : > { %1198 = vmatprep.subr.bf16.mxu1 %v1287_v4 }
  0xa8   : > { %1178 = vmatpush3.bf16.msra.mxu0 %v1275_v17 }
  0xaa   : > { %1199 = vmatpush3.bf16.msra.mxu1 %v1276_v18 }
  0xab   : > { %863 = vmatmul.mubr.bf16.vlgmr.msra.gmra.mxu0 %v678_v19  ;;  %1204 = vmatprep.subr.bf16.mxu1 %v1287_v4 }
  0xad   : > { %1201 = vmatmul.mubr.msk.bf16.vlgmr.msra.gmra.mxu1 %vm391_vm1, %v1416_v43 }
  0xae   : > { %1205 = vmatpush3.bf16.msra.mxu1 %v1277_v20  ;;  %1208 = vmatprep.mubr.msk.bf16.mxu1 %vm1288_vm0, %v1287_v4 }
  0xaf   : > { %1206 = vmatprep.subr.bf16.mxu1 %v1287_v4 }
  0xb2   : > { %1207 = vmatpush3.bf16.msra.mxu1 %v1278_v21 }
  0xb5   : > { %1209 = vmatmul.mubr.msk.bf16.vlgmr.msra.gmra.mxu1 %vm391_vm1, %v1435_v52 }
 0x145   : > { %v468_v22 = vpop.f32.mrf.mxu1 }
 0x147   : > { %v1194_v23 = vpop.f32.mrf.mxu1 }
 0x149   : > { %v471_v24 = vpop.f32.mrf.mxu1 }
 0x14b   : > { %v1129_v25 = vpop.f32.mrf.mxu0  ;;  %v1195_v26 = vpop.f32.mrf.mxu1 }
 0x14d   : > { %v1130_v27 = vpop.f32.mrf.mxu0 }
 0x14e   : > { %v1131_v4 = vadd.f32 %v1130_v27, %v1129_v25 }
 0x14f   : > { %v1132_v28 = vpop.f32.mrf.mxu0 }
 0x150   : > { %v469_v42 = vadd.f32 %v1131_v4, %v468_v22 }
 0x151   : > { %v1133_v29 = vpop.f32.mrf.mxu0 }
 0x165   : > { %v1154_v30 = vpop.f32.mrf.mxu1 }
 0x167   : > { %v1155_v31 = vpop.f32.mrf.mxu1 }
 0x168   : > { %v1156_v39 = vadd.f32 %v1155_v31, %v1154_v30 }
 0x169   : > { %v1157_v32 = vpop.f32.mrf.mxu1 }
 0x16a   : > { %v619_v44 = vadd.f32 %v1156_v39, %v469_v42 }
 0x16b   : > { %v1158_v33 = vpop.f32.mrf.mxu1  ;;  %v1179_v34 = vpop.f32.mrf.mxu0 }
 0x16d   : > { %v658_v35 = vpop.f32.mrf.mxu1  ;;  %v1180_v36 = vpop.f32.mrf.mxu0 }
 0x16e   : > { %v1181_v45 = vadd.f32 %v1180_v36, %v1179_v34  ;;  %v659_v47 = vadd.f32 %v658_v35, %v619_v44 }
 0x16f   : > { %v1202_v37 = vpop.f32.mrf.mxu1  ;;  %v1182_v38 = vpop.f32.mrf.mxu0 }
 0x171   : > { %v661_v40 = vpop.f32.mrf.mxu1  ;;  %v1183_v41 = vpop.f32.mrf.mxu0 }
 0x173   : > { %v1203_v43 = vpop.f32.mrf.mxu1 }
 0x175   : > { %v904_v46 = vpop.f32.mrf.mxu1 }
 0x176   : > { %v905_v48 = vadd.f32 %v1181_v45, %v904_v46 }
 0x177   : > { %v1210_v50 = vpop.f32.mrf.mxu1 }
 0x178   : > { %v910_v51 = vadd.f32 %v905_v48, %v659_v47 }
 0x179   : > { %v907_v52 = vpop.f32.mrf.mxu1 }
 0x17a   : > { %v918_v53 = vadd.f32 %v1110_v49, %v910_v51 }
 0x17b   : > { %v1211_v54 = vpop.f32.mrf.mxu1 }
 0x17c   : > { %v919_v55 = vmax.f32 %v918_v53, 0.0 }
 0x17e   : > { %920 = vst.msk [vmem:[%s168_s9] sm:$0xff] %vm182_vm3, %v919_v55 }
 0x17f PF: > { %s13_s12 = sadd.s32 1, %s1285_s12  }
 0x180   : > { %p10_p4 = scmp.ge.s32.totalorder %s13_s12, 4  }
 0x182   :  { %12 = sbr.rel (!%p10_p4) target bundleno = 1 (0x1), region = 64 }

// kernel: refinement_net_forward.16
= control target key start
LH: loop header
LB: loop body
LE: loop exit
PB: predicated region body
PF: predicated region fallthrough
CT: control target
= control target key end

     0   :  { %s1462_s12 = smov 0   ;;  %s1730_s0 = inlined_call_operand.vmem [shape: f32[2,38,96], index: 0, kind: input, shape index: {}]   ;;  %s1731_s1 = inlined_call_operand.vmem [shape: bf16[3,288,64], index: 1, kind: input, shape index: {}]   ;;  %s1732_s2 = inlined_call_operand.vmem [shape: f32[1,64], index: 2, kind: input, shape index: {}]   ;;  %s1733_s3 = inlined_call_operand.vmem [shape: f32[2,24,64], index: 3, kind: output, shape index: {}]  }
   0x1 LB: > { %s1104_s13 = sadd.s32 4294967295, %s1438_s12   ;;  %p1108_p0 = scmp.ge.s32.totalorder %s1438_s12, 1  ;;  %s1438_s12 = sphi %s1462_s12, %s13_s12  }
   0x2   : > { %p137_p1 = scmp.lt.s32.totalorder %s1438_s12, 3 }
   0x4   : > { %p138_p2 = pnand %p1108_p0, %p137_p1 }
   0x5   : > { %p161_p3 = scmp.lt.s32.totalorder (!%p138_p2), %s1104_s13, 1  ;;  %s1440_s30 = smov (!%p138_p2), 96  }
   0x6   : > { %141 = sbr.rel (%p138_p2) target bundleno = 386 (0x182), region = 32  ;;  %s1441_s6 = smov (!%p138_p2), 64  }
   0xb   : > { %v1378_v0 = vld [vmem:[%s1731_s1 + $0x78] sm:$0xff]   ;;  %s1735_s13 = smov (!%p161_p3, %s1104_s13), 1  ;;  %v1379_v1 = vld [vmem:[%s1731_s1 + $0x108] sm:$0xff]   ;;  %v1382_v4 = vld [vmem:[%s1731_s1 + $0x70] sm:$0xff]   ;;  %vm208_vm0 = vcmask 523264   ;;  %vm199_vm1 = vcmask 785408  }
   0xc   : > { %1278 = vmatprep.subr.bf16.mxu1 %v1378_v0  ;;  %v1380_v2 = vld [vmem:[%s1731_s1 + $0x38] sm:$0xff]   ;;  %s1366_s20 = smul.u32 40, %s1735_s13  ;;  %1246 = vmatprep.subr.bf16.mxu0 %v1379_v1  ;;  %v1381_v3 = vld [vmem:[%s1731_s1 + $0xc8] sm:$0xff]   ;;  %v1383_v5 = vld [vmem:[%s1731_s1 + $0x100] sm:$0xff]   ;;  %vm435_vm2 = vcmask 261120  }
   0xd   : > { %1279 = vmatpush3.bf16.msra.mxu1 %v1380_v2  ;;  %1247 = vmatpush3.bf16.msra.mxu0 %v1381_v3  ;;  %v1384_v23 = vld [vmem:[%s1731_s1 + $0x30] sm:$0xff]   ;;  %v1385_v26 = vld [vmem:[%s1731_s1 + $0xc0] sm:$0xff]   ;;  %v1386_v28 = vld [vmem:[%s1731_s1 + $0x68] sm:$0xff]  }
   0xe   : > { %s1491_s27 = scalar_lea.vmem %s1730_s0, %s1366_s20  ;;  %1280 = vmatprep.subr.bf16.mxu1 %v1382_v4  ;;  %1248 = vmatprep.subr.bf16.mxu0 %v1383_v5  ;;  %v1387_v29 = vld [vmem:[%s1731_s1 + $0xf8] sm:$0xff]   ;;  %v1388_v32 = vld [vmem:[%s1731_s1 + $0x28] sm:$0xff]   ;;  %v1390_v38 = vld [vmem:[%s1731_s1 + $0x60] sm:$0xff]  }
   0xf   : > { %v256_v6 = vld [vmem:[%s1491_s27 + $0x7] sm:$0xff]  ;;  %v257_v7 = vld [vmem:[%s1491_s27 + $0xf] sm:$0xff]  ;;  %v261_v20 = vld [vmem:[%s1491_s27 + $0x18] sm:$0xff] }
  0x10   : > { %v177_v8 = vld [vmem:[%s1491_s27 + $0x1] sm:$0xff]  ;;  %v259_v9 = vpack.c.bf16 %v257_v7, %v256_v6  ;;  %v178_v10 = vld [vmem:[%s1491_s27 + $0x9] sm:$0xff]  ;;  %v258_v21 = vld [vmem:[%s1491_s27 + $0x17] sm:$0xff]  ;;  %v263_v24 = vpack.c.bf16 %v261_v20, %v261_v20 }
  0x11   : > { %v182_v11 = vld [vmem:[%s1491_s27 + $0x2] sm:$0xff]  ;;  %v183_v12 = vld [vmem:[%s1491_s27 + $0xa] sm:$0xff]  ;;  %v180_v13 = vpack.c.bf16 %v178_v10, %v177_v8  ;;  %v184_v22 = vld [vmem:[%s1491_s27 + $0x12] sm:$0xff]  ;;  %v260_v27 = vpack.c.bf16 %v258_v21, %v258_v21  ;;  %1281 = vmatpush3.bf16.msra.mxu1 %v1384_v23  ;;  %1249 = vmatpush3.bf16.msra.mxu0 %v1385_v26 }
  0x12   : > { %v1503_v14 = vld [vmem:[%s1491_s27 + $0x8] sm:$0xff]  ;;  %v1506_v15 = vld [vmem:[%s1491_s27 + $0x10] sm:$0xff]  ;;  %v1509_v16 = vld [vmem:[%s1491_s27] sm:$0xff]  ;;  %266 = vrot.lane.b32.xlu1 %v259_v9, %s1440_s30  ;;  %v185_v19 = vpack.c.bf16 %v183_v12, %v182_v11  ;;  %1282 = vmatprep.subr.bf16.mxu1 %v1386_v28  ;;  %v186_v33 = vpack.c.bf16 %v184_v22, %v184_v22 }
  0x13   : > { %v262_v17 = vpack.c.bf16 %v1506_v15, %v1503_v14  ;;  %v175_v18 = vpack.c.bf16 %v1503_v14, %v1509_v16  ;;  %189 = vrot.lane.b32.xlu0 %v180_v13, %s1440_s30  ;;  %v179_v25 = vld [vmem:[%s1491_s27 + $0x11] sm:$0xff]  ;;  %1250 = vmatprep.subr.bf16.mxu0 %v1387_v29  ;;  %v756_v40 = vld [vmem:[%s1491_s27 + $0x1e] sm:$0xff]  ;;  %v1395_v47 = vld [vmem:[%s1731_s1 + $0xe8] sm:$0xff]   ;;  %v176_v14 = vpack.c.bf16 %v1506_v15, %v1506_v15 }
  0x14   : > { %v1536_v30 = vld [vmem:[%s1491_s27 + $0xe] sm:$0xff]  ;;  %v1539_v31 = vld [vmem:[%s1491_s27 + $0x16] sm:$0xff]  ;;  %v181_v37 = vpack.c.bf16 %v179_v25, %v179_v25  ;;  %v1392_v41 = vld [vmem:[%s1731_s1 + $0x20] sm:$0xff]   ;;  %v758_v49 = vpack.c.bf16 %v756_v40, %v756_v40 }
  0x15   : > { %v749_v34 = vld [vmem:[%s1491_s27 + $0xd] sm:$0xff]  ;;  %v750_v35 = vld [vmem:[%s1491_s27 + $0x15] sm:$0xff]  ;;  %1283 = vmatpush3.bf16.msra.mxu1 %v1388_v32  ;;  %v757_v42 = vpack.c.bf16 %v1539_v31, %v1536_v30  ;;  %v751_v43 = vld [vmem:[%s1491_s27 + $0x1d] sm:$0xff]  ;;  %v255_v20 = vpack.c.bf16 %v1539_v31, %v1539_v31 }
  0x16   : > { %272 = vrot.lane.b32.xlu1 %v262_v17, %s1441_s6  ;;  %v1389_v36 = vld [vmem:[%s1731_s1 + $0xb8] sm:$0xff]   ;;  %v1391_v39 = vld [vmem:[%s1731_s1 + $0xf0] sm:$0xff]   ;;  %1284 = vmatprep.subr.bf16.mxu1 %v1390_v38  ;;  %v752_v45 = vpack.c.bf16 %v750_v35, %v749_v34  ;;  %v1397_v50 = vld [vmem:[%s1731_s1 + $0xa8] sm:$0xff]   ;;  %v753_v51 = vpack.c.bf16 %v751_v43, %v751_v43 }
  0x17   : > { %195 = vrot.lane.b32.xlu0 %v185_v19, %s1441_s6  ;;  %1251 = vmatpush3.bf16.msra.mxu0 %v1389_v36  ;;  %v1393_v44 = vld [vmem:[%s1731_s1 + $0xb0] sm:$0xff]   ;;  %v1394_v46 = vld [vmem:[%s1731_s1 + $0x58] sm:$0xff]   ;;  %v1399_v53 = vld [vmem:[%s1731_s1 + $0xe0] sm:$0xff]  }
  0x18   : > { %1252 = vmatprep.subr.bf16.mxu0 %v1391_v39  ;;  %v1396_v48 = vld [vmem:[%s1731_s1 + $0x18] sm:$0xff]   ;;  %v1398_v52 = vld [vmem:[%s1731_s1 + $0x50] sm:$0xff]   ;;  %v1401_v55 = vld [vmem:[%s1731_s1 + $0xa0] sm:$0xff]  }
  0x19   : > { %1285 = vmatpush3.bf16.msra.mxu1 %v1392_v41  ;;  %v1400_v54 = vld [vmem:[%s1731_s1 + $0x10] sm:$0xff]   ;;  %v1402_v56 = vld [vmem:[%s1731_s1 + $0x48] sm:$0xff]   ;;  %v1403_v57 = vld [vmem:[%s1731_s1 + $0xd8] sm:$0xff]  }
  0x1a   : > { %274 = vrot.lane.b32.xlu1 %v263_v24, %s1441_s6  ;;  %1286 = vmatprep.subr.bf16.mxu1 %v1394_v46  ;;  %v1404_v58 = vld [vmem:[%s1731_s1 + $0x8] sm:$0xff]   ;;  %v1405_v59 = vld [vmem:[%s1731_s1 + $0x98] sm:$0xff]   ;;  %v1406_v60 = vld [vmem:[%s1731_s1 + $0x40] sm:$0xff]  }
  0x1b   : > { %268 = vrot.lane.b32.xlu0 %v260_v27, %s1440_s30  ;;  %1253 = vmatpush3.bf16.msra.mxu0 %v1393_v44  ;;  %v1407_v61 = vld [vmem:[%s1731_s1 + $0xd0] sm:$0xff]   ;;  %v1408_v62 = vld [vmem:[%s1731_s1] sm:$0xff]   ;;  %v1410_v0 = vld [vmem:[%s1731_s1 + $0x198] sm:$0xff]  }
  0x1c   : > { %1254 = vmatprep.subr.bf16.mxu0 %v1395_v47  ;;  %v1409_v63 = vld [vmem:[%s1731_s1 + $0x90] sm:$0xff]   ;;  %v251_v1 = vld [vmem:[%s1491_s27 + $0x6] sm:$0xff]  ;;  %v1413_v3 = vld [vmem:[%s1731_s1 + $0x118] sm:$0xff]  }
  0x1d   : > { %1287 = vmatpush3.bf16.msra.mxu1 %v1396_v48  ;;  %v254_v2 = vpack.c.bf16 %v1536_v30, %v251_v1  ;;  %v1411_v10 = vld [vmem:[%s1731_s1 + $0x158] sm:$0xff]   ;;  %v1418_v11 = vld [vmem:[%s1731_s1 + $0x110] sm:$0xff]   ;;  %v1421_v23 = vld [vmem:[%s1731_s1 + $0x88] sm:$0xff]  }
  0x1e   : > { %197 = vrot.lane.b32.xlu1 %v186_v33, %s1441_s6  ;;  %1288 = vmatprep.subr.bf16.mxu1 %v1398_v52  ;;  %v1412_v13 = vld [vmem:[%s1731_s1 + $0x190] sm:$0xff]   ;;  %v1416_v26 = vld [vmem:[%s1731_s1 + $0x148] sm:$0xff]   ;;  %v1417_v15 = vld [vmem:[%s1731_s1 + $0x180] sm:$0xff]  }
  0x1f   : > { %191 = vrot.lane.b32.xlu0 %v181_v37, %s1440_s30  ;;  %1255 = vmatpush3.bf16.msra.mxu0 %v1397_v50  ;;  %v1414_v21 = vld [vmem:[%s1731_s1 + $0x150] sm:$0xff]   ;;  %v1419_v31 = vld [vmem:[%s1731_s1 + $0x140] sm:$0xff]   ;;  %v1420_v33 = vld [vmem:[%s1731_s1 + $0x178] sm:$0xff]  }
  0x20   : > { %1256 = vmatprep.subr.bf16.mxu0 %v1399_v53  ;;  %v1422_v35 = vld [vmem:[%s1731_s1 + $0x138] sm:$0xff]   ;;  %v1424_v36 = vld [vmem:[%s1731_s1 + $0x80] sm:$0xff]   ;;  %v1423_v37 = vld [vmem:[%s1731_s1 + $0x170] sm:$0xff]  }
  0x21   : > { %1289 = vmatpush3.bf16.msra.mxu1 %v1400_v54  ;;  %v1425_v38 = vld [vmem:[%s1731_s1 + $0x130] sm:$0xff]   ;;  %v1428_v39 = vld [vmem:[%s1731_s1 + $0x1a8] sm:$0xff]   ;;  %v1429_v43 = vld [vmem:[%s1731_s1 + $0x160] sm:$0xff]  }
  0x22   : > { %767 = vrot.lane.b32.xlu1 %v757_v42, %s1441_s6  ;;  %1290 = vmatprep.subr.bf16.mxu1 %v1402_v56  ;;  %v1426_v40 = vld [vmem:[%s1731_s1 + $0x168] sm:$0xff]   ;;  %v1431_v42 = vld [vmem:[%s1731_s1 + $0x1a0] sm:$0xff]  }
  0x23   : > { %761 = vrot.lane.b32.xlu0 %v752_v45, %s1440_s30  ;;  %1257 = vmatpush3.bf16.msra.mxu0 %v1401_v55  ;;  %v1427_v41 = vld [vmem:[%s1731_s1 + $0x128] sm:$0xff]   ;;  %v745_v45 = vld [vmem:[%s1491_s27 + $0x14] sm:$0xff]  ;;  %v1430_v47 = vld [vmem:[%s1731_s1 + $0x120] sm:$0xff]  }
  0x24   : > { %1258 = vmatprep.subr.bf16.mxu0 %v1403_v57  ;;  %v744_v44 = vld [vmem:[%s1491_s27 + $0xc] sm:$0xff]  ;;  %v746_v52 = vld [vmem:[%s1491_s27 + $0x1c] sm:$0xff]  ;;  %s1367_s27 = smul.u32 24, %s1735_s13 }
  0x25   : > { %1291 = vmatpush3.bf16.msra.mxu1 %v1404_v58  ;;  %v747_v46 = vpack.c.bf16 %v745_v45, %v744_v44  ;;  %v748_v53 = vpack.c.bf16 %v746_v52, %v746_v52 }
  0x26   : > { %769 = vrot.lane.b32.xlu1 %v758_v49, %s1441_s6  ;;  %1292 = vmatprep.subr.bf16.mxu1 %v1406_v60  ;;  %s170_s11 = scalar_lea.vmem %s1733_s3, %s1367_s27 }
  0x27   : > { %763 = vrot.lane.b32.xlu0 %v753_v51, %s1440_s30  ;;  %1259 = vmatpush3.bf16.msra.mxu0 %v1405_v59 }
  0x28   : > { %1260 = vmatprep.subr.bf16.mxu0 %v1407_v61 }
  0x29   : > { %1293 = vmatpush3.bf16.msra.mxu1 %v1408_v62 }
  0x2a   : > { %1310 = vmatprep.subr.bf16.mxu1 %v1410_v0 }
  0x2b   : > { %1261 = vmatpush3.bf16.msra.mxu0 %v1409_v63 }
  0x2c   : > { %1342 = vmatprep.subr.bf16.mxu0 %v1413_v3 }
  0x84   : > { %v267_v4 = vpop.permute.xlu1 %266 }
  0x85   : > { %v190_v5 = vpop.permute.xlu0 %189  ;;  %v278_v7 = vsel %vm199_vm1, %v254_v2, %v267_v4 }
  0x86   : > { %v202_v17 = vsel %vm199_vm1, %v175_v18, %v190_v5  ;;  %v1415_v18 = vld [vmem:[%s1731_s1 + $0x188] sm:$0xff]  }
  0x88   : > { %v273_v6 = vpop.permute.xlu1 %272 }
  0x89   : > { %v196_v8 = vpop.permute.xlu0 %195  ;;  %v285_v9 = vsel %vm208_vm0, %v267_v4, %v273_v6 }
  0x8a   : > { %472 = vmatprep.mubr.bf16.mxu0 %v285_v9  ;;  %v210_v12 = vsel %vm208_vm0, %v190_v5, %v196_v8 }
  0x8b   : > { %680 = vmatprep.mubr.bf16.mxu1 %v210_v12  ;;  %473 = vmatmul.mubr.bf16.vlgmr.msra.gmra.mxu0 %v278_v7 }
  0x8c   : > { %681 = vmatmul.mubr.bf16.vlgmr.msra.gmra.mxu1 %v202_v17  ;;  %1343 = vmatpush3.bf16.msra.mxu0 %v1413_v3  ;;  %v275_v19 = vpop.permute.xlu1 %274 }
  0x8d   : > { %1311 = vmatpush3.bf16.msra.mxu1 %v1411_v10  ;;  %v269_v22 = vpop.permute.xlu0 %268  ;;  %1344 = vmatprep.subr.bf16.mxu0 %v1418_v11 }
  0x8e   : > { %1312 = vmatprep.subr.bf16.mxu1 %v1412_v13  ;;  %v288_v16 = vsel %vm208_vm0, %v269_v22, %v275_v19  ;;  %v282_v24 = vsel %vm199_vm1, %v255_v20, %v269_v22 }
  0x8f   : > { %480 = vmatprep.mubr.bf16.mxu0 %v288_v16 }
  0x90   : > { %v198_v25 = vpop.permute.xlu1 %197  ;;  %1345 = vmatpush3.bf16.msra.mxu0 %v1418_v11 }
  0x91   : > { %1313 = vmatpush3.bf16.msra.mxu1 %v1414_v21  ;;  %v192_v27 = vpop.permute.xlu0 %191  ;;  %1350 = vmatprep.subr.bf16.mxu0 %v1421_v23 }
  0x92   : > { %1314 = vmatprep.subr.bf16.mxu1 %v1415_v18  ;;  %v213_v28 = vsel %vm208_vm0, %v192_v27, %v198_v25  ;;  %v206_v29 = vsel %vm199_vm1, %v176_v14, %v192_v27 }
  0x93   : > { %481 = vmatmul.mubr.bf16.gmra.mxu0 %v282_v24  ;;  %688 = vmatprep.mubr.bf16.mxu1 %v213_v28 }
  0x94   : > { %1346 = vmatprep.mubr.msk.bf16.mxu0 %vm435_vm2, %v273_v6  ;;  %689 = vmatmul.mubr.bf16.gmra.mxu1 %v206_v29  ;;  %v768_v30 = vpop.permute.xlu1 %767 }
  0x95   : > { %1315 = vmatpush3.bf16.msra.mxu1 %v1416_v26  ;;  %v762_v32 = vpop.permute.xlu0 %761 }
  0x96   : > { %1316 = vmatprep.subr.bf16.mxu1 %v1417_v15  ;;  %v780_v34 = vsel %vm208_vm0, %v762_v32, %v768_v30  ;;  %v773_v50 = vsel %vm199_vm1, %v747_v46, %v762_v32 }
  0x97   : > { %966 = vmatprep.mubr.bf16.mxu1 %v780_v34 }
  0x98   : > { %v770_v49 = vpop.permute.xlu1 %769 }
  0x99   : > { %1317 = vmatpush3.bf16.msra.mxu1 %v1419_v31  ;;  %v764_v48 = vpop.permute.xlu0 %763 }
  0x9a   : > { %1318 = vmatprep.subr.bf16.mxu1 %v1420_v33  ;;  %v783_v51 = vsel %vm208_vm0, %v764_v48, %v770_v49  ;;  %v777_v54 = vsel %vm199_vm1, %v748_v53, %v764_v48  ;;  %v1243_v33 = vld [vmem:[%s1732_s2] ss:$0 sm:$0xff] }
  0x9b   : > { %1347 = vmatmul.mubr.msk.bf16.vlgmr.msra.gmra.mxu0 %vm435_vm2, %v275_v19 }
  0x9c   : > { %1351 = vmatpush3.bf16.msra.mxu0 %v1421_v23  ;;  %1354 = vmatprep.mubr.msk.bf16.mxu0 %vm435_vm2, %v196_v8 }
  0x9d   : > { %1319 = vmatpush3.bf16.msra.mxu1 %v1422_v35  ;;  %1352 = vmatprep.subr.bf16.mxu0 %v1424_v36 }
  0x9e   : > { %1320 = vmatprep.subr.bf16.mxu1 %v1423_v37 }
  0xa0   : > { %1353 = vmatpush3.bf16.msra.mxu0 %v1424_v36 }
  0xa1   : > { %1321 = vmatpush3.bf16.msra.mxu1 %v1425_v38  ;;  %1358 = vmatprep.subr.bf16.mxu0 %v1428_v39 }
  0xa2   : > { %1322 = vmatprep.subr.bf16.mxu1 %v1426_v40 }
  0xa3   : > { %1355 = vmatmul.mubr.msk.bf16.vlgmr.msra.gmra.mxu0 %vm435_vm2, %v198_v25 }
  0xa4   : > { %1359 = vmatpush3.bf16.msra.mxu0 %v1428_v39  ;;  %1362 = vmatprep.mubr.msk.bf16.mxu0 %vm435_vm2, %v768_v30 }
  0xa5   : > { %1323 = vmatpush3.bf16.msra.mxu1 %v1427_v41  ;;  %1360 = vmatprep.subr.bf16.mxu0 %v1431_v42 }
  0xa6   : > { %1324 = vmatprep.subr.bf16.mxu1 %v1429_v43 }
  0xa8   : > { %1361 = vmatpush3.bf16.msra.mxu0 %v1431_v42 }
  0xa9   : > { %1325 = vmatpush3.bf16.msra.mxu1 %v1430_v47 }
  0xab   : > { %1363 = vmatmul.mubr.msk.bf16.vlgmr.msra.gmra.mxu0 %vm435_vm2, %v770_v49 }
  0xac   : > { %967 = vmatmul.mubr.bf16.vlgmr.msra.gmra.mxu1 %v773_v50 }
  0xad   : > { %974 = vmatprep.mubr.bf16.mxu1 %v783_v51 }
  0xb4   : > { %975 = vmatmul.mubr.bf16.gmra.mxu1 %v777_v54 }
 0x14b   : > { %v1262_v55 = vpop.f32.mrf.mxu0 }
 0x14c   : > { %v1294_v56 = vpop.f32.mrf.mxu1 }
 0x14d   : > { %v1263_v57 = vpop.f32.mrf.mxu0 }
 0x14e   : > { %v1295_v58 = vpop.f32.mrf.mxu1  ;;  %v1264_v17 = vadd.f32 %v1263_v57, %v1262_v55 }
 0x14f   : > { %v1265_v59 = vpop.f32.mrf.mxu0  ;;  %v1296_v23 = vadd.f32 %v1295_v58, %v1294_v56 }
 0x150   : > { %v1297_v60 = vpop.f32.mrf.mxu1 }
 0x151   : > { %v1266_v61 = vpop.f32.mrf.mxu0 }
 0x152   : > { %v1298_v62 = vpop.f32.mrf.mxu1  ;;  %v1267_v14 = vadd.f32 %v1266_v61, %v1265_v59 }
 0x153   : > { %v1268_v63 = vpop.f32.mrf.mxu0  ;;  %v1299_v28 = vadd.f32 %v1298_v62, %v1297_v60 }
 0x154   : > { %v1300_v0 = vpop.f32.mrf.mxu1 }
 0x155   : > { %v1269_v1 = vpop.f32.mrf.mxu0 }
 0x156   : > { %v1301_v2 = vpop.f32.mrf.mxu1  ;;  %v1270_v29 = vadd.f32 %v1269_v1, %v1268_v63 }
 0x157   : > { %v1271_v3 = vpop.f32.mrf.mxu0  ;;  %v1302_v32 = vadd.f32 %v1301_v2, %v1300_v0 }
 0x158   : > { %v1303_v4 = vpop.f32.mrf.mxu1 }
 0x159   : > { %v1272_v5 = vpop.f32.mrf.mxu0 }
 0x15a   : > { %v1304_v6 = vpop.f32.mrf.mxu1 }
 0x15b   : > { %v1348_v7 = vpop.f32.mrf.mxu0 }
 0x15c   : > { %v531_v36 = vadd.f32 %v1348_v7, %v1270_v29 }
 0x15d   : > { %v522_v8 = vpop.f32.mrf.mxu0 }
 0x15e   : > { %v523_v20 = vadd.f32 %v1264_v17, %v522_v8  ;;  %v691_v45 = vadd.f32 %v1302_v32, %v531_v36 }
 0x15f   : > { %v1349_v9 = vpop.f32.mrf.mxu0 }
 0x160   : > { %v683_v25 = vadd.f32 %v1296_v23, %v523_v20 }
 0x161   : > { %v525_v10 = vpop.f32.mrf.mxu0 }
 0x162   : > { %v526_v24 = vadd.f32 %v1267_v14, %v525_v10 }
 0x163   : > { %v1356_v11 = vpop.f32.mrf.mxu0 }
 0x164   : > { %v686_v37 = vadd.f32 %v1299_v28, %v526_v24  ;;  %v739_v50 = vadd.f32 %v1356_v11, %v691_v45 }
 0x165   : > { %v730_v12 = vpop.f32.mrf.mxu0 }
 0x166   : > { %v731_v30 = vadd.f32 %v730_v12, %v683_v25 }
 0x167   : > { %v1357_v13 = vpop.f32.mrf.mxu0 }
 0x169   : > { %v733_v19 = vpop.f32.mrf.mxu0 }
 0x16a   : > { %v734_v41 = vadd.f32 %v733_v19, %v686_v37 }
 0x16b   : > { %v1364_v21 = vpop.f32.mrf.mxu0 }
 0x16c   : > { %v1326_v22 = vpop.f32.mrf.mxu1 }
 0x16d   : > { %v1016_v16 = vpop.f32.mrf.mxu0 }
 0x16e   : > { %v1327_v18 = vpop.f32.mrf.mxu1 }
 0x16f   : > { %v1328_v26 = vadd.f32 %v1327_v18, %v1326_v22  ;;  %v1365_v27 = vpop.f32.mrf.mxu0 }
 0x170   : > { %v1329_v15 = vpop.f32.mrf.mxu1 }
 0x171   : > { %v1017_v31 = vadd.f32 %v1328_v26, %v1016_v16  ;;  %v1019_v35 = vpop.f32.mrf.mxu0 }
 0x172   : > { %v1330_v34 = vpop.f32.mrf.mxu1 }
 0x173   : > { %v1030_v38 = vadd.f32 %v1017_v31, %v731_v30  ;;  %v1331_v39 = vadd.f32 %v1330_v34, %v1329_v15 }
 0x174   : > { %v1332_v40 = vpop.f32.mrf.mxu1 }
 0x175   : > { %v1040_v42 = vadd.f32 %v1243_v33, %v1030_v38  ;;  %v1020_v43 = vadd.f32 %v1331_v39, %v1019_v35 }
 0x176   : > { %v1333_v44 = vpop.f32.mrf.mxu1 }
 0x177   : > { %v1043_v46 = vmax.f32 %v1040_v42, 0.0  ;;  %v1031_v47 = vadd.f32 %v1020_v43, %v734_v41  ;;  %v1334_v48 = vadd.f32 %v1333_v44, %v1332_v40 }
 0x178   : > { %v1335_v49 = vpop.f32.mrf.mxu1 }
 0x179   : > { %1046 = vst.msk [vmem:[%s170_s11] sm:$0xff] %vm208_vm0, %v1043_v46  ;;  %v1041_v51 = vadd.f32 %v1243_v33, %v1031_v47  ;;  %v1025_v52 = vadd.f32 %v1364_v21, %v1334_v48 }
 0x17a   : > { %v1336_v53 = vpop.f32.mrf.mxu1 }
 0x17b   : > { %v1044_v54 = vmax.f32 %v1041_v51, 0.0  ;;  %v1032_v55 = vadd.f32 %v1025_v52, %v739_v50 }
 0x17d   : > { %1047 = vst.msk [vmem:[%s170_s11 + $0x8] sm:$0xff] %vm208_vm0, %v1044_v54  ;;  %v1042_v56 = vadd.f32 %v1243_v33, %v1032_v55 }
 0x17f   : > { %v1045_v57 = vmax.f32 %v1042_v56, 0.0 }
 0x181   : > { %1048 = vst.msk [vmem:[%s170_s11 + $0x10] sm:$0xff] %vm208_vm0, %v1045_v57 }
 0x182 PF: > { %s13_s12 = sadd.s32 1, %s1438_s12  }
 0x183   : > { %p10_p4 = scmp.ge.s32.totalorder %s13_s12, 4  }
 0x185   :  { %12 = sbr.rel (!%p10_p4) target bundleno = 1 (0x1), region = 64 }

// kernel: refinement_net_forward.17
= control target key start
LH: loop header
LB: loop body
LE: loop exit
PB: predicated region body
PF: predicated region fallthrough
CT: control target
= control target key end

     0   :  { %s1994_s12 = smov 0   ;;  %s2568_s0 = inlined_call_operand.vmem [shape: f32[2,102,128], index: 0, kind: input, shape index: {}]   ;;  %s2569_s1 = inlined_call_operand.vmem [shape: bf16[3,384,32], index: 1, kind: input, shape index: {}]   ;;  %s2570_s2 = inlined_call_operand.vmem [shape: f32[1,32], index: 2, kind: input, shape index: {}]   ;;  %s2571_s3 = inlined_call_operand.vmem [shape: f32[2,80,32], index: 3, kind: output, shape index: {}]  }
   0x1 LB: > { %s1417_s13 = sadd.s32 4294967295, %s1970_s12   ;;  %p1421_p0 = scmp.ge.s32.totalorder %s1970_s12, 1  ;;  %s1970_s12 = sphi %s1994_s12, %s13_s12  }
   0x2   : > { %p137_p1 = scmp.lt.s32.totalorder %s1970_s12, 3 }
   0x4   : > { %p138_p2 = pnand %p1421_p0, %p137_p1 }
   0x5   : > { %p161_p3 = scmp.lt.s32.totalorder (!%p138_p2), %s1417_s13, 1 }
   0x6   : > { %141 = sbr.rel (%p138_p2) target bundleno = 367 (0x16f), region = 32 }
   0xb   : > { %v1892_v0 = vld [vmem:[%s2569_s1 + $0x138] sm:$0xff]   ;;  %v1972_v1 = vmov 0.0   ;;  %vm1973_vm0 = vmmov 0   ;;  %v1895_v4 = vld [vmem:[%s2569_s1 + $0x130] sm:$0xff]   ;;  %v1898_v7 = vld [vmem:[%s2569_s1 + $0x128] sm:$0xff]   ;;  %s2573_s13 = smov (!%p161_p3, %s1417_s13), 1 }
   0xc   : > { %1772 = vmatprep.subr.bf16.mxu1 %v1972_v1  ;;  %v1893_v2 = vld [vmem:[%s2569_s1 + $0x178] sm:$0xff]   ;;  %1595 = vmatprep.subr.bf16.mxu0 %v1892_v0  ;;  %v1896_v5 = vld [vmem:[%s2569_s1 + $0x170] sm:$0xff]   ;;  %v1899_v8 = vld [vmem:[%s2569_s1 + $0x168] sm:$0xff]   ;;  %s1880_s21 = smul.u32 104, %s2573_s13  ;;  %vm1351_vm1 = vcmask 261120  }
   0xd   : > { %v1894_v3 = vld [vmem:[%s2569_s1 + $0xf8] sm:$0xff]   ;;  %1788 = vmatprep.mubr.msk.bf16.mxu1 %vm1973_vm0, %v1972_v1  ;;  %1773 = vmatpush3.bf16.msra.mxu1 %v1893_v2  ;;  %v1897_v6 = vld [vmem:[%s2569_s1 + $0xf0] sm:$0xff]   ;;  %v1900_v9 = vld [vmem:[%s2569_s1 + $0xe8] sm:$0xff]  }
   0xe   : > { %1596 = vmatpush3.bf16.msra.mxu0 %v1894_v3  ;;  %1774 = vmatprep.subr.bf16.mxu1 %v1972_v1  ;;  %v1901_v10 = vld [vmem:[%s2569_s1 + $0x120] sm:$0xff]   ;;  %v1904_v13 = vld [vmem:[%s2569_s1 + $0x118] sm:$0xff]   ;;  %v1907_v16 = vld [vmem:[%s2569_s1 + $0x110] sm:$0xff]   ;;  %s2077_s30 = scalar_lea.vmem %s2568_s0, %s1880_s21 }
   0xf   : > { %1597 = vmatprep.subr.bf16.mxu0 %v1895_v4  ;;  %v1902_v11 = vld [vmem:[%s2569_s1 + $0x160] sm:$0xff]   ;;  %v1905_v14 = vld [vmem:[%s2569_s1 + $0x158] sm:$0xff]   ;;  %v1908_v17 = vld [vmem:[%s2569_s1 + $0x150] sm:$0xff]  }
  0x10   : > { %v1903_v12 = vld [vmem:[%s2569_s1 + $0xe0] sm:$0xff]   ;;  %v1906_v15 = vld [vmem:[%s2569_s1 + $0xd8] sm:$0xff]   ;;  %v1909_v18 = vld [vmem:[%s2569_s1 + $0xd0] sm:$0xff]  }
  0x11   : > { %1775 = vmatpush3.bf16.msra.mxu1 %v1896_v5  ;;  %v1910_v19 = vld [vmem:[%s2569_s1 + $0x108] sm:$0xff]   ;;  %v272_v23 = vld [vmem:[%s2077_s30 + $0x13] sm:$0xff]  ;;  %v1913_v24 = vld [vmem:[%s2569_s1 + $0x100] sm:$0xff]  }
  0x12   : > { %1598 = vmatpush3.bf16.msra.mxu0 %v1897_v6  ;;  %1776 = vmatprep.subr.bf16.mxu1 %v1972_v1  ;;  %v1911_v20 = vld [vmem:[%s2569_s1 + $0x148] sm:$0xff]   ;;  %v1914_v25 = vld [vmem:[%s2569_s1 + $0x140] sm:$0xff]   ;;  %v2099_v29 = vld [vmem:[%s2077_s30 + $0x14] sm:$0xff] }
  0x13   : > { %1599 = vmatprep.subr.bf16.mxu0 %v1898_v7  ;;  %v1912_v21 = vld [vmem:[%s2569_s1 + $0xc8] sm:$0xff]   ;;  %v1915_v28 = vld [vmem:[%s2569_s1 + $0xc0] sm:$0xff]   ;;  %v2106_v31 = vld [vmem:[%s2077_s30 + $0x12] sm:$0xff] }
  0x14   : > { %v271_v22 = vld [vmem:[%s2077_s30 + $0xb] sm:$0xff]  ;;  %v1916_v32 = vld [vmem:[%s2569_s1 + $0x78] sm:$0xff]   ;;  %v274_v37 = vld [vmem:[%s2077_s30 + $0x23] sm:$0xff] }
  0x15   : > { %1777 = vmatpush3.bf16.msra.mxu1 %v1899_v8  ;;  %v281_v26 = vpack.c.bf16 %v272_v23, %v271_v22  ;;  %v286_v27 = vld [vmem:[%s2077_s30 + $0xc] sm:$0xff]  ;;  %v1919_v35 = vld [vmem:[%s2569_s1 + $0xb8] sm:$0xff]   ;;  %v2130_v42 = vld [vmem:[%s2077_s30 + $0x24] sm:$0xff] }
  0x16   : > { %1600 = vmatpush3.bf16.msra.mxu0 %v1900_v9  ;;  %1778 = vmatprep.subr.bf16.mxu1 %v1972_v1  ;;  %v2102_v30 = vld [vmem:[%s2077_s30 + $0xa] sm:$0xff]  ;;  %v296_v33 = vpack.c.bf16 %v2099_v29, %v286_v27  ;;  %v273_v36 = vld [vmem:[%s2077_s30 + $0x1b] sm:$0xff]  ;;  %v276_v50 = vld [vmem:[%s2077_s30 + $0x33] sm:$0xff] }
  0x17   : > { %1601 = vmatprep.subr.bf16.mxu0 %v1901_v10  ;;  %526 = vmatprep.mubr.bf16.mxu0 %v281_v26  ;;  %v266_v34 = vpack.c.bf16 %v2106_v31, %v2102_v30  ;;  %v1917_v38 = vld [vmem:[%s2569_s1 + $0x38] sm:$0xff]   ;;  %v1918_v39 = vld [vmem:[%s2569_s1 + $0x70] sm:$0xff]   ;;  %v282_v41 = vpack.c.bf16 %v274_v37, %v273_v36  ;;  %v2146_v47 = vld [vmem:[%s2077_s30 + $0x22] sm:$0xff] }
  0x18   : > { %v2127_v40 = vld [vmem:[%s2077_s30 + $0x1c] sm:$0xff]  ;;  %v1920_v44 = vld [vmem:[%s2569_s1 + $0x30] sm:$0xff]   ;;  %v1921_v48 = vld [vmem:[%s2569_s1 + $0x68] sm:$0xff]  }
  0x19   : > { %1779 = vmatpush3.bf16.msra.mxu1 %v1902_v11  ;;  %v940_v43 = vpack.c.bf16 %v2127_v40, %v2099_v29  ;;  %v2138_v45 = vld [vmem:[%s2077_s30 + $0x1a] sm:$0xff]  ;;  %v1922_v46 = vld [vmem:[%s2569_s1 + $0xb0] sm:$0xff]   ;;  %v297_v52 = vpack.c.bf16 %v2130_v42, %v2127_v40  ;;  %v1923_v55 = vld [vmem:[%s2569_s1 + $0x28] sm:$0xff]  }
  0x1a   : > { %1602 = vmatpush3.bf16.msra.mxu0 %v1903_v12  ;;  %1780 = vmatprep.subr.bf16.mxu1 %v1972_v1  ;;  %v275_v49 = vld [vmem:[%s2077_s30 + $0x2b] sm:$0xff]  ;;  %v267_v54 = vpack.c.bf16 %v2146_v47, %v2138_v45  ;;  %v1924_v57 = vld [vmem:[%s2569_s1 + $0x60] sm:$0xff]   ;;  %v2171_v58 = vld [vmem:[%s2077_s30 + $0x34] sm:$0xff] }
  0x1b   : > { %1603 = vmatprep.subr.bf16.mxu0 %v1904_v13  ;;  %v2154_v51 = vld [vmem:[%s2077_s30 + $0x2c] sm:$0xff]  ;;  %v283_v56 = vpack.c.bf16 %v276_v50, %v275_v49  ;;  %v1926_v62 = vld [vmem:[%s2569_s1 + $0x20] sm:$0xff]   ;;  %v1927_v63 = vld [vmem:[%s2569_s1 + $0x58] sm:$0xff]  }
  0x1c   : > { %v941_v53 = vpack.c.bf16 %v2154_v51, %v2130_v42  ;;  %v1925_v59 = vld [vmem:[%s2569_s1 + $0xa8] sm:$0xff]   ;;  %v2182_v61 = vld [vmem:[%s2077_s30 + $0x32] sm:$0xff]  ;;  %v1928_v0 = vld [vmem:[%s2569_s1 + $0xa0] sm:$0xff]   ;;  %v298_v5 = vpack.c.bf16 %v2171_v58, %v2154_v51 }
  0x1d   : > { %1781 = vmatpush3.bf16.msra.mxu1 %v1905_v14  ;;  %v2177_v60 = vld [vmem:[%s2077_s30 + $0x2a] sm:$0xff]  ;;  %v277_v2 = vld [vmem:[%s2077_s30 + $0x3b] sm:$0xff] }
  0x1e   : > { %1604 = vmatpush3.bf16.msra.mxu0 %v1906_v15  ;;  %1782 = vmatprep.subr.bf16.mxu1 %v1972_v1  ;;  %v278_v3 = vld [vmem:[%s2077_s30 + $0x43] sm:$0xff]  ;;  %v268_v7 = vpack.c.bf16 %v2182_v61, %v2177_v60  ;;  %v1929_v8 = vld [vmem:[%s2569_s1 + $0x18] sm:$0xff]   ;;  %v1931_v12 = vld [vmem:[%s2569_s1 + $0x50] sm:$0xff]  }
  0x1f   : > { %1605 = vmatprep.subr.bf16.mxu0 %v1907_v16  ;;  %v2196_v4 = vld [vmem:[%s2077_s30 + $0x3c] sm:$0xff]  ;;  %v284_v9 = vpack.c.bf16 %v278_v3, %v277_v2  ;;  %v2212_v11 = vld [vmem:[%s2077_s30 + $0x44] sm:$0xff]  ;;  %v1932_v15 = vld [vmem:[%s2569_s1 + $0x10] sm:$0xff]  }
  0x20   : > { %v942_v6 = vpack.c.bf16 %v2196_v4, %v2171_v58  ;;  %v1930_v10 = vld [vmem:[%s2569_s1 + $0x98] sm:$0xff]   ;;  %v2224_v14 = vld [vmem:[%s2077_s30 + $0x42] sm:$0xff]  ;;  %v1933_v16 = vld [vmem:[%s2569_s1 + $0x90] sm:$0xff]   ;;  %v299_v22 = vpack.c.bf16 %v2212_v11, %v2196_v4 }
  0x21   : > { %1783 = vmatpush3.bf16.msra.mxu1 %v1908_v17  ;;  %v2219_v13 = vld [vmem:[%s2077_s30 + $0x3a] sm:$0xff]  ;;  %v1934_v17 = vld [vmem:[%s2569_s1 + $0x48] sm:$0xff]   ;;  %v189_v50 = vld [vmem:[%s2077_s30 + $0x11] sm:$0xff] }
  0x22   : > { %1606 = vmatpush3.bf16.msra.mxu0 %v1909_v18  ;;  %1784 = vmatprep.subr.bf16.mxu1 %v1972_v1  ;;  %v2236_v18 = vld [vmem:[%s2077_s30 + $0x4c] sm:$0xff]  ;;  %v269_v23 = vpack.c.bf16 %v2224_v14, %v2219_v13  ;;  %v2254_v27 = vld [vmem:[%s2077_s30 + $0x54] sm:$0xff]  ;;  %v187_v36 = vld [vmem:[%s2077_s30 + $0x1] sm:$0xff] }
  0x23   : > { %1607 = vmatprep.subr.bf16.mxu0 %v1910_v19  ;;  %v279_v19 = vld [vmem:[%s2077_s30 + $0x4b] sm:$0xff]  ;;  %v175_v2 = vld [vmem:[%s2077_s30 + $0x18] sm:$0xff] }
  0x24   : > { %v1936_v26 = vld [vmem:[%s2569_s1 + $0x88] sm:$0xff]   ;;  %v964_v29 = vld [vmem:[%s2077_s30 + $0x36] sm:$0xff]  ;;  %v965_v40 = vld [vmem:[%s2077_s30 + $0x3e] sm:$0xff] }
  0x25   : > { %1785 = vmatpush3.bf16.msra.mxu1 %v1911_v20  ;;  %v280_v20 = vld [vmem:[%s2077_s30 + $0x53] sm:$0xff]  ;;  %v188_v37 = vld [vmem:[%s2077_s30 + $0x9] sm:$0xff]  ;;  %v969_v4 = vld [vmem:[%s2077_s30 + $0x5e] sm:$0xff] }
  0x26   : > { %1608 = vmatpush3.bf16.msra.mxu0 %v1912_v21  ;;  %1786 = vmatprep.subr.bf16.mxu1 %v1972_v1  ;;  %v943_v21 = vpack.c.bf16 %v2236_v18, %v2212_v11  ;;  %v173_v49 = vld [vmem:[%s2077_s30 + $0x8] sm:$0xff]  ;;  %v968_v58 = vld [vmem:[%s2077_s30 + $0x56] sm:$0xff] }
  0x27   : > { %1609 = vmatprep.subr.bf16.mxu0 %v1913_v24  ;;  %v1935_v24 = vld [vmem:[%s2569_s1 + $0x8] sm:$0xff]  }
  0x28   : > { %v1945_v3 = vld [vmem:[%s2569_s1 + $0x1e8] sm:$0xff]  }
  0x29   : > { %1787 = vmatpush3.bf16.msra.mxu1 %v1914_v25  ;;  %v285_v25 = vpack.c.bf16 %v280_v20, %v279_v19  ;;  %v1951_v19 = vld [vmem:[%s2569_s1 + $0x1d8] sm:$0xff]   ;;  %v1952_v20 = vld [vmem:[%s2569_s1 + $0x220] sm:$0xff]   ;;  %v967_v51 = vld [vmem:[%s2077_s30 + $0x4e] sm:$0xff] }
  0x2a   : > { %1610 = vmatpush3.bf16.msra.mxu0 %v1915_v28  ;;  %1808 = vmatprep.subr.bf16.mxu1 %v1972_v1  ;;  %v1937_v28 = vld [vmem:[%s2569_s1 + $0x40] sm:$0xff]  }
  0x2b   : > { %1654 = vmatprep.subr.bf16.mxu0 %v1916_v32  ;;  %v2261_v32 = vld [vmem:[%s2077_s30 + $0x4a] sm:$0xff] }
  0x2c   : > { %1789 = vmatmul.mubr.bf16.vlgmr.msra.gmra.mxu1 %v296_v33  ;;  %v265_v33 = vld [vmem:[%s2077_s30 + $0x52] sm:$0xff]  ;;  %v966_v42 = vld [vmem:[%s2077_s30 + $0x46] sm:$0xff] }
  0x2d   : > { %527 = vmatmul.mubr.bf16.vlgmr.msra.gmra.mxu0 %v266_v34  ;;  %1809 = vmatpush3.bf16.msra.mxu1 %v1919_v35  ;;  %v1938_v34 = vld [vmem:[%s2569_s1] sm:$0xff]  }
  0x2e   : > { %1655 = vmatpush3.bf16.msra.mxu0 %v1917_v38  ;;  %1792 = vmatprep.mubr.msk.bf16.mxu1 %vm1973_vm0, %v1972_v1  ;;  %v1939_v35 = vld [vmem:[%s2569_s1 + $0x80] sm:$0xff]   ;;  %v1940_v38 = vld [vmem:[%s2569_s1 + $0x1f8] sm:$0xff]  }
  0x2f   : > { %1656 = vmatprep.subr.bf16.mxu0 %v1918_v39  ;;  %534 = vmatprep.mubr.bf16.mxu0 %v282_v41  ;;  %v300_v39 = vpack.c.bf16 %v2254_v27, %v2236_v18  ;;  %v270_v41 = vpack.c.bf16 %v265_v33, %v2261_v32  ;;  %v1954_v33 = vld [vmem:[%s2569_s1 + $0x218] sm:$0xff]  }
  0x30   : > { %1810 = vmatprep.subr.bf16.mxu1 %v1972_v1 }
  0x31   : > { %1811 = vmatpush3.bf16.msra.mxu1 %v1922_v46  ;;  %v202_v46 = vld [vmem:[%s2077_s30 + $0x2] sm:$0xff] }
  0x32   : > { %1657 = vmatpush3.bf16.msra.mxu0 %v1920_v44  ;;  %1812 = vmatprep.subr.bf16.mxu1 %v1972_v1  ;;  %v197_v44 = vpack.c.bf16 %v188_v37, %v187_v36  ;;  %v1957_v36 = vld [vmem:[%s2569_s1 + $0x210] sm:$0xff]   ;;  %v1958_v37 = vld [vmem:[%s2569_s1 + $0x1c8] sm:$0xff]  }
  0x33   : > { %1658 = vmatprep.subr.bf16.mxu0 %v1921_v48  ;;  %v172_v48 = vld [vmem:[%s2077_s30] sm:$0xff] }
  0x34   : > { %1793 = vmatmul.mubr.bf16.gmra.mxu1 %v297_v52  ;;  %v212_v52 = vpack.c.bf16 %v2102_v30, %v202_v46  ;;  %v1944_v30 = vld [vmem:[%s2569_s1 + $0x1b0] sm:$0xff]  }
  0x35   : > { %535 = vmatmul.mubr.bf16.gmra.mxu0 %v267_v54  ;;  %1796 = vmatprep.mubr.msk.bf16.mxu1 %vm1973_vm0, %v1972_v1  ;;  %v190_v54 = vld [vmem:[%s2077_s30 + $0x19] sm:$0xff] }
  0x36   : > { %1659 = vmatpush3.bf16.msra.mxu0 %v1923_v55  ;;  %542 = vmatprep.mubr.bf16.mxu0 %v283_v56  ;;  %v182_v55 = vpack.c.bf16 %v173_v49, %v172_v48  ;;  %v1943_v56 = vld [vmem:[%s2569_s1 + $0x238] sm:$0xff]   ;;  %v1959_v48 = vld [vmem:[%s2569_s1 + $0x188] sm:$0xff]  }
  0x37   : > { %1660 = vmatprep.subr.bf16.mxu0 %v1924_v57  ;;  %1813 = vmatpush3.bf16.msra.mxu1 %v1925_v59  ;;  %v1941_v57 = vld [vmem:[%s2569_s1 + $0x1b8] sm:$0xff]   ;;  %v1942_v59 = vld [vmem:[%s2569_s1 + $0x1f0] sm:$0xff]   ;;  %v1960_v49 = vld [vmem:[%s2569_s1 + $0x208] sm:$0xff]  }
  0x38   : > { %1814 = vmatprep.subr.bf16.mxu1 %v1972_v1 }
  0x3a   : > { %1661 = vmatpush3.bf16.msra.mxu0 %v1926_v62  ;;  %v198_v62 = vpack.c.bf16 %v190_v54, %v189_v50  ;;  %v181_v50 = vld [vmem:[%s2077_s30 + $0x48] sm:$0xff]  ;;  %v1963_v54 = vld [vmem:[%s2569_s1 + $0x200] sm:$0xff]  }
  0x3b   : > { %1662 = vmatprep.subr.bf16.mxu0 %v1927_v63  ;;  %1815 = vmatpush3.bf16.msra.mxu1 %v1928_v0  ;;  %v1946_v63 = vld [vmem:[%s2569_s1 + $0x230] sm:$0xff]  }
  0x3c   : > { %1797 = vmatmul.mubr.bf16.gmra.mxu1 %v298_v5  ;;  %1816 = vmatprep.subr.bf16.mxu1 %v1972_v1  ;;  %v174_v0 = vld [vmem:[%s2077_s30 + $0x10] sm:$0xff]  ;;  %v191_v5 = vld [vmem:[%s2077_s30 + $0x21] sm:$0xff] }
  0x3d   : > { %543 = vmatmul.mubr.bf16.gmra.mxu0 %v268_v7  ;;  %1800 = vmatprep.mubr.msk.bf16.mxu1 %vm1973_vm0, %v1972_v1  ;;  %v192_v7 = vld [vmem:[%s2077_s30 + $0x29] sm:$0xff] }
  0x3e   : > { %1663 = vmatpush3.bf16.msra.mxu0 %v1929_v8  ;;  %550 = vmatprep.mubr.bf16.mxu0 %v284_v9  ;;  %v213_v8 = vpack.c.bf16 %v2138_v45, %v2106_v31  ;;  %v183_v9 = vpack.c.bf16 %v175_v2, %v174_v0  ;;  %v1949_v31 = vld [vmem:[%s2569_s1 + $0x228] sm:$0xff]   ;;  %v176_v45 = vld [vmem:[%s2077_s30 + $0x20] sm:$0xff] }
  0x3f   : > { %1817 = vmatpush3.bf16.msra.mxu1 %v1930_v10  ;;  %1664 = vmatprep.subr.bf16.mxu0 %v1931_v12  ;;  %v1947_v10 = vld [vmem:[%s2569_s1 + $0x1a8] sm:$0xff]   ;;  %v199_v12 = vpack.c.bf16 %v192_v7, %v191_v5  ;;  %v949_v7 = vld [vmem:[%s2077_s30 + $0x35] sm:$0xff] }
  0x40   : > { %1818 = vmatprep.subr.bf16.mxu1 %v1972_v1  ;;  %v947_v0 = vld [vmem:[%s2077_s30 + $0x25] sm:$0xff]  ;;  %v963_v5 = vld [vmem:[%s2077_s30 + $0x2e] sm:$0xff] }
  0x42   : > { %1665 = vmatpush3.bf16.msra.mxu0 %v1932_v15  ;;  %v1948_v15 = vld [vmem:[%s2569_s1 + $0x1e0] sm:$0xff]  }
  0x43   : > { %1819 = vmatpush3.bf16.msra.mxu1 %v1933_v16  ;;  %1666 = vmatprep.subr.bf16.mxu0 %v1934_v17  ;;  %v177_v16 = vld [vmem:[%s2077_s30 + $0x28] sm:$0xff]  ;;  %v1950_v17 = vld [vmem:[%s2569_s1 + $0x1a0] sm:$0xff]  }
  0x44   : > { %1801 = vmatmul.mubr.bf16.gmra.mxu1 %v299_v22  ;;  %1820 = vmatprep.subr.bf16.mxu1 %v1972_v1  ;;  %v193_v22 = vld [vmem:[%s2077_s30 + $0x31] sm:$0xff] }
  0x45   : > { %551 = vmatmul.mubr.bf16.gmra.mxu0 %v269_v23  ;;  %1804 = vmatprep.mubr.msk.bf16.mxu1 %vm1973_vm0, %v1972_v1  ;;  %v194_v23 = vld [vmem:[%s2077_s30 + $0x39] sm:$0xff] }
  0x46   : > { %558 = vmatprep.mubr.bf16.mxu0 %v285_v25  ;;  %1667 = vmatpush3.bf16.msra.mxu0 %v1935_v24  ;;  %v214_v24 = vpack.c.bf16 %v2177_v60, %v2146_v47  ;;  %v184_v25 = vpack.c.bf16 %v177_v16, %v176_v45  ;;  %v1955_v47 = vld [vmem:[%s2569_s1 + $0x1d0] sm:$0xff]   ;;  %v954_v45 = vld [vmem:[%s2077_s30 + $0x5d] sm:$0xff]  ;;  %v973_v16 = vpack.c.bf16 %v967_v51, %v966_v42 }
  0x47   : > { %1821 = vmatpush3.bf16.msra.mxu1 %v1936_v26  ;;  %1668 = vmatprep.subr.bf16.mxu0 %v1937_v28  ;;  %v1953_v26 = vld [vmem:[%s2569_s1 + $0x198] sm:$0xff]   ;;  %v200_v28 = vpack.c.bf16 %v194_v23, %v193_v22  ;;  %v178_v60 = vld [vmem:[%s2077_s30 + $0x30] sm:$0xff] }
  0x48   : > { %1822 = vmatprep.subr.bf16.mxu1 %v1972_v1 }
  0x4a   : > { %1669 = vmatpush3.bf16.msra.mxu0 %v1938_v34  ;;  %v179_v34 = vld [vmem:[%s2077_s30 + $0x38] sm:$0xff] }
  0x4b   : > { %1823 = vmatpush3.bf16.msra.mxu1 %v1939_v35  ;;  %1713 = vmatprep.subr.bf16.mxu0 %v1940_v38  ;;  %v1956_v35 = vld [vmem:[%s2569_s1 + $0x190] sm:$0xff]   ;;  %v195_v38 = vld [vmem:[%s2077_s30 + $0x41] sm:$0xff] }
  0x4c   : > { %1805 = vmatmul.mubr.bf16.gmra.mxu1 %v300_v39  ;;  %1844 = vmatprep.subr.bf16.mxu1 %v1972_v1  ;;  %v196_v39 = vld [vmem:[%s2077_s30 + $0x49] sm:$0xff] }
  0x4d   : > { %559 = vmatmul.mubr.bf16.gmra.mxu0 %v270_v41  ;;  %1824 = vmatprep.mubr.msk.bf16.mxu1 %vm1973_vm0, %v1972_v1  ;;  %v215_v41 = vpack.c.bf16 %v2219_v13, %v2182_v61  ;;  %v201_v46 = vpack.c.bf16 %v196_v39, %v195_v38  ;;  %v1961_v61 = vld [vmem:[%s2569_s1 + $0x1c0] sm:$0xff]  }
  0x4e   : > { %816 = vmatprep.mubr.bf16.mxu0 %v197_v44  ;;  %v185_v44 = vpack.c.bf16 %v179_v34, %v178_v60  ;;  %v180_v13 = vld [vmem:[%s2077_s30 + $0x40] sm:$0xff] }
  0x54   : > { %1825 = vmatmul.mubr.bf16.vlgmr.msra.gmra.mxu1 %v212_v52  ;;  %v1962_v52 = vld [vmem:[%s2569_s1 + $0x180] sm:$0xff]  }
  0x55   : > { %817 = vmatmul.mubr.bf16.vlgmr.msra.gmra.mxu0 %v182_v55  ;;  %1845 = vmatpush3.bf16.msra.mxu1 %v1943_v56  ;;  %v945_v55 = vld [vmem:[%s2077_s30 + $0x15] sm:$0xff]  ;;  %v946_v56 = vld [vmem:[%s2077_s30 + $0x1d] sm:$0xff] }
  0x56   : > { %1714 = vmatpush3.bf16.msra.mxu0 %v1941_v57  ;;  %1828 = vmatprep.mubr.msk.bf16.mxu1 %vm1973_vm0, %v1972_v1  ;;  %v216_v57 = vpack.c.bf16 %v2261_v32, %v2224_v14  ;;  %v948_v14 = vld [vmem:[%s2077_s30 + $0x2d] sm:$0xff] }
  0x57   : > { %1715 = vmatprep.subr.bf16.mxu0 %v1942_v59  ;;  %824 = vmatprep.mubr.bf16.mxu0 %v198_v62  ;;  %v186_v59 = vpack.c.bf16 %v181_v50, %v180_v13  ;;  %v955_v62 = vpack.c.bf16 %v946_v56, %v945_v55  ;;  %v956_v2 = vpack.c.bf16 %v948_v14, %v947_v0 }
  0x58   : > { %1846 = vmatprep.subr.bf16.mxu1 %v1972_v1 }
  0x59   : > { %1847 = vmatpush3.bf16.msra.mxu1 %v1946_v63  ;;  %v961_v63 = vld [vmem:[%s2077_s30 + $0x1e] sm:$0xff] }
  0x5a   : > { %1716 = vmatpush3.bf16.msra.mxu0 %v1944_v30  ;;  %1848 = vmatprep.subr.bf16.mxu1 %v1972_v1  ;;  %v960_v30 = vld [vmem:[%s2077_s30 + $0x16] sm:$0xff] }
  0x5b   : > { %1717 = vmatprep.subr.bf16.mxu0 %v1945_v3  ;;  %v970_v32 = vpack.c.bf16 %v961_v63, %v960_v30  ;;  %v962_v3 = vld [vmem:[%s2077_s30 + $0x26] sm:$0xff] }
  0x5c   : > { %1829 = vmatmul.mubr.bf16.gmra.mxu1 %v213_v8  ;;  %v950_v8 = vld [vmem:[%s2077_s30 + $0x3d] sm:$0xff] }
  0x5d   : > { %825 = vmatmul.mubr.bf16.gmra.mxu0 %v183_v9  ;;  %1832 = vmatprep.mubr.msk.bf16.mxu1 %vm1973_vm0, %v1972_v1  ;;  %v971_v9 = vpack.c.bf16 %v963_v5, %v962_v3 }
  0x5e   : > { %1718 = vmatpush3.bf16.msra.mxu0 %v1947_v10  ;;  %832 = vmatprep.mubr.bf16.mxu0 %v199_v12  ;;  %v957_v10 = vpack.c.bf16 %v950_v8, %v949_v7  ;;  %v952_v12 = vld [vmem:[%s2077_s30 + $0x4d] sm:$0xff] }
  0x5f   : > { %1719 = vmatprep.subr.bf16.mxu0 %v1948_v15  ;;  %1849 = vmatpush3.bf16.msra.mxu1 %v1949_v31  ;;  %v972_v15 = vpack.c.bf16 %v965_v40, %v964_v29 }
  0x60   : > { %1850 = vmatprep.subr.bf16.mxu1 %v1972_v1 }
  0x62   : > { %1720 = vmatpush3.bf16.msra.mxu0 %v1950_v17 }
  0x63   : > { %1721 = vmatprep.subr.bf16.mxu0 %v1951_v19  ;;  %1851 = vmatpush3.bf16.msra.mxu1 %v1952_v20  ;;  %v974_v19 = vpack.c.bf16 %v969_v4, %v968_v58 }
  0x64   : > { %1833 = vmatmul.mubr.bf16.gmra.mxu1 %v214_v24  ;;  %1852 = vmatprep.subr.bf16.mxu1 %v1972_v1 }
  0x65   : > { %833 = vmatmul.mubr.bf16.gmra.mxu0 %v184_v25  ;;  %1836 = vmatprep.mubr.msk.bf16.mxu1 %vm1973_vm0, %v1972_v1 }
  0x66   : > { %1722 = vmatpush3.bf16.msra.mxu0 %v1953_v26  ;;  %840 = vmatprep.mubr.bf16.mxu0 %v200_v28 }
  0x67   : > { %1853 = vmatpush3.bf16.msra.mxu1 %v1954_v33  ;;  %1723 = vmatprep.subr.bf16.mxu0 %v1955_v47 }
  0x68   : > { %1854 = vmatprep.subr.bf16.mxu1 %v1972_v1 }
  0x6a   : > { %1724 = vmatpush3.bf16.msra.mxu0 %v1956_v35 }
  0x6b   : > { %1855 = vmatpush3.bf16.msra.mxu1 %v1957_v36  ;;  %1725 = vmatprep.subr.bf16.mxu0 %v1958_v37 }
  0x6c   : > { %1837 = vmatmul.mubr.bf16.gmra.mxu1 %v215_v41  ;;  %1856 = vmatprep.subr.bf16.mxu1 %v1972_v1 }
  0x6d   : > { %841 = vmatmul.mubr.bf16.gmra.mxu0 %v185_v44  ;;  %1840 = vmatprep.mubr.msk.bf16.mxu1 %vm1973_vm0, %v1972_v1 }
  0x6e   : > { %848 = vmatprep.mubr.bf16.mxu0 %v201_v46  ;;  %1726 = vmatpush3.bf16.msra.mxu0 %v1959_v48 }
  0x6f   : > { %1857 = vmatpush3.bf16.msra.mxu1 %v1960_v49  ;;  %1727 = vmatprep.subr.bf16.mxu0 %v1961_v61 }
  0x70   : > { %1858 = vmatprep.subr.bf16.mxu1 %v1972_v1 }
  0x72   : > { %1728 = vmatpush3.bf16.msra.mxu0 %v1962_v52 }
  0x73   : > { %1859 = vmatpush3.bf16.msra.mxu1 %v1963_v54 }
  0x74   : > { %1841 = vmatmul.mubr.bf16.gmra.mxu1 %v216_v57 }
  0x75   : > { %849 = vmatmul.mubr.bf16.gmra.mxu0 %v186_v59  ;;  %1860 = vmatprep.mubr.msk.bf16.mxu1 %vm1973_vm0, %v1972_v1 }
  0x76   : > { %1200 = vmatprep.mubr.bf16.mxu0 %v955_v62 }
  0x7c   : > { %1861 = vmatmul.mubr.bf16.vlgmr.msra.gmra.mxu1 %v970_v32 }
  0x7d   : > { %1201 = vmatmul.mubr.bf16.vlgmr.msra.gmra.mxu0 %v940_v43  ;;  %1864 = vmatprep.mubr.msk.bf16.mxu1 %vm1973_vm0, %v1972_v1  ;;  %v951_v43 = vld [vmem:[%s2077_s30 + $0x45] sm:$0xff] }
  0x7e   : > { %1208 = vmatprep.mubr.bf16.mxu0 %v956_v2  ;;  %v958_v31 = vpack.c.bf16 %v952_v12, %v951_v43 }
  0x84   : > { %1865 = vmatmul.mubr.bf16.gmra.mxu1 %v971_v9 }
  0x85   : > { %1209 = vmatmul.mubr.bf16.gmra.mxu0 %v941_v53  ;;  %1868 = vmatprep.mubr.msk.bf16.mxu1 %vm1973_vm0, %v1972_v1  ;;  %v953_v53 = vld [vmem:[%s2077_s30 + $0x55] sm:$0xff] }
  0x86   : > { %1216 = vmatprep.mubr.bf16.mxu0 %v957_v10  ;;  %v959_v17 = vpack.c.bf16 %v954_v45, %v953_v53 }
  0x8c   : > { %1869 = vmatmul.mubr.bf16.gmra.mxu1 %v972_v15 }
  0x8d   : > { %1217 = vmatmul.mubr.bf16.gmra.mxu0 %v942_v6  ;;  %1872 = vmatprep.mubr.msk.bf16.mxu1 %vm1973_vm0, %v1972_v1  ;;  %v939_v6 = vld [vmem:[%s2077_s30 + $0x5c] sm:$0xff]  ;;  %s1881_s30 = smul.u32 80, %s2573_s13 }
  0x8e   : > { %1224 = vmatprep.mubr.bf16.mxu0 %v958_v31  ;;  %v944_v20 = vpack.c.bf16 %v939_v6, %v2254_v27 }
  0x8f   : > { %s2509_s19 = scalar_lea.vmem %s2571_s3, %s1881_s30 }
  0x94   : > { %1873 = vmatmul.mubr.bf16.gmra.mxu1 %v973_v16 }
  0x95   : > { %1225 = vmatmul.mubr.bf16.gmra.mxu0 %v943_v21  ;;  %1876 = vmatprep.mubr.msk.bf16.mxu1 %vm1973_vm0, %v1972_v1 }
  0x96   : > { %1232 = vmatprep.mubr.bf16.mxu0 %v959_v17 }
  0x9c   : > { %1877 = vmatmul.mubr.bf16.gmra.mxu1 %v974_v19 }
  0x9d   : > { %1233 = vmatmul.mubr.bf16.gmra.mxu0 %v944_v20 }
  0xec   : > { %v601_v22 = vpop.f32.mrf.mxu1 }
  0xed   : > { %v1611_v23 = vpop.f32.mrf.mxu0 }
  0xee   : > { %v1790_v24 = vpop.f32.mrf.mxu1 }
  0xef   : > { %v1612_v25 = vpop.f32.mrf.mxu0 }
  0xf0   : > { %v1613_v26 = vadd.f32 %v1612_v25, %v1611_v23  ;;  %v604_v28 = vpop.f32.mrf.mxu1 }
  0xf1   : > { %v1614_v11 = vpop.f32.mrf.mxu0 }
  0xf2   : > { %v2440_v18 = vadd.f32 %v1613_v26, %v601_v22  ;;  %v1791_v21 = vpop.f32.mrf.mxu1 }
  0xf3   : > { %v1615_v1 = vpop.f32.mrf.mxu0 }
  0xf4   : > { %v1616_v33 = vadd.f32 %v1615_v1, %v1614_v11  ;;  %v609_v47 = vpop.f32.mrf.mxu1 }
  0xf5   : > { %v1617_v60 = vpop.f32.mrf.mxu0 }
  0xf6   : > { %v2442_v34 = vadd.f32 %v1616_v33, %v604_v28  ;;  %v1794_v35 = vpop.f32.mrf.mxu1 }
  0xf7   : > { %v1618_v27 = vpop.f32.mrf.mxu0 }
  0xf8   : > { %v1619_v36 = vadd.f32 %v1618_v27, %v1617_v60  ;;  %v612_v37 = vpop.f32.mrf.mxu1 }
  0xf9   : > { %v1620_v38 = vpop.f32.mrf.mxu0 }
  0xfa   : > { %v2444_v39 = vadd.f32 %v1619_v36, %v609_v47  ;;  %v1795_v41 = vpop.f32.mrf.mxu1 }
  0xfb   : > { %v1621_v44 = vpop.f32.mrf.mxu0 }
  0xfc   : > { %v1622_v46 = vadd.f32 %v1621_v44, %v1620_v38  ;;  %v617_v48 = vpop.f32.mrf.mxu1 }
  0xfd   : > { %v1623_v49 = vpop.f32.mrf.mxu0 }
  0xfe   : > { %v2446_v61 = vadd.f32 %v1622_v46, %v612_v37  ;;  %v1798_v13 = vpop.f32.mrf.mxu1 }
  0xff   : > { %v1624_v50 = vpop.f32.mrf.mxu0 }
 0x100   : > { %v1625_v52 = vadd.f32 %v1624_v50, %v1623_v49  ;;  %v620_v54 = vpop.f32.mrf.mxu1 }
 0x101   : > { %v1626_v55 = vpop.f32.mrf.mxu0 }
 0x102   : > { %v2448_v56 = vadd.f32 %v1625_v52, %v617_v48  ;;  %v1799_v57 = vpop.f32.mrf.mxu1 }
 0x103   : > { %v1627_v59 = vpop.f32.mrf.mxu0 }
 0x104   : > { %v1628_v62 = vadd.f32 %v1627_v59, %v1626_v55  ;;  %v625_v30 = vpop.f32.mrf.mxu1 }
 0x105   : > { %v1629_v63 = vpop.f32.mrf.mxu0 }
 0x106   : > { %v2450_v0 = vadd.f32 %v1628_v62, %v620_v54  ;;  %v1802_v14 = vpop.f32.mrf.mxu1 }
 0x107   : > { %v1630_v32 = vpop.f32.mrf.mxu0 }
 0x108   : > { %v1631_v2 = vadd.f32 %v1630_v32, %v1629_v63  ;;  %v628_v3 = vpop.f32.mrf.mxu1 }
 0x109   : > { %v1632_v5 = vpop.f32.mrf.mxu0 }
 0x10a   : > { %v2452_v7 = vadd.f32 %v1631_v2, %v625_v30  ;;  %v1803_v8 = vpop.f32.mrf.mxu1 }
 0x10b   : > { %v1633_v9 = vpop.f32.mrf.mxu0 }
 0x10c   : > { %v1634_v10 = vadd.f32 %v1633_v9, %v1632_v5  ;;  %v633_v29 = vpop.f32.mrf.mxu1 }
 0x10d   : > { %v1635_v40 = vpop.f32.mrf.mxu0 }
 0x10e   : > { %v2454_v43 = vadd.f32 %v1634_v10, %v628_v3  ;;  %v1806_v12 = vpop.f32.mrf.mxu1 }
 0x10f   : > { %v1636_v15 = vpop.f32.mrf.mxu0 }
 0x110   : > { %v1637_v31 = vadd.f32 %v1636_v15, %v1635_v40  ;;  %v636_v42 = vpop.f32.mrf.mxu1 }
 0x111   : > { %v1638_v51 = vpop.f32.mrf.mxu0 }
 0x112   : > { %v2456_v53 = vadd.f32 %v1637_v31, %v633_v29  ;;  %v1807_v45 = vpop.f32.mrf.mxu1 }
 0x113   : > { %v1639_v16 = vpop.f32.mrf.mxu0 }
 0x114   : > { %v1640_v17 = vadd.f32 %v1639_v16, %v1638_v51  ;;  %v891_v58 = vpop.f32.mrf.mxu1 }
 0x115   : > { %v1670_v4 = vpop.f32.mrf.mxu0 }
 0x116   : > { %v2458_v6 = vadd.f32 %v1640_v17, %v636_v42  ;;  %v1826_v19 = vpop.f32.mrf.mxu1 }
 0x117   : > { %v1671_v20 = vpop.f32.mrf.mxu0  ;;  %v2502_v19 = vld [vmem:[%s2570_s2] ss:$0 sm:$0xff] }
 0x118   : > { %v894_v22 = vpop.f32.mrf.mxu1  ;;  %v1672_v2 = vadd.f32 %v1671_v20, %v1670_v4 }
 0x119   : > { %v1673_v23 = vpop.f32.mrf.mxu0 }
 0x11a   : > { %v1827_v24 = vpop.f32.mrf.mxu1  ;;  %v819_v29 = vadd.f32 %v1672_v2, %v2440_v18 }
 0x11b   : > { %v1674_v25 = vpop.f32.mrf.mxu0 }
 0x11c   : > { %v2460_v26 = vpop.f32.mrf.mxu1  ;;  %v1675_v9 = vadd.f32 %v1674_v25, %v1673_v23  ;;  %v892_v45 = vadd.f32 %v891_v58, %v819_v29 }
 0x11d   : > { %v1676_v28 = vpop.f32.mrf.mxu0 }
 0x11e   : > { %v1830_v11 = vpop.f32.mrf.mxu1  ;;  %v822_v42 = vadd.f32 %v1675_v9, %v2442_v34 }
 0x11f   : > { %v1677_v21 = vpop.f32.mrf.mxu0 }
 0x120   : > { %v2462_v1 = vpop.f32.mrf.mxu1  ;;  %v1678_v16 = vadd.f32 %v1677_v21, %v1676_v28  ;;  %v895_v25 = vadd.f32 %v894_v22, %v822_v42 }
 0x121   : > { %v1679_v33 = vpop.f32.mrf.mxu0 }
 0x122   : > { %v1831_v47 = vpop.f32.mrf.mxu1 }
 0x123   : > { %v1680_v60 = vpop.f32.mrf.mxu0  ;;  %v827_v47 = vadd.f32 %v1678_v16, %v2444_v39 }
 0x124   : > { %v2464_v35 = vpop.f32.mrf.mxu1  ;;  %v1681_v34 = vadd.f32 %v1680_v60, %v1679_v33 }
 0x125   : > { %v1682_v27 = vpop.f32.mrf.mxu0  ;;  %v900_v39 = vadd.f32 %v2460_v26, %v827_v47 }
 0x126   : > { %v1834_v36 = vpop.f32.mrf.mxu1  ;;  %v830_v33 = vadd.f32 %v1681_v34, %v2446_v61 }
 0x127   : > { %v1683_v37 = vpop.f32.mrf.mxu0 }
 0x128   : > { %v2466_v38 = vpop.f32.mrf.mxu1 }
 0x129   : > { %v2468_v41 = vpop.f32.mrf.mxu0 }
 0x12a   : > { %v1835_v44 = vpop.f32.mrf.mxu1 }
 0x12b   : > { %v2470_v46 = vpop.f32.mrf.mxu0 }
 0x12c   : > { %v2472_v48 = vpop.f32.mrf.mxu1  ;;  %v1687_v61 = vadd.f32 %v2470_v46, %v2468_v41 }
 0x12d   : > { %v2474_v49 = vpop.f32.mrf.mxu0 }
 0x12e   : > { %v1838_v13 = vpop.f32.mrf.mxu1 }
 0x12f   : > { %v2476_v50 = vpop.f32.mrf.mxu0 }
 0x130   : > { %v2478_v52 = vpop.f32.mrf.mxu1  ;;  %v1690_v41 = vadd.f32 %v2476_v50, %v2474_v49 }
 0x131   : > { %v2480_v54 = vpop.f32.mrf.mxu0 }
 0x132   : > { %v1839_v55 = vpop.f32.mrf.mxu1  ;;  %v843_v49 = vadd.f32 %v1690_v41, %v2452_v7 }
 0x133   : > { %v2482_v57 = vpop.f32.mrf.mxu0 }
 0x134   : > { %v2484_v59 = vpop.f32.mrf.mxu1 }
 0x135   : > { %v2486_v62 = vpop.f32.mrf.mxu0 }
 0x136   : > { %v1842_v30 = vpop.f32.mrf.mxu1 }
 0x137   : > { %v2488_v63 = vpop.f32.mrf.mxu0  ;;  %v1684_v30 = vadd.f32 %v1683_v37, %v1682_v27  ;;  %v903_v37 = vadd.f32 %v2462_v1, %v830_v33  ;;  %v838_v1 = vadd.f32 %v1687_v61, %v2450_v0 }
 0x138   : > { %v2490_v14 = vpop.f32.mrf.mxu1  ;;  %v1696_v7 = vadd.f32 %v2488_v63, %v2486_v62 }
 0x139   : > { %v2492_v32 = vpop.f32.mrf.mxu0  ;;  %v911_v0 = vadd.f32 %v2466_v38, %v838_v1 }
 0x13a   : > { %v1843_v3 = vpop.f32.mrf.mxu1 }
 0x13b   : > { %v2494_v5 = vpop.f32.mrf.mxu0 }
 0x13c   : > { %v1275_v8 = vpop.f32.mrf.mxu1  ;;  %v1699_v62 = vadd.f32 %v2494_v5, %v2492_v32 }
 0x13d   : > { %v1729_v10 = vpop.f32.mrf.mxu0 }
 0x13e   : > { %v1862_v40 = vpop.f32.mrf.mxu1 }
 0x13f   : > { %v1730_v12 = vpop.f32.mrf.mxu0 }
 0x140   : > { %v1731_v15 = vadd.f32 %v1730_v12, %v1729_v10  ;;  %v1278_v31 = vpop.f32.mrf.mxu1 }
 0x141   : > { %v1732_v51 = vpop.f32.mrf.mxu0 }
 0x142   : > { %v1276_v17 = vadd.f32 %v1731_v15, %v1275_v8  ;;  %v1863_v4 = vpop.f32.mrf.mxu1  ;;  %v835_v15 = vadd.f32 %v1684_v30, %v2448_v56 }
 0x143   : > { %v1733_v20 = vpop.f32.mrf.mxu0 }
 0x144   : > { %v1314_v23 = vadd.f32 %v1276_v17, %v892_v45  ;;  %v1734_v18 = vadd.f32 %v1733_v20, %v1732_v51  ;;  %v1283_v24 = vpop.f32.mrf.mxu1  ;;  %v908_v56 = vadd.f32 %v2464_v35, %v835_v15  ;;  %v1693_v35 = vadd.f32 %v2482_v57, %v2480_v54 }
 0x145   : > { %v1735_v11 = vpop.f32.mrf.mxu0  ;;  %v916_v57 = vadd.f32 %v2472_v48, %v843_v49  ;;  %v851_v48 = vadd.f32 %v1696_v7, %v2456_v53  ;;  %v854_v53 = vadd.f32 %v1699_v62, %v2458_v6 }
 0x146   : > { %v1331_v58 = vadd.f32 %v2502_v19, %v1314_v23  ;;  %v1279_v28 = vadd.f32 %v1734_v18, %v1278_v31  ;;  %v1866_v21 = vpop.f32.mrf.mxu1  ;;  %v846_v30 = vadd.f32 %v1693_v35, %v2454_v43 }
 0x147   : > { %v1736_v36 = vpop.f32.mrf.mxu0 }
 0x148   : > { %v1341_v44 = vmax.f32 %v1331_v58, 0.0  ;;  %v1315_v13 = vadd.f32 %v1279_v28, %v895_v25  ;;  %v1737_v55 = vadd.f32 %v1736_v36, %v1735_v11  ;;  %v1286_v22 = vpop.f32.mrf.mxu1  ;;  %v919_v43 = vadd.f32 %v2478_v52, %v846_v30 }
 0x149   : > { %v1738_v2 = vpop.f32.mrf.mxu0 }
 0x14a   : > { %1352 = vst.msk [vmem:[%s2509_s19] sm:$0xff] %vm1351_vm1, %v1341_v44  ;;  %v1332_v60 = vadd.f32 %v2502_v19, %v1315_v13  ;;  %v1284_v3 = vadd.f32 %v1737_v55, %v1283_v24  ;;  %v1867_v8 = vpop.f32.mrf.mxu1 }
 0x14b   : > { %v1739_v9 = vpop.f32.mrf.mxu0 }
 0x14c   : > { %v1342_v10 = vmax.f32 %v1332_v60, 0.0  ;;  %v1316_v29 = vadd.f32 %v1284_v3, %v900_v39  ;;  %v1740_v40 = vadd.f32 %v1739_v9, %v1738_v2  ;;  %v1291_v12 = vpop.f32.mrf.mxu1 }
 0x14d   : > { %v1741_v27 = vpop.f32.mrf.mxu0 }
 0x14e   : > { %1353 = vst.msk [vmem:[%s2509_s19 + $0x8] sm:$0xff] %vm1351_vm1, %v1342_v10  ;;  %v1333_v26 = vadd.f32 %v2502_v19, %v1316_v29  ;;  %v1287_v31 = vadd.f32 %v1740_v40, %v1286_v22  ;;  %v1870_v42 = vpop.f32.mrf.mxu1 }
 0x14f   : > { %v1742_v51 = vpop.f32.mrf.mxu0 }
 0x150   : > { %v1343_v45 = vmax.f32 %v1333_v26, 0.0  ;;  %v1317_v16 = vadd.f32 %v1287_v31, %v903_v37  ;;  %v1743_v17 = vadd.f32 %v1742_v51, %v1741_v27  ;;  %v1294_v4 = vpop.f32.mrf.mxu1  ;;  %v924_v26 = vadd.f32 %v2484_v59, %v851_v48 }
 0x151   : > { %v1744_v20 = vpop.f32.mrf.mxu0 }
 0x152   : > { %1354 = vst.msk [vmem:[%s2509_s19 + $0x10] sm:$0xff] %vm1351_vm1, %v1343_v45  ;;  %v1334_v46 = vadd.f32 %v2502_v19, %v1317_v16  ;;  %v1292_v23 = vadd.f32 %v1743_v17, %v1291_v12  ;;  %v1871_v18 = vpop.f32.mrf.mxu1  ;;  %v927_v17 = vadd.f32 %v2490_v14, %v854_v53 }
 0x153   : > { %v1745_v24 = vpop.f32.mrf.mxu0 }
 0x154   : > { %v1344_v25 = vmax.f32 %v1334_v46, 0.0  ;;  %v1318_v11 = vadd.f32 %v1292_v23, %v908_v56  ;;  %v1746_v47 = vadd.f32 %v1745_v24, %v1744_v20  ;;  %v1299_v34 = vpop.f32.mrf.mxu1 }
 0x155   : > { %v1747_v58 = vpop.f32.mrf.mxu0 }
 0x156   : > { %1355 = vst.msk [vmem:[%s2509_s19 + $0x18] sm:$0xff] %vm1351_vm1, %v1344_v25  ;;  %v1335_v50 = vadd.f32 %v2502_v19, %v1318_v11  ;;  %v1295_v28 = vadd.f32 %v1746_v47, %v1294_v4  ;;  %v1874_v21 = vpop.f32.mrf.mxu1 }
 0x157   : > { %v1748_v36 = vpop.f32.mrf.mxu0 }
 0x158   : > { %v1345_v44 = vmax.f32 %v1335_v50, 0.0  ;;  %v1319_v13 = vadd.f32 %v1295_v28, %v911_v0  ;;  %v1749_v55 = vadd.f32 %v1748_v36, %v1747_v58  ;;  %v1302_v22 = vpop.f32.mrf.mxu1 }
 0x159   : > { %v1750_v54 = vpop.f32.mrf.mxu0 }
 0x15a   : > { %1356 = vst.msk [vmem:[%s2509_s19 + $0x20] sm:$0xff] %vm1351_vm1, %v1345_v44  ;;  %v1336_v38 = vadd.f32 %v2502_v19, %v1319_v13  ;;  %v1300_v2 = vadd.f32 %v1749_v55, %v1299_v34  ;;  %v1875_v39 = vpop.f32.mrf.mxu1 }
 0x15b   : > { %v1751_v33 = vpop.f32.mrf.mxu0 }
 0x15c   : > { %v1346_v60 = vmax.f32 %v1336_v38, 0.0  ;;  %v1320_v3 = vadd.f32 %v1300_v2, %v916_v57  ;;  %v1752_v8 = vadd.f32 %v1751_v33, %v1750_v54  ;;  %v1307_v9 = vpop.f32.mrf.mxu1 }
 0x15d   : > { %v1753_v10 = vpop.f32.mrf.mxu0 }
 0x15e   : > { %1357 = vst.msk [vmem:[%s2509_s19 + $0x28] sm:$0xff] %vm1351_vm1, %v1346_v60  ;;  %v1337_v63 = vadd.f32 %v2502_v19, %v1320_v3  ;;  %v1303_v29 = vadd.f32 %v1752_v8, %v1302_v22  ;;  %v1878_v40 = vpop.f32.mrf.mxu1 }
 0x15f   : > { %v1754_v12 = vpop.f32.mrf.mxu0 }
 0x160   : > { %v1347_v15 = vmax.f32 %v1337_v63, 0.0  ;;  %v1321_v27 = vadd.f32 %v1303_v29, %v919_v43  ;;  %v1755_v37 = vadd.f32 %v1754_v12, %v1753_v10  ;;  %v1310_v61 = vpop.f32.mrf.mxu1 }
 0x161   : > { %v1756_v52 = vpop.f32.mrf.mxu0 }
 0x162   : > { %1358 = vst.msk [vmem:[%s2509_s19 + $0x30] sm:$0xff] %vm1351_vm1, %v1347_v15  ;;  %v1338_v32 = vadd.f32 %v2502_v19, %v1321_v27  ;;  %v1308_v5 = vadd.f32 %v1755_v37, %v1307_v9  ;;  %v1879_v31 = vpop.f32.mrf.mxu1 }
 0x163   : > { %v1757_v42 = vpop.f32.mrf.mxu0 }
 0x164   : > { %v1348_v51 = vmax.f32 %v1338_v32, 0.0  ;;  %v1322_v45 = vadd.f32 %v1308_v5, %v924_v26  ;;  %v1758_v16 = vadd.f32 %v1757_v42, %v1756_v52 }
 0x166   : > { %1359 = vst.msk [vmem:[%s2509_s19 + $0x38] sm:$0xff] %vm1351_vm1, %v1348_v51  ;;  %v1339_v59 = vadd.f32 %v2502_v19, %v1322_v45  ;;  %v1311_v4 = vadd.f32 %v1758_v16, %v1310_v61 }
 0x168   : > { %v1349_v56 = vmax.f32 %v1339_v59, 0.0  ;;  %v1323_v6 = vadd.f32 %v1311_v4, %v927_v17 }
 0x16a   : > { %1360 = vst.msk [vmem:[%s2509_s19 + $0x40] sm:$0xff] %vm1351_vm1, %v1349_v56  ;;  %v1340_v20 = vadd.f32 %v2502_v19, %v1323_v6 }
 0x16c   : > { %v1350_v1 = vmax.f32 %v1340_v20, 0.0 }
 0x16e   : > { %1361 = vst.msk [vmem:[%s2509_s19 + $0x48] sm:$0xff] %vm1351_vm1, %v1350_v1 }
 0x16f PF: > { %s13_s12 = sadd.s32 1, %s1970_s12  }
 0x170   : > { %p10_p4 = scmp.ge.s32.totalorder %s13_s12, 4  }
 0x172   :  { %12 = sbr.rel (!%p10_p4) target bundleno = 1 (0x1), region = 64 }

// kernel: refinement_net_forward.18
= control target key start
LH: loop header
LB: loop body
LE: loop exit
PB: predicated region body
PF: predicated region fallthrough
CT: control target
= control target key end

     0   :  { %s2409_s12 = smov 0   ;;  %s3361_s0 = inlined_call_operand.vmem [shape: f32[2,326,64], index: 0, kind: input, shape index: {}]   ;;  %s3362_s1 = inlined_call_operand.vmem [shape: bf16[3,192,6], index: 1, kind: input, shape index: {}]   ;;  %s3363_s2 = inlined_call_operand.vmem [shape: f32[1,6], index: 2, kind: input, shape index: {}]   ;;  %s3364_s3 = inlined_call_operand.vmem [shape: f32[2,288,6], index: 3, kind: output, shape index: {}]  }
   0x1 LB: > { %s2159_s13 = sadd.s32 4294967295, %s2385_s12   ;;  %p2163_p0 = scmp.ge.s32.totalorder %s2385_s12, 1  ;;  %s2385_s12 = sphi %s2409_s12, %s13_s12  }
   0x2   : > { %p137_p1 = scmp.lt.s32.totalorder %s2385_s12, 3 }
   0x4   : > { %p138_p2 = pnand %p2163_p0, %p137_p1 }
   0x5   : > { %p161_p3 = scmp.lt.s32.totalorder (!%p138_p2), %s2159_s13, 1  ;;  %s2388_s24 = smov (!%p138_p2), 64  }
   0x6   : > { %141 = sbr.rel (%p138_p2) target bundleno = 551 (0x227), region = 32 }
   0xb   : > { %v2343_v0 = vld [vmem:[%s3362_s1 + $0x98] sm:$0xff]   ;;  %v2387_v1 = vmov 0   ;;  %s3366_s13 = smov (!%p161_p3, %s2159_s13), 1  ;;  %v2344_v2 = vld [vmem:[%s3362_s1 + $0x90] sm:$0xff]   ;;  %v2345_v3 = vld [vmem:[%s3362_s1 + $0x88] sm:$0xff]   ;;  %vm388_vm0 = vcmask 523264  }
   0xc   : > { %2307 = vmatprep.subr.bf16.mxu1 %v2387_v1  ;;  %873 = vmatprep.subr.bf16.mxu0 %v2387_v1  ;;  %s2331_s18 = smul.u32 328, %s3366_s13  ;;  %v2346_v15 = vld [vmem:[%s3362_s1 + $0x80] sm:$0xff]   ;;  %v2347_v22 = vld [vmem:[%s3362_s1 + $0x78] sm:$0xff]   ;;  %v2348_v29 = vld [vmem:[%s3362_s1 + $0x70] sm:$0xff]   ;;  %vm2067_vm1 = vcmask 48128  }
   0xd   : > { %2319 = vmatpush1.bf16.msra.mxu1 %v2343_v0  ;;  %874 = vmatpush1.bf16.msra.mxu0 %v2343_v0  ;;  %v2349_v40 = vld [vmem:[%s3362_s1 + $0x68] sm:$0xff]   ;;  %v2350_v44 = vld [vmem:[%s3362_s1 + $0x60] sm:$0xff]   ;;  %v2351_v51 = vld [vmem:[%s3362_s1 + $0xb8] sm:$0xff]  }
   0xe   : > { %2308 = vmatprep.subr.bf16.mxu1 %v2387_v1  ;;  %875 = vmatprep.subr.bf16.mxu0 %v2387_v1  ;;  %s2433_s21 = scalar_lea.vmem %s3361_s0, %s2331_s18  ;;  %v2352_v61 = vld [vmem:[%s3362_s1 + $0xb0] sm:$0xff]  }
   0xf   : > { %v506_v4 = vld [vmem:[%s2433_s21 + $0xa3] sm:$0xff]  ;;  %v507_v5 = vld [vmem:[%s2433_s21 + $0xab] sm:$0xff]  ;;  %v488_v6 = vld [vmem:[%s2433_s21 + $0x13] sm:$0xff] }
  0x10   : > { %v533_v7 = vpack.c.bf16 %v507_v5, %v506_v4  ;;  %v489_v8 = vld [vmem:[%s2433_s21 + $0x1b] sm:$0xff]  ;;  %v508_v9 = vld [vmem:[%s2433_s21 + $0xb3] sm:$0xff]  ;;  %v490_v12 = vld [vmem:[%s2433_s21 + $0x23] sm:$0xff] }
  0x11   : > { %2320 = vmatpush1.bf16.msra.mxu1 %v2344_v2  ;;  %876 = vmatpush1.bf16.msra.mxu0 %v2344_v2  ;;  %v509_v10 = vld [vmem:[%s2433_s21 + $0xbb] sm:$0xff]  ;;  %v491_v13 = vld [vmem:[%s2433_s21 + $0x2b] sm:$0xff]  ;;  %v524_v14 = vpack.c.bf16 %v489_v8, %v488_v6  ;;  %v510_v17 = vld [vmem:[%s2433_s21 + $0xc3] sm:$0xff] }
  0x12   : > { %2309 = vmatprep.subr.bf16.mxu1 %v2387_v1  ;;  %877 = vmatprep.subr.bf16.mxu0 %v2387_v1  ;;  %v534_v11 = vpack.c.bf16 %v509_v10, %v508_v9  ;;  %v525_v16 = vpack.c.bf16 %v491_v13, %v490_v12  ;;  %v511_v18 = vld [vmem:[%s2433_s21 + $0xcb] sm:$0xff]  ;;  %v492_v19 = vld [vmem:[%s2433_s21 + $0x33] sm:$0xff]  ;;  %v493_v20 = vld [vmem:[%s2433_s21 + $0x3b] sm:$0xff] }
  0x13   : > { %632 = vrot.lane.b32.xlu0 %v533_v7, %s2388_s24  ;;  %v535_v21 = vpack.c.bf16 %v511_v18, %v510_v17  ;;  %v526_v23 = vpack.c.bf16 %v493_v20, %v492_v19  ;;  %v512_v24 = vld [vmem:[%s2433_s21 + $0xd3] sm:$0xff]  ;;  %v513_v25 = vld [vmem:[%s2433_s21 + $0xdb] sm:$0xff]  ;;  %v494_v26 = vld [vmem:[%s2433_s21 + $0x43] sm:$0xff] }
  0x14   : > { %634 = vrot.lane.b32.xlu1 %v534_v11, %s2388_s24  ;;  %v495_v27 = vld [vmem:[%s2433_s21 + $0x4b] sm:$0xff]  ;;  %v536_v28 = vpack.c.bf16 %v513_v25, %v512_v24  ;;  %v514_v31 = vld [vmem:[%s2433_s21 + $0xe3] sm:$0xff]  ;;  %v496_v33 = vld [vmem:[%s2433_s21 + $0x53] sm:$0xff] }
  0x15   : > { %2321 = vmatpush1.bf16.msra.mxu1 %v2345_v3  ;;  %878 = vmatpush1.bf16.msra.mxu0 %v2345_v3  ;;  %v527_v30 = vpack.c.bf16 %v495_v27, %v494_v26  ;;  %v515_v32 = vld [vmem:[%s2433_s21 + $0xeb] sm:$0xff]  ;;  %v497_v34 = vld [vmem:[%s2433_s21 + $0x5b] sm:$0xff]  ;;  %v516_v36 = vld [vmem:[%s2433_s21 + $0xf3] sm:$0xff] }
  0x16   : > { %2310 = vmatprep.subr.bf16.mxu1 %v2387_v1  ;;  %879 = vmatprep.subr.bf16.mxu0 %v2387_v1  ;;  %v537_v35 = vpack.c.bf16 %v515_v32, %v514_v31  ;;  %v528_v37 = vpack.c.bf16 %v497_v34, %v496_v33  ;;  %v517_v38 = vld [vmem:[%s2433_s21 + $0xfb] sm:$0xff]  ;;  %v498_v39 = vld [vmem:[%s2433_s21 + $0x63] sm:$0xff]  ;;  %v499_v41 = vld [vmem:[%s2433_s21 + $0x6b] sm:$0xff] }
  0x17   : > { %614 = vrot.lane.b32.xlu0 %v524_v14, %s2388_s24  ;;  %v538_v42 = vpack.c.bf16 %v517_v38, %v516_v36  ;;  %v518_v43 = vld [vmem:[%s2433_s21 + $0x103] sm:$0xff]  ;;  %v529_v45 = vpack.c.bf16 %v499_v41, %v498_v39  ;;  %v519_v46 = vld [vmem:[%s2433_s21 + $0x10b] sm:$0xff]  ;;  %v500_v47 = vld [vmem:[%s2433_s21 + $0x73] sm:$0xff] }
  0x18   : > { %616 = vrot.lane.b32.xlu1 %v525_v16, %s2388_s24  ;;  %v501_v48 = vld [vmem:[%s2433_s21 + $0x7b] sm:$0xff]  ;;  %v539_v49 = vpack.c.bf16 %v519_v46, %v518_v43  ;;  %v520_v50 = vld [vmem:[%s2433_s21 + $0x113] sm:$0xff]  ;;  %v560_v54 = vld [vmem:[%s2433_s21 + $0xa4] sm:$0xff] }
  0x19   : > { %2322 = vmatpush1.bf16.msra.mxu1 %v2346_v15  ;;  %880 = vmatpush1.bf16.msra.mxu0 %v2346_v15  ;;  %v530_v52 = vpack.c.bf16 %v501_v48, %v500_v47  ;;  %v521_v53 = vld [vmem:[%s2433_s21 + $0x11b] sm:$0xff]  ;;  %v502_v55 = vld [vmem:[%s2433_s21 + $0x83] sm:$0xff]  ;;  %v503_v56 = vld [vmem:[%s2433_s21 + $0x8b] sm:$0xff] }
  0x1a   : > { %2311 = vmatprep.subr.bf16.mxu1 %v2387_v1  ;;  %881 = vmatprep.subr.bf16.mxu0 %v2387_v1  ;;  %v561_v57 = vld [vmem:[%s2433_s21 + $0xac] sm:$0xff]  ;;  %v522_v58 = vld [vmem:[%s2433_s21 + $0x123] sm:$0xff]  ;;  %v540_v60 = vpack.c.bf16 %v521_v53, %v520_v50  ;;  %v542_v62 = vld [vmem:[%s2433_s21 + $0x14] sm:$0xff]  ;;  %v531_v63 = vpack.c.bf16 %v503_v56, %v502_v55 }
  0x1b   : > { %636 = vrot.lane.b32.xlu0 %v535_v21, %s2388_s24  ;;  %v587_v59 = vpack.c.bf16 %v561_v57, %v560_v54  ;;  %v523_v0 = vld [vmem:[%s2433_s21 + $0x12b] sm:$0xff]  ;;  %v504_v2 = vld [vmem:[%s2433_s21 + $0x93] sm:$0xff]  ;;  %v543_v3 = vld [vmem:[%s2433_s21 + $0x1c] sm:$0xff] }
  0x1c   : > { %618 = vrot.lane.b32.xlu1 %v526_v23, %s2388_s24  ;;  %v505_v4 = vld [vmem:[%s2433_s21 + $0x9b] sm:$0xff]  ;;  %v578_v5 = vpack.c.bf16 %v543_v3, %v542_v62  ;;  %v541_v6 = vpack.c.bf16 %v523_v0, %v522_v58  ;;  %v2353_v8 = vld [vmem:[%s3362_s1 + $0xa8] sm:$0xff]   ;;  %v228_v16 = vld [vmem:[%s2433_s21 + $0x11] sm:$0xff] }
  0x1d   : > { %2323 = vmatpush1.bf16.msra.mxu1 %v2347_v22  ;;  %882 = vmatpush1.bf16.msra.mxu0 %v2347_v22  ;;  %v226_v7 = vld [vmem:[%s2433_s21 + $0x1] sm:$0xff]  ;;  %v532_v9 = vpack.c.bf16 %v505_v4, %v504_v2  ;;  %v227_v10 = vld [vmem:[%s2433_s21 + $0x9] sm:$0xff]  ;;  %v229_v17 = vld [vmem:[%s2433_s21 + $0x19] sm:$0xff] }
  0x1e   : > { %2312 = vmatprep.subr.bf16.mxu1 %v2387_v1  ;;  %883 = vmatprep.subr.bf16.mxu0 %v2387_v1  ;;  %v1390_v11 = vld [vmem:[%s2433_s21 + $0x25] sm:$0xff]  ;;  %v1391_v12 = vld [vmem:[%s2433_s21 + $0x2d] sm:$0xff]  ;;  %v262_v13 = vpack.c.bf16 %v227_v10, %v226_v7  ;;  %v1392_v18 = vld [vmem:[%s2433_s21 + $0x35] sm:$0xff]  ;;  %v263_v20 = vpack.c.bf16 %v229_v17, %v228_v16 }
  0x1f   : > { %638 = vrot.lane.b32.xlu0 %v536_v28, %s2388_s24  ;;  %2211 = vmatprep.mubr.msk.bf16.mxu1 %vm388_vm0, %v587_v59  ;;  %v2354_v14 = vld [vmem:[%s3362_s1 + $0xa0] sm:$0xff]   ;;  %v1426_v15 = vpack.c.bf16 %v1391_v12, %v1390_v11  ;;  %v231_v23 = vld [vmem:[%s2433_s21 + $0x29] sm:$0xff]  ;;  %v232_v28 = vld [vmem:[%s2433_s21 + $0x31] sm:$0xff] }
  0x20   : > { %620 = vrot.lane.b32.xlu1 %v527_v30, %s2388_s24  ;;  %2202 = vmatprep.mubr.msk.bf16.mxu0 %vm388_vm0, %v578_v5  ;;  %v1393_v19 = vld [vmem:[%s2433_s21 + $0x3d] sm:$0xff]  ;;  %v1394_v24 = vld [vmem:[%s2433_s21 + $0x45] sm:$0xff]  ;;  %v1395_v25 = vld [vmem:[%s2433_s21 + $0x4d] sm:$0xff] }
  0x21   : > { %2324 = vmatpush1.bf16.msra.mxu1 %v2348_v29  ;;  %884 = vmatpush1.bf16.msra.mxu0 %v2348_v29  ;;  %v1427_v21 = vpack.c.bf16 %v1393_v19, %v1392_v18  ;;  %v230_v22 = vld [vmem:[%s2433_s21 + $0x21] sm:$0xff]  ;;  %v1428_v27 = vpack.c.bf16 %v1395_v25, %v1394_v24  ;;  %v233_v29 = vld [vmem:[%s2433_s21 + $0x39] sm:$0xff]  ;;  %v236_v39 = vld [vmem:[%s2433_s21 + $0x51] sm:$0xff] }
  0x22   : > { %2313 = vmatprep.subr.bf16.mxu1 %v2387_v1  ;;  %885 = vmatprep.subr.bf16.mxu0 %v2387_v1  ;;  %v264_v26 = vpack.c.bf16 %v231_v23, %v230_v22  ;;  %v1396_v30 = vld [vmem:[%s2433_s21 + $0x55] sm:$0xff]  ;;  %v1397_v31 = vld [vmem:[%s2433_s21 + $0x5d] sm:$0xff]  ;;  %v265_v32 = vpack.c.bf16 %v233_v29, %v232_v28  ;;  %v1398_v36 = vld [vmem:[%s2433_s21 + $0x65] sm:$0xff] }
  0x23   : > { %640 = vrot.lane.b32.xlu0 %v537_v35, %s2388_s24  ;;  %v1429_v33 = vpack.c.bf16 %v1397_v31, %v1396_v30  ;;  %v234_v34 = vld [vmem:[%s2433_s21 + $0x41] sm:$0xff]  ;;  %v235_v35 = vld [vmem:[%s2433_s21 + $0x49] sm:$0xff]  ;;  %v237_v41 = vld [vmem:[%s2433_s21 + $0x59] sm:$0xff] }
  0x24   : > { %622 = vrot.lane.b32.xlu1 %v528_v37, %s2388_s24  ;;  %v1399_v37 = vld [vmem:[%s2433_s21 + $0x6d] sm:$0xff]  ;;  %v266_v38 = vpack.c.bf16 %v235_v35, %v234_v34  ;;  %v1401_v43 = vld [vmem:[%s2433_s21 + $0x7d] sm:$0xff]  ;;  %v1402_v48 = vld [vmem:[%s2433_s21 + $0x85] sm:$0xff] }
  0x25   : > { %2325 = vmatpush1.bf16.msra.mxu1 %v2349_v40  ;;  %886 = vmatpush1.bf16.msra.mxu0 %v2349_v40  ;;  %v1430_v40 = vpack.c.bf16 %v1399_v37, %v1398_v36  ;;  %v238_v46 = vld [vmem:[%s2433_s21 + $0x61] sm:$0xff]  ;;  %v239_v47 = vld [vmem:[%s2433_s21 + $0x69] sm:$0xff]  ;;  %v241_v53 = vld [vmem:[%s2433_s21 + $0x79] sm:$0xff] }
  0x26   : > { %2314 = vmatprep.subr.bf16.mxu1 %v2387_v1  ;;  %887 = vmatprep.subr.bf16.mxu0 %v2387_v1  ;;  %v268_v50 = vpack.c.bf16 %v239_v47, %v238_v46  ;;  %v1404_v54 = vld [vmem:[%s2433_s21 + $0x95] sm:$0xff]  ;;  %v1405_v55 = vld [vmem:[%s2433_s21 + $0x9d] sm:$0xff]  ;;  %v243_v59 = vld [vmem:[%s2433_s21 + $0x89] sm:$0xff] }
  0x27   : > { %642 = vrot.lane.b32.xlu0 %v538_v42, %s2388_s24  ;;  %v1400_v42 = vld [vmem:[%s2433_s21 + $0x75] sm:$0xff]  ;;  %v1433_v57 = vpack.c.bf16 %v1405_v55, %v1404_v54  ;;  %v242_v58 = vld [vmem:[%s2433_s21 + $0x81] sm:$0xff]  ;;  %v1411_v10 = vld [vmem:[%s2433_s21 + $0xcd] sm:$0xff] }
  0x28   : > { %624 = vrot.lane.b32.xlu1 %v529_v45, %s2388_s24  ;;  %v1431_v45 = vpack.c.bf16 %v1401_v43, %v1400_v42  ;;  %v270_v62 = vpack.c.bf16 %v243_v59, %v242_v58  ;;  %v244_v0 = vld [vmem:[%s2433_s21 + $0x91] sm:$0xff]  ;;  %v245_v2 = vld [vmem:[%s2433_s21 + $0x99] sm:$0xff]  ;;  %v250_v19 = vld [vmem:[%s2433_s21 + $0xc1] sm:$0xff] }
  0x29   : > { %2326 = vmatpush1.bf16.msra.mxu1 %v2350_v44  ;;  %888 = vmatpush1.bf16.msra.mxu0 %v2350_v44  ;;  %v267_v44 = vpack.c.bf16 %v237_v41, %v236_v39  ;;  %v1408_v3 = vld [vmem:[%s2433_s21 + $0xb5] sm:$0xff]  ;;  %v1409_v4 = vld [vmem:[%s2433_s21 + $0xbd] sm:$0xff]  ;;  %v271_v5 = vpack.c.bf16 %v245_v2, %v244_v0  ;;  %v1415_v22 = vld [vmem:[%s2433_s21 + $0xed] sm:$0xff] }
  0x2a   : > { %2315 = vmatprep.subr.bf16.mxu1 %v2387_v1  ;;  %897 = vmatprep.subr.bf16.mxu0 %v2387_v1  ;;  %v1435_v7 = vpack.c.bf16 %v1409_v4, %v1408_v3  ;;  %v1413_v16 = vld [vmem:[%s2433_s21 + $0xdd] sm:$0xff]  ;;  %v252_v25 = vld [vmem:[%s2433_s21 + $0xd1] sm:$0xff] }
  0x2b   : > { %644 = vrot.lane.b32.xlu0 %v539_v49, %s2388_s24  ;;  %v1403_v49 = vld [vmem:[%s2433_s21 + $0x8d] sm:$0xff]  ;;  %v1417_v28 = vld [vmem:[%s2433_s21 + $0xfd] sm:$0xff]  ;;  %v1420_v39 = vld [vmem:[%s2433_s21 + $0x115] sm:$0xff] }
  0x2c   : > { %626 = vrot.lane.b32.xlu1 %v530_v52, %s2388_s24  ;;  %v240_v52 = vld [vmem:[%s2433_s21 + $0x71] sm:$0xff]  ;;  %v254_v31 = vld [vmem:[%s2433_s21 + $0xe1] sm:$0xff] }
  0x2d   : > { %2327 = vmatpush2.bf16.msra.mxu1 %v2351_v51  ;;  %898 = vmatpush2.bf16.msra.mxu0 %v2351_v51  ;;  %v1432_v51 = vpack.c.bf16 %v1403_v49, %v1402_v48  ;;  %v269_v56 = vpack.c.bf16 %v241_v53, %v240_v52  ;;  %v1419_v34 = vld [vmem:[%s2433_s21 + $0x10d] sm:$0xff]  ;;  %v258_v43 = vld [vmem:[%s2433_s21 + $0x101] sm:$0xff] }
  0x2e   : > { %2316 = vmatprep.subr.bf16.mxu1 %v2387_v1  ;;  %899 = vmatprep.subr.bf16.mxu0 %v2387_v1  ;;  %v256_v37 = vld [vmem:[%s2433_s21 + $0xf1] sm:$0xff]  ;;  %v1425_v52 = vld [vmem:[%s2433_s21 + $0x13d] sm:$0xff] }
  0x2f   : > { %646 = vrot.lane.b32.xlu0 %v540_v60, %s2388_s24  ;;  %v1406_v60 = vld [vmem:[%s2433_s21 + $0xa5] sm:$0xff]  ;;  %v1423_v46 = vld [vmem:[%s2433_s21 + $0x12d] sm:$0xff]  ;;  %v563_v58 = vld [vmem:[%s2433_s21 + $0xbc] sm:$0xff] }
  0x30   : > { %628 = vrot.lane.b32.xlu1 %v531_v63, %s2388_s24  ;;  %v260_v49 = vld [vmem:[%s2433_s21 + $0x111] sm:$0xff]  ;;  %v300_v55 = vld [vmem:[%s2433_s21 + $0xa2] sm:$0xff]  ;;  %v303_v3 = vld [vmem:[%s2433_s21 + $0xba] sm:$0xff] }
  0x31   : > { %2328 = vmatpush2.bf16.msra.mxu1 %v2352_v61  ;;  %900 = vmatpush2.bf16.msra.mxu0 %v2352_v61  ;;  %v1407_v61 = vld [vmem:[%s2433_s21 + $0xad] sm:$0xff] }
  0x32   : > { %2317 = vmatprep.subr.bf16.mxu1 %v2387_v1  ;;  %901 = vmatprep.subr.bf16.mxu0 %v2387_v1  ;;  %v1434_v63 = vpack.c.bf16 %v1407_v61, %v1406_v60  ;;  %v282_v60 = vld [vmem:[%s2433_s21 + $0x12] sm:$0xff]  ;;  %v283_v61 = vld [vmem:[%s2433_s21 + $0x1a] sm:$0xff] }
  0x33   : > { %648 = vrot.lane.b32.xlu0 %v541_v6, %s2388_s24  ;;  %v246_v6 = vld [vmem:[%s2433_s21 + $0xa1] sm:$0xff]  ;;  %v302_v2 = vld [vmem:[%s2433_s21 + $0xb2] sm:$0xff] }
  0x34   : > { %630 = vrot.lane.b32.xlu1 %v532_v9, %s2388_s24  ;;  %v1410_v9 = vld [vmem:[%s2433_s21 + $0xc5] sm:$0xff] }
  0x35   : > { %2329 = vmatpush2.bf16.msra.mxu1 %v2353_v8  ;;  %902 = vmatpush2.bf16.msra.mxu0 %v2353_v8  ;;  %v247_v8 = vld [vmem:[%s2433_s21 + $0xa9] sm:$0xff]  ;;  %v1436_v12 = vpack.c.bf16 %v1411_v10, %v1410_v9  ;;  %v2356_v9 = vld [vmem:[%s3362_s1 + $0xf8] sm:$0xff]   ;;  %v2678_v10 = vpack.c.bf16 %v303_v3, %v302_v2 }
  0x36   : > { %2318 = vmatprep.subr.bf16.mxu1 %v2387_v1  ;;  %903 = vmatprep.subr.bf16.mxu0 %v2387_v1  ;;  %v272_v11 = vpack.c.bf16 %v247_v8, %v246_v6  ;;  %v544_v6 = vld [vmem:[%s2433_s21 + $0x24] sm:$0xff]  ;;  %v2366_v2 = vld [vmem:[%s3362_s1 + $0xd0] sm:$0xff]  }
  0x37   : > { %352 = vrot.lane.b32.xlu0 %v262_v13, %s2388_s24  ;;  %v248_v13 = vld [vmem:[%s2433_s21 + $0xb1] sm:$0xff] }
  0x38   : > { %1516 = vrot.lane.b32.xlu1 %v1426_v15, %s2388_s24  ;;  %v1412_v15 = vld [vmem:[%s2433_s21 + $0xd5] sm:$0xff] }
  0x39   : > { %2330 = vmatpush2.bf16.msra.mxu1 %v2354_v14  ;;  %904 = vmatpush2.bf16.msra.mxu0 %v2354_v14  ;;  %v249_v14 = vld [vmem:[%s2433_s21 + $0xb9] sm:$0xff]  ;;  %v1437_v18 = vpack.c.bf16 %v1413_v16, %v1412_v15  ;;  %v285_v15 = vld [vmem:[%s2433_s21 + $0x2a] sm:$0xff] }
  0x3a   : > { %1159 = vmatprep.subr.bf16.mxu1 %v2387_v1  ;;  %1775 = vmatprep.subr.bf16.mxu0 %v2387_v1  ;;  %v273_v17 = vpack.c.bf16 %v249_v14, %v248_v13  ;;  %v284_v14 = vld [vmem:[%s2433_s21 + $0x22] sm:$0xff] }
  0x3b   : > { %354 = vrot.lane.b32.xlu0 %v263_v20, %s2388_s24  ;;  %v251_v20 = vld [vmem:[%s2433_s21 + $0xc9] sm:$0xff] }
  0x3c   : > { %1518 = vrot.lane.b32.xlu1 %v1427_v21, %s2388_s24  ;;  %v1414_v21 = vld [vmem:[%s2433_s21 + $0xe5] sm:$0xff]  ;;  %v274_v23 = vpack.c.bf16 %v251_v20, %v250_v19  ;;  %v2358_v20 = vld [vmem:[%s3362_s1 + $0xf0] sm:$0xff]  }
  0x3d   : > { %v1438_v24 = vpack.c.bf16 %v1415_v22, %v1414_v21  ;;  %v2697_v21 = vpack.c.bf16 %v285_v15, %v284_v14  ;;  %v2359_v22 = vld [vmem:[%s3362_s1 + $0x28] sm:$0xff]   ;;  %v291_v14 = vld [vmem:[%s2433_s21 + $0x5a] sm:$0xff] }
  0x3e   : > { %v2368_v15 = vld [vmem:[%s3362_s1 + $0xc8] sm:$0xff]  }
  0x3f   : > { %356 = vrot.lane.b32.xlu0 %v264_v26, %s2388_s24  ;;  %v253_v26 = vld [vmem:[%s2433_s21 + $0xd9] sm:$0xff] }
  0x40   : > { %1520 = vrot.lane.b32.xlu1 %v1428_v27, %s2388_s24  ;;  %v1416_v27 = vld [vmem:[%s2433_s21 + $0xf5] sm:$0xff]  ;;  %v275_v29 = vpack.c.bf16 %v253_v26, %v252_v25  ;;  %v305_v26 = vld [vmem:[%s2433_s21 + $0xca] sm:$0xff] }
  0x41   : > { %v1439_v30 = vpack.c.bf16 %v1417_v28, %v1416_v27  ;;  %v546_v27 = vld [vmem:[%s2433_s21 + $0x34] sm:$0xff]  ;;  %v547_v28 = vld [vmem:[%s2433_s21 + $0x3c] sm:$0xff] }
  0x43   : > { %358 = vrot.lane.b32.xlu0 %v265_v32, %s2388_s24  ;;  %v255_v32 = vld [vmem:[%s2433_s21 + $0xe9] sm:$0xff] }
  0x44   : > { %1522 = vrot.lane.b32.xlu1 %v1429_v33, %s2388_s24  ;;  %v1418_v33 = vld [vmem:[%s2433_s21 + $0x105] sm:$0xff]  ;;  %v276_v35 = vpack.c.bf16 %v255_v32, %v254_v31  ;;  %v2719_v32 = vpack.c.bf16 %v547_v28, %v546_v27 }
  0x45   : > { %v1440_v36 = vpack.c.bf16 %v1419_v34, %v1418_v33  ;;  %v2360_v31 = vld [vmem:[%s3362_s1 + $0xe8] sm:$0xff]   ;;  %v286_v33 = vld [vmem:[%s2433_s21 + $0x32] sm:$0xff]  ;;  %v287_v34 = vld [vmem:[%s2433_s21 + $0x3a] sm:$0xff] }
  0x46   : > { %v2370_v27 = vld [vmem:[%s3362_s1 + $0xc0] sm:$0xff]  }
  0x47   : > { %360 = vrot.lane.b32.xlu0 %v266_v38, %s2388_s24  ;;  %v257_v38 = vld [vmem:[%s2433_s21 + $0xf9] sm:$0xff] }
  0x48   : > { %1524 = vrot.lane.b32.xlu1 %v1430_v40, %s2388_s24  ;;  %v1421_v40 = vld [vmem:[%s2433_s21 + $0x11d] sm:$0xff]  ;;  %v277_v41 = vpack.c.bf16 %v257_v38, %v256_v37  ;;  %v566_v37 = vld [vmem:[%s2433_s21 + $0xd4] sm:$0xff] }
  0x49   : > { %v1441_v42 = vpack.c.bf16 %v1421_v40, %v1420_v39  ;;  %v567_v38 = vld [vmem:[%s2433_s21 + $0xdc] sm:$0xff]  ;;  %v2736_v40 = vpack.c.bf16 %v287_v34, %v286_v33 }
  0x4a   : > { %v2371_v33 = vld [vmem:[%s3362_s1 + $0x58] sm:$0xff]  }
  0x4b   : > { %362 = vrot.lane.b32.xlu0 %v267_v44, %s2388_s24  ;;  %v259_v44 = vld [vmem:[%s2433_s21 + $0x109] sm:$0xff] }
  0x4c   : > { %1526 = vrot.lane.b32.xlu1 %v1431_v45, %s2388_s24  ;;  %v1422_v45 = vld [vmem:[%s2433_s21 + $0x125] sm:$0xff]  ;;  %v278_v47 = vpack.c.bf16 %v259_v44, %v258_v43  ;;  %v306_v43 = vld [vmem:[%s2433_s21 + $0xd2] sm:$0xff]  ;;  %v307_v44 = vld [vmem:[%s2433_s21 + $0xda] sm:$0xff] }
  0x4d   : > { %v1442_v48 = vpack.c.bf16 %v1423_v46, %v1422_v45  ;;  %v2363_v46 = vld [vmem:[%s3362_s1 + $0x18] sm:$0xff]  }
  0x4f   : > { %364 = vrot.lane.b32.xlu0 %v268_v50, %s2388_s24  ;;  %v261_v50 = vld [vmem:[%s2433_s21 + $0x119] sm:$0xff] }
  0x50   : > { %1528 = vrot.lane.b32.xlu1 %v1432_v51, %s2388_s24  ;;  %v1424_v51 = vld [vmem:[%s2433_s21 + $0x135] sm:$0xff]  ;;  %v279_v53 = vpack.c.bf16 %v261_v50, %v260_v49  ;;  %v2756_v50 = vpack.c.bf16 %v307_v44, %v306_v43  ;;  %v572_v43 = vld [vmem:[%s2433_s21 + $0x104] sm:$0xff]  ;;  %v573_v44 = vld [vmem:[%s2433_s21 + $0x10c] sm:$0xff] }
  0x51   : > { %v1443_v54 = vpack.c.bf16 %v1425_v52, %v1424_v51  ;;  %v288_v52 = vld [vmem:[%s2433_s21 + $0x42] sm:$0xff] }
  0x53   : > { %366 = vrot.lane.b32.xlu0 %v269_v56, %s2388_s24  ;;  %v301_v56 = vld [vmem:[%s2433_s21 + $0xaa] sm:$0xff] }
  0x54   : > { %1530 = vrot.lane.b32.xlu1 %v1433_v57, %s2388_s24  ;;  %v562_v57 = vld [vmem:[%s2433_s21 + $0xb4] sm:$0xff]  ;;  %v2659_v59 = vpack.c.bf16 %v301_v56, %v300_v55  ;;  %v568_v56 = vld [vmem:[%s2433_s21 + $0xe4] sm:$0xff] }
  0x57   : > { %368 = vrot.lane.b32.xlu0 %v270_v62, %s2388_s24  ;;  %v2355_v62 = vld [vmem:[%s3362_s1 + $0x38] sm:$0xff]  }
  0x58   : > { %1532 = vrot.lane.b32.xlu1 %v1434_v63, %s2388_s24  ;;  %v588_v63 = vpack.c.bf16 %v563_v58, %v562_v57  ;;  %v569_v57 = vld [vmem:[%s2433_s21 + $0xec] sm:$0xff] }
  0x59   : > { %v2365_v58 = vld [vmem:[%s3362_s1 + $0x10] sm:$0xff]  }
  0x5b   : > { %370 = vrot.lane.b32.xlu0 %v271_v5, %s2388_s24  ;;  %v2670_v5 = vpack.c.bf16 %v283_v61, %v282_v60 }
  0x5c   : > { %1534 = vrot.lane.b32.xlu1 %v1435_v7, %s2388_s24  ;;  %v545_v7 = vld [vmem:[%s2433_s21 + $0x2c] sm:$0xff] }
  0x5d   : > { %v2684_v13 = vpack.c.bf16 %v545_v7, %v544_v6  ;;  %v551_v6 = vld [vmem:[%s2433_s21 + $0x5c] sm:$0xff]  ;;  %v2367_v7 = vld [vmem:[%s3362_s1 + $0x8] sm:$0xff]  }
  0x5f   : > { %372 = vrot.lane.b32.xlu0 %v272_v11, %s2388_s24  ;;  %v2357_v11 = vld [vmem:[%s3362_s1 + $0x30] sm:$0xff]  }
  0x60   : > { %1536 = vrot.lane.b32.xlu1 %v1436_v12, %s2388_s24 }
  0x63   : > { %374 = vrot.lane.b32.xlu0 %v273_v17, %s2388_s24  ;;  %v564_v17 = vld [vmem:[%s2433_s21 + $0xc4] sm:$0xff] }
  0x64   : > { %1538 = vrot.lane.b32.xlu1 %v1437_v18, %s2388_s24  ;;  %v565_v18 = vld [vmem:[%s2433_s21 + $0xcc] sm:$0xff] }
  0x65   : > { %v2706_v25 = vpack.c.bf16 %v565_v18, %v564_v17  ;;  %v570_v17 = vld [vmem:[%s2433_s21 + $0xf4] sm:$0xff]  ;;  %v571_v18 = vld [vmem:[%s2433_s21 + $0xfc] sm:$0xff] }
  0x67   : > { %376 = vrot.lane.b32.xlu0 %v274_v23, %s2388_s24  ;;  %v304_v23 = vld [vmem:[%s2433_s21 + $0xc2] sm:$0xff] }
  0x68   : > { %1540 = vrot.lane.b32.xlu1 %v1438_v24, %s2388_s24 }
  0x6b   : > { %378 = vrot.lane.b32.xlu0 %v275_v29, %s2388_s24 }
  0x6c   : > { %1542 = vrot.lane.b32.xlu1 %v1439_v30, %s2388_s24  ;;  %v2714_v30 = vpack.c.bf16 %v305_v26, %v304_v23  ;;  %v2818_v23 = vpack.c.bf16 %v571_v18, %v570_v17  ;;  %v311_v26 = vld [vmem:[%s2433_s21 + $0xfa] sm:$0xff] }
  0x6d   : > { %v2378_v17 = vld [vmem:[%s3362_s1 + $0x100] sm:$0xff]  }
  0x6f   : > { %380 = vrot.lane.b32.xlu0 %v276_v35, %s2388_s24 }
  0x70   : > { %1544 = vrot.lane.b32.xlu1 %v1440_v36, %s2388_s24  ;;  %v2361_v36 = vld [vmem:[%s3362_s1 + $0x20] sm:$0xff]  }
  0x73   : > { %382 = vrot.lane.b32.xlu0 %v277_v41, %s2388_s24  ;;  %v2362_v41 = vld [vmem:[%s3362_s1 + $0xe0] sm:$0xff]  }
  0x74   : > { %1546 = vrot.lane.b32.xlu1 %v1441_v42, %s2388_s24  ;;  %v2741_v42 = vpack.c.bf16 %v567_v38, %v566_v37  ;;  %v292_v37 = vld [vmem:[%s2433_s21 + $0x62] sm:$0xff]  ;;  %v293_v38 = vld [vmem:[%s2433_s21 + $0x6a] sm:$0xff] }
  0x77   : > { %384 = vrot.lane.b32.xlu0 %v278_v47, %s2388_s24  ;;  %v548_v47 = vld [vmem:[%s2433_s21 + $0x44] sm:$0xff] }
  0x78   : > { %1548 = vrot.lane.b32.xlu1 %v1442_v48, %s2388_s24  ;;  %v549_v48 = vld [vmem:[%s2433_s21 + $0x4c] sm:$0xff] }
  0x79   : > { %v2758_v51 = vpack.c.bf16 %v549_v48, %v548_v47  ;;  %v2856_v47 = vpack.c.bf16 %v293_v38, %v292_v37  ;;  %v2858_v48 = vpack.c.bf16 %v573_v44, %v572_v43  ;;  %v486_v44 = vld [vmem:[%s2433_s21 + $0x12a] sm:$0xff] }
  0x7b   : > { %386 = vrot.lane.b32.xlu0 %v279_v53, %s2388_s24  ;;  %v289_v53 = vld [vmem:[%s2433_s21 + $0x4a] sm:$0xff] }
  0x7c   : > { %1550 = vrot.lane.b32.xlu1 %v1443_v54, %s2388_s24  ;;  %v2364_v54 = vld [vmem:[%s3362_s1 + $0xd8] sm:$0xff]   ;;  %v2776_v61 = vpack.c.bf16 %v289_v53, %v288_v52  ;;  %v313_v52 = vld [vmem:[%s2433_s21 + $0x10a] sm:$0xff] }
  0x7d   : > { %v2374_v53 = vld [vmem:[%s3362_s1 + $0x110] sm:$0xff]  }
  0x85   : > { %v633_v0 = vpop.permute.xlu0 %632 }
  0x86   : > { %v688_v4 = vsel %vm388_vm0, %v2659_v59, %v633_v0  ;;  %v635_v8 = vpop.permute.xlu1 %634  ;;  %v309_v0 = vld [vmem:[%s2433_s21 + $0xea] sm:$0xff] }
  0x87   : > { %978 = vmatmul.mubr.bf16.vlgmr.msra.gmra.mxu1 %v688_v4  ;;  %v692_v19 = vsel %vm388_vm0, %v2678_v10, %v635_v8  ;;  %v550_v4 = vld [vmem:[%s2433_s21 + $0x54] sm:$0xff] }
  0x88   : > { %1160 = vmatpush1.bf16.msra.mxu1 %v2355_v62  ;;  %2212 = vmatprep.mubr.msk.bf16.mxu1 %vm388_vm0, %v588_v63  ;;  %v2778_v62 = vpack.c.bf16 %v569_v57, %v568_v56  ;;  %v308_v63 = vld [vmem:[%s2433_s21 + $0xe2] sm:$0xff] }
  0x89   : > { %v615_v12 = vpop.permute.xlu0 %614  ;;  %1161 = vmatprep.subr.bf16.mxu1 %v2387_v1  ;;  %v555_v56 = vld [vmem:[%s2433_s21 + $0x7c] sm:$0xff]  ;;  %v2375_v57 = vld [vmem:[%s3362_s1 + $0x48] sm:$0xff]  }
  0x8a   : > { %v652_v16 = vsel %vm388_vm0, %v2670_v5, %v615_v12  ;;  %v617_v24 = vpop.permute.xlu1 %616  ;;  %v290_v12 = vld [vmem:[%s2433_s21 + $0x52] sm:$0xff] }
  0x8b   : > { %906 = vmatmul.mubr.bf16.vlgmr.msra.gmra.mxu0 %v652_v16  ;;  %v656_v29 = vsel %vm388_vm0, %v2697_v21, %v617_v24  ;;  %v310_v24 = vld [vmem:[%s2433_s21 + $0xf2] sm:$0xff] }
  0x8c   : > { %1776 = vmatpush1.bf16.msra.mxu0 %v2356_v9  ;;  %1162 = vmatpush1.bf16.msra.mxu1 %v2357_v11  ;;  %v2796_v9 = vpack.c.bf16 %v309_v0, %v308_v63  ;;  %v2798_v11 = vpack.c.bf16 %v551_v6, %v550_v4  ;;  %v294_v0 = vld [vmem:[%s2433_s21 + $0x72] sm:$0xff] }
  0x8d   : > { %1777 = vmatprep.subr.bf16.mxu0 %v2387_v1  ;;  %2203 = vmatprep.mubr.msk.bf16.mxu0 %vm388_vm0, %v2684_v13  ;;  %v637_v35 = vpop.permute.xlu0 %636  ;;  %v574_v6 = vld [vmem:[%s2433_s21 + $0x114] sm:$0xff] }
  0x8e   : > { %1163 = vmatprep.subr.bf16.mxu1 %v2387_v1  ;;  %v696_v39 = vsel %vm388_vm0, %v2714_v30, %v637_v35  ;;  %v619_v45 = vpop.permute.xlu1 %618  ;;  %v2836_v35 = vpack.c.bf16 %v311_v26, %v310_v24  ;;  %v557_v24 = vld [vmem:[%s2433_s21 + $0x8c] sm:$0xff] }
  0x8f   : > { %986 = vmatmul.mubr.bf16.gmra.mxu1 %v692_v19  ;;  %v660_v49 = vsel %vm388_vm0, %v2736_v40, %v619_v45  ;;  %v2369_v19 = vld [vmem:[%s3362_s1] sm:$0xff]   ;;  %v2373_v45 = vld [vmem:[%s3362_s1 + $0x50] sm:$0xff]  }
  0x90   : > { %1778 = vmatpush1.bf16.msra.mxu0 %v2358_v20  ;;  %1164 = vmatpush1.bf16.msra.mxu1 %v2359_v22  ;;  %v2816_v22 = vpack.c.bf16 %v291_v14, %v290_v12 }
  0x91   : > { %2213 = vmatprep.mubr.msk.bf16.mxu1 %vm388_vm0, %v2706_v25  ;;  %1779 = vmatprep.subr.bf16.mxu0 %v2387_v1  ;;  %v639_v55 = vpop.permute.xlu0 %638 }
  0x92   : > { %1165 = vmatprep.subr.bf16.mxu1 %v2387_v1  ;;  %v700_v60 = vsel %vm388_vm0, %v2756_v50, %v639_v55  ;;  %v621_v3 = vpop.permute.xlu1 %620  ;;  %v554_v55 = vld [vmem:[%s2433_s21 + $0x74] sm:$0xff] }
  0x93   : > { %914 = vmatmul.mubr.bf16.gmra.mxu0 %v656_v29  ;;  %v664_v8 = vsel %vm388_vm0, %v2776_v61, %v621_v3  ;;  %v552_v29 = vld [vmem:[%s2433_s21 + $0x64] sm:$0xff]  ;;  %v2878_v63 = vpack.c.bf16 %v555_v56, %v554_v55  ;;  %v299_v56 = vld [vmem:[%s2433_s21 + $0x9a] sm:$0xff] }
  0x94   : > { %1780 = vmatpush1.bf16.msra.mxu0 %v2360_v31  ;;  %2204 = vmatprep.mubr.msk.bf16.mxu0 %vm388_vm0, %v2719_v32  ;;  %v553_v31 = vld [vmem:[%s2433_s21 + $0x6c] sm:$0xff] }
  0x95   : > { %1166 = vmatpush1.bf16.msra.mxu1 %v2361_v36  ;;  %1781 = vmatprep.subr.bf16.mxu0 %v2387_v1  ;;  %v641_v16 = vpop.permute.xlu0 %640  ;;  %v2838_v36 = vpack.c.bf16 %v553_v31, %v552_v29  ;;  %v2376_v3 = vld [vmem:[%s3362_s1 + $0x108] sm:$0xff]  }
  0x96   : > { %1167 = vmatprep.subr.bf16.mxu1 %v2387_v1  ;;  %v704_v20 = vsel %vm388_vm0, %v2796_v9, %v641_v16  ;;  %v623_v28 = vpop.permute.xlu1 %622  ;;  %v314_v16 = vld [vmem:[%s2433_s21 + $0x112] sm:$0xff]  ;;  %v296_v29 = vld [vmem:[%s2433_s21 + $0x82] sm:$0xff] }
  0x97   : > { %994 = vmatmul.mubr.bf16.gmra.mxu1 %v696_v39  ;;  %v668_v34 = vsel %vm388_vm0, %v2816_v22, %v623_v28  ;;  %v2372_v39 = vld [vmem:[%s3362_s1 + $0x118] sm:$0xff]  }
  0x98   : > { %1782 = vmatpush1.bf16.msra.mxu0 %v2362_v41  ;;  %2214 = vmatprep.mubr.msk.bf16.mxu1 %vm388_vm0, %v2741_v42 }
  0x99   : > { %1168 = vmatpush1.bf16.msra.mxu1 %v2363_v46  ;;  %1783 = vmatprep.subr.bf16.mxu0 %v2387_v1  ;;  %v643_v41 = vpop.permute.xlu0 %642 }
  0x9a   : > { %1169 = vmatprep.subr.bf16.mxu1 %v2387_v1  ;;  %v708_v46 = vsel %vm388_vm0, %v2836_v35, %v643_v41  ;;  %v485_v41 = vld [vmem:[%s2433_s21 + $0x122] sm:$0xff] }
  0x9b   : > { %922 = vmatmul.mubr.bf16.gmra.mxu0 %v660_v49  ;;  %v312_v49 = vld [vmem:[%s2433_s21 + $0x102] sm:$0xff] }
  0x9c   : > { %2205 = vmatprep.mubr.msk.bf16.mxu0 %vm388_vm0, %v2758_v51  ;;  %1784 = vmatpush1.bf16.msra.mxu0 %v2364_v54  ;;  %v625_v54 = vpop.permute.xlu1 %624 }
  0x9d   : > { %1170 = vmatpush1.bf16.msra.mxu1 %v2365_v58  ;;  %1785 = vmatprep.subr.bf16.mxu0 %v2387_v1  ;;  %v672_v58 = vsel %vm388_vm0, %v2856_v47, %v625_v54  ;;  %v645_v4 = vpop.permute.xlu0 %644  ;;  %v298_v54 = vld [vmem:[%s2433_s21 + $0x92] sm:$0xff] }
  0x9e   : > { %1171 = vmatprep.subr.bf16.mxu1 %v2387_v1 }
  0x9f   : > { %1002 = vmatmul.mubr.bf16.gmra.mxu1 %v700_v60  ;;  %v2876_v60 = vpack.c.bf16 %v313_v52, %v312_v49  ;;  %v487_v52 = vpack.c.bf16 %v486_v44, %v485_v41  ;;  %v176_v44 = vld [vmem:[%s2433_s21 + $0x20] sm:$0xff] }
  0xa0   : > { %2215 = vmatprep.mubr.msk.bf16.mxu1 %vm388_vm0, %v2778_v62  ;;  %1786 = vmatpush1.bf16.msra.mxu0 %v2366_v2  ;;  %v295_v2 = vld [vmem:[%s2433_s21 + $0x7a] sm:$0xff]  ;;  %v627_v18 = vpop.permute.xlu1 %626 }
  0xa1   : > { %1172 = vmatpush1.bf16.msra.mxu1 %v2367_v7  ;;  %1787 = vmatprep.subr.bf16.mxu0 %v2387_v1  ;;  %v575_v7 = vld [vmem:[%s2433_s21 + $0x11c] sm:$0xff]  ;;  %v712_v12 = vsel %vm388_vm0, %v2876_v60, %v645_v4  ;;  %v2896_v14 = vpack.c.bf16 %v295_v2, %v294_v0  ;;  %v647_v31 = vpop.permute.xlu0 %646  ;;  %v2945_v2 = vpack.c.bf16 %v299_v56, %v298_v54 }
  0xa2   : > { %1173 = vmatprep.subr.bf16.mxu1 %v2387_v1 }
  0xa3   : > { %930 = vmatmul.mubr.bf16.gmra.mxu0 %v664_v8  ;;  %v2377_v8 = vld [vmem:[%s3362_s1 + $0x40] sm:$0xff]   ;;  %v676_v26 = vsel %vm388_vm0, %v2896_v14, %v627_v18 }
  0xa4   : > { %2206 = vmatprep.mubr.msk.bf16.mxu0 %vm388_vm0, %v2798_v11  ;;  %1788 = vmatpush1.bf16.msra.mxu0 %v2368_v15  ;;  %v2898_v15 = vpack.c.bf16 %v575_v7, %v574_v6  ;;  %v629_v43 = vpop.permute.xlu1 %628  ;;  %v173_v7 = vld [vmem:[%s2433_s21 + $0x8] sm:$0xff] }
  0xa5   : > { %1174 = vmatpush1.bf16.msra.mxu1 %v2369_v19  ;;  %1789 = vmatprep.subr.bf16.mxu0 %v2387_v1  ;;  %v315_v19 = vld [vmem:[%s2433_s21 + $0x11a] sm:$0xff]  ;;  %v649_v55 = vpop.permute.xlu0 %648 }
  0xa6   : > { %1183 = vmatprep.subr.bf16.mxu1 %v2387_v1  ;;  %v720_v0 = vsel %vm388_vm0, %v487_v52, %v649_v55 }
  0xa7   : > { %1010 = vmatmul.mubr.bf16.gmra.mxu1 %v704_v20  ;;  %v556_v20 = vld [vmem:[%s2433_s21 + $0x84] sm:$0xff] }
  0xa8   : > { %2216 = vmatprep.mubr.msk.bf16.mxu1 %vm388_vm0, %v2818_v23  ;;  %1790 = vmatpush1.bf16.msra.mxu0 %v2370_v27  ;;  %v2912_v27 = vpack.c.bf16 %v315_v19, %v314_v16  ;;  %v2914_v28 = vpack.c.bf16 %v557_v24, %v556_v20  ;;  %v631_v6 = vpop.permute.xlu1 %630  ;;  %v174_v24 = vld [vmem:[%s2433_s21 + $0x10] sm:$0xff] }
  0xa9   : > { %1184 = vmatpush2.bf16.msra.mxu1 %v2371_v33  ;;  %1799 = vmatprep.subr.bf16.mxu0 %v2387_v1  ;;  %v297_v33 = vld [vmem:[%s2433_s21 + $0x8a] sm:$0xff]  ;;  %v684_v16 = vsel %vm388_vm0, %v2945_v2, %v631_v6  ;;  %v353_v19 = vpop.permute.xlu0 %352 }
  0xaa   : > { %1185 = vmatprep.subr.bf16.mxu1 %v2387_v1  ;;  %v716_v37 = vsel %vm388_vm0, %v2912_v27, %v647_v31  ;;  %v2924_v38 = vpack.c.bf16 %v297_v33, %v296_v29  ;;  %v175_v29 = vld [vmem:[%s2433_s21 + $0x18] sm:$0xff] }
  0xab   : > { %938 = vmatmul.mubr.bf16.gmra.mxu0 %v668_v34  ;;  %v577_v34 = vld [vmem:[%s2433_s21 + $0x12c] sm:$0xff]  ;;  %v1446_v31 = vld [vmem:[%s2433_s21 + $0x36] sm:$0xff]  ;;  %v1447_v33 = vld [vmem:[%s2433_s21 + $0x3e] sm:$0xff] }
  0xac   : > { %2207 = vmatprep.mubr.msk.bf16.mxu0 %vm388_vm0, %v2838_v36  ;;  %1800 = vmatpush2.bf16.msra.mxu0 %v2372_v39  ;;  %v680_v49 = vsel %vm388_vm0, %v2924_v38, %v629_v43 }
  0xad   : > { %1186 = vmatpush2.bf16.msra.mxu1 %v2373_v45  ;;  %1801 = vmatprep.subr.bf16.mxu0 %v2387_v1  ;;  %v558_v45 = vld [vmem:[%s2433_s21 + $0x94] sm:$0xff]  ;;  %v355_v41 = vpop.permute.xlu0 %354 }
  0xae   : > { %1187 = vmatprep.subr.bf16.mxu1 %v2387_v1 }
  0xaf   : > { %1018 = vmatmul.mubr.bf16.gmra.mxu1 %v708_v46  ;;  %v559_v46 = vld [vmem:[%s2433_s21 + $0x9c] sm:$0xff] }
  0xb0   : > { %2217 = vmatprep.mubr.msk.bf16.mxu1 %vm388_vm0, %v2858_v48  ;;  %1802 = vmatpush2.bf16.msra.mxu0 %v2374_v53  ;;  %v2936_v53 = vpack.c.bf16 %v559_v46, %v558_v45  ;;  %v177_v46 = vld [vmem:[%s2433_s21 + $0x28] sm:$0xff] }
  0xb1   : > { %1188 = vmatpush2.bf16.msra.mxu1 %v2375_v57  ;;  %1803 = vmatprep.subr.bf16.mxu0 %v2387_v1  ;;  %v280_v57 = vld [vmem:[%s2433_s21 + $0x2] sm:$0xff]  ;;  %v210_v52 = vpack.c.bf16 %v177_v46, %v176_v44  ;;  %v357_v55 = vpop.permute.xlu0 %356 }
  0xb2   : > { %1189 = vmatprep.subr.bf16.mxu1 %v2387_v1  ;;  %v184_v44 = vld [vmem:[%s2433_s21 + $0x60] sm:$0xff]  ;;  %v185_v46 = vld [vmem:[%s2433_s21 + $0x68] sm:$0xff] }
  0xb3   : > { %946 = vmatmul.mubr.bf16.gmra.mxu0 %v672_v58  ;;  %v281_v58 = vld [vmem:[%s2433_s21 + $0xa] sm:$0xff]  ;;  %v399_v56 = vsel %vm388_vm0, %v210_v52, %v357_v55 }
  0xb4   : > { %2208 = vmatprep.mubr.msk.bf16.mxu0 %vm388_vm0, %v2878_v63  ;;  %1804 = vmatpush2.bf16.msra.mxu0 %v2376_v3  ;;  %v172_v3 = vld [vmem:[%s2433_s21] sm:$0xff]  ;;  %v316_v4 = vpack.c.bf16 %v281_v58, %v280_v57  ;;  %v178_v57 = vld [vmem:[%s2433_s21 + $0x30] sm:$0xff] }
  0xb5   : > { %1190 = vmatpush2.bf16.msra.mxu1 %v2377_v8  ;;  %1805 = vmatprep.subr.bf16.mxu0 %v2387_v1  ;;  %v576_v1 = vld [vmem:[%s2433_s21 + $0x124] sm:$0xff]  ;;  %v186_v55 = vld [vmem:[%s2433_s21 + $0x70] sm:$0xff] }
  0xb6   : > { %v2926_v39 = vpack.c.bf16 %v577_v34, %v576_v1  ;;  %v1444_v8 = vld [vmem:[%s2433_s21 + $0x26] sm:$0xff]  ;;  %v209_v34 = vpack.c.bf16 %v175_v29, %v174_v24  ;;  %v182_v29 = vld [vmem:[%s2433_s21 + $0x50] sm:$0xff] }
  0xb7   : > { %1026 = vmatmul.mubr.bf16.gmra.mxu1 %v712_v12  ;;  %v1445_v12 = vld [vmem:[%s2433_s21 + $0x2e] sm:$0xff] }
  0xb8   : > { %2218 = vmatprep.mubr.msk.bf16.mxu1 %vm388_vm0, %v2898_v15  ;;  %1806 = vmatpush2.bf16.msra.mxu0 %v2378_v17  ;;  %v208_v17 = vpack.c.bf16 %v173_v7, %v172_v3  ;;  %v1480_v18 = vpack.c.bf16 %v1445_v12, %v1444_v8  ;;  %v395_v43 = vsel %vm388_vm0, %v209_v34, %v355_v41  ;;  %v1450_v3 = vld [vmem:[%s2433_s21 + $0x56] sm:$0xff]  ;;  %v359_v7 = vpop.permute.xlu0 %358  ;;  %v180_v12 = vld [vmem:[%s2433_s21 + $0x40] sm:$0xff] }
  0xba   : > { %v391_v20 = vsel %vm388_vm0, %v208_v17, %v353_v19  ;;  %v181_v17 = vld [vmem:[%s2433_s21 + $0x48] sm:$0xff] }
  0xbb   : > { %954 = vmatmul.mubr.bf16.gmra.mxu0 %v676_v26  ;;  %v1517_v26 = vpop.permute.xlu1 %1516  ;;  %v212_v19 = vpack.c.bf16 %v181_v17, %v180_v12 }
  0xbc   : > { %2209 = vmatprep.mubr.msk.bf16.mxu0 %vm388_vm0, %v2914_v28  ;;  %v1554_v1 = vsel %vm388_vm0, %v2684_v13, %v1517_v26  ;;  %v1449_v13 = vld [vmem:[%s2433_s21 + $0x4e] sm:$0xff]  ;;  %v361_v24 = vpop.permute.xlu0 %360 }
  0xbd   : > { %v407_v26 = vsel %vm388_vm0, %v212_v19, %v361_v24 }
  0xbf   : > { %1034 = vmatmul.mubr.bf16.gmra.mxu1 %v716_v37  ;;  %v1481_v37 = vpack.c.bf16 %v1447_v33, %v1446_v31  ;;  %v1519_v45 = vpop.permute.xlu1 %1518  ;;  %v183_v33 = vld [vmem:[%s2433_s21 + $0x58] sm:$0xff] }
  0xc0   : > { %2219 = vmatprep.mubr.msk.bf16.mxu1 %vm388_vm0, %v2926_v39  ;;  %v213_v34 = vpack.c.bf16 %v183_v33, %v182_v29  ;;  %v363_v41 = vpop.permute.xlu0 %362 }
  0xc3   : > { %962 = vmatmul.mubr.bf16.gmra.mxu0 %v680_v49  ;;  %v1448_v49 = vld [vmem:[%s2433_s21 + $0x46] sm:$0xff]  ;;  %v1521_v58 = vpop.permute.xlu1 %1520 }
  0xc4   : > { %2210 = vmatprep.mubr.msk.bf16.mxu0 %vm388_vm0, %v2936_v53  ;;  %v1482_v54 = vpack.c.bf16 %v1449_v13, %v1448_v49  ;;  %v1456_v49 = vld [vmem:[%s2433_s21 + $0x86] sm:$0xff]  ;;  %v214_v13 = vpack.c.bf16 %v185_v46, %v184_v44  ;;  %v365_v52 = vpop.permute.xlu0 %364 }
  0xc5   : > { %v193_v44 = vld [vmem:[%s2433_s21 + $0xa8] sm:$0xff] }
  0xc7   : > { %1042 = vmatmul.mubr.bf16.gmra.mxu1 %v720_v0  ;;  %v179_v0 = vld [vmem:[%s2433_s21 + $0x38] sm:$0xff] }
  0xc8   : > { %2232 = vmatprep.mubr.msk.bf16.mxu1 %vm388_vm0, %v316_v4  ;;  %v211_v4 = vpack.c.bf16 %v179_v0, %v178_v57  ;;  %v187_v57 = vld [vmem:[%s2433_s21 + $0x78] sm:$0xff] }
  0xc9   : > { %v215_v0 = vpack.c.bf16 %v187_v57, %v186_v55  ;;  %v1466_v55 = vld [vmem:[%s2433_s21 + $0xd6] sm:$0xff] }
  0xca   : > { %v403_v8 = vsel %vm388_vm0, %v211_v4, %v359_v7  ;;  %v188_v4 = vld [vmem:[%s2433_s21 + $0x80] sm:$0xff]  ;;  %v189_v7 = vld [vmem:[%s2433_s21 + $0x88] sm:$0xff] }
  0xcb   : > { %970 = vmatmul.mubr.bf16.gmra.mxu0 %v684_v16  ;;  %v1523_v16 = vpop.permute.xlu1 %1522  ;;  %v216_v12 = vpack.c.bf16 %v189_v7, %v188_v4 }
  0xcc   : > { %2286 = vmatprep.mubr.msk.bf16.mxu0 %vm388_vm0, %v1480_v18  ;;  %v1452_v18 = vld [vmem:[%s2433_s21 + $0x66] sm:$0xff] }
  0xcf   : > { %1192 = vmatmul.mubr.bf16.vlgmr.msra.gmra.mxu1 %v391_v20  ;;  %v1525_v31 = vpop.permute.xlu1 %1524 }
  0xd0   : > { %2233 = vmatprep.mubr.msk.bf16.mxu1 %vm388_vm0, %v2670_v5  ;;  %v1558_v5 = vsel %vm388_vm0, %v2719_v32, %v1519_v45  ;;  %v1451_v32 = vld [vmem:[%s2433_s21 + $0x5e] sm:$0xff] }
  0xd1   : > { %v1483_v6 = vpack.c.bf16 %v1451_v32, %v1450_v3  ;;  %v367_v32 = vpop.permute.xlu0 %366 }
  0xd3   : > { %1808 = vmatmul.mubr.bf16.vlgmr.msra.gmra.mxu0 %v1554_v1  ;;  %v1454_v1 = vld [vmem:[%s2433_s21 + $0x76] sm:$0xff]  ;;  %v1527_v45 = vpop.permute.xlu1 %1526 }
  0xd4   : > { %2287 = vmatprep.mubr.msk.bf16.mxu0 %vm388_vm0, %v1481_v37 }
  0xd5   : > { %v369_v17 = vpop.permute.xlu0 %368 }
  0xd7   : > { %1200 = vmatmul.mubr.bf16.gmra.mxu1 %v395_v43  ;;  %v411_v43 = vsel %vm388_vm0, %v213_v34, %v363_v41  ;;  %v192_v41 = vld [vmem:[%s2433_s21 + $0xa0] sm:$0xff] }
  0xd8   : > { %2234 = vmatprep.mubr.msk.bf16.mxu1 %vm388_vm0, %v2697_v21  ;;  %v1562_v21 = vsel %vm388_vm0, %v2758_v51, %v1521_v58  ;;  %v1453_v51 = vld [vmem:[%s2433_s21 + $0x6e] sm:$0xff]  ;;  %v1458_v58 = vld [vmem:[%s2433_s21 + $0x96] sm:$0xff] }
  0xd9   : > { %v1484_v20 = vpack.c.bf16 %v1453_v51, %v1452_v18  ;;  %v1352_v18 = vld [vmem:[%s2433_s21 + $0xa4] sm:$0xff]  ;;  %v1353_v51 = vld [vmem:[%s2433_s21 + $0xac] sm:$0xff] }
  0xda   : > { %v1380_v19 = vpack.c.bf16 %v1353_v51, %v1352_v18 }
  0xdb   : > { %1816 = vmatmul.mubr.bf16.gmra.mxu0 %v1558_v5 }
  0xdc   : > { %2288 = vmatprep.mubr.msk.bf16.mxu0 %vm388_vm0, %v1482_v54  ;;  %v415_v54 = vsel %vm388_vm0, %v214_v13, %v365_v52 }
  0xdf   : > { %1208 = vmatmul.mubr.bf16.gmra.mxu1 %v399_v56  ;;  %v1529_v56 = vpop.permute.xlu1 %1528 }
  0xe0   : > { %2235 = vmatprep.mubr.msk.bf16.mxu1 %vm388_vm0, %v2736_v40  ;;  %v1566_v40 = vsel %vm388_vm0, %v2798_v11, %v1523_v16  ;;  %v1455_v11 = vld [vmem:[%s2433_s21 + $0x7e] sm:$0xff] }
  0xe1   : > { %v1485_v37 = vpack.c.bf16 %v1455_v11, %v1454_v1  ;;  %v371_v1 = vpop.permute.xlu0 %370  ;;  %v1354_v11 = vld [vmem:[%s2433_s21 + $0xb4] sm:$0xff] }
  0xe3   : > { %1824 = vmatmul.mubr.bf16.gmra.mxu0 %v1562_v21  ;;  %v419_v21 = vsel %vm388_vm0, %v215_v0, %v367_v32  ;;  %v196_v0 = vld [vmem:[%s2433_s21 + $0xc0] sm:$0xff]  ;;  %v197_v32 = vld [vmem:[%s2433_s21 + $0xc8] sm:$0xff] }
  0xe4   : > { %2289 = vmatprep.mubr.msk.bf16.mxu0 %vm388_vm0, %v1483_v6  ;;  %v1531_v6 = vpop.permute.xlu1 %1530  ;;  %v220_v4 = vpack.c.bf16 %v197_v32, %v196_v0 }
  0xe7   : > { %1216 = vmatmul.mubr.bf16.gmra.mxu1 %v403_v8  ;;  %v1460_v8 = vld [vmem:[%s2433_s21 + $0xa6] sm:$0xff] }
  0xe8   : > { %2236 = vmatprep.mubr.msk.bf16.mxu1 %vm388_vm0, %v2776_v61  ;;  %v1570_v61 = vsel %vm388_vm0, %v2838_v36, %v1525_v31  ;;  %v1457_v36 = vld [vmem:[%s2433_s21 + $0x8e] sm:$0xff]  ;;  %v1533_v24 = vpop.permute.xlu1 %1532 }
  0xe9   : > { %v1486_v5 = vpack.c.bf16 %v1457_v36, %v1456_v49  ;;  %v1586_v29 = vsel %vm388_vm0, %v1380_v19, %v1533_v24  ;;  %v218_v49 = vpack.c.bf16 %v193_v44, %v192_v41  ;;  %v200_v19 = vld [vmem:[%s2433_s21 + $0xe0] sm:$0xff]  ;;  %v201_v24 = vld [vmem:[%s2433_s21 + $0xe8] sm:$0xff] }
  0xea   : > { %v204_v44 = vld [vmem:[%s2433_s21 + $0x100] sm:$0xff] }
  0xeb   : > { %1832 = vmatmul.mubr.bf16.gmra.mxu0 %v1566_v40  ;;  %v423_v40 = vsel %vm388_vm0, %v216_v12, %v369_v17  ;;  %v199_v12 = vld [vmem:[%s2433_s21 + $0xd8] sm:$0xff] }
  0xec   : > { %2290 = vmatprep.mubr.msk.bf16.mxu0 %vm388_vm0, %v1484_v20  ;;  %v190_v20 = vld [vmem:[%s2433_s21 + $0x90] sm:$0xff] }
  0xef   : > { %1224 = vmatmul.mubr.bf16.gmra.mxu1 %v407_v26  ;;  %v1462_v26 = vld [vmem:[%s2433_s21 + $0xb6] sm:$0xff] }
  0xf0   : > { %2237 = vmatprep.mubr.msk.bf16.mxu1 %vm388_vm0, %v2816_v22  ;;  %v1574_v22 = vsel %vm388_vm0, %v2878_v63, %v1527_v45  ;;  %v1459_v63 = vld [vmem:[%s2433_s21 + $0x9e] sm:$0xff]  ;;  %v1464_v45 = vld [vmem:[%s2433_s21 + $0xc6] sm:$0xff] }
  0xf1   : > { %v1487_v3 = vpack.c.bf16 %v1459_v63, %v1458_v58 }
  0xf3   : > { %1840 = vmatmul.mubr.bf16.gmra.mxu0 %v1570_v61  ;;  %v1355_v61 = vld [vmem:[%s2433_s21 + $0xbc] sm:$0xff] }
  0xf4   : > { %2291 = vmatprep.mubr.msk.bf16.mxu0 %vm388_vm0, %v1485_v37  ;;  %v1381_v37 = vpack.c.bf16 %v1355_v61, %v1354_v11  ;;  %v203_v11 = vld [vmem:[%s2433_s21 + $0xf8] sm:$0xff] }
  0xf5   : > { %v1474_v61 = vld [vmem:[%s2433_s21 + $0x116] sm:$0xff] }
  0xf7   : > { %1232 = vmatmul.mubr.bf16.gmra.mxu1 %v411_v43  ;;  %v1535_v43 = vpop.permute.xlu1 %1534 }
  0xf8   : > { %2238 = vmatprep.mubr.msk.bf16.mxu1 %vm388_vm0, %v2856_v47  ;;  %v1578_v47 = vsel %vm388_vm0, %v2914_v28, %v1529_v56  ;;  %v1461_v28 = vld [vmem:[%s2433_s21 + $0xae] sm:$0xff]  ;;  %v1590_v46 = vsel %vm388_vm0, %v1381_v37, %v1535_v43  ;;  %v1467_v56 = vld [vmem:[%s2433_s21 + $0xde] sm:$0xff] }
  0xf9   : > { %v1488_v16 = vpack.c.bf16 %v1461_v28, %v1460_v8  ;;  %v1491_v58 = vpack.c.bf16 %v1467_v56, %v1466_v55  ;;  %v198_v28 = vld [vmem:[%s2433_s21 + $0xd0] sm:$0xff] }
  0xfa   : > { %v221_v17 = vpack.c.bf16 %v199_v12, %v198_v28 }
  0xfb   : > { %1848 = vmatmul.mubr.bf16.gmra.mxu0 %v1574_v22  ;;  %v373_v22 = vpop.permute.xlu0 %372  ;;  %v1537_v52 = vpop.permute.xlu1 %1536 }
  0xfc   : > { %2292 = vmatprep.mubr.msk.bf16.mxu0 %vm388_vm0, %v1486_v5  ;;  %v431_v13 = vsel %vm388_vm0, %v218_v49, %v373_v22  ;;  %v194_v5 = vld [vmem:[%s2433_s21 + $0xb0] sm:$0xff] }
  0xfd   : > { %v1477_v49 = vld [vmem:[%s2433_s21 + $0x12e] sm:$0xff] }
  0xff   : > { %1240 = vmatmul.mubr.bf16.gmra.mxu1 %v415_v54  ;;  %v195_v54 = vld [vmem:[%s2433_s21 + $0xb8] sm:$0xff]  ;;  %v375_v63 = vpop.permute.xlu0 %374 }
 0x100   : > { %2239 = vmatprep.mubr.msk.bf16.mxu1 %vm388_vm0, %v2896_v14  ;;  %v1582_v14 = vsel %vm388_vm0, %v2936_v53, %v1531_v6  ;;  %v191_v53 = vld [vmem:[%s2433_s21 + $0x98] sm:$0xff]  ;;  %v219_v57 = vpack.c.bf16 %v195_v54, %v194_v5 }
 0x101   : > { %v217_v31 = vpack.c.bf16 %v191_v53, %v190_v20  ;;  %v1472_v53 = vld [vmem:[%s2433_s21 + $0x106] sm:$0xff] }
 0x103   : > { %1856 = vmatmul.mubr.bf16.gmra.mxu0 %v1578_v47  ;;  %v427_v34 = vsel %vm388_vm0, %v217_v31, %v371_v1  ;;  %v435_v47 = vsel %vm388_vm0, %v219_v57, %v375_v63  ;;  %v377_v7 = vpop.permute.xlu0 %376  ;;  %v207_v57 = vld [vmem:[%s2433_s21 + $0x118] sm:$0xff] }
 0x104   : > { %2293 = vmatprep.mubr.msk.bf16.mxu0 %vm388_vm0, %v1487_v3  ;;  %v1539_v3 = vpop.permute.xlu1 %1538  ;;  %v439_v8 = vsel %vm388_vm0, %v220_v4, %v377_v7  ;;  %v1479_v63 = vld [vmem:[%s2433_s21 + $0x13e] sm:$0xff] }
 0x105   : > { %v1371_v7 = vld [vmem:[%s2433_s21 + $0x13c] sm:$0xff] }
 0x107   : > { %1248 = vmatmul.mubr.bf16.gmra.mxu1 %v419_v21  ;;  %v1468_v21 = vld [vmem:[%s2433_s21 + $0xe6] sm:$0xff]  ;;  %v379_v51 = vpop.permute.xlu0 %378 }
 0x108   : > { %2240 = vmatprep.mubr.msk.bf16.mxu1 %vm388_vm0, %v2924_v38  ;;  %v1463_v38 = vld [vmem:[%s2433_s21 + $0xbe] sm:$0xff] }
 0x109   : > { %v1489_v33 = vpack.c.bf16 %v1463_v38, %v1462_v26  ;;  %v222_v26 = vpack.c.bf16 %v201_v24, %v200_v19 }
 0x10b   : > { %1864 = vmatmul.mubr.bf16.gmra.mxu0 %v1582_v14  ;;  %v1541_v14 = vpop.permute.xlu1 %1540 }
 0x10c   : > { %2294 = vmatprep.mubr.msk.bf16.mxu0 %vm388_vm0, %v1488_v16  ;;  %v1470_v16 = vld [vmem:[%s2433_s21 + $0xf6] sm:$0xff] }
 0x10f   : > { %1256 = vmatmul.mubr.bf16.gmra.mxu1 %v423_v40  ;;  %v443_v40 = vsel %vm388_vm0, %v221_v17, %v379_v51  ;;  %v1543_v20 = vpop.permute.xlu1 %1542 }
 0x110   : > { %2241 = vmatprep.mubr.msk.bf16.mxu1 %vm388_vm0, %v2945_v2  ;;  %v1465_v2 = vld [vmem:[%s2433_s21 + $0xce] sm:$0xff] }
 0x111   : > { %v1490_v36 = vpack.c.bf16 %v1465_v2, %v1464_v45  ;;  %v205_v2 = vld [vmem:[%s2433_s21 + $0x108] sm:$0xff] }
 0x113   : > { %1872 = vmatmul.mubr.bf16.gmra.mxu0 %v1586_v29  ;;  %v381_v29 = vpop.permute.xlu0 %380  ;;  %v1545_v1 = vpop.permute.xlu1 %1544 }
 0x114   : > { %2295 = vmatprep.mubr.msk.bf16.mxu0 %vm388_vm0, %v1489_v33  ;;  %v447_v31 = vsel %vm388_vm0, %v222_v26, %v381_v29  ;;  %v202_v33 = vld [vmem:[%s2433_s21 + $0xf0] sm:$0xff] }
 0x117   : > { %1264 = vmatmul.mubr.bf16.gmra.mxu1 %v427_v34  ;;  %v223_v34 = vpack.c.bf16 %v203_v11, %v202_v33  ;;  %v383_v41 = vpop.permute.xlu0 %382  ;;  %v1547_v45 = vpop.permute.xlu1 %1546 }
 0x118   : > { %2242 = vmatprep.mubr.msk.bf16.mxu1 %vm388_vm0, %v2659_v59  ;;  %v1594_v59 = vsel %vm388_vm0, %v2706_v25, %v1537_v52  ;;  %v1469_v25 = vld [vmem:[%s2433_s21 + $0xee] sm:$0xff] }
 0x119   : > { %v1492_v6 = vpack.c.bf16 %v1469_v25, %v1468_v21  ;;  %v451_v43 = vsel %vm388_vm0, %v223_v34, %v383_v41 }
 0x11b   : > { %1880 = vmatmul.mubr.bf16.gmra.mxu0 %v1590_v46  ;;  %v1476_v46 = vld [vmem:[%s2433_s21 + $0x126] sm:$0xff]  ;;  %v385_v5 = vpop.permute.xlu0 %384  ;;  %v1549_v56 = vpop.permute.xlu1 %1548 }
 0x11c   : > { %2296 = vmatprep.mubr.msk.bf16.mxu0 %vm388_vm0, %v1490_v36  ;;  %v1496_v22 = vpack.c.bf16 %v1477_v49, %v1476_v46 }
 0x11f   : > { %1272 = vmatmul.mubr.bf16.gmra.mxu1 %v431_v13  ;;  %v387_v32 = vpop.permute.xlu0 %386  ;;  %v1551_v12 = vpop.permute.xlu1 %1550 }
 0x120   : > { %2243 = vmatprep.mubr.msk.bf16.mxu1 %vm388_vm0, %v2678_v10  ;;  %v1598_v10 = vsel %vm388_vm0, %v2741_v42, %v1539_v3  ;;  %v1471_v42 = vld [vmem:[%s2433_s21 + $0xfe] sm:$0xff]  ;;  %v1618_v3 = vsel %vm388_vm0, %v2926_v39, %v1549_v56 }
 0x121   : > { %v1493_v18 = vpack.c.bf16 %v1471_v42, %v1470_v16 }
 0x123   : > { %1888 = vmatmul.mubr.bf16.gmra.mxu0 %v1594_v59 }
 0x124   : > { %2297 = vmatprep.mubr.msk.bf16.mxu0 %vm388_vm0, %v1491_v58  ;;  %v1478_v58 = vld [vmem:[%s2433_s21 + $0x136] sm:$0xff] }
 0x125   : > { %v1497_v25 = vpack.c.bf16 %v1479_v63, %v1478_v58 }
 0x127   : > { %1280 = vmatmul.mubr.bf16.gmra.mxu1 %v435_v47 }
 0x128   : > { %2244 = vmatprep.mubr.msk.bf16.mxu1 %vm388_vm0, %v2714_v30  ;;  %v1602_v30 = vsel %vm388_vm0, %v2778_v62, %v1541_v14  ;;  %v1473_v62 = vld [vmem:[%s2433_s21 + $0x10e] sm:$0xff] }
 0x129   : > { %v1494_v38 = vpack.c.bf16 %v1473_v62, %v1472_v53 }
 0x12b   : > { %1896 = vmatmul.mubr.bf16.gmra.mxu0 %v1598_v10 }
 0x12c   : > { %2298 = vmatprep.mubr.msk.bf16.mxu0 %vm388_vm0, %v1492_v6  ;;  %v1370_v6 = vld [vmem:[%s2433_s21 + $0x134] sm:$0xff] }
 0x12d   : > { %v1389_v39 = vpack.c.bf16 %v1371_v7, %v1370_v6 }
 0x12f   : > { %1288 = vmatmul.mubr.bf16.gmra.mxu1 %v439_v8  ;;  %v1622_v17 = vsel %vm388_vm0, %v1389_v39, %v1551_v12 }
 0x130   : > { %2245 = vmatprep.mubr.msk.bf16.mxu1 %vm388_vm0, %v2756_v50  ;;  %v1606_v50 = vsel %vm388_vm0, %v2818_v23, %v1543_v20  ;;  %v1475_v23 = vld [vmem:[%s2433_s21 + $0x11e] sm:$0xff] }
 0x131   : > { %v1495_v37 = vpack.c.bf16 %v1475_v23, %v1474_v61 }
 0x133   : > { %1904 = vmatmul.mubr.bf16.gmra.mxu0 %v1602_v30 }
 0x134   : > { %2299 = vmatprep.mubr.msk.bf16.mxu0 %vm388_vm0, %v1493_v18 }
 0x137   : > { %1296 = vmatmul.mubr.bf16.gmra.mxu1 %v443_v40 }
 0x138   : > { %2246 = vmatprep.mubr.msk.bf16.mxu1 %vm388_vm0, %v2796_v9  ;;  %v1610_v9 = vsel %vm388_vm0, %v2858_v48, %v1545_v1  ;;  %v224_v48 = vpack.c.bf16 %v205_v2, %v204_v44 }
 0x13a   : > { %v455_v55 = vsel %vm388_vm0, %v224_v48, %v385_v5 }
 0x13b   : > { %1912 = vmatmul.mubr.bf16.gmra.mxu0 %v1606_v50 }
 0x13c   : > { %2300 = vmatprep.mubr.msk.bf16.mxu0 %vm388_vm0, %v1494_v38 }
 0x13f   : > { %1304 = vmatmul.mubr.bf16.gmra.mxu1 %v447_v31 }
 0x140   : > { %2247 = vmatprep.mubr.msk.bf16.mxu1 %vm388_vm0, %v2836_v35  ;;  %v1614_v35 = vsel %vm388_vm0, %v2898_v15, %v1547_v45  ;;  %v206_v15 = vld [vmem:[%s2433_s21 + $0x110] sm:$0xff]  ;;  %s2332_s21 = smul.u32 288, %s3366_s13 }
 0x141   : > { %v225_v21 = vpack.c.bf16 %v207_v57, %v206_v15 }
 0x142   : > { %s3215_s23 = scalar_lea.vmem %s3364_s3, %s2332_s21 }
 0x143   : > { %1920 = vmatmul.mubr.bf16.gmra.mxu0 %v1610_v9  ;;  %v459_v14 = vsel %vm388_vm0, %v225_v21, %v387_v32 }
 0x144   : > { %2301 = vmatprep.mubr.msk.bf16.mxu0 %vm388_vm0, %v1495_v37 }
 0x147   : > { %v3112_v36 = vpop.f32.mrf.mxu1  ;;  %1312 = vmatmul.mubr.bf16.gmra.mxu1 %v451_v43 }
 0x148   : > { %2248 = vmatprep.mubr.msk.bf16.mxu1 %vm388_vm0, %v2876_v60 }
 0x149   : > { %v981_v13 = vpop.f32.mrf.mxu1 }
 0x14b   : > { %v3118_v52 = vpop.f32.mrf.mxu0  ;;  %v3120_v54 = vpop.f32.mrf.mxu1  ;;  %1928 = vmatmul.mubr.bf16.gmra.mxu0 %v1614_v35 }
 0x14c   : > { %2302 = vmatprep.mubr.msk.bf16.mxu0 %vm388_vm0, %v1496_v22 }
 0x14d   : > { %v909_v59 = vpop.f32.mrf.mxu0  ;;  %v984_v60 = vpop.f32.mrf.mxu1 }
 0x14f   : > { %v3128_v47 = vpop.f32.mrf.mxu0  ;;  %v3130_v0 = vpop.f32.mrf.mxu1  ;;  %1320 = vmatmul.mubr.bf16.gmra.mxu1 %v455_v55 }
 0x150   : > { %2249 = vmatprep.mubr.msk.bf16.mxu1 %vm388_vm0, %v2912_v27 }
 0x151   : > { %v912_v10 = vpop.f32.mrf.mxu0  ;;  %v989_v4 = vpop.f32.mrf.mxu1 }
 0x153   : > { %v3138_v8 = vpop.f32.mrf.mxu0  ;;  %v3140_v28 = vpop.f32.mrf.mxu1  ;;  %1936 = vmatmul.mubr.bf16.gmra.mxu0 %v1618_v3 }
 0x154   : > { %2303 = vmatprep.mubr.msk.bf16.mxu0 %vm388_vm0, %v1497_v25 }
 0x155   : > { %v917_v16 = vpop.f32.mrf.mxu0  ;;  %v992_v42 = vpop.f32.mrf.mxu1 }
 0x157   : > { %v3144_v27 = vpop.f32.mrf.mxu0  ;;  %v3146_v30 = vpop.f32.mrf.mxu1  ;;  %1328 = vmatmul.mubr.bf16.gmra.mxu1 %v459_v14 }
 0x159   : > { %v920_v18 = vpop.f32.mrf.mxu0  ;;  %v997_v51 = vpop.f32.mrf.mxu1 }
 0x15b   : > { %v3149_v40 = vpop.f32.mrf.mxu0  ;;  %v3151_v19 = vpop.f32.mrf.mxu1  ;;  %1944 = vmatmul.mubr.bf16.gmra.mxu0 %v1622_v17 }
 0x15d   : > { %v925_v20 = vpop.f32.mrf.mxu0  ;;  %v1000_v24 = vpop.f32.mrf.mxu1 }
 0x15f   : > { %v3153_v53 = vpop.f32.mrf.mxu0  ;;  %v3155_v62 = vpop.f32.mrf.mxu1 }
 0x161   : > { %v928_v50 = vpop.f32.mrf.mxu0  ;;  %v1005_v26 = vpop.f32.mrf.mxu1 }
 0x163   : > { %v3157_v38 = vpop.f32.mrf.mxu0  ;;  %v3159_v29 = vpop.f32.mrf.mxu1 }
 0x165   : > { %v933_v31 = vpop.f32.mrf.mxu0  ;;  %v1008_v33 = vpop.f32.mrf.mxu1 }
 0x166   : > { %v3208_v31 = vld [vmem:[%s3363_s2] ss:$0 sm:$0xff] }
 0x167   : > { %v3161_v1 = vpop.f32.mrf.mxu0  ;;  %v3163_v11 = vpop.f32.mrf.mxu1 }
 0x169   : > { %v936_v61 = vpop.f32.mrf.mxu0  ;;  %v1013_v23 = vpop.f32.mrf.mxu1 }
 0x16b   : > { %v3165_v9 = vpop.f32.mrf.mxu0  ;;  %v3167_v34 = vpop.f32.mrf.mxu1 }
 0x16d   : > { %v941_v37 = vpop.f32.mrf.mxu0  ;;  %v1016_v41 = vpop.f32.mrf.mxu1 }
 0x16f   : > { %v3169_v43 = vpop.f32.mrf.mxu0  ;;  %v3171_v44 = vpop.f32.mrf.mxu1 }
 0x171   : > { %v944_v45 = vpop.f32.mrf.mxu0  ;;  %v1021_v2 = vpop.f32.mrf.mxu1 }
 0x173   : > { %v3173_v46 = vpop.f32.mrf.mxu0  ;;  %v3175_v49 = vpop.f32.mrf.mxu1 }
 0x175   : > { %v949_v35 = vpop.f32.mrf.mxu0  ;;  %v1024_v48 = vpop.f32.mrf.mxu1 }
 0x177   : > { %v3177_v22 = vpop.f32.mrf.mxu0  ;;  %v3179_v13 = vpop.f32.mrf.mxu1 }
 0x179   : > { %v952_v5 = vpop.f32.mrf.mxu0  ;;  %v1029_v55 = vpop.f32.mrf.mxu1 }
 0x17b   : > { %v3181_v56 = vpop.f32.mrf.mxu0  ;;  %v3183_v15 = vpop.f32.mrf.mxu1 }
 0x17d   : > { %v957_v59 = vpop.f32.mrf.mxu0  ;;  %v1032_v60 = vpop.f32.mrf.mxu1 }
 0x17f   : > { %v3185_v57 = vpop.f32.mrf.mxu0  ;;  %v3187_v58 = vpop.f32.mrf.mxu1 }
 0x181   : > { %v960_v63 = vpop.f32.mrf.mxu0  ;;  %v1037_v3 = vpop.f32.mrf.mxu1 }
 0x183   : > { %v3189_v32 = vpop.f32.mrf.mxu0  ;;  %v3191_v21 = vpop.f32.mrf.mxu1 }
 0x185   : > { %v965_v25 = vpop.f32.mrf.mxu0  ;;  %v1040_v10 = vpop.f32.mrf.mxu1 }
 0x187   : > { %v3193_v4 = vpop.f32.mrf.mxu0  ;;  %v3195_v6 = vpop.f32.mrf.mxu1 }
 0x189   : > { %v968_v7 = vpop.f32.mrf.mxu0  ;;  %v1045_v14 = vpop.f32.mrf.mxu1 }
 0x18b   : > { %v3197_v12 = vpop.f32.mrf.mxu0  ;;  %v3199_v39 = vpop.f32.mrf.mxu1 }
 0x18d   : > { %v973_v16 = vpop.f32.mrf.mxu0  ;;  %v1048_v42 = vpop.f32.mrf.mxu1 }
 0x18f   : > { %v3201_v17 = vpop.f32.mrf.mxu0  ;;  %v1193_v18 = vpop.f32.mrf.mxu1 }
 0x190   : > { %v1194_v24 = vadd.f32 %v1193_v18, %v3118_v52 }
 0x191   : > { %v976_v51 = vpop.f32.mrf.mxu0  ;;  %v1195_v20 = vpop.f32.mrf.mxu1 }
 0x193   : > { %v1196_v50 = vpop.f32.mrf.mxu1  ;;  %v1809_v26 = vpop.f32.mrf.mxu0 }
 0x194   : > { %v1952_v33 = vadd.f32 %v1809_v26, %v1194_v24  ;;  %v1197_v37 = vadd.f32 %v1196_v50, %v3128_v47 }
 0x195   : > { %v1198_v61 = vpop.f32.mrf.mxu1  ;;  %v1811_v23 = vpop.f32.mrf.mxu0 }
 0x196   : > { %v1995_v41 = vadd.f32 %v3208_v31, %v1952_v33 }
 0x197   : > { %v1201_v52 = vpop.f32.mrf.mxu1  ;;  %v1812_v45 = vpop.f32.mrf.mxu0 }
 0x198   : > { %v2031_v2 = vmax.f32 %v1995_v41, 0.0  ;;  %v1953_v35 = vadd.f32 %v1812_v45, %v1197_v37  ;;  %v1202_v47 = vadd.f32 %v1201_v52, %v3138_v8 }
 0x199   : > { %v1203_v48 = vpop.f32.mrf.mxu1  ;;  %v1814_v5 = vpop.f32.mrf.mxu0 }
 0x19a   : > { %2068 = vst.msk [vmem:[%s3215_s23] sm:$0xff] %vm2067_vm1, %v2031_v2  ;;  %v1996_v55 = vadd.f32 %v3208_v31, %v1953_v35 }
 0x19b   : > { %v1204_v59 = vpop.f32.mrf.mxu1  ;;  %v1817_v60 = vpop.f32.mrf.mxu0 }
 0x19c   : > { %v2032_v63 = vmax.f32 %v1996_v55, 0.0  ;;  %v1954_v3 = vadd.f32 %v1817_v60, %v1202_v47  ;;  %v1205_v7 = vadd.f32 %v1204_v59, %v3144_v27 }
 0x19d   : > { %v1206_v25 = vpop.f32.mrf.mxu1  ;;  %v1819_v10 = vpop.f32.mrf.mxu0 }
 0x19e   : > { %2069 = vst.msk [vmem:[%s3215_s23 + $0x8] sm:$0xff] %vm2067_vm1, %v2032_v63  ;;  %v1997_v14 = vadd.f32 %v3208_v31, %v1954_v3 }
 0x19f   : > { %v1209_v16 = vpop.f32.mrf.mxu1  ;;  %v1820_v42 = vpop.f32.mrf.mxu0 }
 0x1a0   : > { %v2033_v18 = vmax.f32 %v1997_v14, 0.0  ;;  %v1955_v8 = vadd.f32 %v1820_v42, %v1205_v7  ;;  %v1210_v24 = vadd.f32 %v1209_v16, %v3149_v40 }
 0x1a1   : > { %v1211_v51 = vpop.f32.mrf.mxu1  ;;  %v1822_v20 = vpop.f32.mrf.mxu0 }
 0x1a2   : > { %2070 = vst.msk [vmem:[%s3215_s23 + $0x10] sm:$0xff] %vm2067_vm1, %v2033_v18  ;;  %v1998_v50 = vadd.f32 %v3208_v31, %v1955_v8 }
 0x1a3   : > { %v1212_v26 = vpop.f32.mrf.mxu1  ;;  %v1825_v33 = vpop.f32.mrf.mxu0 }
 0x1a4   : > { %v2034_v61 = vmax.f32 %v1998_v50, 0.0  ;;  %v1956_v27 = vadd.f32 %v1825_v33, %v1210_v24  ;;  %v1213_v41 = vadd.f32 %v1212_v26, %v3153_v53 }
 0x1a5   : > { %v1214_v23 = vpop.f32.mrf.mxu1  ;;  %v1827_v37 = vpop.f32.mrf.mxu0 }
 0x1a6   : > { %2071 = vst.msk [vmem:[%s3215_s23 + $0x18] sm:$0xff] %vm2067_vm1, %v2034_v61  ;;  %v1999_v52 = vadd.f32 %v3208_v31, %v1956_v27 }
 0x1a7   : > { %v1217_v45 = vpop.f32.mrf.mxu1  ;;  %v1828_v2 = vpop.f32.mrf.mxu0 }
 0x1a8   : > { %v2035_v35 = vmax.f32 %v1999_v52, 0.0  ;;  %v1957_v40 = vadd.f32 %v1828_v2, %v1213_v41  ;;  %v1218_v47 = vadd.f32 %v1217_v45, %v3157_v38 }
 0x1a9   : > { %v1219_v48 = vpop.f32.mrf.mxu1  ;;  %v1830_v5 = vpop.f32.mrf.mxu0 }
 0x1aa   : > { %2072 = vst.msk [vmem:[%s3215_s23 + $0x20] sm:$0xff] %vm2067_vm1, %v2035_v35  ;;  %v2000_v55 = vadd.f32 %v3208_v31, %v1957_v40 }
 0x1ab   : > { %v1220_v59 = vpop.f32.mrf.mxu1  ;;  %v1833_v60 = vpop.f32.mrf.mxu0 }
 0x1ac   : > { %v2036_v63 = vmax.f32 %v2000_v55, 0.0  ;;  %v1958_v53 = vadd.f32 %v1833_v60, %v1218_v47  ;;  %v1221_v10 = vadd.f32 %v1220_v59, %v3161_v1 }
 0x1ad   : > { %v1222_v3 = vpop.f32.mrf.mxu1  ;;  %v1835_v25 = vpop.f32.mrf.mxu0 }
 0x1ae   : > { %2073 = vst.msk [vmem:[%s3215_s23 + $0x28] sm:$0xff] %vm2067_vm1, %v2036_v63  ;;  %v2001_v7 = vadd.f32 %v3208_v31, %v1958_v53 }
 0x1af   : > { %v1225_v14 = vpop.f32.mrf.mxu1  ;;  %v1836_v16 = vpop.f32.mrf.mxu0 }
 0x1b0   : > { %v2037_v42 = vmax.f32 %v2001_v7, 0.0  ;;  %v1959_v38 = vadd.f32 %v1836_v16, %v1221_v10  ;;  %v1226_v51 = vadd.f32 %v1225_v14, %v3165_v9 }
 0x1b1   : > { %v1227_v18 = vpop.f32.mrf.mxu1  ;;  %v1838_v8 = vpop.f32.mrf.mxu0 }
 0x1b2   : > { %2074 = vst.msk [vmem:[%s3215_s23 + $0x30] sm:$0xff] %vm2067_vm1, %v2037_v42  ;;  %v2002_v20 = vadd.f32 %v3208_v31, %v1959_v38 }
 0x1b3   : > { %v1228_v24 = vpop.f32.mrf.mxu1  ;;  %v1841_v50 = vpop.f32.mrf.mxu0 }
 0x1b4   : > { %v2038_v26 = vmax.f32 %v2002_v20, 0.0  ;;  %v1960_v1 = vadd.f32 %v1841_v50, %v1226_v51  ;;  %v1229_v27 = vadd.f32 %v1228_v24, %v3169_v43 }
 0x1b5   : > { %v1230_v33 = vpop.f32.mrf.mxu1  ;;  %v1843_v61 = vpop.f32.mrf.mxu0 }
 0x1b6   : > { %2075 = vst.msk [vmem:[%s3215_s23 + $0x38] sm:$0xff] %vm2067_vm1, %v2038_v26  ;;  %v2003_v23 = vadd.f32 %v3208_v31, %v1960_v1 }
 0x1b7   : > { %v1233_v37 = vpop.f32.mrf.mxu1  ;;  %v1844_v41 = vpop.f32.mrf.mxu0 }
 0x1b8   : > { %v2039_v52 = vmax.f32 %v2003_v23, 0.0  ;;  %v1961_v9 = vadd.f32 %v1844_v41, %v1229_v27  ;;  %v1234_v35 = vadd.f32 %v1233_v37, %v3173_v46 }
 0x1b9   : > { %v1235_v45 = vpop.f32.mrf.mxu1  ;;  %v1846_v2 = vpop.f32.mrf.mxu0 }
 0x1ba   : > { %2076 = vst.msk [vmem:[%s3215_s23 + $0x40] sm:$0xff] %vm2067_vm1, %v2039_v52  ;;  %v2004_v40 = vadd.f32 %v3208_v31, %v1961_v9 }
 0x1bb   : > { %v1236_v48 = vpop.f32.mrf.mxu1  ;;  %v1849_v5 = vpop.f32.mrf.mxu0 }
 0x1bc   : > { %v2040_v47 = vmax.f32 %v2004_v40, 0.0  ;;  %v1962_v43 = vadd.f32 %v1849_v5, %v1234_v35  ;;  %v1237_v60 = vadd.f32 %v1236_v48, %v3177_v22 }
 0x1bd   : > { %v1238_v55 = vpop.f32.mrf.mxu1  ;;  %v1851_v59 = vpop.f32.mrf.mxu0 }
 0x1be   : > { %2077 = vst.msk [vmem:[%s3215_s23 + $0x48] sm:$0xff] %vm2067_vm1, %v2040_v47  ;;  %v2005_v63 = vadd.f32 %v3208_v31, %v1962_v43 }
 0x1bf   : > { %v1241_v53 = vpop.f32.mrf.mxu1  ;;  %v1852_v3 = vpop.f32.mrf.mxu0 }
 0x1c0   : > { %v2041_v25 = vmax.f32 %v2005_v63, 0.0  ;;  %v1963_v46 = vadd.f32 %v1852_v3, %v1237_v60  ;;  %v1242_v14 = vadd.f32 %v1241_v53, %v3181_v56 }
 0x1c1   : > { %v1243_v10 = vpop.f32.mrf.mxu1  ;;  %v1854_v7 = vpop.f32.mrf.mxu0 }
 0x1c2   : > { %2078 = vst.msk [vmem:[%s3215_s23 + $0x50] sm:$0xff] %vm2067_vm1, %v2041_v25  ;;  %v2006_v16 = vadd.f32 %v3208_v31, %v1963_v46 }
 0x1c3   : > { %v1244_v42 = vpop.f32.mrf.mxu1  ;;  %v1857_v38 = vpop.f32.mrf.mxu0 }
 0x1c4   : > { %v2042_v18 = vmax.f32 %v2006_v16, 0.0  ;;  %v1964_v22 = vadd.f32 %v1857_v38, %v1242_v14  ;;  %v1245_v20 = vadd.f32 %v1244_v42, %v3185_v57 }
 0x1c5   : > { %v1246_v8 = vpop.f32.mrf.mxu1  ;;  %v1859_v51 = vpop.f32.mrf.mxu0 }
 0x1c6   : > { %2079 = vst.msk [vmem:[%s3215_s23 + $0x58] sm:$0xff] %vm2067_vm1, %v2042_v18  ;;  %v2007_v24 = vadd.f32 %v3208_v31, %v1964_v22 }
 0x1c7   : > { %v1249_v50 = vpop.f32.mrf.mxu1  ;;  %v1860_v26 = vpop.f32.mrf.mxu0 }
 0x1c8   : > { %v2043_v1 = vmax.f32 %v2007_v24, 0.0  ;;  %v1965_v56 = vadd.f32 %v1860_v26, %v1245_v20  ;;  %v1250_v27 = vadd.f32 %v1249_v50, %v3189_v32 }
 0x1c9   : > { %v1251_v33 = vpop.f32.mrf.mxu1  ;;  %v1862_v61 = vpop.f32.mrf.mxu0 }
 0x1ca   : > { %2080 = vst.msk [vmem:[%s3215_s23 + $0x60] sm:$0xff] %vm2067_vm1, %v2043_v1  ;;  %v2008_v23 = vadd.f32 %v3208_v31, %v1965_v56 }
 0x1cb   : > { %v1252_v37 = vpop.f32.mrf.mxu1  ;;  %v1865_v41 = vpop.f32.mrf.mxu0 }
 0x1cc   : > { %v2044_v52 = vmax.f32 %v2008_v23, 0.0  ;;  %v1966_v57 = vadd.f32 %v1865_v41, %v1250_v27  ;;  %v1253_v2 = vadd.f32 %v1252_v37, %v3193_v4 }
 0x1cd   : > { %v1254_v9 = vpop.f32.mrf.mxu1  ;;  %v1867_v45 = vpop.f32.mrf.mxu0 }
 0x1ce   : > { %2081 = vst.msk [vmem:[%s3215_s23 + $0x68] sm:$0xff] %vm2067_vm1, %v2044_v52  ;;  %v2009_v35 = vadd.f32 %v3208_v31, %v1966_v57 }
 0x1cf   : > { %v1257_v40 = vpop.f32.mrf.mxu1  ;;  %v1868_v48 = vpop.f32.mrf.mxu0 }
 0x1d0   : > { %v2045_v5 = vmax.f32 %v2009_v35, 0.0  ;;  %v1967_v32 = vadd.f32 %v1868_v48, %v1253_v2  ;;  %v1258_v55 = vadd.f32 %v1257_v40, %v3197_v12 }
 0x1d1   : > { %v1259_v47 = vpop.f32.mrf.mxu1  ;;  %v1870_v43 = vpop.f32.mrf.mxu0 }
 0x1d2   : > { %2082 = vst.msk [vmem:[%s3215_s23 + $0x70] sm:$0xff] %vm2067_vm1, %v2045_v5  ;;  %v2010_v59 = vadd.f32 %v3208_v31, %v1967_v32 }
 0x1d3   : > { %v1260_v60 = vpop.f32.mrf.mxu1  ;;  %v1873_v63 = vpop.f32.mrf.mxu0 }
 0x1d4   : > { %v2046_v53 = vmax.f32 %v2010_v59, 0.0  ;;  %v1968_v4 = vadd.f32 %v1873_v63, %v1258_v55  ;;  %v1261_v46 = vadd.f32 %v1260_v60, %v3201_v17 }
 0x1d5   : > { %v1262_v3 = vpop.f32.mrf.mxu1  ;;  %v1875_v25 = vpop.f32.mrf.mxu0 }
 0x1d6   : > { %2083 = vst.msk [vmem:[%s3215_s23 + $0x78] sm:$0xff] %vm2067_vm1, %v2046_v53  ;;  %v2011_v10 = vadd.f32 %v3208_v31, %v1968_v4 }
 0x1d7   : > { %v1265_v7 = vpop.f32.mrf.mxu1  ;;  %v1876_v14 = vpop.f32.mrf.mxu0 }
 0x1d8   : > { %v2047_v16 = vmax.f32 %v2011_v10, 0.0  ;;  %v1969_v12 = vadd.f32 %v1876_v14, %v1261_v46  ;;  %v1266_v18 = vadd.f32 %v1265_v7, %v3112_v36 }
 0x1d9   : > { %v1267_v42 = vpop.f32.mrf.mxu1  ;;  %v1878_v38 = vpop.f32.mrf.mxu0 }
 0x1da   : > { %2084 = vst.msk [vmem:[%s3215_s23 + $0x80] sm:$0xff] %vm2067_vm1, %v2047_v16  ;;  %v2012_v22 = vadd.f32 %v3208_v31, %v1969_v12 }
 0x1db   : > { %v1268_v8 = vpop.f32.mrf.mxu1  ;;  %v1881_v51 = vpop.f32.mrf.mxu0 }
 0x1dc   : > { %v2048_v20 = vmax.f32 %v2012_v22, 0.0  ;;  %v1970_v17 = vadd.f32 %v1881_v51, %v1266_v18  ;;  %v1269_v26 = vadd.f32 %v1268_v8, %v3120_v54 }
 0x1dd   : > { %v1270_v24 = vpop.f32.mrf.mxu1  ;;  %v1883_v50 = vpop.f32.mrf.mxu0 }
 0x1de   : > { %2085 = vst.msk [vmem:[%s3215_s23 + $0x88] sm:$0xff] %vm2067_vm1, %v2048_v20  ;;  %v2013_v1 = vadd.f32 %v3208_v31, %v1970_v17 }
 0x1df   : > { %v1273_v56 = vpop.f32.mrf.mxu1  ;;  %v1884_v33 = vpop.f32.mrf.mxu0 }
 0x1e0   : > { %v2049_v61 = vmax.f32 %v2013_v1, 0.0  ;;  %v1971_v36 = vadd.f32 %v1884_v33, %v1269_v26  ;;  %v1274_v37 = vadd.f32 %v1273_v56, %v3130_v0 }
 0x1e1   : > { %v1275_v27 = vpop.f32.mrf.mxu1  ;;  %v1886_v23 = vpop.f32.mrf.mxu0 }
 0x1e2   : > { %2086 = vst.msk [vmem:[%s3215_s23 + $0x90] sm:$0xff] %vm2067_vm1, %v2049_v61  ;;  %v2014_v41 = vadd.f32 %v3208_v31, %v1971_v36 }
 0x1e3   : > { %v1276_v52 = vpop.f32.mrf.mxu1  ;;  %v1889_v57 = vpop.f32.mrf.mxu0 }
 0x1e4   : > { %v2050_v9 = vmax.f32 %v2014_v41, 0.0  ;;  %v1972_v54 = vadd.f32 %v1889_v57, %v1274_v37  ;;  %v1277_v35 = vadd.f32 %v1276_v52, %v3140_v28 }
 0x1e5   : > { %v1278_v45 = vpop.f32.mrf.mxu1  ;;  %v1891_v2 = vpop.f32.mrf.mxu0 }
 0x1e6   : > { %2087 = vst.msk [vmem:[%s3215_s23 + $0x98] sm:$0xff] %vm2067_vm1, %v2050_v9  ;;  %v2015_v40 = vadd.f32 %v3208_v31, %v1972_v54 }
 0x1e7   : > { %v1281_v48 = vpop.f32.mrf.mxu1  ;;  %v1892_v5 = vpop.f32.mrf.mxu0 }
 0x1e8   : > { %v2051_v32 = vmax.f32 %v2015_v40, 0.0  ;;  %v1973_v0 = vadd.f32 %v1892_v5, %v1277_v35  ;;  %v1282_v55 = vadd.f32 %v1281_v48, %v3146_v30 }
 0x1e9   : > { %v1283_v47 = vpop.f32.mrf.mxu1  ;;  %v1894_v43 = vpop.f32.mrf.mxu0 }
 0x1ea   : > { %2088 = vst.msk [vmem:[%s3215_s23 + $0xa0] sm:$0xff] %vm2067_vm1, %v2051_v32  ;;  %v2016_v59 = vadd.f32 %v3208_v31, %v1973_v0 }
 0x1eb   : > { %v1284_v60 = vpop.f32.mrf.mxu1  ;;  %v1897_v63 = vpop.f32.mrf.mxu0 }
 0x1ec   : > { %v2052_v53 = vmax.f32 %v2016_v59, 0.0  ;;  %v1974_v28 = vadd.f32 %v1897_v63, %v1282_v55  ;;  %v1285_v25 = vadd.f32 %v1284_v60, %v3151_v19 }
 0x1ed   : > { %v1286_v4 = vpop.f32.mrf.mxu1  ;;  %v1899_v3 = vpop.f32.mrf.mxu0 }
 0x1ee   : > { %2089 = vst.msk [vmem:[%s3215_s23 + $0xa8] sm:$0xff] %vm2067_vm1, %v2052_v53  ;;  %v2017_v46 = vadd.f32 %v3208_v31, %v1974_v28 }
 0x1ef   : > { %v1289_v10 = vpop.f32.mrf.mxu1  ;;  %v1900_v7 = vpop.f32.mrf.mxu0 }
 0x1f0   : > { %v2053_v14 = vmax.f32 %v2017_v46, 0.0  ;;  %v1975_v30 = vadd.f32 %v1900_v7, %v1285_v25  ;;  %v1290_v42 = vadd.f32 %v1289_v10, %v3155_v62 }
 0x1f1   : > { %v1291_v16 = vpop.f32.mrf.mxu1  ;;  %v1902_v12 = vpop.f32.mrf.mxu0 }
 0x1f2   : > { %2090 = vst.msk [vmem:[%s3215_s23 + $0xb0] sm:$0xff] %vm2067_vm1, %v2053_v14  ;;  %v2018_v38 = vadd.f32 %v3208_v31, %v1975_v30 }
 0x1f3   : > { %v1292_v18 = vpop.f32.mrf.mxu1  ;;  %v1905_v22 = vpop.f32.mrf.mxu0 }
 0x1f4   : > { %v2054_v8 = vmax.f32 %v2018_v38, 0.0  ;;  %v1976_v19 = vadd.f32 %v1905_v22, %v1290_v42  ;;  %v1293_v17 = vadd.f32 %v1292_v18, %v3159_v29 }
 0x1f5   : > { %v1294_v51 = vpop.f32.mrf.mxu1  ;;  %v1907_v20 = vpop.f32.mrf.mxu0 }
 0x1f6   : > { %2091 = vst.msk [vmem:[%s3215_s23 + $0xb8] sm:$0xff] %vm2067_vm1, %v2054_v8  ;;  %v2019_v24 = vadd.f32 %v3208_v31, %v1976_v19 }
 0x1f7   : > { %v1297_v50 = vpop.f32.mrf.mxu1  ;;  %v1908_v26 = vpop.f32.mrf.mxu0 }
 0x1f8   : > { %v2055_v1 = vmax.f32 %v2019_v24, 0.0  ;;  %v1977_v62 = vadd.f32 %v1908_v26, %v1293_v17  ;;  %v1298_v61 = vadd.f32 %v1297_v50, %v3163_v11 }
 0x1f9   : > { %v1299_v56 = vpop.f32.mrf.mxu1  ;;  %v1910_v33 = vpop.f32.mrf.mxu0 }
 0x1fa   : > { %2092 = vst.msk [vmem:[%s3215_s23 + $0xc0] sm:$0xff] %vm2067_vm1, %v2055_v1  ;;  %v2020_v36 = vadd.f32 %v3208_v31, %v1977_v62 }
 0x1fb   : > { %v1300_v27 = vpop.f32.mrf.mxu1  ;;  %v1913_v23 = vpop.f32.mrf.mxu0 }
 0x1fc   : > { %v2056_v37 = vmax.f32 %v2020_v36, 0.0  ;;  %v1978_v29 = vadd.f32 %v1913_v23, %v1298_v61  ;;  %v1301_v57 = vadd.f32 %v1300_v27, %v3167_v34 }
 0x1fd   : > { %v1302_v41 = vpop.f32.mrf.mxu1  ;;  %v1915_v52 = vpop.f32.mrf.mxu0 }
 0x1fe   : > { %2093 = vst.msk [vmem:[%s3215_s23 + $0xc8] sm:$0xff] %vm2067_vm1, %v2056_v37  ;;  %v2021_v9 = vadd.f32 %v3208_v31, %v1978_v29 }
 0x1ff   : > { %v1305_v54 = vpop.f32.mrf.mxu1  ;;  %v1916_v45 = vpop.f32.mrf.mxu0 }
 0x200   : > { %v2057_v2 = vmax.f32 %v2021_v9, 0.0  ;;  %v1979_v11 = vadd.f32 %v1916_v45, %v1301_v57  ;;  %v1306_v48 = vadd.f32 %v1305_v54, %v3171_v44 }
 0x201   : > { %v1307_v35 = vpop.f32.mrf.mxu1  ;;  %v1918_v40 = vpop.f32.mrf.mxu0 }
 0x202   : > { %2094 = vst.msk [vmem:[%s3215_s23 + $0xd0] sm:$0xff] %vm2067_vm1, %v2057_v2  ;;  %v2022_v5 = vadd.f32 %v3208_v31, %v1979_v11 }
 0x203   : > { %v1308_v32 = vpop.f32.mrf.mxu1  ;;  %v1921_v0 = vpop.f32.mrf.mxu0 }
 0x204   : > { %v2058_v47 = vmax.f32 %v2022_v5, 0.0  ;;  %v1980_v34 = vadd.f32 %v1921_v0, %v1306_v48  ;;  %v1309_v59 = vadd.f32 %v1308_v32, %v3175_v49 }
 0x205   : > { %v1310_v43 = vpop.f32.mrf.mxu1  ;;  %v1923_v55 = vpop.f32.mrf.mxu0 }
 0x206   : > { %2095 = vst.msk [vmem:[%s3215_s23 + $0xd8] sm:$0xff] %vm2067_vm1, %v2058_v47  ;;  %v2023_v60 = vadd.f32 %v3208_v31, %v1980_v34 }
 0x207   : > { %v1313_v63 = vpop.f32.mrf.mxu1  ;;  %v1924_v53 = vpop.f32.mrf.mxu0 }
 0x208   : > { %v2059_v28 = vmax.f32 %v2023_v60, 0.0  ;;  %v1981_v44 = vadd.f32 %v1924_v53, %v1309_v59  ;;  %v1314_v25 = vadd.f32 %v1313_v63, %v3179_v13 }
 0x209   : > { %v1315_v4 = vpop.f32.mrf.mxu1  ;;  %v1926_v3 = vpop.f32.mrf.mxu0 }
 0x20a   : > { %2096 = vst.msk [vmem:[%s3215_s23 + $0xe0] sm:$0xff] %vm2067_vm1, %v2059_v28  ;;  %v2024_v46 = vadd.f32 %v3208_v31, %v1981_v44 }
 0x20b   : > { %v1316_v10 = vpop.f32.mrf.mxu1  ;;  %v1929_v7 = vpop.f32.mrf.mxu0 }
 0x20c   : > { %v2060_v14 = vmax.f32 %v2024_v46, 0.0  ;;  %v1982_v49 = vadd.f32 %v1929_v7, %v1314_v25  ;;  %v1317_v12 = vadd.f32 %v1316_v10, %v3183_v15 }
 0x20d   : > { %v1318_v30 = vpop.f32.mrf.mxu1  ;;  %v1931_v16 = vpop.f32.mrf.mxu0 }
 0x20e   : > { %2097 = vst.msk [vmem:[%s3215_s23 + $0xe8] sm:$0xff] %vm2067_vm1, %v2060_v14  ;;  %v2025_v42 = vadd.f32 %v3208_v31, %v1982_v49 }
 0x20f   : > { %v1321_v38 = vpop.f32.mrf.mxu1  ;;  %v1932_v18 = vpop.f32.mrf.mxu0 }
 0x210   : > { %v2061_v22 = vmax.f32 %v2025_v42, 0.0  ;;  %v1983_v13 = vadd.f32 %v1932_v18, %v1317_v12  ;;  %v1322_v51 = vadd.f32 %v1321_v38, %v3187_v58 }
 0x211   : > { %v1323_v8 = vpop.f32.mrf.mxu1  ;;  %v1934_v19 = vpop.f32.mrf.mxu0 }
 0x212   : > { %2098 = vst.msk [vmem:[%s3215_s23 + $0xf0] sm:$0xff] %vm2067_vm1, %v2061_v22  ;;  %v2026_v20 = vadd.f32 %v3208_v31, %v1983_v13 }
 0x213   : > { %v1324_v17 = vpop.f32.mrf.mxu1  ;;  %v1937_v24 = vpop.f32.mrf.mxu0 }
 0x214   : > { %v2062_v50 = vmax.f32 %v2026_v20, 0.0  ;;  %v1984_v15 = vadd.f32 %v1937_v24, %v1322_v51  ;;  %v1325_v62 = vadd.f32 %v1324_v17, %v3191_v21 }
 0x215   : > { %v1326_v26 = vpop.f32.mrf.mxu1  ;;  %v1939_v1 = vpop.f32.mrf.mxu0 }
 0x216   : > { %2099 = vst.msk [vmem:[%s3215_s23 + $0xf8] sm:$0xff] %vm2067_vm1, %v2062_v50  ;;  %v2027_v56 = vadd.f32 %v3208_v31, %v1984_v15 }
 0x217   : > { %v1329_v33 = vpop.f32.mrf.mxu1  ;;  %v1940_v61 = vpop.f32.mrf.mxu0 }
 0x218   : > { %v2063_v36 = vmax.f32 %v2027_v56, 0.0  ;;  %v1985_v58 = vadd.f32 %v1940_v61, %v1325_v62  ;;  %v1330_v37 = vadd.f32 %v1329_v33, %v3195_v6 }
 0x219   : > { %v1331_v27 = vpop.f32.mrf.mxu1  ;;  %v1942_v23 = vpop.f32.mrf.mxu0 }
 0x21a   : > { %2100 = vst.msk [vmem:[%s3215_s23 + $0x100] sm:$0xff] %vm2067_vm1, %v2063_v36  ;;  %v2028_v29 = vadd.f32 %v3208_v31, %v1985_v58 }
 0x21b   : > { %v1332_v41 = vpop.f32.mrf.mxu1  ;;  %v1945_v52 = vpop.f32.mrf.mxu0 }
 0x21c   : > { %v2064_v21 = vmax.f32 %v2028_v29, 0.0  ;;  %v1986_v57 = vadd.f32 %v1945_v52, %v1330_v37  ;;  %v1333_v45 = vadd.f32 %v1332_v41, %v3199_v39 }
 0x21d   : > { %v1334_v9 = vpop.f32.mrf.mxu1  ;;  %v1947_v54 = vpop.f32.mrf.mxu0 }
 0x21e   : > { %2101 = vst.msk [vmem:[%s3215_s23 + $0x108] sm:$0xff] %vm2067_vm1, %v2064_v21  ;;  %v2029_v2 = vadd.f32 %v3208_v31, %v1986_v57 }
 0x21f   : > { %v1948_v11 = vpop.f32.mrf.mxu0 }
 0x220   : > { %v2065_v35 = vmax.f32 %v2029_v2, 0.0  ;;  %v1987_v40 = vadd.f32 %v1948_v11, %v1333_v45 }
 0x221   : > { %v1950_v48 = vpop.f32.mrf.mxu0 }
 0x222   : > { %2102 = vst.msk [vmem:[%s3215_s23 + $0x110] sm:$0xff] %vm2067_vm1, %v2065_v35  ;;  %v2030_v6 = vadd.f32 %v3208_v31, %v1987_v40 }
 0x224   : > { %v2066_v5 = vmax.f32 %v2030_v6, 0.0 }
 0x226   : > { %2103 = vst.msk [vmem:[%s3215_s23 + $0x118] sm:$0xff] %vm2067_vm1, %v2066_v5 }
 0x227 PF: > { %s13_s12 = sadd.s32 1, %s2385_s12  }
 0x228   : > { %p10_p4 = scmp.ge.s32.totalorder %s13_s12, 4  }
 0x22a   :  { %12 = sbr.rel (!%p10_p4) target bundleno = 1 (0x1), region = 64 }

// kernel: refinement_net_forward.19
= control target key start
LH: loop header
LB: loop body
LE: loop exit
PB: predicated region body
PF: predicated region fallthrough
CT: control target
= control target key end

     0   :  { %s2374_s12 = smov 0   ;;  %s3262_s0 = inlined_call_operand.vmem [shape: f32[2,326,6], index: 0, kind: input, shape index: {}]   ;;  %s3263_s1 = inlined_call_operand.vmem [shape: bf16[3,18,4], index: 1, kind: input, shape index: {}]   ;;  %s3264_s2 = inlined_call_operand.vmem [shape: f32[1,4], index: 2, kind: input, shape index: {}]   ;;  %s3265_s3 = inlined_call_operand.vmem [shape: f32[2,288,4], index: 3, kind: output, shape index: {}]  }
   0x1 LB: > { %s2062_s13 = sadd.s32 4294967295, %s2350_s12   ;;  %p2066_p0 = scmp.ge.s32.totalorder %s2350_s12, 1  ;;  %s2350_s12 = sphi %s2374_s12, %s13_s12  }
   0x2   : > { %p137_p1 = scmp.lt.s32.totalorder %s2350_s12, 3 }
   0x4   : > { %p138_p2 = pnand %p2066_p0, %p137_p1 }
   0x5   : > { %p161_p3 = scmp.lt.s32.totalorder (!%p138_p2), %s2062_s13, 1  ;;  %s2352_s22 = smov (!%p138_p2), 12  }
   0x6   : > { %141 = sbr.rel (%p138_p2) target bundleno = 552 (0x228), region = 32  ;;  %s2353_s23 = smov (!%p138_p2), 6  }
   0xb   : > { %vm896_vm0 = vcmask 1040384   ;;  %v2338_v0 = vld [vmem:[%s3263_s1 + $0x14] ss:$0 sps:$4 sm:$0x11]   ;;  %s3267_s13 = smov (!%p161_p3, %s2062_s13), 1  ;;  %v2339_v1 = vld [vmem:[%s3263_s1 + $0xc] sm:$0xff]  }
   0xc   : > { %2322 = vmatprep.subr.msk.bf16.mxu0 %vm896_vm0, %v2338_v0  ;;  %v898_v2 = vsel %vm896_vm0, %v2338_v0, 0  ;;  %2323 = vmatprep.subr.msk.bf16.mxu1 %vm896_vm0, %v2338_v0  ;;  %s2326_s18 = smul.u32 328, %s3267_s13  ;;  %vm442_vm1 = vcmask 48128   ;;  %vm497_vm2 = vcmask 97280   ;;  %vm859_vm3 = vcmask 146432  }
   0xd   : > { %2199 = vmatpush3.bf16.msra.mxu0 %v898_v2  ;;  %2320 = vmatpush3.bf16.msra.mxu1 %v898_v2  ;;  %s2327_s5 = smul.u32 288, %s3267_s13  ;;  %vm1970_vm4 = vcmask 31744  }
   0xe   : > { %2200 = vmatprep.subr.bf16.mxu0 %v2339_v1  ;;  %2319 = vmatprep.subr.bf16.mxu1 %v2339_v1  ;;  %s2397_s21 = scalar_lea.vmem %s3262_s0, %s2326_s18 }
   0xf   : > { %v594_v3 = vld [vmem:[%s2397_s21 + $0x14] sm:$0xff]  ;;  %v595_v4 = vld [vmem:[%s2397_s21 + $0x1c] sm:$0xff]  ;;  %v596_v8 = vld [vmem:[%s2397_s21 + $0x24] sm:$0xff]  ;;  %s3120_s10 = scalar_lea.vmem %s3265_s3, %s2327_s5 }
  0x10   : > { %v540_v5 = vld [vmem:[%s2397_s21 + $0x13] sm:$0xff]  ;;  %v630_v6 = vpack.c.bf16 %v595_v4, %v594_v3  ;;  %v541_v7 = vld [vmem:[%s2397_s21 + $0x1b] sm:$0xff]  ;;  %v542_v11 = vld [vmem:[%s2397_s21 + $0x23] sm:$0xff] }
  0x11   : > { %v597_v9 = vld [vmem:[%s2397_s21 + $0x2c] sm:$0xff]  ;;  %2201 = vmatpush3.bf16.msra.mxu0 %v2339_v1  ;;  %2321 = vmatpush3.bf16.msra.mxu1 %v2339_v1  ;;  %v576_v10 = vpack.c.bf16 %v541_v7, %v540_v5  ;;  %v562_v15 = vld [vmem:[%s2397_s21 + $0xc3] sm:$0xff]  ;;  %v561_v18 = vld [vmem:[%s2397_s21 + $0xbb] sm:$0xff] }
  0x12   : > { %v543_v12 = vld [vmem:[%s2397_s21 + $0x2b] sm:$0xff]  ;;  %720 = vrot.lane.b32.xlu1 %v630_v6, %s2352_s22  ;;  %v631_v13 = vpack.c.bf16 %v597_v9, %v596_v8  ;;  %v560_v17 = vld [vmem:[%s2397_s21 + $0xb3] sm:$0xff]  ;;  %v545_v22 = vld [vmem:[%s2397_s21 + $0x3b] sm:$0xff] }
  0x13   : > { %666 = vrot.lane.b32.xlu0 %v576_v10, %s2353_s23  ;;  %v577_v14 = vpack.c.bf16 %v543_v12, %v542_v11  ;;  %v563_v16 = vld [vmem:[%s2397_s21 + $0xcb] sm:$0xff]  ;;  %v586_v20 = vpack.c.bf16 %v561_v18, %v560_v17  ;;  %v544_v21 = vld [vmem:[%s2397_s21 + $0x33] sm:$0xff]  ;;  %v615_v24 = vld [vmem:[%s2397_s21 + $0xbc] sm:$0xff] }
  0x14   : > { %v587_v19 = vpack.c.bf16 %v563_v16, %v562_v15  ;;  %v614_v23 = vld [vmem:[%s2397_s21 + $0xb4] sm:$0xff]  ;;  %v578_v25 = vpack.c.bf16 %v545_v22, %v544_v21  ;;  %v546_v27 = vld [vmem:[%s2397_s21 + $0x43] sm:$0xff]  ;;  %v547_v28 = vld [vmem:[%s2397_s21 + $0x4b] sm:$0xff] }
  0x15   : > { %v640_v26 = vpack.c.bf16 %v615_v24, %v614_v23  ;;  %v616_v29 = vld [vmem:[%s2397_s21 + $0xc4] sm:$0xff]  ;;  %v617_v30 = vld [vmem:[%s2397_s21 + $0xcc] sm:$0xff]  ;;  %v579_v31 = vpack.c.bf16 %v547_v28, %v546_v27  ;;  %v598_v35 = vld [vmem:[%s2397_s21 + $0x34] sm:$0xff] }
  0x16   : > { %722 = vrot.lane.b32.xlu1 %v631_v13, %s2352_s22  ;;  %v641_v32 = vpack.c.bf16 %v617_v30, %v616_v29  ;;  %v600_v33 = vld [vmem:[%s2397_s21 + $0x44] sm:$0xff]  ;;  %v601_v34 = vld [vmem:[%s2397_s21 + $0x4c] sm:$0xff]  ;;  %v599_v36 = vld [vmem:[%s2397_s21 + $0x3c] sm:$0xff] }
  0x17   : > { %668 = vrot.lane.b32.xlu0 %v577_v14, %s2353_s23  ;;  %v633_v37 = vpack.c.bf16 %v601_v34, %v600_v33  ;;  %v2433_v38 = vpack.c.bf16 %v599_v36, %v598_v35  ;;  %v566_v39 = vld [vmem:[%s2397_s21 + $0xe3] sm:$0xff]  ;;  %v567_v40 = vld [vmem:[%s2397_s21 + $0xeb] sm:$0xff]  ;;  %v564_v41 = vld [vmem:[%s2397_s21 + $0xd3] sm:$0xff] }
  0x18   : > { %v565_v42 = vld [vmem:[%s2397_s21 + $0xdb] sm:$0xff]  ;;  %v589_v43 = vpack.c.bf16 %v567_v40, %v566_v39  ;;  %v548_v45 = vld [vmem:[%s2397_s21 + $0x53] sm:$0xff]  ;;  %v550_v51 = vld [vmem:[%s2397_s21 + $0x63] sm:$0xff] }
  0x19   : > { %v588_v44 = vpack.c.bf16 %v565_v42, %v564_v41  ;;  %v549_v46 = vld [vmem:[%s2397_s21 + $0x5b] sm:$0xff]  ;;  %v551_v52 = vld [vmem:[%s2397_s21 + $0x6b] sm:$0xff]  ;;  %v570_v63 = vld [vmem:[%s2397_s21 + $0x103] sm:$0xff] }
  0x1a   : > { %688 = vrot.lane.b32.xlu1 %v587_v19, %s2353_s23  ;;  %v618_v47 = vld [vmem:[%s2397_s21 + $0xd4] sm:$0xff]  ;;  %v619_v48 = vld [vmem:[%s2397_s21 + $0xdc] sm:$0xff]  ;;  %v580_v49 = vpack.c.bf16 %v549_v46, %v548_v45  ;;  %v620_v53 = vld [vmem:[%s2397_s21 + $0xe4] sm:$0xff]  ;;  %v581_v55 = vpack.c.bf16 %v551_v52, %v550_v51 }
  0x1b   : > { %686 = vrot.lane.b32.xlu0 %v586_v20, %s2353_s23  ;;  %v642_v50 = vpack.c.bf16 %v619_v48, %v618_v47  ;;  %v621_v54 = vld [vmem:[%s2397_s21 + $0xec] sm:$0xff]  ;;  %v604_v57 = vld [vmem:[%s2397_s21 + $0x64] sm:$0xff]  ;;  %v602_v59 = vld [vmem:[%s2397_s21 + $0x54] sm:$0xff] }
  0x1c   : > { %v643_v56 = vpack.c.bf16 %v621_v54, %v620_v53  ;;  %v605_v58 = vld [vmem:[%s2397_s21 + $0x6c] sm:$0xff]  ;;  %v603_v60 = vld [vmem:[%s2397_s21 + $0x5c] sm:$0xff]  ;;  %v622_v7 = vld [vmem:[%s2397_s21 + $0xf4] sm:$0xff] }
  0x1d   : > { %v635_v61 = vpack.c.bf16 %v605_v58, %v604_v57  ;;  %v634_v62 = vpack.c.bf16 %v603_v60, %v602_v59  ;;  %v571_v0 = vld [vmem:[%s2397_s21 + $0x10b] sm:$0xff]  ;;  %v568_v1 = vld [vmem:[%s2397_s21 + $0xf3] sm:$0xff]  ;;  %v569_v2 = vld [vmem:[%s2397_s21 + $0xfb] sm:$0xff] }
  0x1e   : > { %670 = vrot.lane.b32.xlu1 %v578_v25, %s2353_s23  ;;  %v591_v3 = vpack.c.bf16 %v571_v0, %v570_v63  ;;  %v590_v4 = vpack.c.bf16 %v569_v2, %v568_v1  ;;  %v552_v5 = vld [vmem:[%s2397_s21 + $0x73] sm:$0xff]  ;;  %v553_v6 = vld [vmem:[%s2397_s21 + $0x7b] sm:$0xff]  ;;  %v554_v11 = vld [vmem:[%s2397_s21 + $0x83] sm:$0xff] }
  0x1f   : > { %740 = vrot.lane.b32.xlu0 %v640_v26, %s2352_s22  ;;  %v623_v8 = vld [vmem:[%s2397_s21 + $0xfc] sm:$0xff]  ;;  %v582_v9 = vpack.c.bf16 %v553_v6, %v552_v5  ;;  %v555_v12 = vld [vmem:[%s2397_s21 + $0x8b] sm:$0xff]  ;;  %v606_v19 = vld [vmem:[%s2397_s21 + $0x74] sm:$0xff] }
  0x20   : > { %v644_v10 = vpack.c.bf16 %v623_v8, %v622_v7  ;;  %v624_v13 = vld [vmem:[%s2397_s21 + $0x104] sm:$0xff]  ;;  %v625_v14 = vld [vmem:[%s2397_s21 + $0x10c] sm:$0xff]  ;;  %v583_v15 = vpack.c.bf16 %v555_v12, %v554_v11  ;;  %v607_v20 = vld [vmem:[%s2397_s21 + $0x7c] sm:$0xff] }
  0x21   : > { %v645_v16 = vpack.c.bf16 %v625_v14, %v624_v13  ;;  %v608_v17 = vld [vmem:[%s2397_s21 + $0x84] sm:$0xff]  ;;  %v609_v18 = vld [vmem:[%s2397_s21 + $0x8c] sm:$0xff]  ;;  %v636_v22 = vpack.c.bf16 %v607_v20, %v606_v19  ;;  %v573_v26 = vld [vmem:[%s2397_s21 + $0x11b] sm:$0xff] }
  0x22   : > { %672 = vrot.lane.b32.xlu1 %v579_v31, %s2353_s23  ;;  %v637_v21 = vpack.c.bf16 %v609_v18, %v608_v17  ;;  %v574_v23 = vld [vmem:[%s2397_s21 + $0x123] sm:$0xff]  ;;  %v575_v24 = vld [vmem:[%s2397_s21 + $0x12b] sm:$0xff]  ;;  %v572_v25 = vld [vmem:[%s2397_s21 + $0x113] sm:$0xff] }
  0x23   : > { %742 = vrot.lane.b32.xlu0 %v641_v32, %s2352_s22  ;;  %v593_v27 = vpack.c.bf16 %v575_v24, %v574_v23  ;;  %v592_v28 = vpack.c.bf16 %v573_v26, %v572_v25  ;;  %v556_v29 = vld [vmem:[%s2397_s21 + $0x93] sm:$0xff]  ;;  %v557_v30 = vld [vmem:[%s2397_s21 + $0x9b] sm:$0xff]  ;;  %v558_v35 = vld [vmem:[%s2397_s21 + $0xa3] sm:$0xff] }
  0x24   : > { %v626_v31 = vld [vmem:[%s2397_s21 + $0x114] sm:$0xff]  ;;  %v627_v32 = vld [vmem:[%s2397_s21 + $0x11c] sm:$0xff]  ;;  %v584_v33 = vpack.c.bf16 %v557_v30, %v556_v29  ;;  %v559_v36 = vld [vmem:[%s2397_s21 + $0xab] sm:$0xff] }
  0x25   : > { %v646_v34 = vpack.c.bf16 %v627_v32, %v626_v31  ;;  %v629_v39 = vld [vmem:[%s2397_s21 + $0x12c] sm:$0xff]  ;;  %v585_v40 = vpack.c.bf16 %v559_v36, %v558_v35  ;;  %v612_v42 = vld [vmem:[%s2397_s21 + $0xa4] sm:$0xff]  ;;  %v611_v45 = vld [vmem:[%s2397_s21 + $0x9c] sm:$0xff] }
  0x26   : > { %726 = vrot.lane.b32.xlu1 %v633_v37, %s2352_s22  ;;  %v628_v37 = vld [vmem:[%s2397_s21 + $0x124] sm:$0xff]  ;;  %v2522_v53 = vld [vmem:[%s3263_s1 + $0x20] ss:$0 sps:$4 sm:$0x11]   ;;  %v1357_v1 = vld [vmem:[%s2397_s21 + $0x2d] sm:$0xff] }
  0x27   : > { %724 = vrot.lane.b32.xlu0 %v2433_v38, %s2352_s22  ;;  %v647_v41 = vpack.c.bf16 %v629_v39, %v628_v37  ;;  %v2509_v46 = vld [vmem:[%s3263_s1 + $0x8] ss:$0 sps:$4 sm:$0x11]   ;;  %v227_v52 = vld [vmem:[%s2397_s21 + $0x9] sm:$0xff]  ;;  %2325 = vmatprep.subr.msk.bf16.mxu0 %vm896_vm0, %v2522_v53  ;;  %v283_v57 = vld [vmem:[%s2397_s21 + $0x1a] sm:$0xff] }
  0x28   : > { %2324 = vmatprep.subr.msk.bf16.mxu1 %vm896_vm0, %v2509_v46  ;;  %v226_v51 = vld [vmem:[%s2397_s21 + $0x1] sm:$0xff]  ;;  %v281_v59 = vld [vmem:[%s2397_s21 + $0xa] sm:$0xff]  ;;  %v233_v11 = vld [vmem:[%s2397_s21 + $0x39] sm:$0xff] }
  0x29   : > { %v280_v58 = vld [vmem:[%s2397_s21 + $0x2] sm:$0xff]  ;;  %v1411_v7 = vld [vmem:[%s2397_s21 + $0x2e] sm:$0xff]  ;;  %v287_v17 = vld [vmem:[%s2397_s21 + $0x3a] sm:$0xff] }
  0x2a   : > { %692 = vrot.lane.b32.xlu1 %v589_v43, %s2353_s23  ;;  %v613_v43 = vld [vmem:[%s2397_s21 + $0xac] sm:$0xff]  ;;  %v1359_v63 = vld [vmem:[%s2397_s21 + $0x3d] sm:$0xff] }
  0x2b   : > { %690 = vrot.lane.b32.xlu0 %v588_v44, %s2353_s23  ;;  %v610_v44 = vld [vmem:[%s2397_s21 + $0x94] sm:$0xff]  ;;  %v639_v47 = vpack.c.bf16 %v613_v43, %v612_v42  ;;  %v1356_v0 = vld [vmem:[%s2397_s21 + $0x25] sm:$0xff]  ;;  %v1363_v23 = vld [vmem:[%s2397_s21 + $0x5d] sm:$0xff] }
  0x2c   : > { %v638_v48 = vpack.c.bf16 %v611_v45, %v610_v44  ;;  %v1413_v5 = vld [vmem:[%s2397_s21 + $0x3e] sm:$0xff]  ;;  %v1410_v6 = vld [vmem:[%s2397_s21 + $0x26] sm:$0xff]  ;;  %v1415_v31 = vld [vmem:[%s2397_s21 + $0x4e] sm:$0xff] }
  0x2d   : > { %v230_v12 = vld [vmem:[%s2397_s21 + $0x21] sm:$0xff]  ;;  %v231_v13 = vld [vmem:[%s2397_s21 + $0x29] sm:$0xff]  ;;  %v237_v35 = vld [vmem:[%s2397_s21 + $0x59] sm:$0xff] }
  0x2e   : > { %674 = vrot.lane.b32.xlu1 %v580_v49, %s2353_s23  ;;  %v228_v49 = vld [vmem:[%s2397_s21 + $0x11] sm:$0xff]  ;;  %v284_v18 = vld [vmem:[%s2397_s21 + $0x22] sm:$0xff]  ;;  %v291_v42 = vld [vmem:[%s2397_s21 + $0x5a] sm:$0xff] }
  0x2f   : > { %744 = vrot.lane.b32.xlu0 %v642_v50, %s2352_s22  ;;  %v229_v50 = vld [vmem:[%s2397_s21 + $0x19] sm:$0xff]  ;;  %v285_v19 = vld [vmem:[%s2397_s21 + $0x2a] sm:$0xff]  ;;  %v234_v36 = vld [vmem:[%s2397_s21 + $0x41] sm:$0xff] }
  0x30   : > { %v263_v54 = vpack.c.bf16 %v229_v50, %v228_v49  ;;  %v1360_v24 = vld [vmem:[%s2397_s21 + $0x45] sm:$0xff]  ;;  %v1361_v25 = vld [vmem:[%s2397_s21 + $0x4d] sm:$0xff]  ;;  %v1367_v49 = vld [vmem:[%s2397_s21 + $0x7d] sm:$0xff] }
  0x31   : > { %v1417_v29 = vld [vmem:[%s2397_s21 + $0x5e] sm:$0xff]  ;;  %v1414_v30 = vld [vmem:[%s2397_s21 + $0x46] sm:$0xff] }
  0x32   : > { %676 = vrot.lane.b32.xlu1 %v581_v55, %s2353_s23  ;;  %v262_v55 = vpack.c.bf16 %v227_v52, %v226_v51  ;;  %v235_v37 = vld [vmem:[%s2397_s21 + $0x49] sm:$0xff] }
  0x33   : > { %746 = vrot.lane.b32.xlu0 %v643_v56, %s2352_s22  ;;  %v282_v56 = vld [vmem:[%s2397_s21 + $0x12] sm:$0xff]  ;;  %v288_v43 = vld [vmem:[%s2397_s21 + $0x42] sm:$0xff]  ;;  %v289_v44 = vld [vmem:[%s2397_s21 + $0x4a] sm:$0xff] }
  0x34   : > { %v2533_v60 = vpack.c.bf16 %v283_v57, %v282_v56  ;;  %v1364_v50 = vld [vmem:[%s2397_s21 + $0x65] sm:$0xff]  ;;  %v1365_v51 = vld [vmem:[%s2397_s21 + $0x6d] sm:$0xff] }
  0x35   : > { %v1421_v56 = vld [vmem:[%s2397_s21 + $0x7e] sm:$0xff]  ;;  %v1418_v57 = vld [vmem:[%s2397_s21 + $0x66] sm:$0xff] }
  0x36   : > { %730 = vrot.lane.b32.xlu1 %v635_v61, %s2352_s22  ;;  %v316_v61 = vpack.c.bf16 %v281_v59, %v280_v58  ;;  %v1419_v58 = vld [vmem:[%s2397_s21 + $0x6e] sm:$0xff] }
  0x37   : > { %728 = vrot.lane.b32.xlu0 %v634_v62, %s2352_s22  ;;  %v1358_v62 = vld [vmem:[%s2397_s21 + $0x35] sm:$0xff] }
  0x38   : > { %v1393_v2 = vpack.c.bf16 %v1359_v63, %v1358_v62  ;;  %v240_v62 = vld [vmem:[%s2397_s21 + $0x71] sm:$0xff]  ;;  %v241_v63 = vld [vmem:[%s2397_s21 + $0x79] sm:$0xff] }
  0x3a   : > { %696 = vrot.lane.b32.xlu1 %v591_v3, %s2353_s23  ;;  %v1392_v3 = vpack.c.bf16 %v1357_v1, %v1356_v0  ;;  %v238_v1 = vld [vmem:[%s2397_s21 + $0x61] sm:$0xff] }
  0x3b   : > { %694 = vrot.lane.b32.xlu0 %v590_v4, %s2353_s23  ;;  %v1412_v4 = vld [vmem:[%s2397_s21 + $0x36] sm:$0xff] }
  0x3c   : > { %v1447_v8 = vpack.c.bf16 %v1413_v5, %v1412_v4  ;;  %v269_v5 = vpack.c.bf16 %v241_v63, %v240_v62  ;;  %v299_v62 = vld [vmem:[%s2397_s21 + $0x9a] sm:$0xff] }
  0x3e   : > { %678 = vrot.lane.b32.xlu1 %v582_v9, %s2353_s23  ;;  %v1446_v9 = vpack.c.bf16 %v1411_v7, %v1410_v6 }
  0x3f   : > { %748 = vrot.lane.b32.xlu0 %v644_v10, %s2352_s22  ;;  %v232_v10 = vld [vmem:[%s2397_s21 + $0x31] sm:$0xff] }
  0x40   : > { %v265_v14 = vpack.c.bf16 %v233_v11, %v232_v10  ;;  %v292_v11 = vld [vmem:[%s2397_s21 + $0x62] sm:$0xff] }
  0x42   : > { %680 = vrot.lane.b32.xlu1 %v583_v15, %s2353_s23  ;;  %v264_v15 = vpack.c.bf16 %v231_v13, %v230_v12  ;;  %v293_v12 = vld [vmem:[%s2397_s21 + $0x6a] sm:$0xff] }
  0x43   : > { %750 = vrot.lane.b32.xlu0 %v645_v16, %s2352_s22  ;;  %v286_v16 = vld [vmem:[%s2397_s21 + $0x32] sm:$0xff] }
  0x44   : > { %v2560_v20 = vpack.c.bf16 %v287_v17, %v286_v16  ;;  %v1712_v17 = vsel %vm896_vm0, %v2522_v53, 0  ;;  %v1369_v53 = vld [vmem:[%s2397_s21 + $0x8d] sm:$0xff] }
  0x46   : > { %734 = vrot.lane.b32.xlu1 %v637_v21, %s2352_s22  ;;  %v2563_v21 = vpack.c.bf16 %v285_v19, %v284_v18  ;;  %v2343_v18 = vld [vmem:[%s3263_s1 + $0x18] sm:$0xff]  }
  0x47   : > { %732 = vrot.lane.b32.xlu0 %v636_v22, %s2352_s22  ;;  %v1362_v22 = vld [vmem:[%s2397_s21 + $0x55] sm:$0xff] }
  0x48   : > { %v1395_v26 = vpack.c.bf16 %v1363_v23, %v1362_v22  ;;  %v1370_v22 = vld [vmem:[%s2397_s21 + $0x95] sm:$0xff]  ;;  %v1371_v23 = vld [vmem:[%s2397_s21 + $0x9d] sm:$0xff] }
  0x4a   : > { %700 = vrot.lane.b32.xlu1 %v593_v27, %s2353_s23  ;;  %v1394_v27 = vpack.c.bf16 %v1361_v25, %v1360_v24  ;;  %v1368_v25 = vld [vmem:[%s2397_s21 + $0x85] sm:$0xff] }
  0x4b   : > { %698 = vrot.lane.b32.xlu0 %v592_v28, %s2353_s23  ;;  %v1416_v28 = vld [vmem:[%s2397_s21 + $0x56] sm:$0xff] }
  0x4c   : > { %v1449_v32 = vpack.c.bf16 %v1417_v29, %v1416_v28  ;;  %v304_v28 = vld [vmem:[%s2397_s21 + $0xc2] sm:$0xff]  ;;  %v305_v29 = vld [vmem:[%s2397_s21 + $0xca] sm:$0xff] }
  0x4e   : > { %682 = vrot.lane.b32.xlu1 %v584_v33, %s2353_s23  ;;  %v1448_v33 = vpack.c.bf16 %v1415_v31, %v1414_v30  ;;  %v1399_v30 = vpack.c.bf16 %v1371_v23, %v1370_v22  ;;  %v1398_v31 = vpack.c.bf16 %v1369_v53, %v1368_v25  ;;  %v1429_v22 = vld [vmem:[%s2397_s21 + $0xbe] sm:$0xff]  ;;  %v1427_v25 = vld [vmem:[%s2397_s21 + $0xae] sm:$0xff] }
  0x4f   : > { %752 = vrot.lane.b32.xlu0 %v646_v34, %s2352_s22  ;;  %v236_v34 = vld [vmem:[%s2397_s21 + $0x51] sm:$0xff] }
  0x50   : > { %v267_v39 = vpack.c.bf16 %v237_v35, %v236_v34  ;;  %v1422_v35 = vld [vmem:[%s2397_s21 + $0x86] sm:$0xff] }
  0x52   : > { %684 = vrot.lane.b32.xlu1 %v585_v40, %s2353_s23  ;;  %v266_v40 = vpack.c.bf16 %v235_v37, %v234_v36  ;;  %v1423_v36 = vld [vmem:[%s2397_s21 + $0x8e] sm:$0xff]  ;;  %v2656_v37 = vpack.c.bf16 %v305_v29, %v304_v28 }
  0x53   : > { %754 = vrot.lane.b32.xlu0 %v647_v41, %s2352_s22  ;;  %v290_v41 = vld [vmem:[%s2397_s21 + $0x52] sm:$0xff] }
  0x54   : > { %v2590_v45 = vpack.c.bf16 %v291_v42, %v290_v41 }
  0x56   : > { %738 = vrot.lane.b32.xlu1 %v639_v47, %s2352_s22  ;;  %v2593_v47 = vpack.c.bf16 %v289_v44, %v288_v43  ;;  %v1452_v43 = vpack.c.bf16 %v1423_v36, %v1422_v35  ;;  %v244_v44 = vld [vmem:[%s2397_s21 + $0x91] sm:$0xff]  ;;  %v246_v35 = vld [vmem:[%s2397_s21 + $0xa1] sm:$0xff]  ;;  %v247_v36 = vld [vmem:[%s2397_s21 + $0xa9] sm:$0xff] }
  0x57   : > { %736 = vrot.lane.b32.xlu0 %v638_v48, %s2352_s22  ;;  %v1366_v48 = vld [vmem:[%s2397_s21 + $0x75] sm:$0xff] }
  0x58   : > { %v1397_v52 = vpack.c.bf16 %v1367_v49, %v1366_v48  ;;  %v245_v48 = vld [vmem:[%s2397_s21 + $0x99] sm:$0xff] }
  0x5a   : > { %354 = vrot.lane.b32.xlu1 %v263_v54, %s2353_s23  ;;  %v1396_v54 = vpack.c.bf16 %v1365_v51, %v1364_v50  ;;  %v242_v50 = vld [vmem:[%s2397_s21 + $0x81] sm:$0xff]  ;;  %v243_v51 = vld [vmem:[%s2397_s21 + $0x89] sm:$0xff] }
  0x5b   : > { %352 = vrot.lane.b32.xlu0 %v262_v55, %s2353_s23  ;;  %v1420_v55 = vld [vmem:[%s2397_s21 + $0x76] sm:$0xff] }
  0x5c   : > { %v1451_v59 = vpack.c.bf16 %v1421_v56, %v1420_v55  ;;  %v1123_v55 = vsel %vm896_vm0, %v2509_v46, 0  ;;  %v2341_v56 = vld [vmem:[%s3263_s1] sm:$0xff]  }
  0x5e   : > { %408 = vrot.lane.b32.xlu1 %v2533_v60, %s2352_s22 }
  0x5f   : > { %406 = vrot.lane.b32.xlu0 %v316_v61, %s2352_s22  ;;  %v1450_v61 = vpack.c.bf16 %v1419_v58, %v1418_v57  ;;  %v271_v58 = vpack.c.bf16 %v245_v48, %v244_v44 }
  0x62   : > { %1484 = vrot.lane.b32.xlu1 %v1393_v2, %s2353_s23  ;;  %v239_v2 = vld [vmem:[%s2397_s21 + $0x69] sm:$0xff] }
  0x63   : > { %1482 = vrot.lane.b32.xlu0 %v1392_v3, %s2353_s23  ;;  %v268_v7 = vpack.c.bf16 %v239_v2, %v238_v1  ;;  %v297_v1 = vld [vmem:[%s2397_s21 + $0x8a] sm:$0xff] }
  0x66   : > { %1538 = vrot.lane.b32.xlu1 %v1447_v8, %s2352_s22  ;;  %v294_v8 = vld [vmem:[%s2397_s21 + $0x72] sm:$0xff] }
  0x67   : > { %1536 = vrot.lane.b32.xlu0 %v1446_v9, %s2352_s22  ;;  %v295_v9 = vld [vmem:[%s2397_s21 + $0x7a] sm:$0xff] }
  0x68   : > { %v2628_v16 = vpack.c.bf16 %v295_v9, %v294_v8  ;;  %v1374_v8 = vld [vmem:[%s2397_s21 + $0xb5] sm:$0xff]  ;;  %v1375_v9 = vld [vmem:[%s2397_s21 + $0xbd] sm:$0xff] }
  0x6a   : > { %358 = vrot.lane.b32.xlu1 %v265_v14, %s2353_s23  ;;  %v302_v14 = vld [vmem:[%s2397_s21 + $0xb2] sm:$0xff] }
  0x6b   : > { %356 = vrot.lane.b32.xlu0 %v264_v15, %s2353_s23  ;;  %v303_v15 = vld [vmem:[%s2397_s21 + $0xba] sm:$0xff] }
  0x6e   : > { %412 = vrot.lane.b32.xlu1 %v2560_v20, %s2352_s22 }
  0x6f   : > { %410 = vrot.lane.b32.xlu0 %v2563_v21, %s2352_s22 }
  0x72   : > { %1488 = vrot.lane.b32.xlu1 %v1395_v26, %s2353_s23 }
  0x73   : > { %1486 = vrot.lane.b32.xlu0 %v1394_v27, %s2353_s23  ;;  %v2644_v27 = vpack.c.bf16 %v303_v15, %v302_v14  ;;  %v308_v14 = vld [vmem:[%s2397_s21 + $0xe2] sm:$0xff]  ;;  %v309_v15 = vld [vmem:[%s2397_s21 + $0xea] sm:$0xff] }
  0x74   : > { %v2715_v53 = vpack.c.bf16 %v309_v15, %v308_v14  ;;  %v252_v14 = vld [vmem:[%s2397_s21 + $0xd1] sm:$0xff]  ;;  %v253_v15 = vld [vmem:[%s2397_s21 + $0xd9] sm:$0xff] }
  0x76   : > { %1542 = vrot.lane.b32.xlu1 %v1449_v32, %s2352_s22  ;;  %v1424_v32 = vld [vmem:[%s2397_s21 + $0x96] sm:$0xff] }
  0x77   : > { %1540 = vrot.lane.b32.xlu0 %v1448_v33, %s2352_s22  ;;  %v1425_v33 = vld [vmem:[%s2397_s21 + $0x9e] sm:$0xff] }
  0x78   : > { %v1453_v42 = vpack.c.bf16 %v1425_v33, %v1424_v32  ;;  %v248_v32 = vld [vmem:[%s2397_s21 + $0xb1] sm:$0xff]  ;;  %v249_v33 = vld [vmem:[%s2397_s21 + $0xb9] sm:$0xff] }
  0x7a   : > { %362 = vrot.lane.b32.xlu1 %v267_v39, %s2353_s23 }
  0x7b   : > { %360 = vrot.lane.b32.xlu0 %v266_v40, %s2353_s23 }
  0x7e   : > { %416 = vrot.lane.b32.xlu1 %v2590_v45, %s2352_s22 }
  0x7f   : > { %414 = vrot.lane.b32.xlu0 %v2593_v47, %s2352_s22 }
  0x82   : > { %1492 = vrot.lane.b32.xlu1 %v1397_v52, %s2353_s23 }
  0x83   : > { %1490 = vrot.lane.b32.xlu0 %v1396_v54, %s2353_s23 }
  0x84   : > { %v721_v0 = vpop.permute.xlu1 %720 }
  0x85   : > { %v667_v3 = vpop.permute.xlu0 %666 }
  0x86   : > { %v758_v4 = vsel %vm442_vm1, %v2533_v60, %v667_v3  ;;  %1546 = vrot.lane.b32.xlu1 %v1451_v59, %s2352_s22  ;;  %v270_v59 = vpack.c.bf16 %v243_v51, %v242_v50  ;;  %v301_v50 = vld [vmem:[%s2397_s21 + $0xaa] sm:$0xff] }
  0x87   : > { %1544 = vrot.lane.b32.xlu0 %v1450_v61, %s2352_s22  ;;  %v811_v6 = vsel %vm497_vm2, %v758_v4, %v721_v0  ;;  %v298_v61 = vld [vmem:[%s2397_s21 + $0x92] sm:$0xff]  ;;  %v296_v0 = vld [vmem:[%s2397_s21 + $0x82] sm:$0xff] }
  0x88   : > { %2202 = vmatprep.mubr.msk.bf16.mxu0 %vm859_vm3, %v811_v6  ;;  %v723_v10 = vpop.permute.xlu1 %722  ;;  %v307_v6 = vld [vmem:[%s2397_s21 + $0xda] sm:$0xff] }
  0x89   : > { %v669_v60 = vpop.permute.xlu0 %668 }
  0x8a   : > { %v761_v13 = vsel %vm442_vm1, %v2563_v21, %v669_v60  ;;  %366 = vrot.lane.b32.xlu1 %v269_v5, %s2353_s23  ;;  %v2637_v21 = vpack.c.bf16 %v293_v12, %v292_v11  ;;  %v1372_v11 = vld [vmem:[%s2397_s21 + $0xa5] sm:$0xff]  ;;  %v1373_v12 = vld [vmem:[%s2397_s21 + $0xad] sm:$0xff] }
  0x8b   : > { %364 = vrot.lane.b32.xlu0 %v268_v7, %s2353_s23  ;;  %v813_v19 = vsel %vm497_vm2, %v761_v13, %v723_v10  ;;  %v2692_v7 = vpack.c.bf16 %v299_v62, %v298_v61  ;;  %v1376_v61 = vld [vmem:[%s2397_s21 + $0xc5] sm:$0xff]  ;;  %v1377_v62 = vld [vmem:[%s2397_s21 + $0xcd] sm:$0xff] }
  0x8c   : > { %2203 = vmatmul.mubr.msk.bf16.vlgmr.msra.gmra.mxu0 %vm859_vm3, %v813_v19  ;;  %v689_v24 = vpop.permute.xlu1 %688  ;;  %v1428_v19 = vld [vmem:[%s2397_s21 + $0xb6] sm:$0xff] }
  0x8d   : > { %v687_v26 = vpop.permute.xlu0 %686  ;;  %2279 = vmatpush3.bf16.msra.mxu0 %v1712_v17  ;;  %v791_v52 = vsel %vm442_vm1, %v2656_v37, %v689_v24  ;;  %v1401_v17 = vpack.c.bf16 %v1375_v9, %v1374_v8  ;;  %v1426_v24 = vld [vmem:[%s2397_s21 + $0xa6] sm:$0xff]  ;;  %v1431_v8 = vld [vmem:[%s2397_s21 + $0xce] sm:$0xff] }
  0x8e   : > { %420 = vrot.lane.b32.xlu1 %v2628_v16, %s2352_s22  ;;  %2280 = vmatprep.subr.bf16.mxu0 %v2343_v18  ;;  %v788_v39 = vsel %vm442_vm1, %v2644_v27, %v687_v26 }
  0x8f   : > { %418 = vrot.lane.b32.xlu0 %v2637_v21, %s2352_s22 }
  0x90   : > { %v671_v34 = vpop.permute.xlu1 %670 }
  0x91   : > { %v741_v40 = vpop.permute.xlu0 %740  ;;  %2281 = vmatpush3.bf16.msra.mxu0 %v2343_v18  ;;  %v764_v2 = vsel %vm442_vm1, %v2560_v20, %v671_v34  ;;  %v2696_v20 = vpack.c.bf16 %v297_v1, %v296_v0  ;;  %v1400_v18 = vpack.c.bf16 %v1373_v12, %v1372_v11  ;;  %v312_v0 = vld [vmem:[%s2397_s21 + $0x102] sm:$0xff]  ;;  %v313_v1 = vld [vmem:[%s2397_s21 + $0x10a] sm:$0xff] }
  0x92   : > { %v831_v41 = vsel %vm497_vm2, %v788_v39, %v741_v40  ;;  %1496 = vrot.lane.b32.xlu1 %v1399_v30, %s2353_s23  ;;  %v1455_v30 = vpack.c.bf16 %v1429_v22, %v1428_v19  ;;  %v2765_v9 = vpack.c.bf16 %v313_v1, %v312_v0  ;;  %v251_v19 = vld [vmem:[%s2397_s21 + $0xc9] sm:$0xff] }
  0x93   : > { %2222 = vmatprep.mubr.msk.bf16.mxu1 %vm859_vm3, %v831_v41  ;;  %1494 = vrot.lane.b32.xlu0 %v1398_v31, %s2353_s23  ;;  %v1454_v31 = vpack.c.bf16 %v1427_v25, %v1426_v24  ;;  %v275_v25 = vpack.c.bf16 %v253_v15, %v252_v14  ;;  %v255_v0 = vld [vmem:[%s2397_s21 + $0xe9] sm:$0xff]  ;;  %v172_v14 = vld [vmem:[%s2397_s21] sm:$0xff] }
  0x94   : > { %v673_v49 = vpop.permute.xlu1 %672  ;;  %v173_v15 = vld [vmem:[%s2397_s21 + $0x8] sm:$0xff] }
  0x95   : > { %v743_v54 = vpop.permute.xlu0 %742  ;;  %v767_v46 = vsel %vm442_vm1, %v2593_v47, %v673_v49  ;;  %v306_v47 = vld [vmem:[%s2397_s21 + $0xd2] sm:$0xff]  ;;  %v300_v49 = vld [vmem:[%s2397_s21 + $0xa2] sm:$0xff] }
  0x96   : > { %v833_v57 = vsel %vm497_vm2, %v791_v52, %v743_v54  ;;  %1550 = vrot.lane.b32.xlu1 %v1453_v42, %s2352_s22  ;;  %v2703_v13 = vpack.c.bf16 %v307_v6, %v306_v47  ;;  %v273_v42 = vpack.c.bf16 %v249_v33, %v248_v32  ;;  %v1430_v6 = vld [vmem:[%s2397_s21 + $0xc6] sm:$0xff] }
  0x97   : > { %2223 = vmatmul.mubr.msk.bf16.vlgmr.msra.gmra.mxu1 %vm859_vm3, %v833_v57  ;;  %1548 = vrot.lane.b32.xlu0 %v1452_v43, %s2352_s22  ;;  %v272_v43 = vpack.c.bf16 %v247_v36, %v246_v35  ;;  %v311_v57 = vld [vmem:[%s2397_s21 + $0xfa] sm:$0xff] }
  0x98   : > { %v727_v63 = vpop.permute.xlu1 %726  ;;  %2239 = vmatpush3.bf16.msra.mxu1 %v1123_v55  ;;  %v315_v35 = vld [vmem:[%s2397_s21 + $0x11a] sm:$0xff] }
  0x99   : > { %v817_v3 = vsel %vm497_vm2, %v767_v46, %v727_v63  ;;  %v725_v4 = vpop.permute.xlu0 %724  ;;  %2240 = vmatprep.subr.bf16.mxu1 %v2341_v56  ;;  %v1383_v36 = vld [vmem:[%s2397_s21 + $0xfd] sm:$0xff] }
  0x9a   : > { %v815_v5 = vsel %vm497_vm2, %v764_v2, %v725_v4  ;;  %370 = vrot.lane.b32.xlu1 %v271_v58, %s2353_s23  ;;  %v1379_v58 = vld [vmem:[%s2397_s21 + $0xdd] sm:$0xff] }
  0x9b   : > { %2206 = vmatprep.mubr.msk.bf16.mxu0 %vm859_vm3, %v815_v5  ;;  %368 = vrot.lane.b32.xlu0 %v270_v59, %s2353_s23  ;;  %v1432_v4 = vld [vmem:[%s2397_s21 + $0xd6] sm:$0xff]  ;;  %v1433_v5 = vld [vmem:[%s2397_s21 + $0xde] sm:$0xff] }
  0x9c   : > { %2207 = vmatmul.mubr.msk.bf16.gmra.mxu0 %vm859_vm3, %v817_v3  ;;  %v693_v10 = vpop.permute.xlu1 %692  ;;  %2241 = vmatpush3.bf16.msra.mxu1 %v2341_v56  ;;  %v310_v56 = vld [vmem:[%s2397_s21 + $0xf2] sm:$0xff]  ;;  %v1402_v3 = vpack.c.bf16 %v1377_v62, %v1376_v61  ;;  %v1457_v12 = vpack.c.bf16 %v1433_v5, %v1432_v4 }
  0x9d   : > { %v691_v60 = vpop.permute.xlu0 %690  ;;  %v797_v39 = vsel %vm442_vm1, %v2715_v53, %v693_v10  ;;  %v2753_v63 = vpack.c.bf16 %v311_v57, %v310_v56  ;;  %v257_v61 = vld [vmem:[%s2397_s21 + $0xf9] sm:$0xff] }
  0x9e   : > { %424 = vrot.lane.b32.xlu1 %v2692_v7, %s2352_s22  ;;  %v794_v26 = vsel %vm442_vm1, %v2703_v13, %v691_v60  ;;  %v1456_v60 = vpack.c.bf16 %v1431_v8, %v1430_v6 }
  0x9f   : > { %422 = vrot.lane.b32.xlu0 %v2696_v20, %s2352_s22 }
  0xa0   : > { %v675_v23 = vpop.permute.xlu1 %674 }
  0xa1   : > { %v745_v28 = vpop.permute.xlu0 %744  ;;  %v770_v51 = vsel %vm442_vm1, %v2590_v45, %v675_v23  ;;  %v1378_v45 = vld [vmem:[%s2397_s21 + $0xd5] sm:$0xff] }
  0xa2   : > { %v835_v29 = vsel %vm497_vm2, %v794_v26, %v745_v28  ;;  %1500 = vrot.lane.b32.xlu1 %v1401_v17, %s2353_s23  ;;  %v1403_v2 = vpack.c.bf16 %v1379_v58, %v1378_v45 }
  0xa3   : > { %2226 = vmatprep.mubr.msk.bf16.mxu1 %vm859_vm3, %v835_v29  ;;  %1498 = vrot.lane.b32.xlu0 %v1400_v18, %s2353_s23  ;;  %v250_v18 = vld [vmem:[%s2397_s21 + $0xc1] sm:$0xff] }
  0xa4   : > { %v677_v34 = vpop.permute.xlu1 %676  ;;  %v274_v26 = vpack.c.bf16 %v251_v19, %v250_v18  ;;  %v1384_v19 = vld [vmem:[%s2397_s21 + $0x105] sm:$0xff] }
  0xa5   : > { %v747_v40 = vpop.permute.xlu0 %746  ;;  %v773_v44 = vsel %vm442_vm1, %v2637_v21, %v677_v34  ;;  %v2746_v21 = vpack.c.bf16 %v301_v50, %v300_v49  ;;  %v314_v34 = vld [vmem:[%s2397_s21 + $0x112] sm:$0xff] }
  0xa6   : > { %v837_v41 = vsel %vm497_vm2, %v797_v39, %v747_v40  ;;  %1554 = vrot.lane.b32.xlu1 %v1455_v30, %s2352_s22  ;;  %v1380_v39 = vld [vmem:[%s2397_s21 + $0xe5] sm:$0xff]  ;;  %v1381_v40 = vld [vmem:[%s2397_s21 + $0xed] sm:$0xff]  ;;  %v1436_v50 = vld [vmem:[%s2397_s21 + $0xf6] sm:$0xff] }
  0xa7   : > { %2227 = vmatmul.mubr.msk.bf16.gmra.mxu1 %vm859_vm3, %v837_v41  ;;  %1552 = vrot.lane.b32.xlu0 %v1454_v31, %s2352_s22  ;;  %v1404_v49 = vpack.c.bf16 %v1381_v40, %v1380_v39  ;;  %v260_v40 = vld [vmem:[%s2397_s21 + $0x111] sm:$0xff] }
  0xa8   : > { %v731_v48 = vpop.permute.xlu1 %730 }
  0xa9   : > { %v821_v52 = vsel %vm497_vm2, %v773_v44, %v731_v48  ;;  %v729_v54 = vpop.permute.xlu0 %728  ;;  %v538_v44 = vld [vmem:[%s2397_s21 + $0x12a] sm:$0xff] }
  0xaa   : > { %v819_v55 = vsel %vm497_vm2, %v770_v51, %v729_v54  ;;  %374 = vrot.lane.b32.xlu1 %v273_v42, %s2353_s23  ;;  %v2799_v42 = vpack.c.bf16 %v315_v35, %v314_v34  ;;  %v1437_v51 = vld [vmem:[%s2397_s21 + $0xfe] sm:$0xff]  ;;  %v1434_v54 = vld [vmem:[%s2397_s21 + $0xe6] sm:$0xff] }
  0xab   : > { %2210 = vmatprep.mubr.msk.bf16.mxu0 %vm859_vm3, %v819_v55  ;;  %372 = vrot.lane.b32.xlu0 %v272_v43, %s2353_s23  ;;  %v537_v43 = vld [vmem:[%s2397_s21 + $0x122] sm:$0xff]  ;;  %v1435_v55 = vld [vmem:[%s2397_s21 + $0xee] sm:$0xff] }
  0xac   : > { %2211 = vmatmul.mubr.msk.bf16.gmra.mxu0 %vm859_vm3, %v821_v52  ;;  %v697_v59 = vpop.permute.xlu1 %696  ;;  %v539_v56 = vpack.c.bf16 %v538_v44, %v537_v43  ;;  %v1458_v58 = vpack.c.bf16 %v1435_v55, %v1434_v54  ;;  %v258_v44 = vld [vmem:[%s2397_s21 + $0x101] sm:$0xff] }
  0xad   : > { %v695_v46 = vpop.permute.xlu0 %694  ;;  %v803_v22 = vsel %vm442_vm1, %v2765_v9, %v697_v59  ;;  %v256_v59 = vld [vmem:[%s2397_s21 + $0xf1] sm:$0xff] }
  0xae   : > { %428 = vrot.lane.b32.xlu1 %v2644_v27, %s2352_s22  ;;  %v800_v10 = vsel %vm442_vm1, %v2753_v63, %v695_v46  ;;  %v254_v46 = vld [vmem:[%s2397_s21 + $0xe1] sm:$0xff]  ;;  %v277_v4 = vpack.c.bf16 %v257_v61, %v256_v59 }
  0xaf   : > { %426 = vrot.lane.b32.xlu0 %v2746_v21, %s2352_s22  ;;  %v276_v5 = vpack.c.bf16 %v255_v0, %v254_v46  ;;  %v176_v59 = vld [vmem:[%s2397_s21 + $0x20] sm:$0xff]  ;;  %v177_v61 = vld [vmem:[%s2397_s21 + $0x28] sm:$0xff] }
  0xb0   : > { %v679_v47 = vpop.permute.xlu1 %678 }
  0xb1   : > { %v749_v27 = vpop.permute.xlu0 %748  ;;  %v776_v30 = vsel %vm442_vm1, %v2628_v16, %v679_v47 }
  0xb2   : > { %v839_v11 = vsel %vm497_vm2, %v800_v10, %v749_v27  ;;  %1504 = vrot.lane.b32.xlu1 %v1403_v2, %s2353_s23 }
  0xb3   : > { %2230 = vmatprep.mubr.msk.bf16.mxu1 %vm859_vm3, %v839_v11  ;;  %1502 = vrot.lane.b32.xlu0 %v1402_v3, %s2353_s23  ;;  %v174_v11 = vld [vmem:[%s2397_s21 + $0x10] sm:$0xff] }
  0xb4   : > { %v681_v17 = vpop.permute.xlu1 %680 }
  0xb5   : > { %v751_v23 = vpop.permute.xlu0 %750  ;;  %v779_v28 = vsel %vm442_vm1, %v2696_v20, %v681_v17  ;;  %v1382_v20 = vld [vmem:[%s2397_s21 + $0xf5] sm:$0xff] }
  0xb6   : > { %v841_v24 = vsel %vm497_vm2, %v803_v22, %v751_v23  ;;  %1558 = vrot.lane.b32.xlu1 %v1457_v12, %s2352_s22  ;;  %v1405_v48 = vpack.c.bf16 %v1383_v36, %v1382_v20  ;;  %v175_v12 = vld [vmem:[%s2397_s21 + $0x18] sm:$0xff]  ;;  %v1385_v22 = vld [vmem:[%s2397_s21 + $0x10d] sm:$0xff] }
  0xb7   : > { %2231 = vmatmul.mubr.msk.bf16.gmra.mxu1 %vm859_vm3, %v841_v24  ;;  %1556 = vrot.lane.b32.xlu0 %v1456_v60, %s2352_s22  ;;  %v209_v18 = vpack.c.bf16 %v175_v12, %v174_v11  ;;  %v208_v24 = vpack.c.bf16 %v173_v15, %v172_v14  ;;  %v1303_v36 = vld [vmem:[%s2397_s21 + $0x2c] sm:$0xff] }
  0xb8   : > { %v735_v29 = vpop.permute.xlu1 %734  ;;  %v1442_v11 = vld [vmem:[%s2397_s21 + $0x126] sm:$0xff]  ;;  %v1443_v12 = vld [vmem:[%s2397_s21 + $0x12e] sm:$0xff] }
  0xb9   : > { %v825_v31 = vsel %vm497_vm2, %v779_v28, %v735_v29  ;;  %v733_v32 = vpop.permute.xlu0 %732  ;;  %v1440_v28 = vld [vmem:[%s2397_s21 + $0x116] sm:$0xff]  ;;  %v1441_v29 = vld [vmem:[%s2397_s21 + $0x11e] sm:$0xff] }
  0xba   : > { %v823_v33 = vsel %vm497_vm2, %v776_v30, %v733_v32  ;;  %378 = vrot.lane.b32.xlu1 %v275_v25, %s2353_s23  ;;  %v1438_v32 = vld [vmem:[%s2397_s21 + $0x106] sm:$0xff] }
  0xbb   : > { %2214 = vmatprep.mubr.msk.bf16.mxu0 %vm859_vm3, %v823_v33  ;;  %376 = vrot.lane.b32.xlu0 %v274_v26, %s2353_s23  ;;  %v1406_v26 = vpack.c.bf16 %v1385_v22, %v1384_v19  ;;  %v1439_v33 = vld [vmem:[%s2397_s21 + $0x10e] sm:$0xff]  ;;  %v1462_v19 = vpack.c.bf16 %v1443_v12, %v1442_v11  ;;  %v1317_v11 = vld [vmem:[%s2397_s21 + $0x9c] sm:$0xff] }
  0xbc   : > { %2215 = vmatmul.mubr.msk.bf16.gmra.mxu0 %vm859_vm3, %v825_v31  ;;  %v701_v16 = vpop.permute.xlu1 %700  ;;  %v1460_v39 = vpack.c.bf16 %v1439_v33, %v1438_v32  ;;  %v182_v32 = vld [vmem:[%s2397_s21 + $0x50] sm:$0xff]  ;;  %v183_v33 = vld [vmem:[%s2397_s21 + $0x58] sm:$0xff] }
  0xbd   : > { %v699_v41 = vpop.permute.xlu0 %698  ;;  %v809_v1 = vsel %vm442_vm1, %v539_v56, %v701_v16  ;;  %v1461_v16 = vpack.c.bf16 %v1441_v29, %v1440_v28 }
  0xbe   : > { %432 = vrot.lane.b32.xlu1 %v2703_v13, %s2352_s22  ;;  %v806_v57 = vsel %vm442_vm1, %v2799_v42, %v699_v41  ;;  %v261_v41 = vld [vmem:[%s2397_s21 + $0x119] sm:$0xff] }
  0xbf   : > { %430 = vrot.lane.b32.xlu0 %v2656_v37, %s2352_s22  ;;  %v1459_v37 = vpack.c.bf16 %v1437_v51, %v1436_v50  ;;  %v279_v51 = vpack.c.bf16 %v261_v41, %v260_v40 }
  0xc0   : > { %v683_v52 = vpop.permute.xlu1 %682 }
  0xc1   : > { %v753_v45 = vpop.permute.xlu0 %752  ;;  %v782_v8 = vsel %vm442_vm1, %v2692_v7, %v683_v52  ;;  %v1386_v7 = vld [vmem:[%s2397_s21 + $0x115] sm:$0xff] }
  0xc2   : > { %v843_v13 = vsel %vm497_vm2, %v806_v57, %v753_v45  ;;  %1508 = vrot.lane.b32.xlu1 %v1405_v48, %s2353_s23  ;;  %v259_v48 = vld [vmem:[%s2397_s21 + $0x109] sm:$0xff] }
  0xc3   : > { %2234 = vmatprep.mubr.msk.bf16.mxu1 %vm859_vm3, %v843_v13  ;;  %1506 = vrot.lane.b32.xlu0 %v1404_v49, %s2353_s23  ;;  %v278_v52 = vpack.c.bf16 %v259_v48, %v258_v44  ;;  %v178_v13 = vld [vmem:[%s2397_s21 + $0x30] sm:$0xff] }
  0xc4   : > { %v685_v62 = vpop.permute.xlu1 %684  ;;  %v1312_v48 = vld [vmem:[%s2397_s21 + $0x74] sm:$0xff] }
  0xc5   : > { %v755_v2 = vpop.permute.xlu0 %754  ;;  %v785_v47 = vsel %vm442_vm1, %v2746_v21, %v685_v62  ;;  %v1387_v21 = vld [vmem:[%s2397_s21 + $0x11d] sm:$0xff] }
  0xc6   : > { %v845_v3 = vsel %vm497_vm2, %v809_v1, %v755_v2  ;;  %1562 = vrot.lane.b32.xlu1 %v1459_v37, %s2352_s22  ;;  %v1407_v25 = vpack.c.bf16 %v1387_v21, %v1386_v7  ;;  %v179_v37 = vld [vmem:[%s2397_s21 + $0x38] sm:$0xff]  ;;  %v1388_v1 = vld [vmem:[%s2397_s21 + $0x125] sm:$0xff]  ;;  %v1389_v2 = vld [vmem:[%s2397_s21 + $0x12d] sm:$0xff] }
  0xc7   : > { %2235 = vmatmul.mubr.msk.bf16.gmra.mxu1 %vm859_vm3, %v845_v3  ;;  %1560 = vrot.lane.b32.xlu0 %v1458_v58, %s2352_s22  ;;  %v1391_v62 = vld [vmem:[%s2397_s21 + $0x13d] sm:$0xff]  ;;  %v211_v0 = vpack.c.bf16 %v179_v37, %v178_v13 }
  0xc8   : > { %v739_v6 = vpop.permute.xlu1 %738  ;;  %v1309_v7 = vld [vmem:[%s2397_s21 + $0x5c] sm:$0xff] }
  0xc9   : > { %v829_v10 = vsel %vm497_vm2, %v785_v47, %v739_v6  ;;  %v737_v27 = vpop.permute.xlu0 %736  ;;  %v1408_v47 = vpack.c.bf16 %v1389_v2, %v1388_v1  ;;  %v1444_v6 = vld [vmem:[%s2397_s21 + $0x136] sm:$0xff] }
  0xca   : > { %v827_v60 = vsel %vm497_vm2, %v782_v8, %v737_v27  ;;  %382 = vrot.lane.b32.xlu1 %v277_v4, %s2353_s23  ;;  %v210_v4 = vpack.c.bf16 %v177_v61, %v176_v59  ;;  %v1445_v8 = vld [vmem:[%s2397_s21 + $0x13e] sm:$0xff]  ;;  %v186_v61 = vld [vmem:[%s2397_s21 + $0x70] sm:$0xff] }
  0xcb   : > { %2218 = vmatprep.mubr.msk.bf16.mxu0 %vm859_vm3, %v827_v60  ;;  %380 = vrot.lane.b32.xlu0 %v276_v5, %s2353_s23 }
  0xcc   : > { %2219 = vmatmul.mubr.msk.bf16.gmra.mxu0 %vm859_vm3, %v829_v10  ;;  %v355_v17 = vpop.permute.xlu1 %354 }
  0xcd   : > { %v353_v23 = vpop.permute.xlu0 %352  ;;  %v448_v30 = vsel %vm442_vm1, %v209_v18, %v355_v17  ;;  %v1307_v17 = vld [vmem:[%s2397_s21 + $0x4c] sm:$0xff]  ;;  %v1463_v18 = vpack.c.bf16 %v1445_v8, %v1444_v6 }
  0xce   : > { %436 = vrot.lane.b32.xlu1 %v2753_v63, %s2352_s22  ;;  %v445_v34 = vsel %vm442_vm1, %v208_v24, %v353_v23 }
  0xcf   : > { %434 = vrot.lane.b32.xlu0 %v2715_v53, %s2352_s22  ;;  %v1302_v53 = vld [vmem:[%s2397_s21 + $0x24] sm:$0xff] }
  0xd0   : > { %v409_v31 = vpop.permute.xlu1 %408  ;;  %v1338_v49 = vpack.c.bf16 %v1303_v36, %v1302_v53  ;;  %v213_v53 = vpack.c.bf16 %v183_v33, %v182_v32 }
  0xd1   : > { %v501_v63 = vsel %vm497_vm2, %v448_v30, %v409_v31  ;;  %v407_v35 = vpop.permute.xlu0 %406 }
  0xd2   : > { %v499_v20 = vsel %vm497_vm2, %v445_v34, %v407_v35  ;;  %1512 = vrot.lane.b32.xlu1 %v1407_v25, %s2353_s23  ;;  %v181_v35 = vld [vmem:[%s2397_s21 + $0x48] sm:$0xff] }
  0xd3   : > { %1510 = vrot.lane.b32.xlu0 %v1406_v26, %s2353_s23  ;;  %2242 = vmatprep.mubr.msk.bf16.mxu1 %vm859_vm3, %v499_v20 }
  0xd4   : > { %2243 = vmatmul.mubr.msk.bf16.vlgmr.msra.gmra.mxu1 %vm859_vm3, %v501_v63  ;;  %v1485_v43 = vpop.permute.xlu1 %1484  ;;  %v180_v63 = vld [vmem:[%s2397_s21 + $0x40] sm:$0xff] }
  0xd5   : > { %v1483_v50 = vpop.permute.xlu0 %1482  ;;  %v1577_v54 = vsel %vm442_vm1, %v2433_v38, %v1485_v43  ;;  %v1390_v38 = vld [vmem:[%s2397_s21 + $0x135] sm:$0xff] }
  0xd6   : > { %1566 = vrot.lane.b32.xlu1 %v1461_v16, %s2352_s22  ;;  %v1574_v56 = vsel %vm442_vm1, %v1338_v49, %v1483_v50  ;;  %v1409_v5 = vpack.c.bf16 %v1391_v62, %v1390_v38  ;;  %v212_v16 = vpack.c.bf16 %v181_v35, %v180_v63  ;;  %v1313_v49 = vld [vmem:[%s2397_s21 + $0x7c] sm:$0xff] }
  0xd7   : > { %1564 = vrot.lane.b32.xlu0 %v1460_v39, %s2352_s22  ;;  %v187_v38 = vld [vmem:[%s2397_s21 + $0x78] sm:$0xff] }
  0xd8   : > { %v1539_v55 = vpop.permute.xlu1 %1538  ;;  %v215_v2 = vpack.c.bf16 %v187_v38, %v186_v61 }
  0xd9   : > { %v1629_v57 = vsel %vm497_vm2, %v1577_v54, %v1539_v55  ;;  %v1537_v45 = vpop.permute.xlu0 %1536  ;;  %v1343_v54 = vpack.c.bf16 %v1313_v49, %v1312_v48 }
  0xda   : > { %v1627_v58 = vsel %vm497_vm2, %v1574_v56, %v1537_v45  ;;  %386 = vrot.lane.b32.xlu1 %v279_v51, %s2353_s23  ;;  %v1310_v51 = vld [vmem:[%s2397_s21 + $0x64] sm:$0xff] }
  0xdb   : > { %384 = vrot.lane.b32.xlu0 %v278_v52, %s2353_s23  ;;  %2282 = vmatprep.mubr.msk.bf16.mxu0 %vm859_vm3, %v1627_v58  ;;  %v1311_v52 = vld [vmem:[%s2397_s21 + $0x6c] sm:$0xff] }
  0xdc   : > { %2283 = vmatmul.mubr.msk.bf16.vlgmr.msra.gmra.mxu0 %vm859_vm3, %v1629_v57  ;;  %v359_v46 = vpop.permute.xlu1 %358  ;;  %v1342_v56 = vpack.c.bf16 %v1311_v52, %v1310_v51 }
  0xdd   : > { %v357_v3 = vpop.permute.xlu0 %356  ;;  %v454_v10 = vsel %vm442_vm1, %v211_v0, %v359_v46  ;;  %v184_v46 = vld [vmem:[%s2397_s21 + $0x60] sm:$0xff]  ;;  %v185_v0 = vld [vmem:[%s2397_s21 + $0x68] sm:$0xff] }
  0xde   : > { %440 = vrot.lane.b32.xlu1 %v2799_v42, %s2352_s22  ;;  %v451_v60 = vsel %vm442_vm1, %v210_v4, %v357_v3  ;;  %v1308_v42 = vld [vmem:[%s2397_s21 + $0x54] sm:$0xff]  ;;  %v214_v4 = vpack.c.bf16 %v185_v0, %v184_v46 }
  0xdf   : > { %438 = vrot.lane.b32.xlu0 %v2765_v9, %s2352_s22  ;;  %v1306_v9 = vld [vmem:[%s2397_s21 + $0x44] sm:$0xff]  ;;  %v1341_v22 = vpack.c.bf16 %v1309_v7, %v1308_v42 }
  0xe0   : > { %v413_v27 = vpop.permute.xlu1 %412  ;;  %v1340_v24 = vpack.c.bf16 %v1307_v17, %v1306_v9 }
  0xe1   : > { %v505_v14 = vsel %vm497_vm2, %v454_v10, %v413_v27  ;;  %v411_v15 = vpop.permute.xlu0 %410  ;;  %v1316_v27 = vld [vmem:[%s2397_s21 + $0x94] sm:$0xff] }
  0xe2   : > { %v503_v21 = vsel %vm497_vm2, %v451_v60, %v411_v15  ;;  %1516 = vrot.lane.b32.xlu1 %v1409_v5, %s2353_s23  ;;  %v1314_v60 = vld [vmem:[%s2397_s21 + $0x84] sm:$0xff]  ;;  %v1345_v15 = vpack.c.bf16 %v1317_v11, %v1316_v27 }
  0xe3   : > { %1514 = vrot.lane.b32.xlu0 %v1408_v47, %s2353_s23  ;;  %2246 = vmatprep.mubr.msk.bf16.mxu1 %vm859_vm3, %v503_v21 }
  0xe4   : > { %2247 = vmatmul.mubr.msk.bf16.gmra.mxu1 %vm859_vm3, %v505_v14  ;;  %v1489_v23 = vpop.permute.xlu1 %1488  ;;  %v1315_v14 = vld [vmem:[%s2397_s21 + $0x8c] sm:$0xff] }
  0xe5   : > { %v1487_v25 = vpop.permute.xlu0 %1486  ;;  %v1583_v26 = vsel %vm442_vm1, %v1341_v22, %v1489_v23  ;;  %v1344_v7 = vpack.c.bf16 %v1315_v14, %v1314_v60  ;;  %v190_v23 = vld [vmem:[%s2397_s21 + $0x90] sm:$0xff] }
  0xe6   : > { %1570 = vrot.lane.b32.xlu1 %v1463_v18, %s2352_s22  ;;  %v1580_v29 = vsel %vm442_vm1, %v1340_v24, %v1487_v25  ;;  %v191_v24 = vld [vmem:[%s2397_s21 + $0x98] sm:$0xff] }
  0xe7   : > { %1568 = vrot.lane.b32.xlu0 %v1462_v19, %s2352_s22 }
  0xe8   : > { %v1543_v28 = vpop.permute.xlu1 %1542 }
  0xe9   : > { %v1633_v30 = vsel %vm497_vm2, %v1583_v26, %v1543_v28  ;;  %v1541_v31 = vpop.permute.xlu0 %1540  ;;  %v188_v26 = vld [vmem:[%s2397_s21 + $0x80] sm:$0xff]  ;;  %v189_v28 = vld [vmem:[%s2397_s21 + $0x88] sm:$0xff] }
  0xea   : > { %v1631_v34 = vsel %vm497_vm2, %v1580_v29, %v1541_v31  ;;  %v216_v32 = vpack.c.bf16 %v189_v28, %v188_v26 }
  0xeb   : > { %2286 = vmatprep.mubr.msk.bf16.mxu0 %vm859_vm3, %v1631_v34 }
  0xec   : > { %2287 = vmatmul.mubr.msk.bf16.gmra.mxu0 %vm859_vm3, %v1633_v30  ;;  %v363_v20 = vpop.permute.xlu1 %362  ;;  %v217_v30 = vpack.c.bf16 %v191_v24, %v190_v23 }
  0xed   : > { %v361_v36 = vpop.permute.xlu0 %360  ;;  %v460_v39 = vsel %vm442_vm1, %v213_v53, %v363_v20  ;;  %v1320_v53 = vld [vmem:[%s2397_s21 + $0xb4] sm:$0xff] }
  0xee   : > { %v457_v41 = vsel %vm442_vm1, %v212_v16, %v361_v36  ;;  %v1321_v36 = vld [vmem:[%s2397_s21 + $0xbc] sm:$0xff] }
  0xf0   : > { %v417_v40 = vpop.permute.xlu1 %416 }
  0xf1   : > { %v509_v43 = vsel %vm497_vm2, %v460_v39, %v417_v40  ;;  %v415_v44 = vpop.permute.xlu0 %414  ;;  %v1318_v39 = vld [vmem:[%s2397_s21 + $0xa4] sm:$0xff]  ;;  %v1319_v40 = vld [vmem:[%s2397_s21 + $0xac] sm:$0xff] }
  0xf2   : > { %v507_v50 = vsel %vm497_vm2, %v457_v41, %v415_v44  ;;  %v1347_v41 = vpack.c.bf16 %v1321_v36, %v1320_v53  ;;  %v1346_v44 = vpack.c.bf16 %v1319_v40, %v1318_v39 }
  0xf3   : > { %2250 = vmatprep.mubr.msk.bf16.mxu1 %vm859_vm3, %v507_v50 }
  0xf4   : > { %2251 = vmatmul.mubr.msk.bf16.gmra.mxu1 %vm859_vm3, %v509_v43  ;;  %v1493_v55 = vpop.permute.xlu1 %1492 }
  0xf5   : > { %v1491_v57 = vpop.permute.xlu0 %1490  ;;  %v1589_v45 = vsel %vm442_vm1, %v1343_v54, %v1493_v55  ;;  %v194_v55 = vld [vmem:[%s2397_s21 + $0xb0] sm:$0xff] }
  0xf6   : > { %v1586_v37 = vsel %vm442_vm1, %v1342_v56, %v1491_v57  ;;  %v195_v56 = vld [vmem:[%s2397_s21 + $0xb8] sm:$0xff] }
  0xf8   : > { %v1547_v13 = vpop.permute.xlu1 %1546 }
  0xf9   : > { %v1637_v58 = vsel %vm497_vm2, %v1589_v45, %v1547_v13  ;;  %v1545_v59 = vpop.permute.xlu0 %1544  ;;  %v192_v45 = vld [vmem:[%s2397_s21 + $0xa0] sm:$0xff]  ;;  %v193_v13 = vld [vmem:[%s2397_s21 + $0xa8] sm:$0xff] }
  0xfa   : > { %v1635_v62 = vsel %vm497_vm2, %v1586_v37, %v1545_v59  ;;  %v218_v61 = vpack.c.bf16 %v193_v13, %v192_v45 }
  0xfb   : > { %2290 = vmatprep.mubr.msk.bf16.mxu0 %vm859_vm3, %v1635_v62 }
  0xfc   : > { %2291 = vmatmul.mubr.msk.bf16.gmra.mxu0 %vm859_vm3, %v1637_v58  ;;  %v367_v1 = vpop.permute.xlu1 %366  ;;  %v219_v58 = vpack.c.bf16 %v195_v56, %v194_v55 }
  0xfd   : > { %v365_v3 = vpop.permute.xlu0 %364  ;;  %v466_v5 = vsel %vm442_vm1, %v215_v2, %v367_v1  ;;  %v1324_v2 = vld [vmem:[%s2397_s21 + $0xd4] sm:$0xff] }
  0xfe   : > { %v463_v6 = vsel %vm442_vm1, %v214_v4, %v365_v3  ;;  %v1325_v3 = vld [vmem:[%s2397_s21 + $0xdc] sm:$0xff] }
 0x100   : > { %v421_v47 = vpop.permute.xlu1 %420 }
 0x101   : > { %v513_v8 = vsel %vm497_vm2, %v466_v5, %v421_v47  ;;  %v419_v10 = vpop.permute.xlu0 %418  ;;  %v1322_v5 = vld [vmem:[%s2397_s21 + $0xc4] sm:$0xff]  ;;  %v1323_v47 = vld [vmem:[%s2397_s21 + $0xcc] sm:$0xff] }
 0x102   : > { %v511_v12 = vsel %vm497_vm2, %v463_v6, %v419_v10  ;;  %v1349_v6 = vpack.c.bf16 %v1325_v3, %v1324_v2  ;;  %v1348_v10 = vpack.c.bf16 %v1323_v47, %v1322_v5 }
 0x103   : > { %2254 = vmatprep.mubr.msk.bf16.mxu1 %vm859_vm3, %v511_v12 }
 0x104   : > { %2255 = vmatmul.mubr.msk.bf16.gmra.mxu1 %vm859_vm3, %v513_v8  ;;  %v1497_v42 = vpop.permute.xlu1 %1496 }
 0x105   : > { %v1495_v21 = vpop.permute.xlu0 %1494  ;;  %v1595_v9 = vsel %vm442_vm1, %v1345_v15, %v1497_v42  ;;  %v198_v42 = vld [vmem:[%s2397_s21 + $0xd0] sm:$0xff] }
 0x106   : > { %v1592_v18 = vsel %vm442_vm1, %v1344_v7, %v1495_v21  ;;  %v199_v7 = vld [vmem:[%s2397_s21 + $0xd8] sm:$0xff] }
 0x108   : > { %v1551_v17 = vpop.permute.xlu1 %1550 }
 0x109   : > { %v1641_v19 = vsel %vm497_vm2, %v1595_v9, %v1551_v17  ;;  %v1549_v22 = vpop.permute.xlu0 %1548  ;;  %v196_v9 = vld [vmem:[%s2397_s21 + $0xc0] sm:$0xff]  ;;  %v197_v17 = vld [vmem:[%s2397_s21 + $0xc8] sm:$0xff] }
 0x10a   : > { %v1639_v25 = vsel %vm497_vm2, %v1592_v18, %v1549_v22  ;;  %v220_v23 = vpack.c.bf16 %v197_v17, %v196_v9 }
 0x10b   : > { %2294 = vmatprep.mubr.msk.bf16.mxu0 %vm859_vm3, %v1639_v25 }
 0x10c   : > { %2295 = vmatmul.mubr.msk.bf16.gmra.mxu0 %vm859_vm3, %v1641_v19  ;;  %v371_v29 = vpop.permute.xlu1 %370  ;;  %v221_v19 = vpack.c.bf16 %v199_v7, %v198_v42 }
 0x10d   : > { %v369_v31 = vpop.permute.xlu0 %368  ;;  %v472_v33 = vsel %vm442_vm1, %v217_v30, %v371_v29  ;;  %v1328_v30 = vld [vmem:[%s2397_s21 + $0xf4] sm:$0xff] }
 0x10e   : > { %v469_v63 = vsel %vm442_vm1, %v216_v32, %v369_v31  ;;  %v1329_v31 = vld [vmem:[%s2397_s21 + $0xfc] sm:$0xff] }
 0x110   : > { %v425_v34 = vpop.permute.xlu1 %424 }
 0x111   : > { %v517_v35 = vsel %vm497_vm2, %v472_v33, %v425_v34  ;;  %v423_v20 = vpop.permute.xlu0 %422  ;;  %v1326_v33 = vld [vmem:[%s2397_s21 + $0xe4] sm:$0xff]  ;;  %v1327_v34 = vld [vmem:[%s2397_s21 + $0xec] sm:$0xff] }
 0x112   : > { %v515_v16 = vsel %vm497_vm2, %v469_v63, %v423_v20  ;;  %v1351_v63 = vpack.c.bf16 %v1329_v31, %v1328_v30  ;;  %v1350_v20 = vpack.c.bf16 %v1327_v34, %v1326_v33 }
 0x113   : > { %2258 = vmatprep.mubr.msk.bf16.mxu1 %vm859_vm3, %v515_v16 }
 0x114   : > { %2259 = vmatmul.mubr.msk.bf16.gmra.mxu1 %vm859_vm3, %v517_v35  ;;  %v1501_v43 = vpop.permute.xlu1 %1500 }
 0x115   : > { %v1499_v48 = vpop.permute.xlu0 %1498  ;;  %v1601_v49 = vsel %vm442_vm1, %v1347_v41, %v1501_v43  ;;  %v202_v43 = vld [vmem:[%s2397_s21 + $0xf0] sm:$0xff] }
 0x116   : > { %v1598_v51 = vsel %vm442_vm1, %v1346_v44, %v1499_v48  ;;  %v203_v44 = vld [vmem:[%s2397_s21 + $0xf8] sm:$0xff] }
 0x118   : > { %v1555_v50 = vpop.permute.xlu1 %1554 }
 0x119   : > { %v1645_v52 = vsel %vm497_vm2, %v1601_v49, %v1555_v50  ;;  %v1553_v54 = vpop.permute.xlu0 %1552  ;;  %v200_v49 = vld [vmem:[%s2397_s21 + $0xe0] sm:$0xff]  ;;  %v201_v50 = vld [vmem:[%s2397_s21 + $0xe8] sm:$0xff] }
 0x11a   : > { %v1643_v57 = vsel %vm497_vm2, %v1598_v51, %v1553_v54  ;;  %v222_v55 = vpack.c.bf16 %v201_v50, %v200_v49 }
 0x11b   : > { %2298 = vmatprep.mubr.msk.bf16.mxu0 %vm859_vm3, %v1643_v57 }
 0x11c   : > { %2299 = vmatmul.mubr.msk.bf16.gmra.mxu0 %vm859_vm3, %v1645_v52  ;;  %v375_v37 = vpop.permute.xlu1 %374  ;;  %v223_v52 = vpack.c.bf16 %v203_v44, %v202_v43 }
 0x11d   : > { %v373_v59 = vpop.permute.xlu0 %372  ;;  %v478_v38 = vsel %vm442_vm1, %v219_v58, %v375_v37  ;;  %v1332_v58 = vld [vmem:[%s2397_s21 + $0x114] sm:$0xff] }
 0x11e   : > { %v475_v46 = vsel %vm442_vm1, %v218_v61, %v373_v59  ;;  %v1333_v59 = vld [vmem:[%s2397_s21 + $0x11c] sm:$0xff] }
 0x120   : > { %v429_v62 = vpop.permute.xlu1 %428 }
 0x121   : > { %v521_v0 = vsel %vm497_vm2, %v478_v38, %v429_v62  ;;  %v427_v1 = vpop.permute.xlu0 %426  ;;  %v1330_v38 = vld [vmem:[%s2397_s21 + $0x104] sm:$0xff]  ;;  %v1331_v62 = vld [vmem:[%s2397_s21 + $0x10c] sm:$0xff] }
 0x122   : > { %v519_v4 = vsel %vm497_vm2, %v475_v46, %v427_v1  ;;  %v1353_v46 = vpack.c.bf16 %v1333_v59, %v1332_v58  ;;  %v1352_v1 = vpack.c.bf16 %v1331_v62, %v1330_v38 }
 0x123   : > { %2262 = vmatprep.mubr.msk.bf16.mxu1 %vm859_vm3, %v519_v4 }
 0x124   : > { %2263 = vmatmul.mubr.msk.bf16.gmra.mxu1 %vm859_vm3, %v521_v0  ;;  %v1505_v8 = vpop.permute.xlu1 %1504 }
 0x125   : > { %v1503_v27 = vpop.permute.xlu0 %1502  ;;  %v1607_v11 = vsel %vm442_vm1, %v1349_v6, %v1505_v8  ;;  %v206_v8 = vld [vmem:[%s2397_s21 + $0x110] sm:$0xff] }
 0x126   : > { %v1604_v60 = vsel %vm442_vm1, %v1348_v10, %v1503_v27  ;;  %v207_v10 = vld [vmem:[%s2397_s21 + $0x118] sm:$0xff] }
 0x128   : > { %v1559_v12 = vpop.permute.xlu1 %1558 }
 0x129   : > { %v1649_v14 = vsel %vm497_vm2, %v1607_v11, %v1559_v12  ;;  %v1557_v15 = vpop.permute.xlu0 %1556  ;;  %v204_v11 = vld [vmem:[%s2397_s21 + $0x100] sm:$0xff]  ;;  %v205_v12 = vld [vmem:[%s2397_s21 + $0x108] sm:$0xff] }
 0x12a   : > { %v1647_v21 = vsel %vm497_vm2, %v1604_v60, %v1557_v15  ;;  %v224_v42 = vpack.c.bf16 %v205_v12, %v204_v11 }
 0x12b   : > { %2302 = vmatprep.mubr.msk.bf16.mxu0 %vm859_vm3, %v1647_v21 }
 0x12c   : > { %2303 = vmatmul.mubr.msk.bf16.gmra.mxu0 %vm859_vm3, %v1649_v14  ;;  %v379_v18 = vpop.permute.xlu1 %378  ;;  %v225_v14 = vpack.c.bf16 %v207_v10, %v206_v8 }
 0x12d   : > { %v377_v22 = vpop.permute.xlu0 %376  ;;  %v484_v24 = vsel %vm442_vm1, %v221_v19, %v379_v18  ;;  %v1336_v19 = vld [vmem:[%s2397_s21 + $0x134] sm:$0xff] }
 0x12e   : > { %v481_v26 = vsel %vm442_vm1, %v220_v23, %v377_v22  ;;  %v1337_v22 = vld [vmem:[%s2397_s21 + $0x13c] sm:$0xff] }
 0x130   : > { %v433_v25 = vpop.permute.xlu1 %432 }
 0x131   : > { %v525_v28 = vsel %vm497_vm2, %v484_v24, %v433_v25  ;;  %v431_v29 = vpop.permute.xlu0 %430  ;;  %v1334_v24 = vld [vmem:[%s2397_s21 + $0x124] sm:$0xff]  ;;  %v1335_v25 = vld [vmem:[%s2397_s21 + $0x12c] sm:$0xff] }
 0x132   : > { %v523_v32 = vsel %vm497_vm2, %v481_v26, %v431_v29  ;;  %v1355_v26 = vpack.c.bf16 %v1337_v22, %v1336_v19  ;;  %v1354_v29 = vpack.c.bf16 %v1335_v25, %v1334_v24 }
 0x133   : > { %2266 = vmatprep.mubr.msk.bf16.mxu1 %vm859_vm3, %v523_v32 }
 0x134   : > { %2267 = vmatmul.mubr.msk.bf16.gmra.mxu1 %vm859_vm3, %v525_v28  ;;  %v1509_v35 = vpop.permute.xlu1 %1508 }
 0x135   : > { %v1507_v53 = vpop.permute.xlu0 %1506  ;;  %v1613_v36 = vsel %vm442_vm1, %v1351_v63, %v1509_v35 }
 0x136   : > { %v1610_v39 = vsel %vm442_vm1, %v1350_v20, %v1507_v53 }
 0x138   : > { %v1563_v16 = vpop.permute.xlu1 %1562 }
 0x139   : > { %v1653_v40 = vsel %vm497_vm2, %v1613_v36, %v1563_v16  ;;  %v1561_v41 = vpop.permute.xlu0 %1560 }
 0x13a   : > { %v1651_v48 = vsel %vm497_vm2, %v1610_v39, %v1561_v41 }
 0x13b   : > { %2306 = vmatprep.mubr.msk.bf16.mxu0 %vm859_vm3, %v1651_v48 }
 0x13c   : > { %2307 = vmatmul.mubr.msk.bf16.gmra.mxu0 %vm859_vm3, %v1653_v40  ;;  %v383_v51 = vpop.permute.xlu1 %382 }
 0x13d   : > { %v381_v54 = vpop.permute.xlu0 %380  ;;  %v490_v56 = vsel %vm442_vm1, %v223_v52, %v383_v51 }
 0x13e   : > { %v487_v45 = vsel %vm442_vm1, %v222_v55, %v381_v54 }
 0x140   : > { %v437_v57 = vpop.permute.xlu1 %436 }
 0x141   : > { %v529_v13 = vsel %vm497_vm2, %v490_v56, %v437_v57  ;;  %v435_v37 = vpop.permute.xlu0 %434 }
 0x142   : > { %v527_v61 = vsel %vm497_vm2, %v487_v45, %v435_v37 }
 0x143   : > { %2270 = vmatprep.mubr.msk.bf16.mxu1 %vm859_vm3, %v527_v61 }
 0x144   : > { %2271 = vmatmul.mubr.msk.bf16.gmra.mxu1 %vm859_vm3, %v529_v13  ;;  %v1513_v0 = vpop.permute.xlu1 %1512 }
 0x145   : > { %v1511_v2 = vpop.permute.xlu0 %1510  ;;  %v1619_v3 = vsel %vm442_vm1, %v1353_v46, %v1513_v0 }
 0x146   : > { %v1616_v5 = vsel %vm442_vm1, %v1352_v1, %v1511_v2 }
 0x148   : > { %v1567_v4 = vpop.permute.xlu1 %1566 }
 0x149   : > { %v1657_v47 = vsel %vm497_vm2, %v1619_v3, %v1567_v4  ;;  %v1565_v6 = vpop.permute.xlu0 %1564 }
 0x14a   : > { %v1655_v27 = vsel %vm497_vm2, %v1616_v5, %v1565_v6 }
 0x14b   : > { %2310 = vmatprep.mubr.msk.bf16.mxu0 %vm859_vm3, %v1655_v27 }
 0x14c   : > { %2311 = vmatmul.mubr.msk.bf16.gmra.mxu0 %vm859_vm3, %v1657_v47  ;;  %v387_v60 = vpop.permute.xlu1 %386  ;;  %v2204_v31 = vpop.f32.mrf.mxu0 }
 0x14d   : > { %v385_v15 = vpop.permute.xlu0 %384  ;;  %v496_v7 = vsel %vm442_vm1, %v225_v14, %v387_v60  ;;  %v3115_v14 = vld [vmem:[%s3264_s2] ss:$0 sm:$0xff] }
 0x14e   : > { %v493_v9 = vsel %vm442_vm1, %v224_v42, %v385_v15  ;;  %v934_v20 = vpop.f32.mrf.mxu0 }
 0x150   : > { %v441_v21 = vpop.permute.xlu1 %440  ;;  %v2205_v16 = vpop.f32.mrf.mxu0 }
 0x151   : > { %v533_v17 = vsel %vm497_vm2, %v496_v7, %v441_v21  ;;  %v439_v18 = vpop.permute.xlu0 %438 }
 0x152   : > { %v531_v23 = vsel %vm497_vm2, %v493_v9, %v439_v18  ;;  %v937_v40 = vpop.f32.mrf.mxu0 }
 0x153   : > { %2274 = vmatprep.mubr.msk.bf16.mxu1 %vm859_vm3, %v531_v23 }
 0x154   : > { %2275 = vmatmul.mubr.msk.bf16.gmra.mxu1 %vm859_vm3, %v533_v17  ;;  %v1517_v28 = vpop.permute.xlu1 %1516 }
 0x155   : > { %v1515_v30 = vpop.permute.xlu0 %1514  ;;  %v1625_v32 = vsel %vm442_vm1, %v1355_v26, %v1517_v28 }
 0x156   : > { %v1622_v34 = vsel %vm442_vm1, %v1354_v29, %v1515_v30 }
 0x157   : > { %v3053_v36 = vpop.f32.mrf.mxu1 }
 0x158   : > { %v1571_v33 = vpop.permute.xlu1 %1570 }
 0x159   : > { %v1661_v63 = vsel %vm497_vm2, %v1625_v32, %v1571_v33  ;;  %v1569_v35 = vpop.permute.xlu0 %1568  ;;  %v3055_v39 = vpop.f32.mrf.mxu1 }
 0x15a   : > { %v1659_v53 = vsel %vm497_vm2, %v1622_v34, %v1569_v35 }
 0x15b   : > { %2314 = vmatprep.mubr.msk.bf16.mxu0 %vm859_vm3, %v1659_v53  ;;  %v3057_v43 = vpop.f32.mrf.mxu1 }
 0x15c   : > { %2315 = vmatmul.mubr.msk.bf16.gmra.mxu0 %vm859_vm3, %v1661_v63  ;;  %v2208_v41 = vpop.f32.mrf.mxu0 }
 0x15d   : > { %v3059_v48 = vpop.f32.mrf.mxu1 }
 0x15e   : > { %v950_v44 = vpop.f32.mrf.mxu0 }
 0x160   : > { %v2209_v50 = vpop.f32.mrf.mxu0 }
 0x162   : > { %v3065_v52 = vpop.f32.mrf.mxu0 }
 0x167   : > { %v3061_v49 = vpop.f32.mrf.mxu1 }
 0x169   : > { %v3063_v51 = vpop.f32.mrf.mxu1 }
 0x16b   : > { %v3069_v55 = vpop.f32.mrf.mxu1 }
 0x16c   : > { %v3067_v54 = vpop.f32.mrf.mxu0 }
 0x16d   : > { %v3073_v57 = vpop.f32.mrf.mxu1 }
 0x16e   : > { %v3071_v56 = vpop.f32.mrf.mxu0 }
 0x170   : > { %v3077_v13 = vpop.f32.mrf.mxu0 }
 0x172   : > { %v3081_v58 = vpop.f32.mrf.mxu0 }
 0x177   : > { %v3075_v45 = vpop.f32.mrf.mxu1 }
 0x179   : > { %v3079_v37 = vpop.f32.mrf.mxu1 }
 0x17b   : > { %v3085_v61 = vpop.f32.mrf.mxu1 }
 0x17c   : > { %v3083_v59 = vpop.f32.mrf.mxu0 }
 0x17d   : > { %v3089_v62 = vpop.f32.mrf.mxu1 }
 0x17e   : > { %v3087_v38 = vpop.f32.mrf.mxu0 }
 0x180   : > { %v3093_v0 = vpop.f32.mrf.mxu0 }
 0x182   : > { %v3097_v2 = vpop.f32.mrf.mxu0 }
 0x187   : > { %v3091_v46 = vpop.f32.mrf.mxu1 }
 0x189   : > { %v3095_v1 = vpop.f32.mrf.mxu1 }
 0x18b   : > { %v3099_v3 = vpop.f32.mrf.mxu1 }
 0x18c   : > { %v3101_v4 = vpop.f32.mrf.mxu0 }
 0x18d   : > { %v3103_v5 = vpop.f32.mrf.mxu1 }
 0x18e   : > { %v3105_v47 = vpop.f32.mrf.mxu0 }
 0x190   : > { %v3107_v8 = vpop.f32.mrf.mxu0 }
 0x192   : > { %v3109_v27 = vpop.f32.mrf.mxu0 }
 0x194   : > { %v2244_v6 = vpop.f32.mrf.mxu1 }
 0x195   : > { %v1168_v12 = vadd.f32 %v2244_v6, %v2204_v31 }
 0x196   : > { %v1159_v10 = vpop.f32.mrf.mxu1 }
 0x197   : > { %v1160_v15 = vadd.f32 %v1159_v10, %v934_v20 }
 0x198   : > { %v2245_v11 = vpop.f32.mrf.mxu1 }
 0x199   : > { %v1171_v9 = vadd.f32 %v2245_v11, %v2205_v16 }
 0x19a   : > { %v1162_v7 = vpop.f32.mrf.mxu1 }
 0x19b   : > { %v1163_v22 = vadd.f32 %v1162_v7, %v937_v40 }
 0x19c   : > { %v2284_v60 = vpop.f32.mrf.mxu0 }
 0x19d   : > { %v1893_v42 = vadd.f32 %v2284_v60, %v1168_v12 }
 0x19e   : > { %v1748_v21 = vpop.f32.mrf.mxu0 }
 0x19f   : > { %v1936_v17 = vadd.f32 %v3115_v14, %v1893_v42  ;;  %v1891_v18 = vadd.f32 %v1748_v21, %v1160_v15 }
 0x1a0   : > { %v2285_v19 = vpop.f32.mrf.mxu0 }
 0x1a1   : > { %1973 = vst.msk [vmem:[%s3120_s10 + $0x10] sm:$0xff] %vm1970_vm4, %v1936_v17  ;;  %v1934_v23 = vadd.f32 %v3115_v14, %v1891_v18  ;;  %v1894_v24 = vadd.f32 %v2285_v19, %v1171_v9 }
 0x1a2   : > { %v1751_v25 = vpop.f32.mrf.mxu0 }
 0x1a3   : > { %1971 = vst.msk [vmem:[%s3120_s10] sm:$0xff] %vm1970_vm4, %v1934_v23  ;;  %v1937_v26 = vadd.f32 %v3115_v14, %v1894_v24  ;;  %v1892_v28 = vadd.f32 %v1751_v25, %v1163_v22 }
 0x1a4   : > { %v2248_v29 = vpop.f32.mrf.mxu1 }
 0x1a5   : > { %1974 = vst.msk [vmem:[%s3120_s10 + $0x18] sm:$0xff] %vm1970_vm4, %v1937_v26  ;;  %v1935_v30 = vadd.f32 %v3115_v14, %v1892_v28  ;;  %v1184_v33 = vadd.f32 %v2248_v29, %v2208_v41 }
 0x1a6   : > { %v1175_v31 = vpop.f32.mrf.mxu1 }
 0x1a7   : > { %1972 = vst.msk [vmem:[%s3120_s10 + $0x8] sm:$0xff] %vm1970_vm4, %v1935_v30  ;;  %v1176_v63 = vadd.f32 %v1175_v31, %v950_v44 }
 0x1a8   : > { %v2249_v32 = vpop.f32.mrf.mxu1 }
 0x1a9   : > { %v1187_v16 = vadd.f32 %v2249_v32, %v2209_v50 }
 0x1aa   : > { %v1178_v20 = vpop.f32.mrf.mxu1 }
 0x1ab   : > { %v1179_v11 = vadd.f32 %v1178_v20, %v3065_v52 }
 0x1ac   : > { %v2288_v34 = vpop.f32.mrf.mxu0 }
 0x1ad   : > { %v1897_v35 = vadd.f32 %v2288_v34, %v1184_v33 }
 0x1ae   : > { %v1764_v53 = vpop.f32.mrf.mxu0 }
 0x1af   : > { %v1940_v40 = vadd.f32 %v3115_v14, %v1897_v35  ;;  %v1895_v6 = vadd.f32 %v1764_v53, %v1176_v63 }
 0x1b0   : > { %v2289_v10 = vpop.f32.mrf.mxu0 }
 0x1b1   : > { %1977 = vst.msk [vmem:[%s3120_s10 + $0x30] sm:$0xff] %vm1970_vm4, %v1940_v40  ;;  %v1938_v12 = vadd.f32 %v3115_v14, %v1895_v6  ;;  %v1898_v60 = vadd.f32 %v2289_v10, %v1187_v16 }
 0x1b2   : > { %v1767_v41 = vpop.f32.mrf.mxu0 }
 0x1b3   : > { %1975 = vst.msk [vmem:[%s3120_s10 + $0x20] sm:$0xff] %vm1970_vm4, %v1938_v12  ;;  %v1941_v44 = vadd.f32 %v3115_v14, %v1898_v60  ;;  %v1896_v15 = vadd.f32 %v1767_v41, %v1179_v11 }
 0x1b4   : > { %v2252_v42 = vpop.f32.mrf.mxu1 }
 0x1b5   : > { %1978 = vst.msk [vmem:[%s3120_s10 + $0x38] sm:$0xff] %vm1970_vm4, %v1941_v44  ;;  %v1939_v50 = vadd.f32 %v3115_v14, %v1896_v15  ;;  %v1200_v21 = vadd.f32 %v2252_v42, %v3067_v54 }
 0x1b6   : > { %v1191_v7 = vpop.f32.mrf.mxu1 }
 0x1b7   : > { %1976 = vst.msk [vmem:[%s3120_s10 + $0x28] sm:$0xff] %vm1970_vm4, %v1939_v50  ;;  %v1192_v17 = vadd.f32 %v1191_v7, %v3071_v56 }
 0x1b8   : > { %v2253_v52 = vpop.f32.mrf.mxu1 }
 0x1b9   : > { %v1203_v23 = vadd.f32 %v2253_v52, %v3077_v13 }
 0x1ba   : > { %v1194_v19 = vpop.f32.mrf.mxu1 }
 0x1bb   : > { %v1195_v28 = vadd.f32 %v1194_v19, %v3081_v58 }
 0x1bc   : > { %v2292_v9 = vpop.f32.mrf.mxu0 }
 0x1bd   : > { %v1901_v18 = vadd.f32 %v2292_v9, %v1200_v21 }
 0x1be   : > { %v1780_v22 = vpop.f32.mrf.mxu0 }
 0x1bf   : > { %v1944_v24 = vadd.f32 %v3115_v14, %v1901_v18  ;;  %v1899_v25 = vadd.f32 %v1780_v22, %v1192_v17 }
 0x1c0   : > { %v2293_v26 = vpop.f32.mrf.mxu0 }
 0x1c1   : > { %1981 = vst.msk [vmem:[%s3120_s10 + $0x50] sm:$0xff] %vm1970_vm4, %v1944_v24  ;;  %v1942_v54 = vadd.f32 %v3115_v14, %v1899_v25  ;;  %v1902_v29 = vadd.f32 %v2293_v26, %v1203_v23 }
 0x1c2   : > { %v1783_v30 = vpop.f32.mrf.mxu0 }
 0x1c3   : > { %1979 = vst.msk [vmem:[%s3120_s10 + $0x40] sm:$0xff] %vm1970_vm4, %v1942_v54  ;;  %v1945_v56 = vadd.f32 %v3115_v14, %v1902_v29  ;;  %v1900_v31 = vadd.f32 %v1783_v30, %v1195_v28 }
 0x1c4   : > { %v2256_v32 = vpop.f32.mrf.mxu1 }
 0x1c5   : > { %1982 = vst.msk [vmem:[%s3120_s10 + $0x58] sm:$0xff] %vm1970_vm4, %v1945_v56  ;;  %v1943_v13 = vadd.f32 %v3115_v14, %v1900_v31  ;;  %v1216_v34 = vadd.f32 %v2256_v32, %v3083_v59 }
 0x1c6   : > { %v1207_v33 = vpop.f32.mrf.mxu1 }
 0x1c7   : > { %1980 = vst.msk [vmem:[%s3120_s10 + $0x48] sm:$0xff] %vm1970_vm4, %v1943_v13  ;;  %v1208_v35 = vadd.f32 %v1207_v33, %v3087_v38 }
 0x1c8   : > { %v2257_v58 = vpop.f32.mrf.mxu1 }
 0x1c9   : > { %v1219_v40 = vadd.f32 %v2257_v58, %v3093_v0 }
 0x1ca   : > { %v1210_v53 = vpop.f32.mrf.mxu1 }
 0x1cb   : > { %v1211_v12 = vadd.f32 %v1210_v53, %v3097_v2 }
 0x1cc   : > { %v2296_v63 = vpop.f32.mrf.mxu0 }
 0x1cd   : > { %v1905_v20 = vadd.f32 %v2296_v63, %v1216_v34 }
 0x1ce   : > { %v1796_v16 = vpop.f32.mrf.mxu0 }
 0x1cf   : > { %v1948_v6 = vadd.f32 %v3115_v14, %v1905_v20  ;;  %v1903_v10 = vadd.f32 %v1796_v16, %v1208_v35 }
 0x1d0   : > { %v2297_v11 = vpop.f32.mrf.mxu0 }
 0x1d1   : > { %1985 = vst.msk [vmem:[%s3120_s10 + $0x70] sm:$0xff] %vm1970_vm4, %v1948_v6  ;;  %v1946_v59 = vadd.f32 %v3115_v14, %v1903_v10  ;;  %v1906_v60 = vadd.f32 %v2297_v11, %v1219_v40 }
 0x1d2   : > { %v1799_v41 = vpop.f32.mrf.mxu0 }
 0x1d3   : > { %1983 = vst.msk [vmem:[%s3120_s10 + $0x60] sm:$0xff] %vm1970_vm4, %v1946_v59  ;;  %v1949_v38 = vadd.f32 %v3115_v14, %v1906_v60  ;;  %v1904_v44 = vadd.f32 %v1799_v41, %v1211_v12 }
 0x1d4   : > { %v2260_v15 = vpop.f32.mrf.mxu1 }
 0x1d5   : > { %1986 = vst.msk [vmem:[%s3120_s10 + $0x78] sm:$0xff] %vm1970_vm4, %v1949_v38  ;;  %v1947_v0 = vadd.f32 %v3115_v14, %v1904_v44  ;;  %v1232_v50 = vadd.f32 %v2260_v15, %v3101_v4 }
 0x1d6   : > { %v1223_v42 = vpop.f32.mrf.mxu1 }
 0x1d7   : > { %1984 = vst.msk [vmem:[%s3120_s10 + $0x68] sm:$0xff] %vm1970_vm4, %v1947_v0  ;;  %v1224_v52 = vadd.f32 %v1223_v42, %v3105_v47 }
 0x1d8   : > { %v2261_v2 = vpop.f32.mrf.mxu1 }
 0x1d9   : > { %v1235_v18 = vadd.f32 %v2261_v2, %v3107_v8 }
 0x1da   : > { %v1226_v9 = vpop.f32.mrf.mxu1 }
 0x1db   : > { %v1227_v24 = vadd.f32 %v1226_v9, %v3109_v27 }
 0x1dc   : > { %v2300_v7 = vpop.f32.mrf.mxu0 }
 0x1dd   : > { %v1909_v21 = vadd.f32 %v2300_v7, %v1232_v50 }
 0x1de   : > { %v1812_v17 = vpop.f32.mrf.mxu0 }
 0x1df   : > { %v1952_v19 = vadd.f32 %v3115_v14, %v1909_v21  ;;  %v1907_v22 = vadd.f32 %v1812_v17, %v1224_v52 }
 0x1e0   : > { %v2301_v23 = vpop.f32.mrf.mxu0 }
 0x1e1   : > { %1989 = vst.msk [vmem:[%s3120_s10 + $0x90] sm:$0xff] %vm1970_vm4, %v1952_v19  ;;  %v1950_v4 = vadd.f32 %v3115_v14, %v1907_v22  ;;  %v1910_v25 = vadd.f32 %v2301_v23, %v1235_v18 }
 0x1e2   : > { %v1815_v26 = vpop.f32.mrf.mxu0 }
 0x1e3   : > { %1987 = vst.msk [vmem:[%s3120_s10 + $0x80] sm:$0xff] %vm1970_vm4, %v1950_v4  ;;  %v1953_v47 = vadd.f32 %v3115_v14, %v1910_v25  ;;  %v1908_v28 = vadd.f32 %v1815_v26, %v1227_v24 }
 0x1e4   : > { %v2264_v54 = vpop.f32.mrf.mxu1 }
 0x1e5   : > { %1990 = vst.msk [vmem:[%s3120_s10 + $0x98] sm:$0xff] %vm1970_vm4, %v1953_v47  ;;  %v1951_v8 = vadd.f32 %v3115_v14, %v1908_v28  ;;  %v1248_v30 = vadd.f32 %v2264_v54, %v3053_v36 }
 0x1e6   : > { %v1239_v29 = vpop.f32.mrf.mxu1 }
 0x1e7   : > { %1988 = vst.msk [vmem:[%s3120_s10 + $0x88] sm:$0xff] %vm1970_vm4, %v1951_v8  ;;  %v1240_v31 = vadd.f32 %v1239_v29, %v3055_v39 }
 0x1e8   : > { %v2265_v27 = vpop.f32.mrf.mxu1 }
 0x1e9   : > { %v1251_v58 = vadd.f32 %v2265_v27, %v3057_v43 }
 0x1ea   : > { %v1242_v13 = vpop.f32.mrf.mxu1 }
 0x1eb   : > { %v1243_v20 = vadd.f32 %v1242_v13, %v3059_v48 }
 0x1ec   : > { %v2304_v56 = vpop.f32.mrf.mxu0 }
 0x1ed   : > { %v1913_v32 = vadd.f32 %v2304_v56, %v1248_v30 }
 0x1ee   : > { %v1828_v33 = vpop.f32.mrf.mxu0 }
 0x1ef   : > { %v1956_v34 = vadd.f32 %v3115_v14, %v1913_v32  ;;  %v1911_v63 = vadd.f32 %v1828_v33, %v1240_v31 }
 0x1f0   : > { %v2305_v35 = vpop.f32.mrf.mxu0 }
 0x1f1   : > { %1993 = vst.msk [vmem:[%s3120_s10 + $0xb0] sm:$0xff] %vm1970_vm4, %v1956_v34  ;;  %v1954_v36 = vadd.f32 %v3115_v14, %v1911_v63  ;;  %v1914_v53 = vadd.f32 %v2305_v35, %v1251_v58 }
 0x1f2   : > { %v1831_v16 = vpop.f32.mrf.mxu0 }
 0x1f3   : > { %1991 = vst.msk [vmem:[%s3120_s10 + $0xa0] sm:$0xff] %vm1970_vm4, %v1954_v36  ;;  %v1957_v39 = vadd.f32 %v3115_v14, %v1914_v53  ;;  %v1912_v40 = vadd.f32 %v1831_v16, %v1243_v20 }
 0x1f4   : > { %v2268_v6 = vpop.f32.mrf.mxu1 }
 0x1f5   : > { %1994 = vst.msk [vmem:[%s3120_s10 + $0xb8] sm:$0xff] %vm1970_vm4, %v1957_v39  ;;  %v1955_v43 = vadd.f32 %v3115_v14, %v1912_v40  ;;  %v1264_v11 = vadd.f32 %v2268_v6, %v3061_v49 }
 0x1f6   : > { %v1255_v10 = vpop.f32.mrf.mxu1 }
 0x1f7   : > { %1992 = vst.msk [vmem:[%s3120_s10 + $0xa8] sm:$0xff] %vm1970_vm4, %v1955_v43  ;;  %v1256_v59 = vadd.f32 %v1255_v10, %v3063_v51 }
 0x1f8   : > { %v2269_v48 = vpop.f32.mrf.mxu1 }
 0x1f9   : > { %v1267_v44 = vadd.f32 %v2269_v48, %v3069_v55 }
 0x1fa   : > { %v1258_v41 = vpop.f32.mrf.mxu1 }
 0x1fb   : > { %v1259_v2 = vadd.f32 %v1258_v41, %v3073_v57 }
 0x1fc   : > { %v2308_v12 = vpop.f32.mrf.mxu0 }
 0x1fd   : > { %v1917_v60 = vadd.f32 %v2308_v12, %v1264_v11 }
 0x1fe   : > { %v1844_v38 = vpop.f32.mrf.mxu0 }
 0x1ff   : > { %v1960_v15 = vadd.f32 %v3115_v14, %v1917_v60  ;;  %v1915_v0 = vadd.f32 %v1844_v38, %v1256_v59 }
 0x200   : > { %v2309_v42 = vpop.f32.mrf.mxu0 }
 0x201   : > { %1997 = vst.msk [vmem:[%s3120_s10 + $0xd0] sm:$0xff] %vm1970_vm4, %v1960_v15  ;;  %v1958_v49 = vadd.f32 %v3115_v14, %v1915_v0  ;;  %v1918_v50 = vadd.f32 %v2309_v42, %v1267_v44 }
 0x202   : > { %v1847_v7 = vpop.f32.mrf.mxu0 }
 0x203   : > { %1995 = vst.msk [vmem:[%s3120_s10 + $0xc0] sm:$0xff] %vm1970_vm4, %v1958_v49  ;;  %v1961_v51 = vadd.f32 %v3115_v14, %v1918_v50  ;;  %v1916_v52 = vadd.f32 %v1847_v7, %v1259_v2 }
 0x204   : > { %v2272_v21 = vpop.f32.mrf.mxu1 }
 0x205   : > { %1998 = vst.msk [vmem:[%s3120_s10 + $0xd8] sm:$0xff] %vm1970_vm4, %v1961_v51  ;;  %v1959_v55 = vadd.f32 %v3115_v14, %v1916_v52  ;;  %v1280_v17 = vadd.f32 %v2272_v21, %v3075_v45 }
 0x206   : > { %v1271_v9 = vpop.f32.mrf.mxu1 }
 0x207   : > { %1996 = vst.msk [vmem:[%s3120_s10 + $0xc8] sm:$0xff] %vm1970_vm4, %v1959_v55  ;;  %v1272_v19 = vadd.f32 %v1271_v9, %v3079_v37 }
 0x208   : > { %v2273_v57 = vpop.f32.mrf.mxu1 }
 0x209   : > { %v1283_v4 = vadd.f32 %v2273_v57, %v3085_v61 }
 0x20a   : > { %v1274_v23 = vpop.f32.mrf.mxu1 }
 0x20b   : > { %v1275_v28 = vadd.f32 %v1274_v23, %v3089_v62 }
 0x20c   : > { %v2312_v18 = vpop.f32.mrf.mxu0 }
 0x20d   : > { %v1921_v22 = vadd.f32 %v2312_v18, %v1280_v17 }
 0x20e   : > { %v1860_v24 = vpop.f32.mrf.mxu0 }
 0x20f   : > { %v1964_v25 = vadd.f32 %v3115_v14, %v1921_v22  ;;  %v1919_v26 = vadd.f32 %v1860_v24, %v1272_v19 }
 0x210   : > { %v2313_v47 = vpop.f32.mrf.mxu0 }
 0x211   : > { %2001 = vst.msk [vmem:[%s3120_s10 + $0xf0] sm:$0xff] %vm1970_vm4, %v1964_v25  ;;  %v1962_v45 = vadd.f32 %v3115_v14, %v1919_v26  ;;  %v1922_v54 = vadd.f32 %v2313_v47, %v1283_v4 }
 0x212   : > { %v1863_v8 = vpop.f32.mrf.mxu0 }
 0x213   : > { %1999 = vst.msk [vmem:[%s3120_s10 + $0xe0] sm:$0xff] %vm1970_vm4, %v1962_v45  ;;  %v1965_v37 = vadd.f32 %v3115_v14, %v1922_v54  ;;  %v1920_v29 = vadd.f32 %v1863_v8, %v1275_v28 }
 0x214   : > { %v2276_v27 = vpop.f32.mrf.mxu1 }
 0x215   : > { %2002 = vst.msk [vmem:[%s3120_s10 + $0xf8] sm:$0xff] %vm1970_vm4, %v1965_v37  ;;  %v1963_v61 = vadd.f32 %v3115_v14, %v1920_v29  ;;  %v1296_v56 = vadd.f32 %v2276_v27, %v3091_v46 }
 0x216   : > { %v1287_v30 = vpop.f32.mrf.mxu1 }
 0x217   : > { %2000 = vst.msk [vmem:[%s3120_s10 + $0xe8] sm:$0xff] %vm1970_vm4, %v1963_v61  ;;  %v1288_v32 = vadd.f32 %v1287_v30, %v3095_v1 }
 0x218   : > { %v2277_v62 = vpop.f32.mrf.mxu1 }
 0x219   : > { %v1299_v34 = vadd.f32 %v2277_v62, %v3099_v3 }
 0x21a   : > { %v1290_v33 = vpop.f32.mrf.mxu1 }
 0x21b   : > { %v1291_v36 = vadd.f32 %v1290_v33, %v3103_v5 }
 0x21c   : > { %v2316_v31 = vpop.f32.mrf.mxu0 }
 0x21d   : > { %v1925_v13 = vadd.f32 %v2316_v31, %v1296_v56 }
 0x21e   : > { %v1876_v58 = vpop.f32.mrf.mxu0 }
 0x21f   : > { %v1968_v63 = vadd.f32 %v3115_v14, %v1925_v13  ;;  %v1923_v35 = vadd.f32 %v1876_v58, %v1288_v32 }
 0x220   : > { %v2317_v20 = vpop.f32.mrf.mxu0 }
 0x221   : > { %2005 = vst.msk [vmem:[%s3120_s10 + $0x110] sm:$0xff] %vm1970_vm4, %v1968_v63  ;;  %v1966_v46 = vadd.f32 %v3115_v14, %v1923_v35  ;;  %v1926_v53 = vadd.f32 %v2317_v20, %v1299_v34 }
 0x222   : > { %v1879_v16 = vpop.f32.mrf.mxu0 }
 0x223   : > { %2003 = vst.msk [vmem:[%s3120_s10 + $0x100] sm:$0xff] %vm1970_vm4, %v1966_v46  ;;  %v1969_v1 = vadd.f32 %v3115_v14, %v1926_v53  ;;  %v1924_v39 = vadd.f32 %v1879_v16, %v1291_v36 }
 0x225   : > { %2006 = vst.msk [vmem:[%s3120_s10 + $0x118] sm:$0xff] %vm1970_vm4, %v1969_v1  ;;  %v1967_v3 = vadd.f32 %v3115_v14, %v1924_v39 }
 0x227   : > { %2004 = vst.msk [vmem:[%s3120_s10 + $0x108] sm:$0xff] %vm1970_vm4, %v1967_v3 }
 0x228 PF: > { %s13_s12 = sadd.s32 1, %s2350_s12  }
 0x229   : > { %p10_p4 = scmp.ge.s32.totalorder %s13_s12, 4  }
 0x22b   :  { %12 = sbr.rel (!%p10_p4) target bundleno = 1 (0x1), region = 64 }

</bundles_post_ra>
